<compile_context>
chip_gen: v7x
topology: tpu7x:2x2x1
jax: 0.10.0
libtpu: 0.0.40
codegen_flags: <defaults>
</compile_context>

<pallas_src>
import functools

import numpy as np

import jax
import jax.numpy as jnp
from jax.experimental import pallas as pl
from jax.experimental.pallas import tpu as pltpu


_LANE = 128
# Conservative per-step VMEM budget for the tile heuristic (v5e's default
# scoped limit is 16 MiB; v6e/v7x default to 32 MiB scoped).
_VMEM_BUDGET = 14 * 1024 * 1024


def _round_up(x, m):
    return (x + m - 1) // m * m


def _phase_tap_sets(s):
    """sets[p][a] = taps d in {0,1,2} of the 3x3 kernel folded into polyphase
    tap a.  Tap a=0/1 corresponds to source offset -1/0 for phase p==0 and
    0/+1 for p>0 (middle phases of s>2 get an empty -> zero second tap)."""
    sets = []
    for p in range(s):
        offs = (-1, 0) if p == 0 else (0, 1)
        sets.append(tuple(tuple(d for d in range(3) if (p + d - 1) // s == off)
                          for off in offs))
    return sets


def _fold_polyphase_weights(weight, s, cin_p, cout_p, compute_dtype):
    """(Cout, Cin, 3, 3) conv weight -> (s*s*2, 2*Cin_p, Cout_p) polyphase
    weight.  Block (py*s + px)*2 + a holds row-tap a of phase (py, px); its K
    dim is [col-tap b=0 | col-tap b=1], each padded to Cin_p (matches the lhs
    layout built in the kernel).  Folding is done in f32, then cast once."""
    cout, cin = weight.shape[0], weight.shape[1]
    w_t = jnp.transpose(weight, (2, 3, 1, 0)).astype(jnp.float32)  # (3,3,Cin,Cout)
    sets = _phase_tap_sets(s)
    blocks = []
    for py in range(s):
        for px in range(s):
            for a in range(2):
                taps = []
                for b in range(2):
                    wsum = jnp.zeros((cin, cout), jnp.float32)
                    for dy in sets[py][a]:
                        for dx in sets[px][b]:
                            wsum = wsum + w_t[dy, dx]
                    wsum = jnp.pad(wsum, ((0, cin_p - cin), (0, cout_p - cout)))
                    taps.append(wsum)
                blocks.append(jnp.concatenate(taps, axis=0))      # (2*Cin_p, Cout_p)
    return jnp.stack(blocks, axis=0).astype(compute_dtype)        # (s*s*2, 2*Cin_p, Cout_p)


def _resize_conv3x3_poly_kernel(x_ref, w_ref, b_ref, o_ref, *, tin, s):
    # x_ref : (H, W, Cin_p)            one batch element, ORIGINAL resolution (resident)
    # w_ref : (s*s*2, 2*Cin_p, Cout_p) folded polyphase weights (col taps in K)
    # b_ref : (1, Cout_p) f32
    # o_ref : (TH, Wout, Cout_p)       TH = tin*s upsampled output rows of this tile
    H, W, cin_p = x_ref.shape
    TH, Wout, cout_p = o_ref.shape
    K = 2 * cin_p
    M = tin * W

    t = pl.program_id(1)
    r0 = t * tin                                          # first ORIGINAL row of tile

    # ---- tile rows + 1-row halo at ORIGINAL resolution (fused zero pad) ----
    core = x_ref[pl.ds(r0, tin), :, :]                               # (tin, W, C)
    top = x_ref[pl.ds(jnp.maximum(r0 - 1, 0), 1), :, :]              # (1, W, C)
    bot = x_ref[pl.ds(jnp.minimum(r0 + tin, H - 1), 1), :, :]        # (1, W, C)
    top = top * (r0 > 0).astype(top.dtype)                           # zero pad at image top
    bot = bot * (r0 + tin < H).astype(bot.dtype)                     # zero pad at bottom
    xh = jnp.concatenate([top, core, bot], axis=0)                   # (tin+2, W, C)

    # ---- column taps at ORIGINAL resolution, folded into K ------------------
    zc = jnp.zeros((tin + 2, 1, cin_p), xh.dtype)
    x_m1 = jnp.concatenate([zc, xh[:, :W - 1, :]], axis=1)           # source col ix-1
    x_p1 = jnp.concatenate([xh[:, 1:, :], zc], axis=1)               # source col ix+1
    lhs_a = jnp.concatenate([x_m1, xh], axis=-1).reshape((tin + 2) * W, K)  # phases px == 0
    lhs_b = jnp.concatenate([xh, x_p1], axis=-1).reshape((tin + 2) * W, K)  # phases px >= 1

    bias = b_ref[...].astype(jnp.float32)                            # (1, Cout_p)

    # ---- s*s polyphase filters: 2 large-K MXU matmuls per phase -------------
    rows = []
    for py in range(s):
        base = 0 if py == 0 else 1              # row tap a -> source offset base+a-1
        cols = []
        for px in range(s):
            lhs = lhs_a if px == 0 else lhs_b
            widx = (py * s + px) * 2
            acc = jnp.dot(lhs[base * W:base * W + M], w_ref[widx],
                          preferred_element_type=jnp.float32)
            acc = acc + jnp.dot(lhs[(base + 1) * W:(base + 1) * W + M],
                                w_ref[widx + 1],
                                preferred_element_type=jnp.float32)
            cols.append((acc + bias).astype(o_ref.dtype).reshape(M, 1, cout_p))
        # interleave the px phases along W: (M, s, C) -> (tin, W*s, C)
        rows.append(jnp.concatenate(cols, axis=1).reshape(tin, Wout, cout_p))
    # interleave the py phases along H: (tin, s*Wout, C) -> (TH, Wout, C)
    o_ref[...] = jnp.concatenate(rows, axis=1).reshape(TH, Wout, cout_p)


def _vmem_estimate(H, W, tin, s, cin_p, cout_p, in_bytes, out_bytes):
    TH, Wout = tin * s, W * s
    x_blk = 2 * H * W * cin_p * in_bytes                        # double-buffered image
    w_blk = (s * s * 2) * 2 * cin_p * cout_p * in_bytes         # Buffered(1)
    o_blk = 2 * TH * Wout * cout_p * out_bytes                  # double-buffered output
    lhs = 2 * (tin + 2) * W * 2 * cin_p * in_bytes              # lhs_a + lhs_b
    halo = 3 * (tin + 2) * W * cin_p * in_bytes                 # xh, x_m1, x_p1
    acc = 2 * tin * W * cout_p * 4                              # live f32 accumulators
    il = 2 * TH * Wout * cout_p * out_bytes                     # interleave temporaries
    return x_blk + w_blk + o_blk + lhs + halo + acc + il


def _pick_row_tile(H, W, s, cin_p, cout_p, in_bytes, out_bytes, budget):
    # Largest divisor of H whose working set fits the VMEM budget: bigger tile
    # => bigger matmul M = tin*W (MXU row fill) and fewer ~0.35us grid steps.
    for tin in range(H, 0, -1):
        if H % tin == 0 and _vmem_estimate(H, W, tin, s, cin_p, cout_p,
                                           in_bytes, out_bytes) <= budget:
            return tin
    return 1


def resize_conv2d_nhwc(x_nhwc, weight, bias, *, scale_factor, mode="nearest",
                       row_tile=None, compute_dtype=jnp.bfloat16,
                       out_dtype=jnp.float32, slice_output=True,
                       vmem_budget=_VMEM_BUDGET):
    """ResizeConv2d forward on channels-last input.

    x_nhwc: (N, H, W, C) with C == Cin or C already padded to a lane multiple
    (pass padded bf16 activations to keep the whole decoder NHWC / padded once).
    weight: (Cout, Cin, 3, 3); bias: (Cout,).
    Returns (N, H*s, W*s, Cout) in out_dtype (Cout kept lane-padded if
    slice_output=False, handy for chaining layers without an extra HBM pass).
    """
    assert mode == "nearest"                       # module only uses 'nearest'
    Cout, Cin, KH, KW = weight.shape
    assert KH == 3 and KW == 3, "kernel specialized to the module's 3x3 conv"
    s = int(scale_factor)
    assert s >= 2, "polyphase path expects the module's scale_factor >= 2"
    N, H, W, C = x_nhwc.shape
    cin_p = _round_up(Cin, _LANE)
    cout_p = _round_up(Cout, _LANE)
    assert C in (Cin, cin_p), "input channels must be Cin or Cin padded to 128"

    in_bytes = np.dtype(compute_dtype).itemsize
    out_bytes = np.dtype(out_dtype).itemsize
    if row_tile is None:
        tin = _pick_row_tile(H, W, s, cin_p, cout_p, in_bytes, out_bytes, vmem_budget)
    else:
        tin = int(row_tile)
        if H % tin != 0:
            raise ValueError(f"row_tile={tin} must divide H={H}")
        if _vmem_estimate(H, W, tin, s, cin_p, cout_p, in_bytes, out_bytes) > vmem_budget:
            raise ValueError(f"row_tile={tin} exceeds the VMEM budget "
                             f"({vmem_budget} bytes); pick a smaller tile")
    TH = tin * s
    Hout, Wout = H * s, W * s

    # layout glue only (single fused pad / cast); no upsample, im2col or
    # transposes in HBM.
    x = x_nhwc.astype(compute_dtype)
    if C != cin_p:
        x = jnp.pad(x, ((0, 0), (0, 0), (0, 0), (0, cin_p - C)))
    w = _fold_polyphase_weights(weight, s, cin_p, cout_p, compute_dtype)
    b = jnp.pad(bias.astype(jnp.float32), (0, cout_p - Cout)).reshape(1, cout_p)

    cost = pl.CostEstimate(
        flops=2 * N * Hout * Wout * 2 * (2 * cin_p) * cout_p,     # 4 taps / out pixel
        transcendentals=0,
        bytes_accessed=(x.size * in_bytes + w.size * in_bytes + b.size * 4
                        + N * Hout * Wout * cout_p * out_bytes))

    kernel = functools.partial(_resize_conv3x3_poly_kernel, tin=tin, s=s)

    out = pl.pallas_call(
        kernel,
        out_shape=jax.ShapeDtypeStruct((N, Hout, Wout, cout_p), out_dtype),
        grid_spec=pltpu.PrefetchScalarGridSpec(
            num_scalar_prefetch=0,
            grid=(N, H // tin),
            in_specs=[
                # full original-resolution image per batch element; block index
                # ignores t so it is DMA'd once per n and stays resident across
                # the row-tile axis (double-buffered across n for overlap).
                pl.BlockSpec((pl.Squeezed(), H, W, cin_p),
                             lambda n, t: (n, 0, 0, 0)),
                # constant-index operands: single-buffered to save VMEM.
                pl.BlockSpec((s * s * 2, 2 * cin_p, cout_p),
                             lambda n, t: (0, 0, 0),
                             pipeline_mode=pl.Buffered(1)),
                pl.BlockSpec((1, cout_p), lambda n, t: (0, 0),
                             pipeline_mode=pl.Buffered(1)),
            ],
            out_specs=pl.BlockSpec((pl.Squeezed(), TH, Wout, cout_p),
                                   lambda n, t: (n, t, 0, 0)),
        ),
        compiler_params=pltpu.CompilerParams(
            dimension_semantics=("parallel", "parallel")),
        cost_estimate=cost,
    )(x, w, b)

    if slice_output and cout_p != Cout:
        out = out[..., :Cout]
    return out


def resize_conv2d(x_nchw, weight, bias, *, scale_factor, mode="nearest", **kwargs):
    """Drop-in ResizeConv2d forward: (N, Cin, H, W) -> (N, Cout, H*s, W*s).

    Layout glue only; inside a full decoder prefer resize_conv2d_nhwc so the
    NCHW<->NHWC transposes and channel pad/slice happen once at the boundary.
    """
    x = jnp.transpose(x_nchw, (0, 2, 3, 1))
    out = resize_conv2d_nhwc(x, weight, bias, scale_factor=scale_factor,
                             mode=mode, **kwargs)
    return jnp.transpose(out, (0, 3, 1, 2))


def _reference(x_nchw, weight, bias, *, scale_factor):
    s = int(scale_factor)
    x = jnp.repeat(jnp.repeat(x_nchw, s, axis=2), s, axis=3)
    out = jax.lax.conv_general_dilated(
        x, weight, window_strides=(1, 1), padding=((1, 1), (1, 1)),
        dimension_numbers=("NCHW", "OIHW", "NCHW"),
        precision=jax.lax.Precision.HIGHEST)
    return out + bias.reshape(1, -1, 1, 1)


if __name__ == "__main__":
    key = jax.random.PRNGKey(0)
    k_x, k_w, k_b = jax.random.split(key, 3)

    N, Cin, H, W = 2, 4, 16, 16
    Cout = 8
    scale_factor = 2

    x = jax.random.normal(k_x, (N, Cin, H, W), dtype=jnp.float32)
    weight = jax.random.normal(k_w, (Cout, Cin, 3, 3), dtype=jnp.float32) * 0.1
    bias = jax.random.normal(k_b, (Cout,), dtype=jnp.float32) * 0.1

    ref = _reference(x, weight, bias, scale_factor=scale_factor)

    # default path: bf16 compute, f32 accumulation, auto row tile.
    out = resize_conv2d(x, weight, bias, scale_factor=scale_factor)
    out = jax.block_until_ready(out)
    assert out.shape == (N, Cout, H * scale_factor, W * scale_factor)
    err = float(jnp.max(jnp.abs(out - ref)))
    assert jnp.allclose(out, ref, atol=3e-2, rtol=3e-2), err

    # multi-row-tile path (exercises halo handling across tile boundaries);
    # f32 compute for a tight comparison against the reference.
    out32 = resize_conv2d(x, weight, bias, scale_factor=scale_factor,
                          row_tile=4, compute_dtype=jnp.float32)
    out32 = jax.block_until_ready(out32)
    err32 = float(jnp.max(jnp.abs(out32 - ref)))
    assert jnp.allclose(out32, ref, atol=2e-3, rtol=2e-3), err32

    print("KERNEL_OK")
</pallas_src>

<mosaic_0001>
module attributes {stable_mosaic.version = 11 : i64} {
  func.func @_resize_conv3x3_poly_kernel(%arg0: i32, %arg1: i32, %arg2: memref<1x16x16x128xbf16, #tpu.memory_space<vmem>>, %arg3: memref<8x256x128xbf16, #tpu.memory_space<vmem>>, %arg4: memref<1x128xf32, #tpu.memory_space<vmem>>, %arg5: memref<1x32x32x128xf32, #tpu.memory_space<vmem>>) attributes {dimension_semantics = [#tpu.dimension_semantics<parallel>, #tpu.dimension_semantics<parallel>], iteration_bounds = array<i64: 2, 1>, scalar_prefetch = 0 : i64, scratch_operands = 0 : i64, tpu.core_type = #tpu.core_type<tc>, window_params = [{transform_indices = @transform_0, window_bounds = array<i64: 1, 16, 16, 128>}, {pipeline_mode = #tpu.pipeline_mode<synchronous>, transform_indices = @transform_1, window_bounds = array<i64: 8, 256, 128>}, {pipeline_mode = #tpu.pipeline_mode<synchronous>, transform_indices = @transform_2, window_bounds = array<i64: 1, 128>}, {transform_indices = @transform_3, window_bounds = array<i64: 1, 32, 32, 128>}]} {
    %c16_i32 = arith.constant 16 : i32
    %0 = arith.muli %arg1, %c16_i32 : i32
    %c0 = arith.constant 0 : index
    %1 = arith.index_cast %0 : i32 to index
    %c0_0 = arith.constant 0 : index
    %c0_1 = arith.constant 0 : index
    %2 = vector.load %arg2[%c0, %1, %c0_0, %c0_1] : memref<1x16x16x128xbf16, #tpu.memory_space<vmem>>, vector<1x16x16x128xbf16>
    %3 = vector.shape_cast %2 : vector<1x16x16x128xbf16> to vector<16x16x128xbf16>
    %c1_i32 = arith.constant 1 : i32
    %4 = arith.subi %0, %c1_i32 : i32
    %c0_i32 = arith.constant 0 : i32
    %5 = arith.maxsi %4, %c0_i32 : i32
    %c0_2 = arith.constant 0 : index
    %6 = arith.index_cast %5 : i32 to index
    %c0_3 = arith.constant 0 : index
    %c0_4 = arith.constant 0 : index
    %7 = vector.load %arg2[%c0_2, %6, %c0_3, %c0_4] : memref<1x16x16x128xbf16, #tpu.memory_space<vmem>>, vector<1x1x16x128xbf16>
    %8 = vector.shape_cast %7 : vector<1x1x16x128xbf16> to vector<1x16x128xbf16>
    %c16_i32_5 = arith.constant 16 : i32
    %9 = arith.addi %0, %c16_i32_5 : i32
    %c15_i32 = arith.constant 15 : i32
    %10 = arith.minsi %9, %c15_i32 : i32
    %c0_6 = arith.constant 0 : index
    %11 = arith.index_cast %10 : i32 to index
    %c0_7 = arith.constant 0 : index
    %c0_8 = arith.constant 0 : index
    %12 = vector.load %arg2[%c0_6, %11, %c0_7, %c0_8] : memref<1x16x16x128xbf16, #tpu.memory_space<vmem>>, vector<1x1x16x128xbf16>
    %13 = vector.shape_cast %12 : vector<1x1x16x128xbf16> to vector<1x16x128xbf16>
    %c0_i32_9 = arith.constant 0 : i32
    %14 = arith.cmpi sgt, %0, %c0_i32_9 : i32
    %15 = arith.extui %14 : i1 to i32
    %16 = arith.sitofp %15 : i32 to f32
    %17 = arith.truncf %16 : f32 to bf16
    %18 = vector.broadcast %17 : bf16 to vector<1x16x128xbf16>
    %19 = arith.mulf %8, %18 : vector<1x16x128xbf16>
    %c16_i32_10 = arith.constant 16 : i32
    %20 = arith.addi %0, %c16_i32_10 : i32
    %c16_i32_11 = arith.constant 16 : i32
    %21 = arith.cmpi slt, %20, %c16_i32_11 : i32
    %22 = arith.extui %21 : i1 to i32
    %23 = arith.sitofp %22 : i32 to f32
    %24 = arith.truncf %23 : f32 to bf16
    %25 = vector.broadcast %24 : bf16 to vector<1x16x128xbf16>
    %26 = arith.mulf %13, %25 : vector<1x16x128xbf16>
    %27 = tpu.concatenate %19, %3, %26 in 0 : vector<1x16x128xbf16>, vector<16x16x128xbf16>, vector<1x16x128xbf16> -> vector<18x16x128xbf16>
    %cst = arith.constant 0.000000e+00 : bf16
    %28 = vector.broadcast %cst : bf16 to vector<18x1x128xbf16>
    %29 = vector.extract_strided_slice %27 {offsets = [0, 0, 0], sizes = [18, 15, 128], strides = [1, 1, 1]} : vector<18x16x128xbf16> to vector<18x15x128xbf16>
    %30 = tpu.concatenate %28, %29 in 1 : vector<18x1x128xbf16>, vector<18x15x128xbf16> -> vector<18x16x128xbf16>
    %31 = vector.extract_strided_slice %27 {offsets = [0, 1, 0], sizes = [18, 15, 128], strides = [1, 1, 1]} : vector<18x16x128xbf16> to vector<18x15x128xbf16>
    %32 = tpu.concatenate %31, %28 in 1 : vector<18x15x128xbf16>, vector<18x1x128xbf16> -> vector<18x16x128xbf16>
    %33 = tpu.concatenate %30, %27 in 2 : vector<18x16x128xbf16>, vector<18x16x128xbf16> -> vector<18x16x256xbf16>
    %34 = vector.shape_cast %33 : vector<18x16x256xbf16> to vector<288x256xbf16>
    %35 = tpu.concatenate %27, %32 in 2 : vector<18x16x128xbf16>, vector<18x16x128xbf16> -> vector<18x16x256xbf16>
    %36 = vector.shape_cast %35 : vector<18x16x256xbf16> to vector<288x256xbf16>
    %c0_12 = arith.constant 0 : index
    %c0_13 = arith.constant 0 : index
    %37 = vector.load %arg4[%c0_12, %c0_13] : memref<1x128xf32, #tpu.memory_space<vmem>>, vector<1x128xf32>
    %38 = vector.extract_strided_slice %34 {offsets = [0, 0], sizes = [256, 256], strides = [1, 1]} : vector<288x256xbf16> to vector<256x256xbf16>
    %c0_14 = arith.constant 0 : index
    %c0_15 = arith.constant 0 : index
    %c0_16 = arith.constant 0 : index
    %39 = vector.load %arg3[%c0_14, %c0_15, %c0_16] : memref<8x256x128xbf16, #tpu.memory_space<vmem>>, vector<1x256x128xbf16>
    %40 = vector.shape_cast %39 : vector<1x256x128xbf16> to vector<256x128xbf16>
    %cst_17 = arith.constant dense<0.000000e+00> : vector<256x128xf32>
    %41 = tpu.matmul %38, %40, %cst_17 {dimension_numbers = #tpu.dot_dimension_numbers<[1], [0], [0], [1], [0, 0, 1, 1], [], []>} : vector<256x256xbf16>, vector<256x128xbf16>, vector<256x128xf32> -> vector<256x128xf32>
    %42 = vector.extract_strided_slice %34 {offsets = [16, 0], sizes = [256, 256], strides = [1, 1]} : vector<288x256xbf16> to vector<256x256xbf16>
    %c1 = arith.constant 1 : index
    %c0_18 = arith.constant 0 : index
    %c0_19 = arith.constant 0 : index
    %43 = vector.load %arg3[%c1, %c0_18, %c0_19] : memref<8x256x128xbf16, #tpu.memory_space<vmem>>, vector<1x256x128xbf16>
    %44 = vector.shape_cast %43 : vector<1x256x128xbf16> to vector<256x128xbf16>
    %cst_20 = arith.constant dense<0.000000e+00> : vector<256x128xf32>
    %45 = tpu.matmul %42, %44, %cst_20 {dimension_numbers = #tpu.dot_dimension_numbers<[1], [0], [0], [1], [0, 0, 1, 1], [], []>} : vector<256x256xbf16>, vector<256x128xbf16>, vector<256x128xf32> -> vector<256x128xf32>
    %46 = arith.addf %41, %45 : vector<256x128xf32>
    %47 = vector.broadcast %37 : vector<1x128xf32> to vector<256x128xf32>
    %48 = arith.addf %46, %47 : vector<256x128xf32>
    %49 = vector.shape_cast %48 : vector<256x128xf32> to vector<256x1x128xf32>
    %50 = vector.extract_strided_slice %36 {offsets = [0, 0], sizes = [256, 256], strides = [1, 1]} : vector<288x256xbf16> to vector<256x256xbf16>
    %c2 = arith.constant 2 : index
    %c0_21 = arith.constant 0 : index
    %c0_22 = arith.constant 0 : index
    %51 = vector.load %arg3[%c2, %c0_21, %c0_22] : memref<8x256x128xbf16, #tpu.memory_space<vmem>>, vector<1x256x128xbf16>
    %52 = vector.shape_cast %51 : vector<1x256x128xbf16> to vector<256x128xbf16>
    %cst_23 = arith.constant dense<0.000000e+00> : vector<256x128xf32>
    %53 = tpu.matmul %50, %52, %cst_23 {dimension_numbers = #tpu.dot_dimension_numbers<[1], [0], [0], [1], [0, 0, 1, 1], [], []>} : vector<256x256xbf16>, vector<256x128xbf16>, vector<256x128xf32> -> vector<256x128xf32>
    %54 = vector.extract_strided_slice %36 {offsets = [16, 0], sizes = [256, 256], strides = [1, 1]} : vector<288x256xbf16> to vector<256x256xbf16>
    %c3 = arith.constant 3 : index
    %c0_24 = arith.constant 0 : index
    %c0_25 = arith.constant 0 : index
    %55 = vector.load %arg3[%c3, %c0_24, %c0_25] : memref<8x256x128xbf16, #tpu.memory_space<vmem>>, vector<1x256x128xbf16>
    %56 = vector.shape_cast %55 : vector<1x256x128xbf16> to vector<256x128xbf16>
    %cst_26 = arith.constant dense<0.000000e+00> : vector<256x128xf32>
    %57 = tpu.matmul %54, %56, %cst_26 {dimension_numbers = #tpu.dot_dimension_numbers<[1], [0], [0], [1], [0, 0, 1, 1], [], []>} : vector<256x256xbf16>, vector<256x128xbf16>, vector<256x128xf32> -> vector<256x128xf32>
    %58 = arith.addf %53, %57 : vector<256x128xf32>
    %59 = vector.broadcast %37 : vector<1x128xf32> to vector<256x128xf32>
    %60 = arith.addf %58, %59 : vector<256x128xf32>
    %61 = vector.shape_cast %60 : vector<256x128xf32> to vector<256x1x128xf32>
    %62 = tpu.concatenate %49, %61 in 1 : vector<256x1x128xf32>, vector<256x1x128xf32> -> vector<256x2x128xf32>
    %63 = vector.shape_cast %62 : vector<256x2x128xf32> to vector<16x32x128xf32>
    %64 = vector.extract_strided_slice %34 {offsets = [16, 0], sizes = [256, 256], strides = [1, 1]} : vector<288x256xbf16> to vector<256x256xbf16>
    %c4 = arith.constant 4 : index
    %c0_27 = arith.constant 0 : index
    %c0_28 = arith.constant 0 : index
    %65 = vector.load %arg3[%c4, %c0_27, %c0_28] : memref<8x256x128xbf16, #tpu.memory_space<vmem>>, vector<1x256x128xbf16>
    %66 = vector.shape_cast %65 : vector<1x256x128xbf16> to vector<256x128xbf16>
    %cst_29 = arith.constant dense<0.000000e+00> : vector<256x128xf32>
    %67 = tpu.matmul %64, %66, %cst_29 {dimension_numbers = #tpu.dot_dimension_numbers<[1], [0], [0], [1], [0, 0, 1, 1], [], []>} : vector<256x256xbf16>, vector<256x128xbf16>, vector<256x128xf32> -> vector<256x128xf32>
    %68 = vector.extract_strided_slice %34 {offsets = [32, 0], sizes = [256, 256], strides = [1, 1]} : vector<288x256xbf16> to vector<256x256xbf16>
    %c5 = arith.constant 5 : index
    %c0_30 = arith.constant 0 : index
    %c0_31 = arith.constant 0 : index
    %69 = vector.load %arg3[%c5, %c0_30, %c0_31] : memref<8x256x128xbf16, #tpu.memory_space<vmem>>, vector<1x256x128xbf16>
    %70 = vector.shape_cast %69 : vector<1x256x128xbf16> to vector<256x128xbf16>
    %cst_32 = arith.constant dense<0.000000e+00> : vector<256x128xf32>
    %71 = tpu.matmul %68, %70, %cst_32 {dimension_numbers = #tpu.dot_dimension_numbers<[1], [0], [0], [1], [0, 0, 1, 1], [], []>} : vector<256x256xbf16>, vector<256x128xbf16>, vector<256x128xf32> -> vector<256x128xf32>
    %72 = arith.addf %67, %71 : vector<256x128xf32>
    %73 = vector.broadcast %37 : vector<1x128xf32> to vector<256x128xf32>
    %74 = arith.addf %72, %73 : vector<256x128xf32>
    %75 = vector.shape_cast %74 : vector<256x128xf32> to vector<256x1x128xf32>
    %76 = vector.extract_strided_slice %36 {offsets = [16, 0], sizes = [256, 256], strides = [1, 1]} : vector<288x256xbf16> to vector<256x256xbf16>
    %c6 = arith.constant 6 : index
    %c0_33 = arith.constant 0 : index
    %c0_34 = arith.constant 0 : index
    %77 = vector.load %arg3[%c6, %c0_33, %c0_34] : memref<8x256x128xbf16, #tpu.memory_space<vmem>>, vector<1x256x128xbf16>
    %78 = vector.shape_cast %77 : vector<1x256x128xbf16> to vector<256x128xbf16>
    %cst_35 = arith.constant dense<0.000000e+00> : vector<256x128xf32>
    %79 = tpu.matmul %76, %78, %cst_35 {dimension_numbers = #tpu.dot_dimension_numbers<[1], [0], [0], [1], [0, 0, 1, 1], [], []>} : vector<256x256xbf16>, vector<256x128xbf16>, vector<256x128xf32> -> vector<256x128xf32>
    %80 = vector.extract_strided_slice %36 {offsets = [32, 0], sizes = [256, 256], strides = [1, 1]} : vector<288x256xbf16> to vector<256x256xbf16>
    %c7 = arith.constant 7 : index
    %c0_36 = arith.constant 0 : index
    %c0_37 = arith.constant 0 : index
    %81 = vector.load %arg3[%c7, %c0_36, %c0_37] : memref<8x256x128xbf16, #tpu.memory_space<vmem>>, vector<1x256x128xbf16>
    %82 = vector.shape_cast %81 : vector<1x256x128xbf16> to vector<256x128xbf16>
    %cst_38 = arith.constant dense<0.000000e+00> : vector<256x128xf32>
    %83 = tpu.matmul %80, %82, %cst_38 {dimension_numbers = #tpu.dot_dimension_numbers<[1], [0], [0], [1], [0, 0, 1, 1], [], []>} : vector<256x256xbf16>, vector<256x128xbf16>, vector<256x128xf32> -> vector<256x128xf32>
    %84 = arith.addf %79, %83 : vector<256x128xf32>
    %85 = vector.broadcast %37 : vector<1x128xf32> to vector<256x128xf32>
    %86 = arith.addf %84, %85 : vector<256x128xf32>
    %87 = vector.shape_cast %86 : vector<256x128xf32> to vector<256x1x128xf32>
    %88 = tpu.concatenate %75, %87 in 1 : vector<256x1x128xf32>, vector<256x1x128xf32> -> vector<256x2x128xf32>
    %89 = vector.shape_cast %88 : vector<256x2x128xf32> to vector<16x32x128xf32>
    %90 = tpu.concatenate %63, %89 in 1 : vector<16x32x128xf32>, vector<16x32x128xf32> -> vector<16x64x128xf32>
    %91 = vector.shape_cast %90 : vector<16x64x128xf32> to vector<32x32x128xf32>
    %c0_39 = arith.constant 0 : index
    %c0_40 = arith.constant 0 : index
    %c0_41 = arith.constant 0 : index
    %c0_42 = arith.constant 0 : index
    %92 = vector.load %arg5[%c0_39, %c0_40, %c0_41, %c0_42] : memref<1x32x32x128xf32, #tpu.memory_space<vmem>>, vector<1x32x32x128xf32>
    %93 = vector.shape_cast %92 : vector<1x32x32x128xf32> to vector<32x32x128xf32>
    %94 = vector.shape_cast %91 : vector<32x32x128xf32> to vector<1x32x32x128xf32>
    tpu.vector_store %arg5[%c0_39, %c0_40, %c0_41, %c0_42], %94 {strides = array<i32>} : memref<1x32x32x128xf32, #tpu.memory_space<vmem>>, vector<1x32x32x128xf32>,
    return
  }
  func.func @transform_0(%arg0: i32, %arg1: i32) -> (i32, i32, i32, i32) {
    %c0_i32 = arith.constant 0 : i32
    %c0_i32_0 = arith.constant 0 : i32
    %c0_i32_1 = arith.constant 0 : i32
    %c0_i32_2 = arith.constant 0 : i32
    return %arg0, %c0_i32, %c0_i32_0, %c0_i32_1 : i32, i32, i32, i32
  }
  func.func @transform_1(%arg0: i32, %arg1: i32) -> (i32, i32, i32) {
    %c0_i32 = arith.constant 0 : i32
    %c0_i32_0 = arith.constant 0 : i32
    %c0_i32_1 = arith.constant 0 : i32
    %c0_i32_2 = arith.constant 0 : i32
    return %c0_i32, %c0_i32_0, %c0_i32_1 : i32, i32, i32
  }
  func.func @transform_2(%arg0: i32, %arg1: i32) -> (i32, i32) {
    %c0_i32 = arith.constant 0 : i32
    %c0_i32_0 = arith.constant 0 : i32
    %c0_i32_1 = arith.constant 0 : i32
    return %c0_i32, %c0_i32_0 : i32, i32
  }
  func.func @transform_3(%arg0: i32, %arg1: i32) -> (i32, i32, i32, i32) {
    %c0_i32 = arith.constant 0 : i32
    %c0_i32_0 = arith.constant 0 : i32
    %c0_i32_1 = arith.constant 0 : i32
    return %arg0, %arg1, %c0_i32, %c0_i32_0 : i32, i32, i32, i32
  }
}

</mosaic_0001>

<bundles_post_ra>
// kernel: tpu_custom_call.1
= control target key start
LH: loop header
LB: loop body
LE: loop exit
PB: predicated region body
PF: predicated region fallthrough
CT: control target
= control target key end

     0   :  { %8 = vsyncpa [#allocation3], 0  ;;  %s24373_s0 = inlined_call_operand.hbm [shape: bf16[2,16,16,128], index: 0, kind: input, shape index: {}]   ;;  %s24374_s1 = inlined_call_operand.hbm [shape: bf16[8,256,128], index: 1, kind: input, shape index: {}]   ;;  %s24375_s2 = inlined_call_operand.vmem [shape: f32[1,128], index: 2, kind: input, shape index: {}]   ;;  %s24376_s3 = inlined_call_operand.hbm [shape: f32[2,32,32,128], index: 3, kind: output, shape index: {}]  }
   0x1   :  { %10 = vsyncpa [#allocation3 + $0x1], 0 }
   0x2   :  { %11 = vsyncpa [#allocation6], 0 }
   0x3   :  { %12 = vsyncpa [#allocation4], 0 }
   0x4   :  { %14 = vsyncpa [#allocation4 + $0x1], 0  ;;  %s17660_s12 = smov 0   ;;  %s17662_s13 = smov 0  }
   0x5   :  { %s17664_s14 = smov 0   ;;  %s17666_s15 = smov 0  }
   0x6   :  { %s17668_s16 = smov 0   ;;  %s17670_s17 = smov 0  }
   0x7 LB: > { %s16158_s18 = sadd.s32 4294967295, %s17629_s17   ;;  %s16159_s19 = sadd.s32 4294967294, %s17629_s17   ;;  %s17629_s17 = sphi %s17670_s17, %s20_s17   ;;  %s17625_s16 = sphi %s17668_s16, %s26036_s16   ;;  %s17621_s15 = sphi %s17666_s15, %s26035_s15   ;;  %s17617_s14 = sphi %s17664_s14, %s26034_s14   ;;  %s17613_s13 = sphi %s17662_s13, %s26033_s13   ;;  %s17609_s12 = sphi %s17660_s12, %s26032_s12  }
   0x8   : > { %p52_p0 = scmp.ne.s32.totalorder %s17613_s13, %s17609_s12  ;;  %p17694_p1 = scmp.eq.s32.totalorder %s16158_s18, 0 }
   0x9   : > { %p17698_p2 = scmp.eq.s32.totalorder %s16158_s18, 1  ;;  %p126_p3 = scmp.eq.s32.totalorder %s16159_s19, 1 }
   0xa   : > { %s24902_s20 = scalar_select %p17694_p1, 1, 0 }
   0xb   : > { %s24903_s21 = scalar_select %p17698_p2, 1, 0 }
   0xc   : > { %p17704_p4 = por %p17694_p1, %p52_p0  ;;  %p16160_p5 = scmp.ge.s32.totalorder %s17629_s17, 1 }
   0xd   : > { %p17709_p6 = por %p126_p3, %p52_p0  ;;  %p133_p7 = scmp.lt.s32.totalorder %s17629_s17, 3 }
   0xe   : > { %s24904_s22 = scalar_select %p17704_p4, 1, 0 }
   0xf   : > { %s24905_s23 = scalar_select %p17709_p6, 1, 0 }
  0x10   : > { %p17714_p8 = pnand %p16160_p5, %p133_p7  ;;  %s17631_s25 = smov [#allocation5]  }
  0x11   : > { %s145_s26 = sshll.u32 %s17631_s25, 4  ;;  %s32_s28 = sadd.s32 1, %s17625_s16  ;;  %s146_s26 = int_to_ptr.vmem [resolvable:$true] %s145_s26 }
  0x12   : > { %s24906_s24 = scalar_select %p17714_p8, 1, 0 }
  0x13   : > { %p17230_p9 = pneg %p17714_p8  ;;  %s17485_s4 = scalar_lea.hbm %s24374_s1, 16384 }
  0x14   : > { %p17486_p12 = scmp.ne.s32.totalorder %s24374_s1, %s17485_s4  ;;  %p17492_p5 = scmp.lt.u32.totalorder %s17485_s4, %s24374_s1 }
  0x15   : > { %p17723_p11 = pnand %p17230_p9, %p17694_p1 }
  0x17   : > { %p17487_p13 = pneg %p17723_p11 }
  0x19   : > { %p17488_p0 = pnand %p17487_p13, %p17486_p12 }
  0x1b   : > { %p17489_p3 = pneg %p17488_p0 }
  0x1d   : > { %p17494_p7 = pnand %p17492_p5, %p17489_p3 }
  0x1f   : > { %17497 = shalt.err (!%p17494_p7)
}
  0x20   : > { %s17498_s9 = scalar_lea.vmem %s146_s26, 16384  ;;  %p17506_p1 = scmp.lt.s32.totalorder %s146_s26, %s146_s26 }
  0x21   : > { %p17499_p9 = scmp.ne.s32.totalorder %s146_s26, %s17498_s9  ;;  %p17507_p4 = scmp.lt.s32.totalorder %s17498_s9, %s17498_s9 }
  0x23   : > { %p17501_p10 = pnand %p17499_p9, %p17487_p13  ;;  %p17508_p8 = por %p17507_p4, %p17506_p1 }
  0x25   : > { %p17502_p6 = pneg %p17501_p10 }
  0x27   : > { %p17509_p2 = pnand %p17508_p8, %p17502_p6 }
  0x29   : > { %17512 = shalt.err (!%p17509_p2)
}
  0x2a   : > { %s17632_s10 = smov 64   ;;  %s17633_s11 = smov 4  }
  0x2b   : > { %17233 = dma.hbm_to_vmem [thread:$0]  (!%p17723_p11), %s24374_s1, 16384, %s146_s26, [#allocation6], %s17632_s10, %s17632_s10, %s17633_s11  }
  0x2c   : > { %p34_p1 = scmp.ge.s32.totalorder %s32_s28, 2  ;;  %s39_s25 = sadd.s32 1, %s17617_s14 }
  0x2d   : > { %p46_p2 = scmp.ne.s32.totalorder %s17617_s14, %s17613_s13  ;;  %p47_p4 = scmp.eq.s32.totalorder %s17629_s17, 0 }
  0x2e   : > { %s26038_s28 = smov (%p34_p1, %s32_s28), 0  ;;  %p24909_p8 = scmp.ne.s32.totalorder %s24903_s21, 0 }
  0x2f   : > { %p17753_p6 = por %p47_p4, %p46_p2  ;;  %s36_s30 = ssub.s32 %s17625_s16, %s26038_s28 }
  0x30   : > { %p17759_p10 = por %p24909_p8, %p46_p2  ;;  %p17243_p12 = scmp.lt.s32.totalorder %s17629_s17, 2 }
  0x31   : > { %p37_p11 = scmp.eq.s32.totalorder %s36_s30, 0  ;;  %s162_s26 = sand.u32 1, %s17617_s14  }
  0x32   : > { %s16163_s4 = sshll.u32 %s162_s26, 7  ;;  %s16324_s6 = sshll.u32 %s17625_s16, 11 }
  0x33   : > { %s17768_s5 = scalar_select %p37_p11, %s17617_s14, %s39_s25  }
  0x34   : > { %s17774_s9 = scalar_lea.hbm %s24373_s0, %s16324_s6  ;;  %s166_s21 = scalar_lea.vmem [#allocation2], %s16163_s4 }
  0x35   : > { %s173_s18 = sshll.u32 %s166_s21, 4  ;;  %p17780_p13 = pnand %p17243_p12, %p17753_p6  ;;  %s17776_s18 = int_to_ptr.vmem [resolvable:$true] %s173_s18 }
  0x36   : > { %s17784_s25 = scalar_lea.sflag [#allocation3], %s162_s26  ;;  %s17513_s30 = scalar_lea.hbm %s17774_s9, 2048 }
  0x37   : > { %p17514_p0 = scmp.ne.s32.totalorder %s17774_s9, %s17513_s30  ;;  %p17515_p3 = pneg %p17780_p13 }
  0x38   : > { %s17518_s29 = scalar_lea.hbm %s24373_s0, 4096  ;;  %p17519_p9 = scmp.lt.u32.totalorder %s17774_s9, %s24373_s0 }
  0x39   : > { %p17516_p5 = pnand %p17515_p3, %p17514_p0  ;;  %p17520_p1 = scmp.lt.u32.totalorder %s17518_s29, %s17513_s30 }
  0x3a   : > { %p17522_p4 = scmp.lt.u32.totalorder %s17513_s30, %s17774_s9 }
  0x3b   : > { %p17517_p7 = pneg %p17516_p5  ;;  %p17521_p2 = por %p17520_p1, %p17519_p9 }
  0x3d   : > { %p17523_p6 = por %p17522_p4, %p17521_p2 }
  0x3f   : > { %p17524_p8 = pnand %p17523_p6, %p17517_p7 }
  0x41   : > { %17527 = shalt.err (!%p17524_p8)
}
  0x42   : > { %s17528_s26 = scalar_lea.vmem %s17776_s18, 2048  ;;  %s17634_s21 = smov [#allocation2]  }
  0x43   : > { %p17529_p12 = scmp.ne.s32.totalorder %s17776_s18, %s17528_s26  ;;  %s17533_s4 = sshll.u32 %s17634_s21, 4  ;;  %s17534_s4 = int_to_ptr.vmem [resolvable:$false] %s17533_s4 }
  0x44   : > { %s17535_s6 = scalar_lea.vmem %s17534_s4, 4096  ;;  %p17536_p5 = scmp.lt.s32.totalorder %s17776_s18, %s17534_s4 }
  0x45   : > { %p17531_p11 = pnand %p17529_p12, %p17515_p3  ;;  %p17537_p9 = scmp.lt.s32.totalorder %s17535_s6, %s17528_s26 }
  0x47   : > { %p17532_p0 = pneg %p17531_p11  ;;  %p17538_p1 = por %p17537_p9, %p17536_p5 }
  0x49   : > { %p17539_p2 = pnand %p17538_p1, %p17532_p0 }
  0x4b   : > { %17542 = shalt.err (!%p17539_p2)
}
  0x4c   : > { %17237 = dma.hbm_to_vmem [thread:$0]  (!%p17780_p13), %s17774_s9, 2048, %s17776_s18, %s17784_s25, %s17632_s10, %s17632_s10, %s17633_s11  }
  0x4d   : > { %p24912_p3 = scmp.ne.s32.totalorder %s24906_s24, 0 }
  0x4f   : > { %185 = sbr.rel (%p24912_p3) target bundleno = 1388 (0x56c), region = 32 }
  0x56   : > { %s17818_s30 = sand.u32 1, %s17613_s13   ;;  %p24913_p7 = scmp.ne.s32.totalorder %s24904_s22, 0 }
  0x57   : > { %s16167_s29 = sshll.u32 %s17818_s30, 7  ;;  %s188_s7 = scalar_lea.sflag [#allocation3], %s17818_s30 }
  0x58   : > { %s17822_s8 = scalar_lea.vmem [#allocation2], %s16167_s29 }
  0x59   : > { %17596 = dma.done.wait (%p24913_p7), %s188_s7, 2048  }
  0x5a   : > { %17598 = vsyncadd (%p24913_p7), %s188_s7, 4294965248  ;;  %p24914_p13 = scmp.ne.s32.totalorder %s24902_s20, 0 }
  0x5c   : > { %17600 = dma.done.wait (%p24914_p13), [#allocation6], 16384  }
  0x5d   : > { %17602 = vsyncadd (%p24914_p13), [#allocation6], 4294950912  ;;  %v17301_v0 = vld [vmem:[#allocation5 + $0xc0] sm:$0xff]   ;;  %v17305_v4 = vld [vmem:[#allocation5 + $0xc8] sm:$0xff]   ;;  %vm545_vm0 = vsmask.f32 256 }
  0x5e   : > { %v17302_v1 = vld [vmem:[#allocation5 + $0x40] sm:$0xff]   ;;  %16326 = vmatprep.subr.bf16.mxu0 %v17301_v0  ;;  %v17306_v5 = vld [vmem:[#allocation5 + $0x48] sm:$0xff]   ;;  %v17309_v8 = vld [vmem:[#allocation5 + $0xd0] sm:$0xff]   ;;  %vm544_vm1 = vcmask 1040384   ;;  %v24915_v43 = vmov 0  ;;  %vm619_vm3 = vcmask 1047552  }
  0x5f   : > { %v17303_v2 = vld [vmem:[#allocation5 + $0x80] sm:$0xff]   ;;  %16438 = vmatprep.subr.bf16.mxu1 %v17302_v1  ;;  %v17307_v6 = vld [vmem:[#allocation5 + $0x88] sm:$0xff]   ;;  %v17310_v9 = vld [vmem:[#allocation5 + $0x50] sm:$0xff]   ;;  %vm620_vm4 = vsmask.f32 7424  ;;  %s16169_s11 = sshll.u32 %s17818_s30, 10 }
  0x60   : > { %v17304_v3 = vld [vmem:[#allocation5] sm:$0xff]   ;;  %16327 = vmatpush3.bf16.msra.mxu0 %v17303_v2  ;;  %v17308_v7 = vld [vmem:[#allocation5 + $0x8] sm:$0xff]   ;;  %v17311_v10 = vld [vmem:[#allocation5 + $0x90] sm:$0xff]   ;;  %s19313_s9 = scalar_lea.vmem [#allocation7], %s16169_s11  ;;  %s16325_s11 = sshll.u32 %s17621_s15, 14 }
  0x61   : > { %16439 = vmatpush3.bf16.msra.mxu1 %v17304_v3  ;;  %16328 = vmatprep.subr.bf16.mxu0 %v17305_v4  ;;  %v17312_v11 = vld [vmem:[#allocation5 + $0x10] sm:$0xff]   ;;  %v17313_v12 = vld [vmem:[#allocation5 + $0xd8] sm:$0xff]   ;;  %v17317_v16 = vld [vmem:[#allocation5 + $0xe0] sm:$0xff]   ;;  %s16058_s18 = sshll.u32 %s19313_s9, 4  ;;  %s24320_s26 = scalar_lea.hbm %s24376_s3, %s16325_s11  ;;  %s24322_s18 = int_to_ptr.vmem [resolvable:$true] %s16058_s18 }
  0x62   : > { %16440 = vmatprep.subr.bf16.mxu1 %v17306_v5  ;;  %v17314_v13 = vld [vmem:[#allocation5 + $0x58] sm:$0xff]   ;;  %v17318_v17 = vld [vmem:[#allocation5 + $0x60] sm:$0xff]   ;;  %v17321_v20 = vld [vmem:[#allocation5 + $0xe8] sm:$0xff]   ;;  %s16042_s15 = scalar_lea.sflag [#allocation4], %s17818_s30  ;;  %s17543_s21 = scalar_lea.vmem %s24322_s18, 16384 }
  0x63   : > { %v17315_v14 = vld [vmem:[#allocation5 + $0x98] sm:$0xff]   ;;  %v17319_v18 = vld [vmem:[#allocation5 + $0xa0] sm:$0xff]   ;;  %v17322_v21 = vld [vmem:[#allocation5 + $0x68] sm:$0xff]   ;;  %p17544_p4 = scmp.ne.s32.totalorder %s24322_s18, %s17543_s21  ;;  %s17637_s4 = smov [#allocation7]  }
  0x64   : > { %16329 = vmatpush3.bf16.msra.mxu0 %v17307_v6  ;;  %v17316_v15 = vld [vmem:[#allocation5 + $0x18] sm:$0xff]   ;;  %v17320_v19 = vld [vmem:[#allocation5 + $0x20] sm:$0xff]   ;;  %v17323_v22 = vld [vmem:[#allocation5 + $0xa8] sm:$0xff]   ;;  %s17547_s6 = sshll.u32 %s17637_s4, 4  ;;  %s17548_s6 = int_to_ptr.vmem [resolvable:$false] %s17547_s6 }
  0x65   : > { %16441 = vmatpush3.bf16.msra.mxu1 %v17308_v7  ;;  %16330 = vmatprep.subr.bf16.mxu0 %v17309_v8  ;;  %v17324_v23 = vld [vmem:[#allocation5 + $0x28] sm:$0xff]   ;;  %v17325_v24 = vld [vmem:[#allocation5 + $0xf0] sm:$0xff]   ;;  %v17329_v28 = vld [vmem:[#allocation5 + $0xf8] sm:$0xff]   ;;  %p17545_p6 = pnand %p17544_p4, %p17759_p10  ;;  %s17549_s29 = scalar_lea.vmem %s17548_s6, 32768 }
  0x66   : > { %16442 = vmatprep.subr.bf16.mxu1 %v17310_v9  ;;  %v17326_v25 = vld [vmem:[#allocation5 + $0x70] sm:$0xff]   ;;  %v17330_v29 = vld [vmem:[#allocation5 + $0x78] sm:$0xff]   ;;  %v17833_v32 = vld [vmem:[%s17822_s8] sm:$0xff]   ;;  %p17550_p12 = scmp.lt.s32.totalorder %s24322_s18, %s17548_s6  ;;  %p17551_p11 = scmp.lt.s32.totalorder %s17549_s29, %s17543_s21 }
  0x67   : > { %v17327_v26 = vld [vmem:[#allocation5 + $0xb0] sm:$0xff]   ;;  %v17331_v30 = vld [vmem:[#allocation5 + $0xb8] sm:$0xff]   ;;  %v262_v33 = vld [vmem:[%s17822_s8] sm:$0xf]  ;;  %852 = vmatprep.mubr.bf16.mxu0 %v17833_v32  ;;  %v408_v37 = vshrl.u32 %v17833_v32, 16  ;;  %v411_v38 = vshll.u32 %v17833_v32, 16  ;;  %p17546_p8 = pneg %p17545_p6 }
  0x68   : > { %16331 = vmatpush3.bf16.msra.mxu0 %v17311_v10  ;;  %v17328_v27 = vld [vmem:[#allocation5 + $0x30] sm:$0xff]   ;;  %v17332_v31 = vld [vmem:[#allocation5 + $0x38] sm:$0xff]   ;;  %v263_v34 = vld [vmem:[%s17822_s8 + $0x4] sm:$0xf]  ;;  %v289_v35 = vmul.bf16 0.0, %v262_v33  ;;  %p17552_p0 = por %p17551_p11, %p17550_p12 }
  0x69   : > { %16443 = vmatpush3.bf16.msra.mxu1 %v17312_v11  ;;  %16332 = vmatprep.subr.bf16.mxu0 %v17313_v12  ;;  %v290_v36 = vmul.bf16 0.0, %v263_v34  ;;  %v17334_v39 = vld [vmem:[#allocation5 + $0x1c0] sm:$0xff]   ;;  %v410_v41 = vrot.slane %v408_v37, 7  ;;  %vm17844_vm2 = vmand %vm544_vm1, %vm545_vm0  ;;  %v567_v44 = vrot.slane %v411_v38, 1  ;;  %v17852_v49 = vld [vmem:[%s17822_s8 + $0x8] sm:$0xff]  }
  0x6a   : > { %16444 = vmatprep.subr.bf16.mxu1 %v17314_v13  ;;  %v17335_v42 = vld [vmem:[#allocation5 + $0x140] sm:$0xff]   ;;  %v24916_v43 = vsel %vm17844_vm2, 4294967295, %v24915_v43  ;;  %v415_v53 = vshrl.u32 %v17852_v49, 16  ;;  %v418_v54 = vshll.u32 %v17852_v49, 16  ;;  %v17863_v55 = vld [vmem:[%s17822_s8 + $0x10] sm:$0xff]   ;;  %v17340_v56 = vld [vmem:[#allocation5 + $0x1c8] sm:$0xff]   ;;  %p17553_p5 = pnand %p17552_p0, %p17546_p8 }
  0x6b   : > { %v17840_v40 = vcombine.low %v289_v35, %v290_v36  ;;  %24917 = vst [vmem:[#allocation11_spill] sm:$0xff] %v24916_v43  ;;  %v413_v45 = vor.u32 %v411_v38, %v410_v41  ;;  %v17336_v48 = vld [vmem:[#allocation5 + $0x180] sm:$0xff]   ;;  %v17854_v50 = vor.u32 %v567_v44, %v408_v37  ;;  %v422_v60 = vshrl.u32 %v17863_v55, 16  ;;  %v17341_v61 = vld [vmem:[#allocation5 + $0x148] sm:$0xff]   ;;  %v17877_v6 = vld [vmem:[%s17822_s8 + $0x18] sm:$0xff]  }
  0x6c   : > { %16333 = vmatpush3.bf16.msra.mxu0 %v17315_v14  ;;  %v17337_v58 = vld [vmem:[#allocation5 + $0x100] sm:$0xff]   ;;  %v417_v59 = vrot.slane %v415_v53, 7  ;;  %v425_v62 = vshll.u32 %v17863_v55, 16  ;;  %v17342_v63 = vld [vmem:[#allocation5 + $0x188] sm:$0xff]   ;;  %v569_v8 = vrot.slane %v418_v54, 1  ;;  %v17346_v9 = vld [vmem:[#allocation5 + $0x1d0] sm:$0xff]  }
  0x6d   : > { %16445 = vmatpush3.bf16.msra.mxu1 %v17316_v15  ;;  %16334 = vmatprep.subr.bf16.mxu0 %v17317_v16  ;;  %v401_v46 = vshrl.u32 %v17840_v40, 16  ;;  %v404_v47 = vshll.u32 %v17840_v40, 16  ;;  %v17858_v51 = vsel %vm17844_vm2, 0, %v413_v45  ;;  %v424_v2 = vrot.slane %v422_v60, 7  ;;  %v17343_v3 = vld [vmem:[#allocation5 + $0x108] sm:$0xff]   ;;  %v17347_v11 = vld [vmem:[#allocation5 + $0x150] sm:$0xff]   ;;  %vm18089_vm5 = vmand %vm619_vm3, %vm620_vm4 }
  0x6e   : > { %16446 = vmatprep.subr.bf16.mxu1 %v17318_v17  ;;  %1109 = vmatprep.mubr.bf16.mxu1 %v17840_v40  ;;  %v420_v1 = vor.u32 %v418_v54, %v417_v59  ;;  %v17348_v12 = vld [vmem:[#allocation5 + $0x190] sm:$0xff]   ;;  %v17882_v13 = vor.u32 %v569_v8, %v415_v53  ;;  %v429_v14 = vshrl.u32 %v17877_v6, 16  ;;  %v432_v17 = vshll.u32 %v17877_v6, 16  ;;  %v17359_v34 = vld [vmem:[#allocation5 + $0x160] sm:$0xff]   ;;  %v17365_v41 = vld [vmem:[#allocation5 + $0x168] sm:$0xff]  }
  0x6f   : > { %v403_v52 = vrot.slane %v401_v46, 7  ;;  %v565_v4 = vrot.slane %v404_v47, 1  ;;  %v427_v10 = vor.u32 %v425_v62, %v424_v2  ;;  %v17349_v15 = vld [vmem:[#allocation5 + $0x110] sm:$0xff]   ;;  %v17360_v35 = vld [vmem:[#allocation5 + $0x1a0] sm:$0xff]   ;;  %v17940_v2 = vld [vmem:[%s17822_s8 + $0x38] sm:$0xff]  }
  0x70   : > { %16335 = vmatpush3.bf16.msra.mxu0 %v17319_v18  ;;  %v17874_v5 = vsel %vm17844_vm2, 0, %v420_v1  ;;  %v17893_v18 = vld [vmem:[%s17822_s8 + $0x20] sm:$0xff]   ;;  %v17918_v45 = vld [vmem:[%s17822_s8 + $0x30] sm:$0xff]  }
  0x71   : > { %16447 = vmatpush3.bf16.msra.mxu1 %v17320_v19  ;;  %16336 = vmatprep.subr.bf16.mxu0 %v17321_v20  ;;  %v406_v57 = vor.u32 %v404_v47, %v403_v52  ;;  %v17879_v7 = vor.u32 %v565_v4, %v401_v46  ;;  %v17889_v16 = vsel %vm17844_vm2, 0, %v427_v10  ;;  %v17352_v19 = vld [vmem:[#allocation5 + $0x1d8] sm:$0xff]   ;;  %v431_v20 = vrot.slane %v429_v14, 7  ;;  %v17361_v36 = vld [vmem:[#allocation5 + $0x120] sm:$0xff]   ;;  %v17366_v47 = vld [vmem:[#allocation5 + $0x1a8] sm:$0xff]  }
  0x72   : > { %16448 = vmatprep.subr.bf16.mxu1 %v17322_v21  ;;  %v17353_v21 = vld [vmem:[#allocation5 + $0x158] sm:$0xff]   ;;  %v573_v52 = vrot.slane %v432_v17, 1  ;;  %v450_v53 = vshrl.u32 %v17918_v45, 16  ;;  %v453_v59 = vshll.u32 %v17918_v45, 16  ;;  %v17947_v10 = vld [vmem:[%s17822_s8 + $0x40] sm:$0xff]  }
  0x73   : > { %v547_v0 = vsel %vm17844_vm2, 0, %v406_v57  ;;  %v17377_v4 = vld [vmem:[#allocation5 + $0x178] sm:$0xff]  }
  0x74   : > { %16337 = vmatpush3.bf16.msra.mxu0 %v17323_v22  ;;  %v436_v22 = vshrl.u32 %v17893_v18, 16 }
  0x75   : > { %16449 = vmatpush3.bf16.msra.mxu1 %v17324_v23  ;;  %16338 = vmatprep.subr.bf16.mxu0 %v17325_v24  ;;  %v17354_v23 = vld [vmem:[#allocation5 + $0x198] sm:$0xff]   ;;  %v434_v24 = vor.u32 %v432_v17, %v431_v20  ;;  %v17381_v20 = vld [vmem:[#allocation5 + $0x2c0] sm:$0xff]  }
  0x76   : > { %16450 = vmatprep.subr.bf16.mxu1 %v17326_v25  ;;  %v17355_v25 = vld [vmem:[#allocation5 + $0x118] sm:$0xff]   ;;  %v438_v33 = vrot.slane %v436_v22, 7 }
  0x78   : > { %16339 = vmatpush3.bf16.msra.mxu0 %v17327_v26  ;;  %v571_v26 = vrot.slane %v425_v62, 1 }
  0x79   : > { %16451 = vmatpush3.bf16.msra.mxu1 %v17328_v27  ;;  %16340 = vmatprep.subr.bf16.mxu0 %v17329_v28  ;;  %v17900_v27 = vld [vmem:[%s17822_s8 + $0x28] sm:$0xff]  }
  0x7a   : > { %16452 = vmatprep.subr.bf16.mxu1 %v17330_v29  ;;  %v17902_v28 = vor.u32 %v571_v26, %v422_v60  ;;  %v439_v29 = vshll.u32 %v17893_v18, 16  ;;  %v443_v37 = vshrl.u32 %v17900_v27, 16  ;;  %v446_v44 = vshll.u32 %v17900_v27, 16  ;;  %v17371_v60 = vld [vmem:[#allocation5 + $0x170] sm:$0xff]  }
  0x7c   : > { %16341 = vmatpush3.bf16.msra.mxu0 %v17331_v30  ;;  %v17358_v30 = vld [vmem:[#allocation5 + $0x1e0] sm:$0xff]   ;;  %v441_v38 = vor.u32 %v439_v29, %v438_v33  ;;  %v575_v57 = vrot.slane %v439_v29, 1  ;;  %v17968_v33 = vld [vmem:[%s17822_s8 + $0x48] sm:$0xff]  }
  0x7d   : > { %16453 = vmatpush3.bf16.msra.mxu1 %v17332_v31  ;;  %16550 = vmatprep.subr.bf16.mxu0 %v17334_v39  ;;  %v17909_v31 = vsel %vm17844_vm2, 0, %v434_v24  ;;  %v17364_v39 = vld [vmem:[#allocation5 + $0x1e8] sm:$0xff]   ;;  %v17382_v24 = vld [vmem:[#allocation5 + $0x240] sm:$0xff]  }
  0x7e   : > { %16662 = vmatprep.subr.bf16.mxu1 %v17335_v42  ;;  %v445_v42 = vrot.slane %v443_v37, 7  ;;  %v17924_v46 = vsel %vm17844_vm2, 0, %v441_v38  ;;  %v17932_v62 = vor.u32 %v575_v57, %v436_v22  ;;  %v579_v22 = vrot.slane %v453_v59, 1 }
  0x7f   : > { %853 = vmatmul.mubr.bf16.vlgmr.msra.gmra.mrb[0].mxu0 %v17858_v51 }
  0x80   : > { %16551 = vmatpush3.bf16.msra.mxu0 %v17336_v48  ;;  %860 = vmatprep.mubr.bf16.mxu0 %v17852_v49  ;;  %v17367_v48 = vld [vmem:[#allocation5 + $0x128] sm:$0xff]   ;;  %v448_v54 = vor.u32 %v446_v44, %v445_v42 }
  0x81   : > { %16552 = vmatprep.subr.bf16.mxu0 %v17340_v56  ;;  %1110 = vmatmul.mubr.bf16.vlgmr.msra.gmra.mrb[0].mxu1 %v547_v0  ;;  %v17928_v56 = vor.u32 %v573_v52, %v429_v14  ;;  %v17373_v0 = vld [vmem:[#allocation5 + $0x130] sm:$0xff]   ;;  %v577_v14 = vrot.slane %v446_v44, 1  ;;  %v474_v44 = vshll.u32 %v17968_v33, 16 }
  0x82   : > { %16663 = vmatpush3.bf16.msra.mxu1 %v17337_v58  ;;  %1117 = vmatprep.mubr.bf16.mxu1 %v17833_v32  ;;  %v17370_v58 = vld [vmem:[#allocation5 + $0x1f0] sm:$0xff]   ;;  %v17937_v1 = vsel %vm17844_vm2, 0, %v448_v54 }
  0x83   : > { %16664 = vmatprep.subr.bf16.mxu1 %v17341_v61  ;;  %v17372_v61 = vld [vmem:[#allocation5 + $0x1b0] sm:$0xff]  }
  0x84   : > { %16553 = vmatpush3.bf16.msra.mxu0 %v17342_v63  ;;  %v452_v63 = vrot.slane %v450_v53, 7 }
  0x85   : > { %16554 = vmatprep.subr.bf16.mxu0 %v17346_v9  ;;  %v457_v9 = vshrl.u32 %v17940_v2, 16 }
  0x86   : > { %16665 = vmatpush3.bf16.msra.mxu1 %v17343_v3  ;;  %v17376_v3 = vld [vmem:[#allocation5 + $0x1f8] sm:$0xff]   ;;  %v455_v8 = vor.u32 %v453_v59, %v452_v63  ;;  %v585_v63 = vrot.slane %v474_v44, 1 }
  0x87   : > { %861 = vmatmul.mubr.bf16.gmra.mrb[4].mxu0 %v17874_v5  ;;  %16666 = vmatprep.subr.bf16.mxu1 %v17347_v11  ;;  %v17378_v11 = vld [vmem:[#allocation5 + $0x1b8] sm:$0xff]   ;;  %v459_v17 = vrot.slane %v457_v9, 7 }
  0x88   : > { %868 = vmatprep.mubr.bf16.mxu0 %v17863_v55  ;;  %16555 = vmatpush3.bf16.msra.mxu0 %v17348_v12  ;;  %v17379_v12 = vld [vmem:[#allocation5 + $0x138] sm:$0xff]  }
  0x89   : > { %1118 = vmatmul.mubr.bf16.gmra.mrb[4].mxu1 %v17858_v51  ;;  %16556 = vmatprep.subr.bf16.mxu0 %v17352_v19  ;;  %v460_v19 = vshll.u32 %v17940_v2, 16  ;;  %v17997_v59 = vld [vmem:[%s17822_s8 + $0x58] sm:$0xff]  }
  0x8a   : > { %1125 = vmatprep.mubr.bf16.mxu1 %v17852_v49  ;;  %16667 = vmatpush3.bf16.msra.mxu1 %v17349_v15  ;;  %v17952_v15 = vsel %vm17844_vm2, 0, %v455_v8  ;;  %v488_v8 = vshll.u32 %v17997_v59, 16 }
  0x8b   : > { %16668 = vmatprep.subr.bf16.mxu1 %v17353_v21  ;;  %v17958_v21 = vor.u32 %v577_v14, %v443_v37  ;;  %v462_v26 = vor.u32 %v460_v19, %v459_v17  ;;  %v471_v37 = vshrl.u32 %v17968_v33, 16  ;;  %v581_v38 = vrot.slane %v460_v19, 1 }
  0x8c   : > { %16557 = vmatpush3.bf16.msra.mxu0 %v17354_v23  ;;  %v464_v23 = vshrl.u32 %v17947_v10, 16 }
  0x8d   : > { %16558 = vmatprep.subr.bf16.mxu0 %v17358_v30  ;;  %v467_v30 = vshll.u32 %v17947_v10, 16 }
  0x8e   : > { %16669 = vmatpush3.bf16.msra.mxu1 %v17355_v25  ;;  %v17961_v25 = vor.u32 %v579_v22, %v450_v53  ;;  %v466_v29 = vrot.slane %v464_v23, 7  ;;  %v18027_v22 = vld [vmem:[%s17822_s8 + $0x68] sm:$0xff]  }
  0x8f   : > { %869 = vmatmul.mubr.bf16.gmra.mrb[8].mxu0 %v17889_v16  ;;  %16670 = vmatprep.subr.bf16.mxu1 %v17359_v34  ;;  %v17973_v34 = vsel %vm17844_vm2, 0, %v462_v26  ;;  %v583_v53 = vrot.slane %v467_v30, 1  ;;  %v499_v26 = vshrl.u32 %v18027_v22, 16 }
  0x90   : > { %876 = vmatprep.mubr.bf16.mxu0 %v17877_v6  ;;  %16559 = vmatpush3.bf16.msra.mxu0 %v17360_v35  ;;  %v17976_v35 = vld [vmem:[%s17822_s8 + $0x50] sm:$0xff]  }
  0x91   : > { %1126 = vmatmul.mubr.bf16.gmra.mrb[8].mxu1 %v17874_v5  ;;  %16560 = vmatprep.subr.bf16.mxu0 %v17364_v39  ;;  %v478_v39 = vshrl.u32 %v17976_v35, 16  ;;  %v17992_v54 = vor.u32 %v583_v53, %v464_v23 }
  0x92   : > { %1133 = vmatprep.mubr.bf16.mxu1 %v17863_v55  ;;  %16671 = vmatpush3.bf16.msra.mxu1 %v17361_v36  ;;  %v469_v36 = vor.u32 %v467_v30, %v466_v29  ;;  %v589_v29 = vrot.slane %v488_v8, 1  ;;  %v502_v30 = vshll.u32 %v18027_v22, 16 }
  0x93   : > { %16672 = vmatprep.subr.bf16.mxu1 %v17365_v41  ;;  %v17982_v41 = vor.u32 %v581_v38, %v457_v9  ;;  %v480_v52 = vrot.slane %v478_v39, 7  ;;  %v501_v38 = vrot.slane %v499_v26, 7 }
  0x94   : > { %16561 = vmatpush3.bf16.msra.mxu0 %v17366_v47  ;;  %v17986_v42 = vsel %vm17844_vm2, 0, %v469_v36  ;;  %v473_v47 = vrot.slane %v471_v37, 7 }
  0x95   : > { %16562 = vmatprep.subr.bf16.mxu0 %v17370_v58 }
  0x96   : > { %16673 = vmatpush3.bf16.msra.mxu1 %v17367_v48  ;;  %v481_v48 = vshll.u32 %v17976_v35, 16  ;;  %v476_v57 = vor.u32 %v474_v44, %v473_v47  ;;  %v504_v44 = vor.u32 %v502_v30, %v501_v38  ;;  %v17383_v38 = vld [vmem:[#allocation5 + $0x280] sm:$0xff]  }
  0x97   : > { %877 = vmatmul.mubr.bf16.gmra.mrb[12].mxu0 %v17909_v31  ;;  %16674 = vmatprep.subr.bf16.mxu1 %v17371_v60 }
  0x98   : > { %884 = vmatprep.mubr.bf16.mxu0 %v17893_v18  ;;  %16563 = vmatpush3.bf16.msra.mxu0 %v17372_v61  ;;  %v483_v58 = vor.u32 %v481_v48, %v480_v52  ;;  %v18002_v60 = vsel %vm17844_vm2, 0, %v476_v57  ;;  %v18005_v61 = vld [vmem:[%s17822_s8 + $0x60] sm:$0xff]   ;;  %v18063_v53 = vsel %vm17844_vm2, 0, %v504_v44  ;;  %v18113_v44 = vsel %vm18089_vm5, %v17882_v13, 0 }
  0x99   : > { %1134 = vmatmul.mubr.bf16.gmra.mrb[12].mxu1 %v17889_v16  ;;  %16564 = vmatprep.subr.bf16.mxu0 %v17376_v3  ;;  %v485_v3 = vshrl.u32 %v17997_v59, 16  ;;  %v492_v9 = vshrl.u32 %v18005_v61, 16  ;;  %v495_v19 = vshll.u32 %v18005_v61, 16  ;;  %v18122_v13 = vsel %vm18089_vm5, %v17902_v28, 0  ;;  %v17397_v28 = vld [vmem:[#allocation5 + $0x2e0] sm:$0xff]  }
  0x9a   : > { %1141 = vmatprep.mubr.bf16.mxu1 %v17877_v6  ;;  %16675 = vmatpush3.bf16.msra.mxu1 %v17373_v0  ;;  %v18010_v0 = vsel %vm17844_vm2, 0, %v483_v58  ;;  %24921 = vst [vmem:[#allocation13_spill] sm:$0xff] %v18122_v13 }
  0x9b   : > { %16676 = vmatprep.subr.bf16.mxu1 %v17377_v4  ;;  %v18013_v4 = vor.u32 %v585_v63, %v471_v37  ;;  %v494_v17 = vrot.slane %v492_v9, 7  ;;  %v18039_v36 = vor.u32 %v589_v29, %v485_v3  ;;  %v18069_v63 = vld [vmem:[%s17822_s8 + $0x78] sm:$0xff]   ;;  %v622_v29 = vsel %vm18089_vm5, %v17879_v7, 0  ;;  %v17389_v7 = vld [vmem:[#allocation5 + $0x2d0] sm:$0xff]  }
  0x9c   : > { %16565 = vmatpush3.bf16.msra.mxu0 %v17378_v11  ;;  %v487_v11 = vrot.slane %v485_v3, 7 }
  0x9d   : > { %16774 = vmatprep.subr.bf16.mxu0 %v17381_v20 }
  0x9e   : > { %16677 = vmatpush3.bf16.msra.mxu1 %v17379_v12  ;;  %v587_v12 = vrot.slane %v481_v48, 1  ;;  %v490_v20 = vor.u32 %v488_v8, %v487_v11  ;;  %v591_v48 = vrot.slane %v495_v19, 1  ;;  %v24381_v8 = vshrl.u32 %v18069_v63, 16 }
  0x9f   : > { %885 = vmatmul.mubr.bf16.gmra.mrb[16].mxu0 %v17924_v46  ;;  %16886 = vmatprep.subr.bf16.mxu1 %v17382_v24  ;;  %v497_v24 = vor.u32 %v495_v19, %v494_v17  ;;  %v24918_v19 = vmov 0 }
  0xa0   : > { %892 = vmatprep.mubr.bf16.mxu0 %v17900_v27  ;;  %v18021_v14 = vor.u32 %v587_v12, %v478_v39  ;;  %v18033_v23 = vsel %vm17844_vm2, 0, %v490_v20  ;;  %v18048_v39 = vld [vmem:[%s17822_s8 + $0x70] sm:$0xff]   ;;  %v18057_v52 = vor.u32 %v591_v48, %v492_v9  ;;  %v515_v11 = vrot.slane %v24381_v8, 7  ;;  %v17385_v48 = vld [vmem:[#allocation5 + $0x2c8] sm:$0xff]  }
  0xa1   : > { %1142 = vmatmul.mubr.bf16.gmra.mrb[16].mxu1 %v17909_v31  ;;  %v18043_v37 = vsel %vm17844_vm2, 0, %v497_v24  ;;  %v24382_v47 = vshrl.u32 %v18048_v39, 16  ;;  %v509_v58 = vshll.u32 %v18048_v39, 16  ;;  %v516_v12 = vshll.u32 %v18069_v63, 16 }
  0xa2   : > { %1149 = vmatprep.mubr.bf16.mxu1 %v17893_v18  ;;  %v24919_v19 = vsel %vm18089_vm5, 4294967295, %v24918_v19  ;;  %v18102_v24 = vsel %vm18089_vm5, %v17854_v50, 0  ;;  %v17384_v50 = vld [vmem:[#allocation5 + $0x200] sm:$0xff]  }
  0xa3   : > { %v508_v57 = vrot.slane %v24382_v47, 7  ;;  %v518_v17 = vor.u32 %v516_v12, %v515_v11  ;;  %24920 = vst [vmem:[#allocation12_spill] sm:$0xff] %v24919_v19  ;;  %v17388_v11 = vld [vmem:[#allocation5 + $0x208] sm:$0xff]  }
  0xa5   : > { %v511_v3 = vor.u32 %v509_v58, %v508_v57  ;;  %v18097_v20 = vsel %vm17844_vm2, 0, %v518_v17  ;;  %v17386_v57 = vld [vmem:[#allocation5 + $0x248] sm:$0xff]   ;;  %v17391_v17 = vld [vmem:[#allocation5 + $0x290] sm:$0xff]  }
  0xa7   : > { %893 = vmatmul.mubr.bf16.gmra.mrb[20].mxu0 %v17937_v1  ;;  %v18080_v9 = vsel %vm17844_vm2, 0, %v511_v3  ;;  %v17387_v3 = vld [vmem:[#allocation5 + $0x288] sm:$0xff]  }
  0xa8   : > { %900 = vmatprep.mubr.bf16.mxu0 %v17918_v45 }
  0xa9   : > { %1150 = vmatmul.mubr.bf16.gmra.mrb[20].mxu1 %v17924_v46 }
  0xaa   : > { %1157 = vmatprep.mubr.bf16.mxu1 %v17900_v27 }
  0xaf   : > { %901 = vmatmul.mubr.bf16.gmra.mrb[24].mxu0 %v17952_v15 }
  0xb0   : > { %908 = vmatprep.mubr.bf16.mxu0 %v17940_v2 }
  0xb1   : > { %1158 = vmatmul.mubr.bf16.gmra.mrb[24].mxu1 %v17937_v1 }
  0xb2   : > { %1165 = vmatprep.mubr.bf16.mxu1 %v17918_v45 }
  0xb7   : > { %909 = vmatmul.mubr.bf16.gmra.mrb[28].mxu0 %v17973_v34 }
  0xb8   : > { %916 = vmatprep.mubr.bf16.mxu0 %v17947_v10 }
  0xb9   : > { %1166 = vmatmul.mubr.bf16.gmra.mrb[28].mxu1 %v17952_v15 }
  0xba   : > { %1173 = vmatprep.mubr.bf16.mxu1 %v17940_v2 }
  0xbf   : > { %917 = vmatmul.mubr.bf16.gmra.mrb[32].mxu0 %v17986_v42 }
  0xc0   : > { %924 = vmatprep.mubr.bf16.mxu0 %v17968_v33 }
  0xc1   : > { %1174 = vmatmul.mubr.bf16.gmra.mrb[32].mxu1 %v17973_v34 }
  0xc2   : > { %1181 = vmatprep.mubr.bf16.mxu1 %v17947_v10 }
  0xc7   : > { %925 = vmatmul.mubr.bf16.gmra.mrb[36].mxu0 %v18002_v60 }
  0xc8   : > { %932 = vmatprep.mubr.bf16.mxu0 %v17976_v35 }
  0xc9   : > { %1182 = vmatmul.mubr.bf16.gmra.mrb[36].mxu1 %v17986_v42 }
  0xca   : > { %1189 = vmatprep.mubr.bf16.mxu1 %v17968_v33 }
  0xcf   : > { %933 = vmatmul.mubr.bf16.gmra.mrb[40].mxu0 %v18010_v0 }
  0xd0   : > { %940 = vmatprep.mubr.bf16.mxu0 %v17997_v59 }
  0xd1   : > { %1190 = vmatmul.mubr.bf16.gmra.mrb[40].mxu1 %v18002_v60 }
  0xd2   : > { %1197 = vmatprep.mubr.bf16.mxu1 %v17976_v35 }
  0xd7   : > { %941 = vmatmul.mubr.bf16.gmra.mrb[44].mxu0 %v18033_v23 }
  0xd8   : > { %948 = vmatprep.mubr.bf16.mxu0 %v18005_v61 }
  0xd9   : > { %1198 = vmatmul.mubr.bf16.gmra.mrb[44].mxu1 %v18010_v0 }
  0xda   : > { %1205 = vmatprep.mubr.bf16.mxu1 %v17997_v59 }
  0xdf   : > { %949 = vmatmul.mubr.bf16.gmra.mrb[48].mxu0 %v18043_v37 }
  0xe0   : > { %956 = vmatprep.mubr.bf16.mxu0 %v18027_v22 }
  0xe1   : > { %1206 = vmatmul.mubr.bf16.gmra.mrb[48].mxu1 %v18033_v23 }
  0xe2   : > { %1213 = vmatprep.mubr.bf16.mxu1 %v18005_v61 }
  0xe7   : > { %957 = vmatmul.mubr.bf16.gmra.mrb[52].mxu0 %v18063_v53 }
  0xe8   : > { %964 = vmatprep.mubr.bf16.mxu0 %v18048_v39 }
  0xe9   : > { %1214 = vmatmul.mubr.bf16.gmra.mrb[52].mxu1 %v18043_v37 }
  0xea   : > { %1221 = vmatprep.mubr.bf16.mxu1 %v18027_v22 }
  0xef   : > { %965 = vmatmul.mubr.bf16.gmra.mrb[56].mxu0 %v18080_v9 }
  0xf0   : > { %972 = vmatprep.mubr.bf16.mxu0 %v18069_v63 }
  0xf1   : > { %1222 = vmatmul.mubr.bf16.gmra.mrb[56].mxu1 %v18063_v53 }
  0xf2   : > { %1229 = vmatprep.mubr.bf16.mxu1 %v18048_v39 }
  0xf7   : > { %973 = vmatmul.mubr.bf16.gmra.mrb[60].mxu0 %v18097_v20 }
  0xf8   : > { %3326 = vmatprep.mubr.bf16.mxu0 %v18102_v24 }
  0xf9   : > { %1230 = vmatmul.mubr.bf16.gmra.mrb[60].mxu1 %v18080_v9 }
  0xfa   : > { %3583 = vmatprep.mubr.bf16.mxu1 %v622_v29  ;;  %v17393_v29 = vld [vmem:[#allocation5 + $0x2d8] sm:$0xff]  }
  0xff   : > { %3327 = vmatmul.mubr.bf16.vlgmr.msra.gmra.mrb[64].mxu0 %v17833_v32  ;;  %v17390_v32 = vld [vmem:[#allocation5 + $0x250] sm:$0xff]  }
 0x100   : > { %16775 = vmatpush3.bf16.msra.mxu0 %v17383_v38  ;;  %3334 = vmatprep.mubr.bf16.mxu0 %v18113_v44  ;;  %v17394_v38 = vld [vmem:[#allocation5 + $0x258] sm:$0xff]  }
 0x101   : > { %16776 = vmatprep.subr.bf16.mxu0 %v17385_v48  ;;  %3584 = vmatmul.mubr.bf16.vlgmr.msra.gmra.mrb[64].mxu1 %v17840_v40  ;;  %v17392_v40 = vld [vmem:[#allocation5 + $0x210] sm:$0xff]   ;;  %v17395_v48 = vld [vmem:[#allocation5 + $0x298] sm:$0xff]  }
 0x102   : > { %16887 = vmatpush3.bf16.msra.mxu1 %v17384_v50  ;;  %3591 = vmatprep.mubr.bf16.mxu1 %v18102_v24  ;;  %v18127_v50 = vld [vmem:[%s17822_s8] sm:$0xff]  }
 0x103   : > { %16888 = vmatprep.subr.bf16.mxu1 %v17386_v57  ;;  %v17396_v57 = vld [vmem:[#allocation5 + $0x218] sm:$0xff]  }
 0x104   : > { %16777 = vmatpush3.bf16.msra.mxu0 %v17387_v3  ;;  %v17398_v3 = vld [vmem:[#allocation5 + $0x260] sm:$0xff]  }
 0x105   : > { %16778 = vmatprep.subr.bf16.mxu0 %v17389_v7  ;;  %v17399_v7 = vld [vmem:[#allocation5 + $0x2a0] sm:$0xff]  }
 0x106   : > { %16889 = vmatpush3.bf16.msra.mxu1 %v17388_v11  ;;  %v17401_v11 = vld [vmem:[#allocation5 + $0x2e8] sm:$0xff]  }
 0x107   : > { %3335 = vmatmul.mubr.bf16.gmra.mrb[68].mxu0 %v17852_v49  ;;  %16890 = vmatprep.subr.bf16.mxu1 %v17390_v32  ;;  %v18134_v49 = vsel %vm18089_vm5, %v17928_v56, 0  ;;  %v17400_v32 = vld [vmem:[#allocation5 + $0x220] sm:$0xff]   ;;  %v17405_v56 = vld [vmem:[#allocation5 + $0x2f0] sm:$0xff]  }
 0x108   : > { %3342 = vmatprep.mubr.bf16.mxu0 %v18122_v13  ;;  %16779 = vmatpush3.bf16.msra.mxu0 %v17391_v17  ;;  %24922 = vst [vmem:[#allocation14_spill] sm:$0xff] %v18134_v49  ;;  %v17402_v17 = vld [vmem:[#allocation5 + $0x268] sm:$0xff]  }
 0x109   : > { %16780 = vmatprep.subr.bf16.mxu0 %v17393_v29  ;;  %3592 = vmatmul.mubr.bf16.gmra.mrb[68].mxu1 %v18127_v50  ;;  %v17403_v29 = vld [vmem:[#allocation5 + $0x2a8] sm:$0xff]  }
 0x10a   : > { %3599 = vmatprep.mubr.bf16.mxu1 %v18113_v44  ;;  %16891 = vmatpush3.bf16.msra.mxu1 %v17392_v40  ;;  %v18139_v40 = vld [vmem:[%s17822_s8 + $0x8] sm:$0xff]  }
 0x10b   : > { %16892 = vmatprep.subr.bf16.mxu1 %v17394_v38  ;;  %v17404_v38 = vld [vmem:[#allocation5 + $0x228] sm:$0xff]  }
 0x10c   : > { %16781 = vmatpush3.bf16.msra.mxu0 %v17395_v48  ;;  %v17406_v48 = vld [vmem:[#allocation5 + $0x270] sm:$0xff]  }
 0x10d   : > { %16782 = vmatprep.subr.bf16.mxu0 %v17397_v28  ;;  %v17407_v28 = vld [vmem:[#allocation5 + $0x2b0] sm:$0xff]  }
 0x10e   : > { %16893 = vmatpush3.bf16.msra.mxu1 %v17396_v57  ;;  %v17409_v57 = vld [vmem:[#allocation5 + $0x2f8] sm:$0xff]  }
 0x10f   : > { %3343 = vmatmul.mubr.bf16.gmra.mrb[72].mxu0 %v17863_v55  ;;  %16894 = vmatprep.subr.bf16.mxu1 %v17398_v3  ;;  %v18146_v55 = vsel %vm18089_vm5, %v17932_v62, 0  ;;  %v17408_v3 = vld [vmem:[#allocation5 + $0x230] sm:$0xff]   ;;  %v17413_v62 = vld [vmem:[#allocation5 + $0x3c0] sm:$0xff]  }
 0x110   : > { %3350 = vmatprep.mubr.bf16.mxu0 %v18134_v49  ;;  %16783 = vmatpush3.bf16.msra.mxu0 %v17399_v7  ;;  %24923 = vst [vmem:[#allocation15_spill] sm:$0xff] %v18146_v55  ;;  %v17410_v7 = vld [vmem:[#allocation5 + $0x278] sm:$0xff]  }
 0x111   : > { %16784 = vmatprep.subr.bf16.mxu0 %v17401_v11  ;;  %3600 = vmatmul.mubr.bf16.gmra.mrb[72].mxu1 %v18139_v40  ;;  %v17411_v11 = vld [vmem:[#allocation5 + $0x2b8] sm:$0xff]  }
 0x112   : > { %3607 = vmatprep.mubr.bf16.mxu1 %v18122_v13  ;;  %16895 = vmatpush3.bf16.msra.mxu1 %v17400_v32  ;;  %v18151_v32 = vld [vmem:[%s17822_s8 + $0x10] sm:$0xff]  }
 0x113   : > { %16896 = vmatprep.subr.bf16.mxu1 %v17402_v17  ;;  %v17412_v17 = vld [vmem:[#allocation5 + $0x238] sm:$0xff]  }
 0x114   : > { %16785 = vmatpush3.bf16.msra.mxu0 %v17403_v29  ;;  %v17414_v29 = vld [vmem:[#allocation5 + $0x340] sm:$0xff]  }
 0x115   : > { %16786 = vmatprep.subr.bf16.mxu0 %v17405_v56  ;;  %v18163_v56 = vld [vmem:[%s17822_s8 + $0x18] sm:$0xff]  }
 0x116   : > { %16897 = vmatpush3.bf16.msra.mxu1 %v17404_v38  ;;  %v18179_v38 = vsel %vm18089_vm5, %v17982_v41, 0  ;;  %v17635_v41 = vmov 1966171168  }
 0x117   : > { %3351 = vmatmul.mubr.bf16.gmra.mrb[76].mxu0 %v17877_v6  ;;  %16898 = vmatprep.subr.bf16.mxu1 %v17406_v48  ;;  %v18158_v6 = vsel %vm18089_vm5, %v17958_v21, 0  ;;  %v18170_v21 = vsel %vm18089_vm5, %v17961_v25, 0  ;;  %24926 = vst [vmem:[#allocation18_spill] sm:$0xff] %v18179_v38  ;;  %v18188_v25 = vsel %vm18089_vm5, %v17992_v54, 0  ;;  %v1310_v54 = vunpack.c.l.s4 %v17635_v41 }
 0x118   : > { %3358 = vmatprep.mubr.bf16.mxu0 %v18146_v55  ;;  %16787 = vmatpush3.bf16.msra.mxu0 %v17407_v28  ;;  %24924 = vst [vmem:[#allocation16_spill] sm:$0xff] %v18158_v6  ;;  %24925 = vst [vmem:[#allocation17_spill] sm:$0xff] %v18170_v21 }
 0x119   : > { %16788 = vmatprep.subr.bf16.mxu0 %v17409_v57  ;;  %3608 = vmatmul.mubr.bf16.gmra.mrb[76].mxu1 %v18151_v32  ;;  %24927 = vst [vmem:[#allocation19_spill] sm:$0xff] %v18188_v25  ;;  %v593_v57 = vrot.slane %v502_v30, 1 }
 0x11a   : > { %3615 = vmatprep.mubr.bf16.mxu1 %v18134_v49  ;;  %16899 = vmatpush3.bf16.msra.mxu1 %v17408_v3 }
 0x11b   : > { %16900 = vmatprep.subr.bf16.mxu1 %v17410_v7  ;;  %v1311_v7 = vunpack.c.0.s8 %v1310_v54  ;;  %v594_v30 = vor.u32 %v593_v57, %v499_v26  ;;  %v597_v26 = vrot.slane %v516_v12, 1  ;;  %v24933_v12 = vshrl.u32 %v18048_v39, 16 }
 0x11c   : > { %16789 = vmatpush3.bf16.msra.mxu0 %v17411_v11 }
 0x11d   : > { %16998 = vmatprep.subr.bf16.mxu0 %v17413_v62  ;;  %v18251_v57 = vsel %vm18089_vm5, %v594_v30, 0 }
 0x11e   : > { %16901 = vmatpush3.bf16.msra.mxu1 %v17412_v17  ;;  %24932 = vst [vmem:[#allocation24_spill] sm:$0xff] %v18251_v57 }
 0x11f   : > { %3359 = vmatmul.mubr.bf16.gmra.mrb[80].mxu0 %v17893_v18  ;;  %17110 = vmatprep.subr.bf16.mxu1 %v17414_v29 }
 0x120   : > { %3366 = vmatprep.mubr.bf16.mxu0 %v18158_v6 }
 0x121   : > { %3616 = vmatmul.mubr.bf16.gmra.mrb[80].mxu1 %v18163_v56 }
 0x122   : > { %3623 = vmatprep.mubr.bf16.mxu1 %v18146_v55 }
 0x127   : > { %3367 = vmatmul.mubr.bf16.gmra.mrb[84].mxu0 %v17900_v27 }
 0x128   : > { %3374 = vmatprep.mubr.bf16.mxu0 %v18170_v21 }
 0x129   : > { %3624 = vmatmul.mubr.bf16.gmra.mrb[84].mxu1 %v17893_v18  ;;  %v18197_v18 = vsel %vm18089_vm5, %v18013_v4, 0  ;;  %v1312_v4 = vlaneseq }
 0x12a   : > { %3631 = vmatprep.mubr.bf16.mxu1 %v18158_v6  ;;  %24928 = vst [vmem:[#allocation20_spill] sm:$0xff] %v18197_v18 }
 0x12b   : > { %v18228_v11 = vshrl.u32 %v1312_v4, 7 }
 0x12d   : > { %v18240_v54 = vsub.s32 %v1311_v7, %v18228_v11 }
 0x12f   : > { %3375 = vmatmul.mubr.bf16.gmra.mrb[88].mxu0 %v17918_v45 }
 0x130   : > { %3382 = vmatprep.mubr.bf16.mxu0 %v18179_v38 }
 0x131   : > { %3632 = vmatmul.mubr.bf16.gmra.mrb[88].mxu1 %v17900_v27  ;;  %v18206_v27 = vsel %vm18089_vm5, %v18021_v14, 0 }
 0x132   : > { %3639 = vmatprep.mubr.bf16.mxu1 %v18170_v21  ;;  %24929 = vst [vmem:[#allocation21_spill] sm:$0xff] %v18206_v27 }
 0x137   : > { %3383 = vmatmul.mubr.bf16.gmra.mrb[92].mxu0 %v17940_v2 }
 0x138   : > { %3390 = vmatprep.mubr.bf16.mxu0 %v18188_v25 }
 0x139   : > { %3640 = vmatmul.mubr.bf16.gmra.mrb[92].mxu1 %v17918_v45  ;;  %v18215_v45 = vsel %vm18089_vm5, %v18039_v36, 0  ;;  %v18224_v36 = vsel %vm18089_vm5, %v18057_v52, 0  ;;  %v18235_v52 = vld [vmem:[%s24375_s2] ss:$0 sm:$0xff] }
 0x13a   : > { %3647 = vmatprep.mubr.bf16.mxu1 %v18179_v38  ;;  %24930 = vst [vmem:[#allocation22_spill] sm:$0xff] %v18215_v45  ;;  %24931 = vst [vmem:[#allocation23_spill] sm:$0xff] %v18224_v36 }
 0x13f   : > { %3391 = vmatmul.mubr.bf16.gmra.mrb[96].mxu0 %v17947_v10 }
 0x140   : > { %3398 = vmatprep.mubr.bf16.mxu0 %v18197_v18 }
 0x141   : > { %3648 = vmatmul.mubr.bf16.gmra.mrb[96].mxu1 %v17940_v2 }
 0x142   : > { %3655 = vmatprep.mubr.bf16.mxu1 %v18188_v25 }
 0x147   : > { %3399 = vmatmul.mubr.bf16.gmra.mrb[100].mxu0 %v17968_v33 }
 0x148   : > { %3406 = vmatprep.mubr.bf16.mxu0 %v18206_v27 }
 0x149   : > { %3656 = vmatmul.mubr.bf16.gmra.mrb[100].mxu1 %v17947_v10 }
 0x14a   : > { %3663 = vmatprep.mubr.bf16.mxu1 %v18197_v18 }
 0x14f   : > { %3407 = vmatmul.mubr.bf16.gmra.mrb[104].mxu0 %v17976_v35 }
 0x150   : > { %3414 = vmatprep.mubr.bf16.mxu0 %v18215_v45 }
 0x151   : > { %3664 = vmatmul.mubr.bf16.gmra.mrb[104].mxu1 %v17968_v33 }
 0x152   : > { %v16342_v2 = vpop.f32.mrb[0].mxu0  ;;  %3671 = vmatprep.mubr.bf16.mxu1 %v18206_v27 }
 0x153   : > { %v16343_v14 = vpop.f32.mrb[1].mxu0 }
 0x154   : > { %v16344_v48 = vadd.f32 %v16343_v14, %v16342_v2  ;;  %v16345_v10 = vpop.f32.mrb[2].mxu0  ;;  %v16454_v3 = vpop.f32.mrb[0].mxu1 }
 0x155   : > { %v16346_v28 = vpop.f32.mrb[3].mxu0  ;;  %v16455_v33 = vpop.f32.mrb[1].mxu1 }
 0x156   : > { %v16347_v62 = vadd.f32 %v16346_v28, %v16345_v10  ;;  %v16456_v17 = vadd.f32 %v16455_v33, %v16454_v3  ;;  %v16457_v29 = vpop.f32.mrb[2].mxu1  ;;  %v595_v28 = vrot.slane %v509_v58, 1 }
 0x157   : > { %3415 = vmatmul.mubr.bf16.gmra.mrb[108].mxu0 %v17997_v59  ;;  %v16458_v2 = vpop.f32.mrb[3].mxu1 }
 0x158   : > { %3422 = vmatprep.mubr.bf16.mxu0 %v18224_v36  ;;  %v1112_v41 = vadd.f32 %v16456_v17, %v16344_v48  ;;  %v16459_v4 = vadd.f32 %v16458_v2, %v16457_v29  ;;  %v596_v30 = vor.u32 %v595_v28, %v24933_v12 }
 0x159   : > { %3672 = vmatmul.mubr.bf16.gmra.mrb[108].mxu1 %v17976_v35 }
 0x15a   : > { %v16348_v14 = vpop.f32.mrb[4].mxu0  ;;  %v1244_v3 = vadd.f32 %v18235_v52, %v1112_v41  ;;  %v1115_v33 = vadd.f32 %v16459_v4, %v16347_v62  ;;  %3679 = vmatprep.mubr.bf16.mxu1 %v18215_v45 }
 0x15b   : > { %v16349_v10 = vpop.f32.mrb[5].mxu0 }
 0x15c   : > { %v16350_v8 = vadd.f32 %v16349_v10, %v16348_v14  ;;  %v16351_v47 = vpop.f32.mrb[6].mxu0  ;;  %v1308_v35 = vcombine.high %v1244_v3, %v1244_v3  ;;  %v1315_v7 = vrot.slane %v1244_v3, %v18240_v54  ;;  %v1245_v58 = vadd.f32 %v18235_v52, %v1115_v33  ;;  %v16460_v17 = vpop.f32.mrb[4].mxu1 }
 0x15d   : > { %v16352_v48 = vpop.f32.mrb[7].mxu0  ;;  %v16461_v62 = vpop.f32.mrb[5].mxu1  ;;  %v24934_v14 = vshrl.u32 %v18069_v63, 16 }
 0x15e   : > { %v16353_v29 = vadd.f32 %v16352_v48, %v16351_v47  ;;  %v1322_v2 = vrot.slane %v1308_v35, %v18240_v54  ;;  %v1357_v41 = vcombine.high %v1245_v58, %v1245_v58  ;;  %v16463_v4 = vpop.f32.mrb[6].mxu1  ;;  %v1323_v3 = vcombine.high %v1315_v7, %v1315_v7 }
 0x15f   : > { %3423 = vmatmul.mubr.bf16.gmra.mrb[112].mxu0 %v18005_v61  ;;  %v598_v10 = vor.u32 %v597_v26, %v24934_v14  ;;  %v1364_v33 = vrot.slane %v1245_v58, %v18240_v54  ;;  %v16462_v43 = vadd.f32 %v16461_v62, %v16460_v17  ;;  %v16464_v47 = vpop.f32.mrb[7].mxu1  ;;  %v18264_v27 = vrot.slane %v1315_v7, %v18240_v54 }
 0x160   : > { %3430 = vmatprep.mubr.bf16.mxu0 %v18251_v57  ;;  %v1324_v48 = vcombine.high %v1322_v2, %v1322_v2  ;;  %v18267_v35 = vrot.slane %v1322_v2, %v18240_v54  ;;  %v1371_v18 = vrot.slane %v1357_v41, %v18240_v54  ;;  %v16465_v26 = vadd.f32 %v16464_v47, %v16463_v4 }
 0x161   : > { %v1120_v25 = vadd.f32 %v16462_v43, %v16350_v8  ;;  %3680 = vmatmul.mubr.bf16.gmra.mrb[112].mxu1 %v17997_v59  ;;  %v18274_v58 = vsel %vm18089_vm5, %v596_v30, 0  ;;  %v18278_v7 = vsel %vm18089_vm5, %v598_v10, 0  ;;  %v18281_v17 = vrot.slane %v1323_v3, %v18240_v54 }
 0x162   : > { %v16354_v45 = vpop.f32.mrb[8].mxu0  ;;  %3687 = vmatprep.mubr.bf16.mxu1 %v18224_v36  ;;  %24935 = vst [vmem:[#allocation25_spill] sm:$0xff] %v18274_v58  ;;  %24936 = vst [vmem:[#allocation26_spill] sm:$0xff] %v18278_v7  ;;  %v18284_v43 = vrot.slane %v1324_v48, %v18240_v54  ;;  %v1372_v59 = vcombine.high %v1364_v33, %v1364_v33  ;;  %v18287_v8 = vrot.slane %v1364_v33, %v18240_v54 }
 0x163   : > { %v16355_v28 = vpop.f32.mrb[9].mxu0  ;;  %v1373_v2 = vcombine.high %v1371_v18, %v1371_v18  ;;  %v1246_v41 = vadd.f32 %v18235_v52, %v1120_v25  ;;  %v1123_v4 = vadd.f32 %v16465_v26, %v16353_v29  ;;  %v18295_v47 = vrot.slane %v1371_v18, %v18240_v54 }
 0x164   : > { %v16357_v12 = vpop.f32.mrb[10].mxu0  ;;  %v16466_v30 = vpop.f32.mrb[8].mxu1  ;;  %v16356_v14 = vadd.f32 %v16355_v28, %v16354_v45  ;;  %v18306_v26 = vrot.slane %v1372_v59, %v18240_v54 }
 0x165   : > { %v16358_v62 = vpop.f32.mrb[11].mxu0  ;;  %v16467_v48 = vpop.f32.mrb[9].mxu1  ;;  %v1406_v33 = vcombine.high %v1246_v41, %v1246_v41  ;;  %v1413_v36 = vrot.slane %v1246_v41, %v18240_v54  ;;  %v1247_v25 = vadd.f32 %v18235_v52, %v1123_v4  ;;  %v18311_v41 = vrot.slane %v1373_v2, %v18240_v54 }
 0x166   : > { %v16359_v19 = vadd.f32 %v16358_v62, %v16357_v12  ;;  %v16468_v29 = vadd.f32 %v16467_v48, %v16466_v30  ;;  %v16469_v45 = vpop.f32.mrb[10].mxu1 }
 0x167   : > { %3431 = vmatmul.mubr.bf16.gmra.mrb[116].mxu0 %v18027_v22  ;;  %v16470_v62 = vpop.f32.mrb[11].mxu1  ;;  %v1420_v4 = vrot.slane %v1406_v33, %v18240_v54  ;;  %v1421_v30 = vcombine.high %v1413_v36, %v1413_v36  ;;  %v1455_v48 = vcombine.high %v1247_v25, %v1247_v25  ;;  %v18315_v28 = vrot.slane %v1413_v36, %v18240_v54 }
 0x168   : > { %3438 = vmatprep.mubr.bf16.mxu0 %v18274_v58  ;;  %v1462_v18 = vrot.slane %v1247_v25, %v18240_v54  ;;  %v1128_v10 = vadd.f32 %v16468_v29, %v16356_v14  ;;  %v16471_v59 = vadd.f32 %v16470_v62, %v16469_v45 }
 0x169   : > { %3688 = vmatmul.mubr.bf16.gmra.mrb[116].mxu1 %v18005_v61  ;;  %v1422_v2 = vcombine.high %v1420_v4, %v1420_v4  ;;  %v18322_v21 = vrot.slane %v1420_v4, %v18240_v54  ;;  %v18325_v33 = vrot.slane %v1421_v30, %v18240_v54  ;;  %v1469_v36 = vrot.slane %v1455_v48, %v18240_v54 }
 0x16a   : > { %v16360_v3 = vpop.f32.mrb[12].mxu0  ;;  %3695 = vmatprep.mubr.bf16.mxu1 %v18251_v57  ;;  %v1470_v14 = vcombine.high %v1462_v18, %v1462_v18  ;;  %v18330_v25 = vrot.slane %v1462_v18, %v18240_v54  ;;  %v1248_v61 = vadd.f32 %v18235_v52, %v1128_v10  ;;  %v1131_v30 = vadd.f32 %v16471_v59, %v16359_v19 }
 0x16b   : > { %v16361_v38 = vpop.f32.mrb[13].mxu0  ;;  %24937 = vst [vmem:[#allocation27_spill] sm:$0xff] %v18322_v21  ;;  %24938 = vst [vmem:[#allocation28_spill] sm:$0xff] %v18325_v33  ;;  %v18338_v4 = vrot.slane %v1422_v2, %v18240_v54  ;;  %v1471_v57 = vcombine.high %v1469_v36, %v1469_v36  ;;  %v18348_v62 = vrot.slane %v1469_v36, %v18240_v54 }
 0x16c   : > { %v16363_v6 = vpop.f32.mrb[14].mxu0  ;;  %24939 = vst [vmem:[#allocation29_spill] sm:$0xff] %v18330_v25  ;;  %v16472_v12 = vpop.f32.mrb[12].mxu1  ;;  %v1504_v2 = vcombine.high %v1248_v61, %v1248_v61  ;;  %v1511_v19 = vrot.slane %v1248_v61, %v18240_v54  ;;  %v1249_v59 = vadd.f32 %v18235_v52, %v1131_v30  ;;  %v18356_v10 = vrot.slane %v1470_v14, %v18240_v54 }
 0x16d   : > { %v16364_v29 = vpop.f32.mrb[15].mxu0  ;;  %24940 = vst [vmem:[#allocation30_spill] sm:$0xff] %v18338_v4  ;;  %v16473_v55 = vpop.f32.mrb[13].mxu1  ;;  %v16362_v49 = vadd.f32 %v16361_v38, %v16360_v3  ;;  %v18361_v13 = vrot.slane %v1471_v57, %v18240_v54 }
 0x16e   : > { %v16475_v45 = vpop.f32.mrb[14].mxu1  ;;  %v1518_v61 = vrot.slane %v1504_v2, %v18240_v54  ;;  %v1519_v30 = vcombine.high %v1511_v19, %v1511_v19  ;;  %v1553_v21 = vcombine.high %v1249_v59, %v1249_v59  ;;  %v1560_v18 = vrot.slane %v1249_v59, %v18240_v54 }
 0x16f   : > { %3439 = vmatmul.mubr.bf16.gmra.mrb[120].mxu0 %v18048_v39  ;;  %v16476_v36 = vpop.f32.mrb[15].mxu1  ;;  %v16474_v14 = vadd.f32 %v16473_v55, %v16472_v12  ;;  %v16365_v4 = vadd.f32 %v16364_v29, %v16363_v6 }
 0x170   : > { %3446 = vmatprep.mubr.bf16.mxu0 %v18278_v7  ;;  %v18365_v7 = vrot.slane %v1511_v19, %v18240_v54  ;;  %v1520_v57 = vcombine.high %v1518_v61, %v1518_v61  ;;  %v18372_v3 = vrot.slane %v1518_v61, %v18240_v54  ;;  %v18375_v2 = vrot.slane %v1519_v30, %v18240_v54 }
 0x171   : > { %3696 = vmatmul.mubr.bf16.gmra.mrb[120].mxu1 %v18027_v22  ;;  %v1567_v19 = vrot.slane %v1553_v21, %v18240_v54  ;;  %v1568_v55 = vcombine.high %v1560_v18, %v1560_v18  ;;  %v18380_v6 = vrot.slane %v1560_v18, %v18240_v54  ;;  %v1136_v22 = vadd.f32 %v16474_v14, %v16362_v49 }
 0x172   : > { %v16366_v33 = vpop.f32.mrb[16].mxu0  ;;  %24941 = vst [vmem:[#allocation31_spill] sm:$0xff] %v18365_v7  ;;  %24942 = vst [vmem:[#allocation32_spill] sm:$0xff] %v18372_v3  ;;  %3703 = vmatprep.mubr.bf16.mxu1 %v18274_v58  ;;  %v18387_v61 = vrot.slane %v1520_v57, %v18240_v54  ;;  %v16477_v30 = vadd.f32 %v16476_v36, %v16475_v45 }
 0x173   : > { %v16367_v48 = vpop.f32.mrb[17].mxu0  ;;  %24943 = vst [vmem:[#allocation33_spill] sm:$0xff] %v18375_v2  ;;  %24944 = vst [vmem:[#allocation34_spill] sm:$0xff] %v18380_v6  ;;  %v1569_v58 = vcombine.high %v1567_v19, %v1567_v19  ;;  %v18394_v49 = vrot.slane %v1567_v19, %v18240_v54  ;;  %v1250_v57 = vadd.f32 %v18235_v52, %v1136_v22 }
 0x174   : > { %v16369_v25 = vpop.f32.mrb[18].mxu0  ;;  %24945 = vst [vmem:[#allocation35_spill] sm:$0xff] %v18387_v61  ;;  %v16478_v38 = vpop.f32.mrb[16].mxu1  ;;  %v1139_v45 = vadd.f32 %v16477_v30, %v16365_v4  ;;  %v16368_v36 = vadd.f32 %v16367_v48, %v16366_v33  ;;  %v18404_v21 = vrot.slane %v1568_v55, %v18240_v54 }
 0x175   : > { %v16370_v12 = vpop.f32.mrb[19].mxu0  ;;  %24946 = vst [vmem:[#allocation36_spill] sm:$0xff] %v18394_v49  ;;  %v16479_v14 = vpop.f32.mrb[17].mxu1  ;;  %v1602_v7 = vcombine.high %v1250_v57, %v1250_v57  ;;  %v1609_v59 = vrot.slane %v1250_v57, %v18240_v54  ;;  %v18411_v22 = vrot.slane %v1569_v58, %v18240_v54  ;;  %v17415_v58 = vld [vmem:[#allocation5 + $0x380] sm:$0xff]   ;;  %v17417_v49 = vld [vmem:[#allocation5 + $0x3c8] sm:$0xff]  }
 0x176   : > { %v16481_v29 = vpop.f32.mrb[18].mxu1  ;;  %24947 = vst [vmem:[#allocation37_spill] sm:$0xff] %v18404_v21  ;;  %v1251_v4 = vadd.f32 %v18235_v52, %v1139_v45  ;;  %v16371_v33 = vadd.f32 %v16370_v12, %v16369_v25 }
 0x177   : > { %3447 = vmatmul.mubr.bf16.gmra.mrb[124].mxu0 %v18069_v63  ;;  %v16480_v63 = vadd.f32 %v16479_v14, %v16478_v38  ;;  %v16482_v3 = vpop.f32.mrb[19].mxu1  ;;  %24948 = vst [vmem:[#allocation38_spill] sm:$0xff] %v18411_v22  ;;  %v1616_v38 = vrot.slane %v1602_v7, %v18240_v54  ;;  %v1617_v14 = vcombine.high %v1609_v59, %v1609_v59  ;;  %v17416_v7 = vld [vmem:[#allocation5 + $0x300] sm:$0xff]  }
 0x178   : > { %7075 = vmatprep.mubr.bf16.mxu0 %v18139_v40  ;;  %v16483_v18 = vadd.f32 %v16482_v3, %v16481_v29  ;;  %v18418_v57 = vrot.slane %v1609_v59, %v18240_v54  ;;  %v1651_v45 = vcombine.high %v1251_v4, %v1251_v4  ;;  %v1658_v12 = vrot.slane %v1251_v4, %v18240_v54 }
 0x179   : > { %v1144_v55 = vadd.f32 %v16480_v63, %v16368_v36  ;;  %3704 = vmatmul.mubr.bf16.gmra.mrb[124].mxu1 %v18048_v39  ;;  %v1618_v29 = vcombine.high %v1616_v38, %v1616_v38  ;;  %v18428_v59 = vrot.slane %v1616_v38, %v18240_v54  ;;  %v18431_v63 = vrot.slane %v1617_v14, %v18240_v54 }
 0x17a   : > { %v16372_v48 = vpop.f32.mrb[20].mxu0  ;;  %24949 = vst [vmem:[#allocation39_spill] sm:$0xff] %v18418_v57  ;;  %7332 = vmatprep.mubr.bf16.mxu1 %v18127_v50  ;;  %v1147_v36 = vadd.f32 %v16483_v18, %v16371_v33  ;;  %v1665_v4 = vrot.slane %v1651_v45, %v18240_v54  ;;  %v1666_v6 = vcombine.high %v1658_v12, %v1658_v12 }
 0x17b   : > { %v16373_v19 = vpop.f32.mrb[21].mxu0  ;;  %v1252_v30 = vadd.f32 %v18235_v52, %v1144_v55  ;;  %24950 = vst [vmem:[#allocation40_spill] sm:$0xff] %v18428_v59  ;;  %24951 = vst [vmem:[#allocation41_spill] sm:$0xff] %v18431_v63  ;;  %v18435_v18 = vrot.slane %v1658_v12, %v18240_v54  ;;  %v18441_v55 = vrot.slane %v1618_v29, %v18240_v54  ;;  %v17418_v59 = vld [vmem:[#allocation5 + $0x348] sm:$0xff]  }
 0x17c   : > { %v16375_v25 = vpop.f32.mrb[22].mxu0  ;;  %v18423_v3 = vadd.f32 %v16373_v19, %v16372_v48  ;;  %v16484_v50 = vpop.f32.mrb[20].mxu1  ;;  %v1667_v21 = vcombine.high %v1665_v4, %v1665_v4  ;;  %v18449_v61 = vrot.slane %v1665_v4, %v18240_v54  ;;  %v18452_v48 = vrot.slane %v1666_v6, %v18240_v54 }
 0x17d   : > { %v16376_v39 = vpop.f32.mrb[23].mxu0  ;;  %24952 = vst [vmem:[#allocation42_spill] sm:$0xff] %v18435_v18  ;;  %v1700_v19 = vcombine.high %v1252_v30, %v1252_v30  ;;  %v16485_v33 = vpop.f32.mrb[21].mxu1  ;;  %24953 = vst [vmem:[#allocation43_spill] sm:$0xff] %v18441_v55  ;;  %v1707_v14 = vrot.slane %v1252_v30, %v18240_v54  ;;  %v1253_v38 = vadd.f32 %v18235_v52, %v1147_v36 }
 0x17e   : > { %v16487_v45 = vpop.f32.mrb[22].mxu1  ;;  %24954 = vst [vmem:[#allocation44_spill] sm:$0xff] %v18449_v61  ;;  %24955 = vst [vmem:[#allocation45_spill] sm:$0xff] %v18452_v48  ;;  %v18464_v6 = vrot.slane %v1667_v21, %v18240_v54  ;;  %v17420_v48 = vld [vmem:[#allocation5 + $0x308] sm:$0xff]  }
 0x17f   : > { %7076 = vmatmul.mubr.bf16.vlgmr.msra.gmra.mrb[128].mxu0 %v17874_v5  ;;  %v16488_v29 = vpop.f32.mrb[23].mxu1  ;;  %v1714_v30 = vrot.slane %v1700_v19, %v18240_v54  ;;  %v18459_v57 = vrot.slane %v1707_v14, %v18240_v54  ;;  %v1749_v22 = vcombine.high %v1253_v38, %v1253_v38  ;;  %v1756_v36 = vrot.slane %v1253_v38, %v18240_v54 }
 0x180   : > { %16999 = vmatpush3.bf16.msra.mxu0 %v17415_v58  ;;  %7083 = vmatprep.mubr.bf16.mxu0 %v18151_v32  ;;  %v1715_v58 = vcombine.high %v1707_v14, %v1707_v14  ;;  %24957 = vst [vmem:[#allocation47_spill] sm:$0xff] %v18464_v6  ;;  %v17419_v14 = vld [vmem:[#allocation5 + $0x388] sm:$0xff]  }
 0x181   : > { %24956 = vst [vmem:[#allocation46_spill] sm:$0xff] %v18459_v57  ;;  %17000 = vmatprep.subr.bf16.mxu0 %v17417_v49  ;;  %7333 = vmatmul.mubr.bf16.vlgmr.msra.gmra.mrb[128].mxu1 %v17858_v51  ;;  %v1716_v63 = vcombine.high %v1714_v30, %v1714_v30  ;;  %v18475_v4 = vrot.slane %v1714_v30, %v18240_v54  ;;  %v17421_v57 = vld [vmem:[#allocation5 + $0x3d0] sm:$0xff]  }
 0x182   : > { %v16378_v12 = vpop.f32.mrb[24].mxu0  ;;  %17111 = vmatpush3.bf16.msra.mxu1 %v17416_v7  ;;  %v18478_v55 = vrot.slane %v1715_v58, %v18240_v54  ;;  %v16486_v51 = vadd.f32 %v16485_v33, %v16484_v50  ;;  %7340 = vmatprep.mubr.bf16.mxu1 %v18139_v40  ;;  %v16377_v30 = vadd.f32 %v16376_v39, %v16375_v25 }
 0x183   : > { %v16379_v19 = vpop.f32.mrb[25].mxu0  ;;  %24958 = vst [vmem:[#allocation48_spill] sm:$0xff] %v18475_v4  ;;  %v18485_v61 = vrot.slane %v1716_v63, %v18240_v54  ;;  %17112 = vmatprep.subr.bf16.mxu1 %v17418_v59  ;;  %v1763_v38 = vrot.slane %v1749_v22, %v18240_v54  ;;  %v1764_v50 = vcombine.high %v1756_v36, %v1756_v36  ;;  %v17422_v63 = vld [vmem:[#allocation5 + $0x350] sm:$0xff]  }
 0x184   : > { %v16381_v21 = vpop.f32.mrb[26].mxu0  ;;  %24959 = vst [vmem:[#allocation49_spill] sm:$0xff] %v18478_v55  ;;  %v16490_v58 = vpop.f32.mrb[24].mxu1  ;;  %v18491_v33 = vrot.slane %v1756_v36, %v18240_v54  ;;  %v1152_v40 = vadd.f32 %v16486_v51, %v18423_v3  ;;  %v16489_v49 = vadd.f32 %v16488_v29, %v16487_v45  ;;  %v16380_v7 = vadd.f32 %v16379_v19, %v16378_v12 }
 0x185   : > { %v16382_v18 = vpop.f32.mrb[27].mxu0  ;;  %24960 = vst [vmem:[#allocation50_spill] sm:$0xff] %v18485_v61  ;;  %v16491_v2 = vpop.f32.mrb[25].mxu1  ;;  %v1765_v59 = vcombine.high %v1763_v38, %v1763_v38  ;;  %v18501_v36 = vrot.slane %v1763_v38, %v18240_v54  ;;  %v18504_v3 = vrot.slane %v1764_v50, %v18240_v54  ;;  %17001 = vmatpush3.bf16.msra.mxu0 %v17419_v14  ;;  %v18548_v50 = vld [vmem:[%s17822_s8 + $0x20] sm:$0xff]   ;;  %v17427_v61 = vld [vmem:[#allocation5 + $0x398] sm:$0xff]  }
 0x186   : > { %24961 = vst [vmem:[#allocation51_spill] sm:$0xff] %v18491_v33  ;;  %v16492_v25 = vadd.f32 %v16491_v2, %v16490_v58  ;;  %v16493_v39 = vpop.f32.mrb[26].mxu1  ;;  %v1254_v45 = vadd.f32 %v18235_v52, %v1152_v40  ;;  %v1155_v2 = vadd.f32 %v16489_v49, %v16377_v30  ;;  %v16383_v29 = vadd.f32 %v16382_v18, %v16381_v21  ;;  %v17423_v58 = vld [vmem:[#allocation5 + $0x390] sm:$0xff]  }
 0x187   : > { %7084 = vmatmul.mubr.bf16.gmra.mrb[132].mxu0 %v17889_v16  ;;  %24962 = vst [vmem:[#allocation52_spill] sm:$0xff] %v18501_v36  ;;  %24963 = vst [vmem:[#allocation53_spill] sm:$0xff] %v18504_v3  ;;  %v16494_v51 = vpop.f32.mrb[27].mxu1  ;;  %17113 = vmatpush3.bf16.msra.mxu1 %v17420_v48  ;;  %v18510_v38 = vrot.slane %v1765_v59, %v18240_v54  ;;  %v18528_v59 = vsub.s32 0, %v18228_v11 }
 0x188   : > { %7091 = vmatprep.mubr.bf16.mxu0 %v18163_v56  ;;  %v1160_v12 = vadd.f32 %v16492_v25, %v16380_v7  ;;  %v16495_v14 = vadd.f32 %v16494_v51, %v16493_v39  ;;  %v1798_v40 = vcombine.high %v1254_v45, %v1254_v45  ;;  %v1805_v49 = vrot.slane %v1254_v45, %v18240_v54 }
 0x189   : > { %24964 = vst [vmem:[#allocation54_spill] sm:$0xff] %v18510_v38  ;;  %7341 = vmatmul.mubr.bf16.gmra.mrb[132].mxu1 %v17874_v5  ;;  %v1255_v18 = vadd.f32 %v18235_v52, %v1155_v2  ;;  %17002 = vmatprep.subr.bf16.mxu0 %v17421_v57  ;;  %v17424_v5 = vld [vmem:[#allocation5 + $0x310] sm:$0xff]   ;;  %24965 = vst [vmem:[#allocation55_spill] sm:$0xff] %v18528_v59 }
 0x18a   : > { %v16384_v19 = vpop.f32.mrb[28].mxu0  ;;  %v1256_v48 = vadd.f32 %v18235_v52, %v1160_v12  ;;  %7348 = vmatprep.mubr.bf16.mxu1 %v18151_v32  ;;  %v1163_v30 = vadd.f32 %v16495_v14, %v16383_v29  ;;  %17114 = vmatprep.subr.bf16.mxu1 %v17422_v63  ;;  %v1812_v45 = vrot.slane %v1798_v40, %v18240_v54 }
 0x18b   : > { %v16385_v4 = vpop.f32.mrb[29].mxu0  ;;  %v1813_v32 = vcombine.high %v1805_v49, %v1805_v49  ;;  %v1847_v2 = vcombine.high %v1255_v18, %v1255_v18  ;;  %17003 = vmatpush3.bf16.msra.mxu0 %v17423_v58  ;;  %v18534_v29 = vrot.slane %v1805_v49, %v18240_v54  ;;  %v1854_v57 = vrot.slane %v1255_v18, %v18240_v54 }
 0x18c   : > { %v18518_v21 = vpop.f32.mrb[30].mxu0  ;;  %v18523_v25 = vadd.f32 %v16385_v4, %v16384_v19  ;;  %v16496_v12 = vpop.f32.mrb[28].mxu1  ;;  %v17425_v4 = vld [vmem:[#allocation5 + $0x3d8] sm:$0xff]   ;;  %v1896_v63 = vcombine.high %v1256_v48, %v1256_v48  ;;  %v1903_v19 = vrot.slane %v1256_v48, %v18240_v54  ;;  %v1814_v7 = vcombine.high %v1812_v45, %v1812_v45  ;;  %17115 = vmatpush3.bf16.msra.mxu1 %v17424_v5 }
 0x18d   : > { %v18525_v39 = vpop.f32.mrb[31].mxu0  ;;  %24966 = vst [vmem:[#allocation56_spill] sm:$0xff] %v18534_v29  ;;  %v16497_v14 = vpop.f32.mrb[29].mxu1  ;;  %v18542_v51 = vrot.slane %v1812_v45, %v18240_v54  ;;  %v18545_v58 = vrot.slane %v1813_v32, %v18240_v54  ;;  %v1861_v18 = vrot.slane %v1847_v2, %v18240_v54  ;;  %v1862_v48 = vcombine.high %v1854_v57, %v1854_v57  ;;  %v17426_v45 = vld [vmem:[#allocation5 + $0x358] sm:$0xff]  }
 0x18e   : > { %v16499_v49 = vpop.f32.mrb[30].mxu1  ;;  %v18553_v22 = vrot.slane %v1854_v57, %v18240_v54  ;;  %v1910_v40 = vrot.slane %v1896_v63, %v18240_v54  ;;  %v18557_v36 = vrot.slane %v1814_v7, %v18240_v54  ;;  %v1911_v32 = vcombine.high %v1903_v19, %v1903_v19  ;;  %17004 = vmatprep.subr.bf16.mxu0 %v17425_v4 }
 0x18f   : > { %7092 = vmatmul.mubr.bf16.gmra.mrb[136].mxu0 %v17909_v31  ;;  %24967 = vst [vmem:[#allocation57_spill] sm:$0xff] %v18542_v51  ;;  %24968 = vst [vmem:[#allocation58_spill] sm:$0xff] %v18545_v58  ;;  %v16500_v38 = vpop.f32.mrb[31].mxu1  ;;  %v1257_v3 = vadd.f32 %v18235_v52, %v1163_v30  ;;  %v1863_v55 = vcombine.high %v1861_v18, %v1861_v18  ;;  %v18563_v57 = vrot.slane %v1861_v18, %v18240_v54  ;;  %v17428_v51 = vld [vmem:[#allocation5 + $0x318] sm:$0xff]  }
 0x190   : > { %7099 = vmatprep.mubr.bf16.mxu0 %v18548_v50  ;;  %24969 = vst [vmem:[#allocation59_spill] sm:$0xff] %v18553_v22  ;;  %24970 = vst [vmem:[#allocation60_spill] sm:$0xff] %v18557_v36  ;;  %v18566_v63 = vrot.slane %v1862_v48, %v18240_v54  ;;  %v1912_v30 = vcombine.high %v1910_v40, %v1910_v40  ;;  %v18572_v4 = vrot.slane %v1903_v19, %v18240_v54  ;;  %v18607_v22 = vld [vmem:[%s17822_s8 + $0x28] sm:$0xff]  }
 0x191   : > { %24971 = vst [vmem:[#allocation61_spill] sm:$0xff] %v18563_v57  ;;  %7349 = vmatmul.mubr.bf16.gmra.mrb[136].mxu1 %v17889_v16  ;;  %v18575_v6 = vrot.slane %v1910_v40, %v18240_v54  ;;  %v18583_v48 = vrot.slane %v1863_v55, %v18240_v54  ;;  %17116 = vmatprep.subr.bf16.mxu1 %v17426_v45  ;;  %v17429_v55 = vld [vmem:[#allocation5 + $0x3e0] sm:$0xff]  }
 0x192   : > { %v16390_v33 = vpop.f32.mrb[32].mxu0  ;;  %24972 = vst [vmem:[#allocation62_spill] sm:$0xff] %v18566_v63  ;;  %24973 = vst [vmem:[#allocation63_spill] sm:$0xff] %v18572_v4  ;;  %7356 = vmatprep.mubr.bf16.mxu1 %v18163_v56  ;;  %v18592_v18 = vrot.slane %v1911_v32, %v18240_v54  ;;  %v1945_v16 = vcombine.high %v1257_v3, %v1257_v3  ;;  %17005 = vmatpush3.bf16.msra.mxu0 %v17427_v61  ;;  %v17430_v32 = vld [vmem:[#allocation5 + $0x360] sm:$0xff]  }
 0x193   : > { %v16391_v7 = vpop.f32.mrb[33].mxu0  ;;  %24974 = vst [vmem:[#allocation64_spill] sm:$0xff] %v18575_v6  ;;  %24975 = vst [vmem:[#allocation65_spill] sm:$0xff] %v18583_v48  ;;  %v18595_v58 = vrot.slane %v1912_v30, %v18240_v54  ;;  %v1952_v5 = vrot.slane %v1257_v3, %v18240_v54  ;;  %v16498_v40 = vadd.f32 %v16497_v14, %v16496_v12  ;;  %17117 = vmatpush3.bf16.msra.mxu1 %v17428_v51  ;;  %v17431_v6 = vld [vmem:[#allocation5 + $0x3a0] sm:$0xff]  }
 0x194   : > { %v16393_v2 = vpop.f32.mrb[34].mxu0  ;;  %24976 = vst [vmem:[#allocation66_spill] sm:$0xff] %v18592_v18  ;;  %v16502_v36 = vpop.f32.mrb[32].mxu1  ;;  %v1959_v56 = vrot.slane %v1945_v16, %v18240_v54  ;;  %v16389_v61 = vadd.f32 %v18525_v39, %v18518_v21  ;;  %v16501_v63 = vadd.f32 %v16500_v38, %v16499_v49  ;;  %v16392_v14 = vadd.f32 %v16391_v7, %v16390_v33 }
 0x195   : > { %v16394_v19 = vpop.f32.mrb[35].mxu0  ;;  %24977 = vst [vmem:[#allocation67_spill] sm:$0xff] %v18595_v58  ;;  %v16503_v57 = vpop.f32.mrb[33].mxu1  ;;  %v1960_v45 = vcombine.high %v1952_v5, %v1952_v5  ;;  %v18611_v3 = vrot.slane %v1952_v5, %v18240_v54  ;;  %v1168_v12 = vadd.f32 %v16498_v40, %v18523_v25  ;;  %17006 = vmatprep.subr.bf16.mxu0 %v17429_v55 }
 0x196   : > { %v16505_v30 = vpop.f32.mrb[34].mxu1  ;;  %v1961_v21 = vcombine.high %v1959_v56, %v1959_v56  ;;  %v1171_v38 = vadd.f32 %v16501_v63, %v16389_v61  ;;  %v16504_v39 = vadd.f32 %v16503_v57, %v16502_v36  ;;  %v16395_v51 = vadd.f32 %v16394_v19, %v16393_v2  ;;  %17118 = vmatprep.subr.bf16.mxu1 %v17430_v32  ;;  %v17433_v2 = vld [vmem:[#allocation5 + $0x3e8] sm:$0xff]  }
 0x197   : > { %7100 = vmatmul.mubr.bf16.gmra.mrb[140].mxu0 %v17924_v46  ;;  %24978 = vst [vmem:[#allocation68_spill] sm:$0xff] %v18611_v3  ;;  %v16506_v4 = vpop.f32.mrb[35].mxu1  ;;  %v1258_v33 = vadd.f32 %v18235_v52, %v1168_v12  ;;  %v18627_v63 = vrot.slane %v1959_v56, %v18240_v54  ;;  %v18630_v36 = vrot.slane %v1960_v45, %v18240_v54  ;;  %v17432_v56 = vld [vmem:[#allocation5 + $0x320] sm:$0xff]  }
 0x198   : > { %7107 = vmatprep.mubr.bf16.mxu0 %v18607_v22  ;;  %v1259_v57 = vadd.f32 %v18235_v52, %v1171_v38  ;;  %v1176_v40 = vadd.f32 %v16504_v39, %v16392_v14  ;;  %v16507_v61 = vadd.f32 %v16506_v4, %v16505_v30  ;;  %v18642_v45 = vrot.slane %v1961_v21, %v18240_v54 }
 0x199   : > { %7357 = vmatmul.mubr.bf16.gmra.mrb[140].mxu1 %v17909_v31  ;;  %24979 = vst [vmem:[#allocation69_spill] sm:$0xff] %v18627_v63  ;;  %24980 = vst [vmem:[#allocation70_spill] sm:$0xff] %v18630_v36  ;;  %v1994_v19 = vcombine.high %v1258_v33, %v1258_v33  ;;  %v2001_v31 = vrot.slane %v1258_v33, %v18240_v54  ;;  %17007 = vmatpush3.bf16.msra.mxu0 %v17431_v6  ;;  %v18660_v6 = vld [vmem:[%s17822_s8 + $0x30] sm:$0xff]  }
 0x19a   : > { %v18616_v49 = vpop.f32.mrb[36].mxu0  ;;  %7364 = vmatprep.mubr.bf16.mxu1 %v18548_v50  ;;  %24981 = vst [vmem:[#allocation71_spill] sm:$0xff] %v18642_v45  ;;  %v2043_v38 = vcombine.high %v1259_v57, %v1259_v57  ;;  %v2050_v14 = vrot.slane %v1259_v57, %v18240_v54  ;;  %v1260_v50 = vadd.f32 %v18235_v52, %v1176_v40 }
 0x19b   : > { %v18624_v7 = vpop.f32.mrb[37].mxu0  ;;  %v2008_v33 = vrot.slane %v1994_v19, %v18240_v54  ;;  %v2009_v4 = vcombine.high %v2001_v31, %v2001_v31  ;;  %v18650_v30 = vrot.slane %v2001_v31, %v18240_v54  ;;  %v1179_v32 = vadd.f32 %v16507_v61, %v16395_v51  ;;  %17119 = vmatpush3.bf16.msra.mxu1 %v17432_v56 }
 0x19c   : > { %v18633_v55 = vpop.f32.mrb[38].mxu0  ;;  %v18646_v39 = vpop.f32.mrb[36].mxu1  ;;  %v2057_v21 = vrot.slane %v2043_v38, %v18240_v54  ;;  %v2058_v57 = vcombine.high %v2050_v14, %v2050_v14  ;;  %v18655_v5 = vrot.slane %v2050_v14, %v18240_v54  ;;  %v2092_v40 = vcombine.high %v1260_v50, %v1260_v50  ;;  %v17434_v14 = vld [vmem:[#allocation5 + $0x368] sm:$0xff]   ;;  %17008 = vmatprep.subr.bf16.mxu0 %v17433_v2 }
 0x19d   : > { %v18639_v12 = vpop.f32.mrb[39].mxu0  ;;  %24982 = vst [vmem:[#allocation72_spill] sm:$0xff] %v18650_v30  ;;  %v16509_v25 = vpop.f32.mrb[37].mxu1  ;;  %v2010_v51 = vcombine.high %v2008_v33, %v2008_v33  ;;  %v18666_v31 = vrot.slane %v2008_v33, %v18240_v54  ;;  %v18669_v61 = vrot.slane %v2009_v4, %v18240_v54  ;;  %v17435_v33 = vld [vmem:[#allocation5 + $0x3a8] sm:$0xff]   ;;  %v2099_v3 = vrot.slane %v1260_v50, %v18240_v54 }
 0x19e   : > { %24983 = vst [vmem:[#allocation73_spill] sm:$0xff] %v18655_v5  ;;  %v18657_v16 = vpop.f32.mrb[38].mxu1  ;;  %v2059_v58 = vcombine.high %v2057_v21, %v2057_v21  ;;  %v18674_v18 = vrot.slane %v2057_v21, %v18240_v54  ;;  %v18677_v48 = vrot.slane %v2058_v57, %v18240_v54  ;;  %v2106_v4 = vrot.slane %v2092_v40, %v18240_v54  ;;  %v17436_v2 = vld [vmem:[#allocation5 + $0x328] sm:$0xff]  }
 0x19f   : > { %7108 = vmatmul.mubr.bf16.gmra.mrb[144].mxu0 %v17937_v1  ;;  %24984 = vst [vmem:[#allocation74_spill] sm:$0xff] %v18666_v31  ;;  %24985 = vst [vmem:[#allocation75_spill] sm:$0xff] %v18669_v61  ;;  %v16512_v38 = vpop.f32.mrb[39].mxu1  ;;  %v18688_v57 = vrot.slane %v2010_v51, %v18240_v54  ;;  %v2107_v63 = vcombine.high %v2099_v3, %v2099_v3  ;;  %v1261_v51 = vadd.f32 %v18235_v52, %v1179_v32 }
 0x1a0   : > { %7115 = vmatprep.mubr.bf16.mxu0 %v18660_v6  ;;  %24986 = vst [vmem:[#allocation76_spill] sm:$0xff] %v18674_v18  ;;  %24987 = vst [vmem:[#allocation77_spill] sm:$0xff] %v18677_v48  ;;  %v18693_v36 = vrot.slane %v2059_v58, %v18240_v54  ;;  %17120 = vmatprep.subr.bf16.mxu1 %v17434_v14  ;;  %v2108_v31 = vcombine.high %v2106_v4, %v2106_v4 }
 0x1a1   : > { %7365 = vmatmul.mubr.bf16.gmra.mrb[144].mxu1 %v17924_v46  ;;  %24988 = vst [vmem:[#allocation78_spill] sm:$0xff] %v18688_v57  ;;  %v18705_v40 = vrot.slane %v2099_v3, %v18240_v54  ;;  %17009 = vmatpush3.bf16.msra.mxu0 %v17435_v33  ;;  %v17437_v46 = vld [vmem:[#allocation5 + $0x3f0] sm:$0xff]   ;;  %v18710_v18 = vrot.slane %v2106_v4, %v18240_v54 }
 0x1a2   : > { %v16402_v19 = vpop.f32.mrb[40].mxu0  ;;  %24989 = vst [vmem:[#allocation79_spill] sm:$0xff] %v18693_v36  ;;  %7372 = vmatprep.mubr.bf16.mxu1 %v18607_v22  ;;  %v16398_v22 = vadd.f32 %v18624_v7, %v18616_v49  ;;  %v18713_v32 = vrot.slane %v2107_v63, %v18240_v54  ;;  %v2141_v14 = vcombine.high %v1261_v51, %v1261_v51  ;;  %v18725_v63 = vld [vmem:[%s17822_s8 + $0x38] sm:$0xff]  }
 0x1a3   : > { %v16403_v21 = vpop.f32.mrb[41].mxu0  ;;  %24990 = vst [vmem:[#allocation80_spill] sm:$0xff] %v18705_v40  ;;  %24991 = vst [vmem:[#allocation81_spill] sm:$0xff] %v18710_v18  ;;  %v2148_v58 = vrot.slane %v1261_v51, %v18240_v54  ;;  %v16510_v7 = vadd.f32 %v16509_v25, %v18646_v39  ;;  %v16401_v33 = vadd.f32 %v18639_v12, %v18633_v55  ;;  %17121 = vmatpush3.bf16.msra.mxu1 %v17436_v2  ;;  %v17438_v25 = vld [vmem:[#allocation5 + $0x370] sm:$0xff]  }
 0x1a4   : > { %v16405_v56 = vpop.f32.mrb[42].mxu0  ;;  %v16514_v50 = vpop.f32.mrb[40].mxu1  ;;  %24992 = vst [vmem:[#allocation82_spill] sm:$0xff] %v18713_v32  ;;  %v18729_v51 = vrot.slane %v2108_v31, %v18240_v54  ;;  %v2155_v61 = vrot.slane %v2141_v14, %v18240_v54  ;;  %v16513_v39 = vadd.f32 %v16512_v38, %v18657_v16  ;;  %v16404_v36 = vadd.f32 %v16403_v21, %v16402_v19  ;;  %v17439_v31 = vld [vmem:[#allocation5 + $0x3b0] sm:$0xff]  }
 0x1a5   : > { %v16406_v5 = vpop.f32.mrb[43].mxu0  ;;  %v16515_v48 = vpop.f32.mrb[41].mxu1  ;;  %v2156_v30 = vcombine.high %v2148_v58, %v2148_v58  ;;  %v18733_v3 = vrot.slane %v2148_v58, %v18240_v54  ;;  %v1184_v12 = vadd.f32 %v16510_v7, %v16398_v22  ;;  %17010 = vmatprep.subr.bf16.mxu0 %v17437_v46  ;;  %17122 = vmatprep.subr.bf16.mxu1 %v17438_v25  ;;  %v17440_v58 = vld [vmem:[#allocation5 + $0x330] sm:$0xff]  }
 0x1a6   : > { %v16517_v4 = vpop.f32.mrb[42].mxu1  ;;  %24993 = vst [vmem:[#allocation83_spill] sm:$0xff] %v18729_v51  ;;  %v2157_v45 = vcombine.high %v2155_v61, %v2155_v61  ;;  %v18743_v2 = vrot.slane %v2155_v61, %v18240_v54  ;;  %v1187_v16 = vadd.f32 %v16513_v39, %v16401_v33  ;;  %v16516_v19 = vadd.f32 %v16515_v48, %v16514_v50 }
 0x1a7   : > { %7116 = vmatmul.mubr.bf16.gmra.mrb[148].mxu0 %v17952_v15  ;;  %24994 = vst [vmem:[#allocation84_spill] sm:$0xff] %v18733_v3  ;;  %v16518_v49 = vpop.f32.mrb[43].mxu1  ;;  %v1262_v22 = vadd.f32 %v18235_v52, %v1184_v12  ;;  %v16407_v38 = vadd.f32 %v16406_v5, %v16405_v56  ;;  %v18751_v7 = vrot.slane %v2156_v30, %v18240_v54 }
 0x1a8   : > { %7123 = vmatprep.mubr.bf16.mxu0 %v18725_v63  ;;  %24995 = vst [vmem:[#allocation85_spill] sm:$0xff] %v18743_v2  ;;  %v16519_v14 = vadd.f32 %v16518_v49, %v16517_v4  ;;  %v1263_v5 = vadd.f32 %v18235_v52, %v1187_v16  ;;  %17011 = vmatpush3.bf16.msra.mxu0 %v17439_v31 }
 0x1a9   : > { %7373 = vmatmul.mubr.bf16.gmra.mrb[148].mxu1 %v17937_v1  ;;  %24996 = vst [vmem:[#allocation86_spill] sm:$0xff] %v18751_v7  ;;  %v2190_v12 = vcombine.high %v1262_v22, %v1262_v22  ;;  %v2197_v48 = vrot.slane %v1262_v22, %v18240_v54  ;;  %v18758_v50 = vrot.slane %v2157_v45, %v18240_v54  ;;  %v18767_v22 = vld [vmem:[%s17822_s8 + $0x40] sm:$0xff]  }
 0x1aa   : > { %v16408_v57 = vpop.f32.mrb[44].mxu0  ;;  %7380 = vmatprep.mubr.bf16.mxu1 %v18660_v6  ;;  %v1192_v6 = vadd.f32 %v16516_v19, %v16404_v36  ;;  %v1195_v30 = vadd.f32 %v16519_v14, %v16407_v38  ;;  %v2239_v52 = vcombine.high %v1263_v5, %v1263_v5  ;;  %17123 = vmatpush3.bf16.msra.mxu1 %v17440_v58 }
 0x1ab   : > { %v16409_v55 = vpop.f32.mrb[45].mxu0  ;;  %24997 = vst [vmem:[#allocation87_spill] sm:$0xff] %v18758_v50  ;;  %v2204_v4 = vrot.slane %v2190_v12, %v18240_v54  ;;  %v2205_v25 = vcombine.high %v2197_v48, %v2197_v48  ;;  %v18771_v45 = vrot.slane %v2197_v48, %v18240_v54 }
 0x1ac   : > { %v16411_v21 = vpop.f32.mrb[46].mxu0  ;;  %v16520_v56 = vpop.f32.mrb[44].mxu1  ;;  %v16410_v33 = vadd.f32 %v16409_v55, %v16408_v57  ;;  %v2246_v57 = vrot.slane %v1263_v5, %v18240_v54  ;;  %v18777_v55 = vld [vmem:[%s24375_s2] ss:$0 sm:$0xff]  ;;  %v2253_v48 = vrot.slane %v2239_v52, %v18240_v54 }
 0x1ad   : > { %v16412_v1 = vpop.f32.mrb[47].mxu0  ;;  %v16521_v39 = vpop.f32.mrb[45].mxu1  ;;  %24998 = vst [vmem:[#allocation88_spill] sm:$0xff] %v18771_v45  ;;  %v1264_v31 = vadd.f32 %v18777_v55, %v1192_v6  ;;  %v2206_v19 = vcombine.high %v2204_v4, %v2204_v4  ;;  %v18781_v38 = vrot.slane %v2204_v4, %v18240_v54 }
 0x1ae   : > { %v18760_v61 = vadd.f32 %v16412_v1, %v16411_v21  ;;  %v16523_v36 = vpop.f32.mrb[46].mxu1  ;;  %v16522_v14 = vadd.f32 %v16521_v39, %v16520_v56  ;;  %v18784_v21 = vrot.slane %v2205_v25, %v18240_v54  ;;  %v1265_v1 = vadd.f32 %v18777_v55, %v1195_v30 }
 0x1af   : > { %7124 = vmatmul.mubr.bf16.gmra.mrb[152].mxu0 %v17973_v34  ;;  %v16524_v16 = vpop.f32.mrb[47].mxu1  ;;  %24999 = vst [vmem:[#allocation89_spill] sm:$0xff] %v18781_v38  ;;  %v2254_v5 = vcombine.high %v2246_v57, %v2246_v57  ;;  %v18789_v49 = vrot.slane %v2246_v57, %v18240_v54  ;;  %v2288_v6 = vcombine.high %v1264_v31, %v1264_v31 }
 0x1b0   : > { %7131 = vmatprep.mubr.bf16.mxu0 %v18767_v22  ;;  %25000 = vst [vmem:[#allocation90_spill] sm:$0xff] %v18784_v21  ;;  %v18797_v4 = vrot.slane %v2206_v19, %v18240_v54  ;;  %v2295_v30 = vrot.slane %v1264_v31, %v18240_v54  ;;  %v2255_v57 = vcombine.high %v2253_v48, %v2253_v48 }
 0x1b1   : > { %25001 = vst [vmem:[#allocation91_spill] sm:$0xff] %v18789_v49  ;;  %7381 = vmatmul.mubr.bf16.gmra.mrb[152].mxu1 %v17952_v15  ;;  %v18808_v56 = vrot.slane %v2253_v48, %v18240_v54  ;;  %v18811_v19 = vrot.slane %v2254_v5, %v18240_v54  ;;  %v2302_v31 = vrot.slane %v2288_v6, %v18240_v54  ;;  %v17441_v48 = vld [vmem:[#allocation5 + $0x3f8] sm:$0xff]  }
 0x1b2   : > { %v16414_v12 = vpop.f32.mrb[48].mxu0  ;;  %25002 = vst [vmem:[#allocation92_spill] sm:$0xff] %v18797_v4  ;;  %7388 = vmatprep.mubr.bf16.mxu1 %v18725_v63  ;;  %v2303_v46 = vcombine.high %v2295_v30, %v2295_v30  ;;  %v18815_v63 = vrot.slane %v2295_v30, %v18240_v54  ;;  %v18820_v15 = vrot.slane %v2255_v57, %v18240_v54  ;;  %v18833_v57 = vld [vmem:[%s17822_s8 + $0x48] sm:$0xff]   ;;  %v17442_v30 = vld [vmem:[#allocation5 + $0x378] sm:$0xff]  }
 0x1b3   : > { %v16415_v58 = vpop.f32.mrb[49].mxu0  ;;  %25003 = vst [vmem:[#allocation93_spill] sm:$0xff] %v18808_v56  ;;  %25004 = vst [vmem:[#allocation94_spill] sm:$0xff] %v18811_v19  ;;  %v2337_v38 = vcombine.high %v1265_v1, %v1265_v1  ;;  %v2304_v45 = vcombine.high %v2302_v31, %v2302_v31  ;;  %v18830_v2 = vrot.slane %v2302_v31, %v18240_v54  ;;  %17012 = vmatprep.subr.bf16.mxu0 %v17441_v48 }
 0x1b4   : > { %v18800_v25 = vpop.f32.mrb[50].mxu0  ;;  %25005 = vst [vmem:[#allocation95_spill] sm:$0xff] %v18815_v63  ;;  %v16526_v50 = vpop.f32.mrb[48].mxu1  ;;  %25006 = vst [vmem:[#allocation96_spill] sm:$0xff] %v18820_v15  ;;  %v18837_v49 = vrot.slane %v2303_v46, %v18240_v54  ;;  %v2344_v21 = vrot.slane %v1265_v1, %v18240_v54  ;;  %v1200_v4 = vadd.f32 %v16522_v14, %v16410_v33  ;;  %v17443_v46 = vld [vmem:[#allocation5 + $0x3b8] sm:$0xff]   ;;  %17124 = vmatprep.subr.bf16.mxu1 %v17442_v30 }
 0x1b5   : > { %v16418_v39 = vpop.f32.mrb[51].mxu0  ;;  %v16527_v5 = vpop.f32.mrb[49].mxu1  ;;  %25007 = vst [vmem:[#allocation97_spill] sm:$0xff] %v18830_v2  ;;  %v2351_v6 = vrot.slane %v2337_v38, %v18240_v54  ;;  %v18844_v56 = vrot.slane %v2304_v45, %v18240_v54  ;;  %v16525_v51 = vadd.f32 %v16524_v16, %v16523_v36  ;;  %v16416_v16 = vadd.f32 %v16415_v58, %v16414_v12 }
 0x1b6   : > { %v16529_v52 = vpop.f32.mrb[50].mxu1  ;;  %25008 = vst [vmem:[#allocation98_spill] sm:$0xff] %v18837_v49  ;;  %v2352_v38 = vcombine.high %v2344_v21, %v2344_v21  ;;  %v18851_v14 = vrot.slane %v2344_v21, %v18240_v54  ;;  %v1266_v3 = vadd.f32 %v18777_v55, %v1200_v4  ;;  %v16528_v58 = vadd.f32 %v16527_v5, %v16526_v50 }
 0x1b7   : > { %7132 = vmatmul.mubr.bf16.gmra.mrb[156].mxu0 %v17986_v42  ;;  %v16530_v7 = vpop.f32.mrb[51].mxu1  ;;  %25009 = vst [vmem:[#allocation99_spill] sm:$0xff] %v18844_v56  ;;  %v2353_v33 = vcombine.high %v2351_v6, %v2351_v6  ;;  %v1203_v36 = vadd.f32 %v16525_v51, %v18760_v61  ;;  %v17444_v51 = vld [vmem:[#allocation5 + $0x338] sm:$0xff]   ;;  %v16419_v21 = vadd.f32 %v16418_v39, %v18800_v25 }
 0x1b8   : > { %7139 = vmatprep.mubr.bf16.mxu0 %v18833_v57  ;;  %25010 = vst [vmem:[#allocation100_spill] sm:$0xff] %v18851_v14  ;;  %v18869_v45 = vrot.slane %v2352_v38, %v18240_v54  ;;  %v2386_v61 = vcombine.high %v1266_v3, %v1266_v3  ;;  %v2393_v12 = vrot.slane %v1266_v3, %v18240_v54 }
 0x1b9   : > { %7389 = vmatmul.mubr.bf16.gmra.mrb[156].mxu1 %v17973_v34  ;;  %v18866_v34 = vrot.slane %v2351_v6, %v18240_v54  ;;  %17013 = vmatpush3.bf16.msra.mxu0 %v17443_v46  ;;  %v18878_v6 = vrot.slane %v2353_v33, %v18240_v54  ;;  %v16531_v30 = vadd.f32 %v16530_v7, %v16529_v52  ;;  %v18891_v33 = vld [vmem:[%s17822_s8 + $0x50] sm:$0xff]  }
 0x1ba   : > { %v16420_v18 = vpop.f32.mrb[52].mxu0  ;;  %7396 = vmatprep.mubr.bf16.mxu1 %v18767_v22  ;;  %25012 = vst [vmem:[#allocation102_spill] sm:$0xff] %v18869_v45  ;;  %v1267_v22 = vadd.f32 %v18777_v55, %v1203_v36  ;;  %v2400_v3 = vrot.slane %v2386_v61, %v18240_v54  ;;  %v2401_v2 = vcombine.high %v2393_v12, %v2393_v12 }
 0x1bb   : > { %v16421_v31 = vpop.f32.mrb[53].mxu0  ;;  %25011 = vst [vmem:[#allocation101_spill] sm:$0xff] %v18866_v34  ;;  %25013 = vst [vmem:[#allocation103_spill] sm:$0xff] %v18878_v6  ;;  %v18886_v50 = vrot.slane %v2393_v12, %v18240_v54  ;;  %v1208_v39 = vadd.f32 %v16528_v58, %v16416_v16  ;;  %v1211_v7 = vadd.f32 %v16531_v30, %v16419_v21  ;;  %17125 = vmatpush3.bf16.msra.mxu1 %v17444_v51  ;;  %v18948_v34 = vld [vmem:[%s17822_s8 + $0x58] sm:$0xff]  }
 0x1bc   : > { %v18858_v48 = vpop.f32.mrb[54].mxu0  ;;  %v18875_v1 = vpop.f32.mrb[52].mxu1  ;;  %v2435_v5 = vcombine.high %v1267_v22, %v1267_v22  ;;  %v2442_v36 = vrot.slane %v1267_v22, %v18240_v54  ;;  %v16422_v25 = vadd.f32 %v16421_v31, %v16420_v18  ;;  %v2402_v12 = vcombine.high %v2400_v3, %v2400_v3 }
 0x1bd   : > { %v18871_v4 = vpop.f32.mrb[55].mxu0  ;;  %v16533_v56 = vpop.f32.mrb[53].mxu1  ;;  %25014 = vst [vmem:[#allocation104_spill] sm:$0xff] %v18886_v50  ;;  %v18900_v38 = vrot.slane %v2400_v3, %v18240_v54  ;;  %v18903_v14 = vrot.slane %v2401_v2, %v18240_v54  ;;  %v1268_v31 = vadd.f32 %v18777_v55, %v1208_v39  ;;  %v1269_v30 = vadd.f32 %v18777_v55, %v1211_v7 }
 0x1be   : > { %v18888_v46 = vpop.f32.mrb[54].mxu1  ;;  %v2449_v22 = vrot.slane %v2435_v5, %v18240_v54  ;;  %v2450_v16 = vcombine.high %v2442_v36, %v2442_v36  ;;  %v18909_v18 = vrot.slane %v2442_v36, %v18240_v54  ;;  %v18922_v5 = vrot.slane %v2402_v12, %v18240_v54 }
 0x1bf   : > { %7140 = vmatmul.mubr.bf16.gmra.mrb[160].mxu0 %v18002_v60  ;;  %v18895_v52 = vpop.f32.mrb[55].mxu1  ;;  %25015 = vst [vmem:[#allocation105_spill] sm:$0xff] %v18900_v38  ;;  %25016 = vst [vmem:[#allocation106_spill] sm:$0xff] %v18903_v14  ;;  %v2484_v58 = vcombine.high %v1268_v31, %v1268_v31  ;;  %v2491_v7 = vrot.slane %v1268_v31, %v18240_v54  ;;  %v2533_v51 = vcombine.high %v1269_v30, %v1269_v30 }
 0x1c0   : > { %7147 = vmatprep.mubr.bf16.mxu0 %v18891_v33  ;;  %25017 = vst [vmem:[#allocation107_spill] sm:$0xff] %v18909_v18  ;;  %25018 = vst [vmem:[#allocation108_spill] sm:$0xff] %v18922_v5  ;;  %v2451_v39 = vcombine.high %v2449_v22, %v2449_v22  ;;  %v18929_v2 = vrot.slane %v2449_v22, %v18240_v54  ;;  %v18933_v12 = vrot.slane %v2450_v16, %v18240_v54 }
 0x1c1   : > { %7397 = vmatmul.mubr.bf16.gmra.mrb[160].mxu1 %v17986_v42  ;;  %v2540_v36 = vrot.slane %v1269_v30, %v18240_v54  ;;  %v2498_v22 = vrot.slane %v2484_v58, %v18240_v54  ;;  %v2499_v14 = vcombine.high %v2491_v7, %v2491_v7  ;;  %v18944_v31 = vrot.slane %v2491_v7, %v18240_v54 }
 0x1c2   : > { %v18905_v49 = vpop.f32.mrb[56].mxu0  ;;  %7404 = vmatprep.mubr.bf16.mxu1 %v18833_v57  ;;  %25019 = vst [vmem:[#allocation109_spill] sm:$0xff] %v18929_v2  ;;  %25020 = vst [vmem:[#allocation110_spill] sm:$0xff] %v18933_v12  ;;  %v18936_v50 = vrot.slane %v2451_v39, %v18240_v54  ;;  %v2547_v16 = vrot.slane %v2533_v51, %v18240_v54  ;;  %v16534_v58 = vadd.f32 %v16533_v56, %v18875_v1 }
 0x1c3   : > { %v16427_v21 = vpop.f32.mrb[57].mxu0  ;;  %25022 = vst [vmem:[#allocation112_spill] sm:$0xff] %v18944_v31  ;;  %v2548_v30 = vcombine.high %v2540_v36, %v2540_v36  ;;  %v18954_v42 = vrot.slane %v2540_v36, %v18240_v54  ;;  %v2500_v45 = vcombine.high %v2498_v22, %v2498_v22  ;;  %v18960_v51 = vrot.slane %v2498_v22, %v18240_v54 }
 0x1c4   : > { %v16429_v3 = vpop.f32.mrb[58].mxu0  ;;  %v16538_v57 = vpop.f32.mrb[56].mxu1  ;;  %25021 = vst [vmem:[#allocation111_spill] sm:$0xff] %v18936_v50  ;;  %v18963_v63 = vrot.slane %v2499_v14, %v18240_v54  ;;  %v2549_v5 = vcombine.high %v2547_v16, %v2547_v16  ;;  %v18970_v56 = vrot.slane %v2547_v16, %v18240_v54  ;;  %v1216_v39 = vadd.f32 %v16534_v58, %v16422_v25  ;;  %v19002_v50 = vld [vmem:[%s17822_s8 + $0x60] sm:$0xff]  }
 0x1c5   : > { %v16430_v61 = vpop.f32.mrb[59].mxu0  ;;  %v16539_v38 = vpop.f32.mrb[57].mxu1  ;;  %25023 = vst [vmem:[#allocation113_spill] sm:$0xff] %v18954_v42  ;;  %25024 = vst [vmem:[#allocation114_spill] sm:$0xff] %v18960_v51  ;;  %v18976_v14 = vrot.slane %v2548_v30, %v18240_v54  ;;  %v18982_v36 = vrot.slane %v2500_v45, %v18240_v54  ;;  %v16425_v30 = vadd.f32 %v18871_v4, %v18858_v48 }
 0x1c6   : > { %v16541_v6 = vpop.f32.mrb[58].mxu1  ;;  %25025 = vst [vmem:[#allocation115_spill] sm:$0xff] %v18963_v63  ;;  %25026 = vst [vmem:[#allocation116_spill] sm:$0xff] %v18970_v56  ;;  %v18991_v31 = vrot.slane %v2549_v5, %v18240_v54  ;;  %v1270_v25 = vadd.f32 %v18777_v55, %v1216_v39  ;;  %v16537_v45 = vadd.f32 %v18895_v52, %v18888_v46 }
 0x1c7   : > { %7148 = vmatmul.mubr.bf16.gmra.mrb[164].mxu0 %v18010_v0  ;;  %v16542_v18 = vpop.f32.mrb[59].mxu1  ;;  %25027 = vst [vmem:[#allocation117_spill] sm:$0xff] %v18976_v14  ;;  %25028 = vst [vmem:[#allocation118_spill] sm:$0xff] %v18982_v36  ;;  %v16431_v16 = vadd.f32 %v16430_v61, %v16429_v3 }
 0x1c8   : > { %7155 = vmatprep.mubr.bf16.mxu0 %v18948_v34  ;;  %25029 = vst [vmem:[#allocation119_spill] sm:$0xff] %v18991_v31  ;;  %v16543_v42 = vadd.f32 %v16542_v18, %v16541_v6  ;;  %v2582_v4 = vcombine.high %v1270_v25, %v1270_v25  ;;  %v2589_v5 = vrot.slane %v1270_v25, %v18240_v54 }
 0x1c9   : > { %7405 = vmatmul.mubr.bf16.gmra.mrb[164].mxu1 %v18002_v60  ;;  %v16540_v60 = vadd.f32 %v16539_v38, %v16538_v57  ;;  %v1219_v51 = vadd.f32 %v16537_v45, %v16425_v30 }
 0x1ca   : > { %v16432_v15 = vpop.f32.mrb[60].mxu0  ;;  %7412 = vmatprep.mubr.bf16.mxu1 %v18891_v33  ;;  %v16428_v33 = vadd.f32 %v16427_v21, %v18905_v49  ;;  %v1227_v46 = vadd.f32 %v16543_v42, %v16431_v16  ;;  %v2596_v61 = vrot.slane %v2582_v4, %v18240_v54  ;;  %v2597_v18 = vcombine.high %v2589_v5, %v2589_v5 }
 0x1cb   : > { %v16433_v1 = vpop.f32.mrb[61].mxu0  ;;  %v1271_v3 = vadd.f32 %v18777_v55, %v1219_v51  ;;  %v19021_v30 = vrot.slane %v2589_v5, %v18240_v54 }
 0x1cc   : > { %v16435_v2 = vpop.f32.mrb[62].mxu0  ;;  %v16544_v58 = vpop.f32.mrb[60].mxu1  ;;  %v16434_v39 = vadd.f32 %v16433_v1, %v16432_v15  ;;  %v1224_v49 = vadd.f32 %v16540_v60, %v16428_v33  ;;  %v1273_v1 = vadd.f32 %v18777_v55, %v1227_v46  ;;  %v2598_v16 = vcombine.high %v2596_v61, %v2596_v61 }
 0x1cd   : > { %v16436_v22 = vpop.f32.mrb[63].mxu0  ;;  %v16545_v48 = vpop.f32.mrb[61].mxu1  ;;  %25030 = vst [vmem:[#allocation120_spill] sm:$0xff] %v19021_v30  ;;  %v19024_v51 = vrot.slane %v2596_v61, %v18240_v54  ;;  %v2631_v45 = vcombine.high %v1271_v3, %v1271_v3  ;;  %v19036_v4 = vrot.slane %v2597_v18, %v18240_v54 }
 0x1ce   : > { %v16547_v63 = vpop.f32.mrb[62].mxu1  ;;  %v16546_v52 = vadd.f32 %v16545_v48, %v16544_v58  ;;  %v19005_v21 = vadd.f32 %v16436_v22, %v16435_v2  ;;  %v1272_v57 = vadd.f32 %v18777_v55, %v1224_v49  ;;  %v19039_v5 = vrot.slane %v2598_v16, %v18240_v54 }
 0x1cf   : > { %7156 = vmatmul.mubr.bf16.gmra.mrb[168].mxu0 %v18033_v23  ;;  %v16548_v38 = vpop.f32.mrb[63].mxu1  ;;  %25031 = vst [vmem:[#allocation121_spill] sm:$0xff] %v19024_v51  ;;  %25032 = vst [vmem:[#allocation122_spill] sm:$0xff] %v19036_v4  ;;  %v2645_v49 = vrot.slane %v2631_v45, %v18240_v54  ;;  %v2736_v16 = vrot.slane %v1273_v1, %v18240_v54  ;;  %v19054_v45 = vld [vmem:[%s17822_s8 + $0x68] sm:$0xff]  }
 0x1d0   : > { %7163 = vmatprep.mubr.bf16.mxu0 %v19002_v50  ;;  %v1232_v60 = vadd.f32 %v16546_v52, %v16434_v39  ;;  %v16549_v42 = vadd.f32 %v16548_v38, %v16547_v63  ;;  %v2638_v63 = vrot.slane %v1271_v3, %v18240_v54  ;;  %v2687_v33 = vrot.slane %v1272_v57, %v18240_v54 }
 0x1d1   : > { %7413 = vmatmul.mubr.bf16.gmra.mrb[168].mxu1 %v18010_v0  ;;  %v2680_v0 = vcombine.high %v1272_v57, %v1272_v57  ;;  %25033 = vst [vmem:[#allocation123_spill] sm:$0xff] %v19039_v5  ;;  %v2729_v39 = vcombine.high %v1273_v1, %v1273_v1  ;;  %v19060_v7 = vrot.slane %v2645_v49, %v18240_v54 }
 0x1d2   : > { %v19011_v15 = vpop.f32.mrb[64].mxu0  ;;  %7420 = vmatprep.mubr.bf16.mxu1 %v18948_v34  ;;  %v2646_v46 = vcombine.high %v2638_v63, %v2638_v63  ;;  %v19043_v52 = vrot.slane %v2638_v63, %v18240_v54  ;;  %v2695_v3 = vcombine.high %v2687_v33, %v2687_v33  ;;  %v19050_v57 = vrot.slane %v2687_v33, %v18240_v54 }
 0x1d3   : > { %v19016_v2 = vpop.f32.mrb[65].mxu0  ;;  %v2694_v38 = vrot.slane %v2680_v0, %v18240_v54  ;;  %v2647_v0 = vcombine.high %v2645_v49, %v2645_v49  ;;  %25036 = vst [vmem:[#allocation126_spill] sm:$0xff] %v19060_v7  ;;  %v2743_v33 = vrot.slane %v2729_v39, %v18240_v54  ;;  %v1235_v39 = vadd.f32 %v16549_v42, %v19005_v21 }
 0x1d4   : > { %v19026_v25 = vpop.f32.mrb[66].mxu0  ;;  %v16678_v34 = vpop.f32.mrb[64].mxu1  ;;  %25034 = vst [vmem:[#allocation124_spill] sm:$0xff] %v19043_v52  ;;  %25035 = vst [vmem:[#allocation125_spill] sm:$0xff] %v19050_v57  ;;  %v19063_v18 = vrot.slane %v2646_v46, %v18240_v54  ;;  %v19071_v30 = vrot.slane %v2695_v3, %v18240_v54  ;;  %v19101_v3 = vrot.slane %v2736_v16, %v18240_v54  ;;  %v19132_v57 = vld [vmem:[%s17822_s8 + $0x70] sm:$0xff]  }
 0x1d5   : > { %v19031_v58 = vpop.f32.mrb[67].mxu0  ;;  %v16679_v61 = vpop.f32.mrb[65].mxu1  ;;  %v2696_v1 = vcombine.high %v2694_v38, %v2694_v38  ;;  %v19068_v22 = vrot.slane %v2694_v38, %v18240_v54  ;;  %v19078_v63 = vrot.slane %v2647_v0, %v18240_v54  ;;  %v2744_v0 = vcombine.high %v2736_v16, %v2736_v16 }
 0x1d6   : > { %v16681_v48 = vpop.f32.mrb[66].mxu1  ;;  %25037 = vst [vmem:[#allocation127_spill] sm:$0xff] %v19063_v18  ;;  %25039 = vst [vmem:[#allocation129_spill] sm:$0xff] %v19071_v30  ;;  %v2745_v46 = vcombine.high %v2743_v33, %v2743_v33  ;;  %v19116_v16 = vrot.slane %v2743_v33, %v18240_v54  ;;  %v16568_v49 = vadd.f32 %v19016_v2, %v19011_v15 }
 0x1d7   : > { %7164 = vmatmul.mubr.bf16.gmra.mrb[172].mxu0 %v18043_v37  ;;  %v16682_v6 = vpop.f32.mrb[67].mxu1  ;;  %25038 = vst [vmem:[#allocation128_spill] sm:$0xff] %v19068_v22  ;;  %25040 = vst [vmem:[#allocation130_spill] sm:$0xff] %v19078_v63  ;;  %v19089_v51 = vrot.slane %v2696_v1, %v18240_v54  ;;  %v19119_v22 = vrot.slane %v2744_v0, %v18240_v54  ;;  %v16680_v2 = vadd.f32 %v16679_v61, %v16678_v34  ;;  %v17636_v0 = vmov 1983009808  }
 0x1d8   : > { %7171 = vmatprep.mubr.bf16.mxu0 %v19054_v45  ;;  %25042 = vst [vmem:[#allocation132_spill] sm:$0xff] %v19101_v3  ;;  %25043 = vst [vmem:[#allocation133_spill] sm:$0xff] %v19116_v16  ;;  %v19127_v21 = vrot.slane %v2745_v46, %v18240_v54  ;;  %v16571_v46 = vadd.f32 %v19031_v58, %v19026_v25  ;;  %v16683_v34 = vadd.f32 %v16682_v6, %v16681_v48 }
 0x1d9   : > { %7421 = vmatmul.mubr.bf16.gmra.mrb[172].mxu1 %v18033_v23  ;;  %25041 = vst [vmem:[#allocation131_spill] sm:$0xff] %v19089_v51  ;;  %25044 = vst [vmem:[#allocation134_spill] sm:$0xff] %v19119_v22  ;;  %v1275_v23 = vadd.f32 %v18777_v55, %v1235_v39  ;;  %v13356_v51 = vunpack.c.l.s4 %v17636_v0  ;;  %v3586_v14 = vadd.f32 %v16680_v2, %v16568_v49 }
 0x1da   : > { %v19073_v31 = vpop.f32.mrb[68].mxu0  ;;  %7428 = vmatprep.mubr.bf16.mxu1 %v19002_v50  ;;  %v1274_v50 = vadd.f32 %v18777_v55, %v1232_v60  ;;  %25045 = vst [vmem:[#allocation135_spill] sm:$0xff] %v19127_v21 }
 0x1db   : > { %v19084_v38 = vpop.f32.mrb[69].mxu0  ;;  %v2827_v52 = vcombine.high %v1275_v23, %v1275_v23  ;;  %v2834_v56 = vrot.slane %v1275_v23, %v18240_v54  ;;  %v13357_v15 = vunpack.c.0.s8 %v13356_v51  ;;  %v3712_v48 = vadd.f32 %v18777_v55, %v3586_v14 }
 0x1dc   : > { %v19093_v5 = vpop.f32.mrb[70].mxu0  ;;  %v19111_v7 = vpop.f32.mrb[68].mxu1  ;;  %v2778_v60 = vcombine.high %v1274_v50, %v1274_v50  ;;  %v2785_v42 = vrot.slane %v1274_v50, %v18240_v54  ;;  %v16574_v14 = vadd.f32 %v19084_v38, %v19073_v31 }
 0x1dd   : > { %v19103_v1 = vpop.f32.mrb[71].mxu0  ;;  %v19123_v63 = vpop.f32.mrb[69].mxu1  ;;  %v2841_v6 = vrot.slane %v2827_v52, %v18240_v54  ;;  %v2842_v51 = vcombine.high %v2834_v56, %v2834_v56  ;;  %v3776_v52 = vcombine.high %v3712_v48, %v3712_v48  ;;  %v3783_v23 = vrot.slane %v3712_v48, %v18240_v54 }
 0x1de   : > { %v16687_v33 = vpop.f32.mrb[70].mxu1  ;;  %v2792_v18 = vrot.slane %v2778_v60, %v18240_v54  ;;  %v2793_v50 = vcombine.high %v2785_v42, %v2785_v42  ;;  %v19141_v39 = vrot.slane %v2785_v42, %v18240_v54  ;;  %v19221_v31 = vadd.f32 %v19103_v1, %v19093_v5 }
 0x1df   : > { %7172 = vmatmul.mubr.bf16.gmra.mrb[176].mxu0 %v18063_v53  ;;  %v16688_v30 = vpop.f32.mrb[71].mxu1 }
 0x1e0   : > { %7179 = vmatprep.mubr.bf16.mxu0 %v19132_v57  ;;  %25046 = vst [vmem:[#allocation136_spill] sm:$0xff] %v19141_v39  ;;  %v2794_v58 = vcombine.high %v2792_v18, %v2792_v18  ;;  %v19152_v60 = vrot.slane %v2792_v18, %v18240_v54  ;;  %v19155_v42 = vrot.slane %v2793_v50, %v18240_v54 }
 0x1e1   : > { %7429 = vmatmul.mubr.bf16.gmra.mrb[176].mxu1 %v18043_v37  ;;  %v19162_v37 = vrot.slane %v2834_v56, %v18240_v54  ;;  %v2843_v50 = vcombine.high %v2841_v6, %v2841_v6  ;;  %v19183_v18 = vsub.s32 %v13357_v15, %v18228_v11  ;;  %v3589_v39 = vadd.f32 %v16683_v34, %v16571_v46  ;;  %v19195_v56 = vld [vmem:[%s17822_s8 + $0x78] sm:$0xff]  }
 0x1e2   : > { %v19143_v4 = vpop.f32.mrb[72].mxu0  ;;  %25047 = vst [vmem:[#allocation137_spill] sm:$0xff] %v19152_v60  ;;  %25048 = vst [vmem:[#allocation138_spill] sm:$0xff] %v19155_v42  ;;  %7436 = vmatprep.mubr.bf16.mxu1 %v19054_v45  ;;  %v19172_v2 = vrot.slane %v2794_v58, %v18240_v54  ;;  %v19189_v58 = vrot.slane %v2841_v6, %v18240_v54  ;;  %v19201_v15 = vrot.slane %v2842_v51, %v18240_v54 }
 0x1e3   : > { %v19147_v61 = vpop.f32.mrb[73].mxu0  ;;  %25049 = vst [vmem:[#allocation139_spill] sm:$0xff] %v19162_v37  ;;  %25051 = vst [vmem:[#allocation141_spill] sm:$0xff] %v19183_v18  ;;  %v3790_v46 = vrot.slane %v3776_v52, %v18240_v54  ;;  %v3791_v34 = vcombine.high %v3783_v23, %v3783_v23  ;;  %v3713_v60 = vadd.f32 %v18777_v55, %v3589_v39 }
 0x1e4   : > { %v19157_v0 = vpop.f32.mrb[74].mxu0  ;;  %25050 = vst [vmem:[#allocation140_spill] sm:$0xff] %v19172_v2  ;;  %v19176_v45 = vpop.f32.mrb[72].mxu1  ;;  %25052 = vst [vmem:[#allocation142_spill] sm:$0xff] %v19189_v58  ;;  %v3799_v58 = vrot.slane %v3783_v23, %v18240_v54  ;;  %v19215_v51 = vrot.slane %v2843_v50, %v18240_v54  ;;  %v16686_v6 = vadd.f32 %v19123_v63, %v19111_v7 }
 0x1e5   : > { %v19165_v49 = vpop.f32.mrb[75].mxu0  ;;  %v19185_v25 = vpop.f32.mrb[73].mxu1  ;;  %25053 = vst [vmem:[#allocation143_spill] sm:$0xff] %v19201_v15  ;;  %v19223_v38 = vadd.f32 %v16688_v30, %v16687_v33  ;;  %v3792_v23 = vcombine.high %v3790_v46, %v3790_v46  ;;  %v3806_v39 = vrot.slane %v3790_v46, %v18240_v54  ;;  %v3813_v11 = vrot.slane %v3791_v34, %v18240_v54 }
 0x1e6   : > { %v19192_v21 = vpop.f32.mrb[74].mxu1  ;;  %25054 = vst [vmem:[#allocation144_spill] sm:$0xff] %v19215_v51  ;;  %v3821_v50 = vcombine.high %v3799_v58, %v3799_v58  ;;  %v5347_v7 = vrot.slane %v3799_v58, %v18528_v59  ;;  %v3825_v5 = vcombine.high %v3713_v60, %v3713_v60  ;;  %v3832_v30 = vrot.slane %v3713_v60, %v18240_v54 }
 0x1e7   : > { %7180 = vmatmul.mubr.bf16.gmra.mrb[180].mxu0 %v18080_v9  ;;  %v19207_v48 = vpop.f32.mrb[75].mxu1  ;;  %v19235_v63 = vadd.f32 %v16686_v6, %v16574_v14  ;;  %v3820_v1 = vrot.slane %v3792_v23, %v18240_v54  ;;  %v3822_v33 = vcombine.high %v3806_v39, %v3806_v39  ;;  %v3823_v46 = vcombine.high %v3813_v11, %v3813_v11 }
 0x1e8   : > { %7187 = vmatprep.mubr.bf16.mxu0 %v19195_v56  ;;  %v5351_v34 = vrot.slane %v3813_v11, %v18528_v59  ;;  %v5355_v15 = vrot.slane %v3821_v50, %v18528_v59  ;;  %v6625_v58 = vsel %vm544_vm1, %v18264_v27, %v5347_v7  ;;  %v3839_v60 = vrot.slane %v3825_v5, %v18240_v54 }
 0x1e9   : > { %7437 = vmatmul.mubr.bf16.gmra.mrb[180].mxu1 %v18063_v53  ;;  %v3824_v6 = vcombine.high %v3820_v1, %v3820_v1  ;;  %v5359_v23 = vrot.slane %v3823_v46, %v18528_v59  ;;  %v5367_v11 = vrot.slane %v3820_v1, %v18528_v59  ;;  %v5371_v2 = vrot.slane %v3822_v33, %v18528_v59 }
 0x1ea   : > { %v19212_v42 = vpop.f32.mrb[76].mxu0  ;;  %7444 = vmatprep.mubr.bf16.mxu1 %v19132_v57  ;;  %v5363_v57 = vrot.slane %v3806_v39, %v18528_v59  ;;  %v6626_v39 = vsel %vm544_vm1, %v18281_v17, %v5351_v34  ;;  %v25055_v7 = vcombine.high %v18264_v27, %v18264_v27  ;;  %v3840_v16 = vcombine.high %v3832_v30, %v3832_v30 }
 0x1eb   : > { %v19226_v52 = vpop.f32.mrb[77].mxu0  ;;  %v5375_v1 = vrot.slane %v3824_v6, %v18528_v59  ;;  %v25056_v33 = vcombine.high %v18281_v17, %v18281_v17  ;;  %v6630_v34 = vsel %vm544_vm1, %v18284_v43, %v5367_v11  ;;  %v25057_v27 = vcombine.high %v18267_v35, %v18267_v35 }
 0x1ec   : > { %v19230_v37 = vpop.f32.mrb[78].mxu0  ;;  %v19241_v51 = vpop.f32.mrb[76].mxu1  ;;  %v6627_v5 = vsel %vm544_vm1, %v25055_v7, %v5355_v15  ;;  %v6629_v22 = vsel %vm544_vm1, %v18267_v35, %v5363_v57  ;;  %v13353_v57 = vcombine.low %v6625_v58, %v6626_v39  ;;  %v3841_v6 = vcombine.high %v3839_v60, %v3839_v60 }
 0x1ed   : > { %v19237_v53 = vpop.f32.mrb[79].mxu0  ;;  %v19248_v14 = vpop.f32.mrb[77].mxu1  ;;  %v6628_v46 = vsel %vm544_vm1, %v25056_v33, %v5359_v23  ;;  %v6631_v15 = vsel %vm544_vm1, %v25057_v27, %v5371_v2  ;;  %v13370_v12 = vcombine.low %v6629_v22, %v6630_v34  ;;  %v25058_v23 = vcombine.high %v18284_v43, %v18284_v43 }
 0x1ee   : > { %v19254_v50 = vpop.f32.mrb[78].mxu1  ;;  %v13354_v36 = vcombine.low %v6627_v5, %v6628_v46  ;;  %v3848_v35 = vrot.slane %v3832_v30, %v18240_v54  ;;  %v3855_v2 = vrot.slane %v3839_v60, %v18240_v54  ;;  %v3862_v33 = vrot.slane %v3840_v16, %v18240_v54 }
 0x1ef   : > { %7188 = vmatmul.mubr.bf16.gmra.mrb[184].mxu0 %v18097_v20  ;;  %v19264_v3 = vpop.f32.mrb[79].mxu1  ;;  %v6632_v11 = vsel %vm544_vm1, %v25058_v23, %v5375_v1  ;;  %v13361_v22 = vrot.slane %v13353_v57, %v19183_v18  ;;  %v13378_v39 = vrot.slane %v13370_v12, %v19183_v18  ;;  %v3869_v5 = vrot.slane %v3841_v6, %v18240_v54 }
 0x1f0   : > { %v13371_v58 = vcombine.low %v6631_v15, %v6632_v11  ;;  %v3870_v30 = vcombine.high %v3848_v35, %v3848_v35  ;;  %v3871_v60 = vcombine.high %v3855_v2, %v3855_v2  ;;  %v3872_v1 = vcombine.high %v3862_v33, %v3862_v33 }
 0x1f1   : > { %7445 = vmatmul.mubr.bf16.gmra.mrb[184].mxu1 %v18080_v9  ;;  %v13368_v9 = vrot.slane %v13354_v36, %v19183_v18  ;;  %v5379_v34 = vrot.slane %v3848_v35, %v18528_v59  ;;  %v5383_v36 = vrot.slane %v3862_v33, %v18528_v59  ;;  %v3873_v12 = vcombine.high %v3869_v5, %v3869_v5 }
 0x1f2   : > { %v19277_v7 = vpop.f32.mrb[80].mxu0  ;;  %7452 = vmatprep.mubr.bf16.mxu1 %v19195_v56  ;;  %v13385_v56 = vrot.slane %v13371_v58, %v19183_v18  ;;  %v5387_v57 = vrot.slane %v3870_v30, %v18528_v59  ;;  %v5391_v6 = vrot.slane %v3872_v1, %v18528_v59  ;;  %v5395_v23 = vrot.slane %v3855_v2, %v18528_v59 }
 0x1f3   : > { %v19281_v17 = vpop.f32.mrb[81].mxu0  ;;  %v13369_v46 = vcombine.low %v13361_v22, %v13368_v9  ;;  %v5399_v35 = vrot.slane %v3869_v5, %v18528_v59  ;;  %v5403_v33 = vrot.slane %v3871_v60, %v18528_v59  ;;  %v6633_v22 = vsel %vm544_vm1, %v18287_v8, %v5379_v34 }
 0x1f4   : > { %v19290_v27 = vpop.f32.mrb[82].mxu0  ;;  %v19299_v16 = vpop.f32.mrb[80].mxu1  ;;  %v13386_v19 = vcombine.low %v13378_v39, %v13385_v56  ;;  %v5407_v2 = vrot.slane %v3873_v12, %v18528_v59  ;;  %v6634_v58 = vsel %vm544_vm1, %v18306_v26, %v5383_v36  ;;  %v25059_v39 = vcombine.high %v18287_v8, %v18287_v8 }
 0x1f5   : > { %v19296_v43 = vpop.f32.mrb[83].mxu0  ;;  %v19304_v15 = vpop.f32.mrb[81].mxu1  ;;  %15913 = vst [vmem:[%s19313_s9] sm:$0xff] %v13369_v46  ;;  %v25060_v5 = vcombine.high %v18306_v26, %v18306_v26  ;;  %v6637_v46 = vsel %vm544_vm1, %v18295_v47, %v5395_v23  ;;  %v6638_v56 = vsel %vm544_vm1, %v18311_v41, %v5399_v35  ;;  %v25061_v34 = vcombine.high %v18295_v47, %v18295_v47 }
 0x1f6   : > { %v19309_v11 = vpop.f32.mrb[82].mxu1  ;;  %v6635_v30 = vsel %vm544_vm1, %v25059_v39, %v5387_v57  ;;  %15914 = vst [vmem:[%s19313_s9 + $0x8] sm:$0xff] %v13386_v19  ;;  %v13387_v36 = vcombine.low %v6633_v22, %v6634_v58  ;;  %v25062_v12 = vcombine.high %v18311_v41, %v18311_v41  ;;  %v3714_v23 = vadd.f32 %v18777_v55, %v19235_v63 }
 0x1f7   : > { %v19320_v9 = vpop.f32.mrb[83].mxu1  ;;  %v6636_v60 = vsel %vm544_vm1, %v25060_v5, %v5391_v6  ;;  %v6639_v8 = vsel %vm544_vm1, %v25061_v34, %v5403_v33  ;;  %v13404_v6 = vcombine.low %v6637_v46, %v6638_v56  ;;  %v16580_v41 = vadd.f32 %v19147_v61, %v19143_v4 }
 0x1f8   : > { %v6640_v19 = vsel %vm544_vm1, %v25062_v12, %v5407_v2  ;;  %v13388_v57 = vcombine.low %v6635_v30, %v6636_v60  ;;  %v13395_v47 = vrot.slane %v13387_v36, %v19183_v18  ;;  %v3874_v63 = vcombine.high %v3714_v23, %v3714_v23 }
 0x1f9   : > { %7453 = vmatmul.mubr.bf16.gmra.mrb[188].mxu1 %v18097_v20  ;;  %v13405_v33 = vcombine.low %v6639_v8, %v6640_v19  ;;  %v3597_v20 = vadd.f32 %v19223_v38, %v19221_v31  ;;  %v13412_v58 = vrot.slane %v13404_v6, %v19183_v18  ;;  %v3881_v39 = vrot.slane %v3714_v23, %v18240_v54 }
 0x1fa   : > { %v19333_v1 = vpop.f32.mrb[84].mxu0  ;;  %9800 = vmatprep.mubr.bf16.mxu1 %v18102_v24  ;;  %v13402_v2 = vrot.slane %v13388_v57, %v19183_v18  ;;  %v16692_v31 = vadd.f32 %v19185_v25, %v19176_v45  ;;  %v19374_v4 = vadd.f32 %v19165_v49, %v19157_v0  ;;  %v3888_v60 = vrot.slane %v3874_v63, %v18240_v54 }
 0x1fb   : > { %v19345_v26 = vpop.f32.mrb[85].mxu0  ;;  %v13419_v24 = vrot.slane %v13405_v33, %v19183_v18  ;;  %v3715_v5 = vadd.f32 %v18777_v55, %v3597_v20  ;;  %v3889_v46 = vcombine.high %v3881_v39, %v3881_v39  ;;  %v3897_v56 = vrot.slane %v3881_v39, %v18240_v54  ;;  %v17462_v20 = vld [vmem:[%s17822_s8] sm:$0xff]  }
 0x1fc   : > { %v19353_v35 = vpop.f32.mrb[86].mxu0  ;;  %v19366_v30 = vpop.f32.mrb[84].mxu1  ;;  %v13403_v38 = vcombine.low %v13395_v47, %v13402_v2  ;;  %v19383_v45 = vadd.f32 %v16692_v31, %v16580_v41  ;;  %v3890_v49 = vcombine.high %v3888_v60, %v3888_v60  ;;  %v3904_v36 = vrot.slane %v3888_v60, %v18240_v54 }
 0x1fd   : > { %v19361_v22 = vpop.f32.mrb[87].mxu0  ;;  %v19376_v61 = vpop.f32.mrb[85].mxu1  ;;  %v13420_v8 = vcombine.low %v13412_v58, %v13419_v24  ;;  %v3923_v55 = vcombine.high %v3715_v5, %v3715_v5  ;;  %v3930_v25 = vrot.slane %v3715_v5, %v18240_v54  ;;  %v3911_v12 = vrot.slane %v3889_v46, %v18240_v54 }
 0x1fe   : > { %v19380_v34 = vpop.f32.mrb[86].mxu1  ;;  %15915 = vst [vmem:[%s19313_s9 + $0x10] sm:$0xff] %v13403_v38  ;;  %v3919_v19 = vcombine.high %v3897_v56, %v3897_v56  ;;  %v5411_v6 = vrot.slane %v3897_v56, %v18528_v59  ;;  %v3918_v2 = vrot.slane %v3890_v49, %v18240_v54  ;;  %v3920_v58 = vcombine.high %v3904_v36, %v3904_v36 }
 0x1ff   : > { %v19385_v0 = vpop.f32.mrb[87].mxu1  ;;  %15916 = vst [vmem:[%s19313_s9 + $0x18] sm:$0xff] %v13420_v8  ;;  %v3937_v23 = vrot.slane %v3923_v55, %v18240_v54  ;;  %v3938_v47 = vcombine.high %v3930_v25, %v3930_v25  ;;  %v19396_v33 = vrot.slane %v3930_v25, %v18240_v54  ;;  %v3921_v63 = vcombine.high %v3911_v12, %v3911_v12 }
 0x200   : > { %v5415_v39 = vrot.slane %v3911_v12, %v18528_v59  ;;  %v5419_v5 = vrot.slane %v3919_v19, %v18528_v59  ;;  %v5427_v31 = vrot.slane %v3904_v36, %v18528_v59  ;;  %v6641_v38 = vsel %vm544_vm1, %v18315_v28, %v5411_v6  ;;  %v25065_v12 = vld [vmem:[#allocation28_spill] sm:$0xff] }
 0x201   : > { %9801 = vmatmul.mubr.bf16.vlgmr.msra.gmra.mrb[192].mxu1 %v17462_v20  ;;  %v3939_v60 = vcombine.high %v3937_v23, %v3937_v23  ;;  %v3922_v56 = vcombine.high %v3918_v2, %v3918_v2  ;;  %v5423_v8 = vrot.slane %v3921_v63, %v18528_v59  ;;  %v5431_v55 = vrot.slane %v3918_v2, %v18528_v59  ;;  %v25067_v20 = vld [vmem:[#allocation27_spill] sm:$0xff] }
 0x202   : > { %v19390_v57 = vpop.f32.mrb[88].mxu0  ;;  %9808 = vmatprep.mubr.bf16.mxu1 %v18113_v44  ;;  %v5435_v25 = vrot.slane %v3920_v58, %v18528_v59  ;;  %v6642_v19 = vsel %vm544_vm1, %v25065_v12, %v5415_v39  ;;  %v25066_v36 = vcombine.high %v18315_v28, %v18315_v28  ;;  %v6645_v32 = vsel %vm544_vm1, %v25067_v20, %v5427_v31  ;;  %v25070_v39 = vld [vmem:[#allocation30_spill] sm:$0xff] }
 0x203   : > { %v19399_v41 = vpop.f32.mrb[89].mxu0  ;;  %v3953_v40 = vrot.slane %v3937_v23, %v18240_v54  ;;  %v5439_v2 = vrot.slane %v3922_v56, %v18528_v59  ;;  %v25069_v58 = vcombine.high %v25065_v12, %v25065_v12  ;;  %v25071_v28 = vcombine.high %v25067_v20, %v25067_v20 }
 0x204   : > { %v19403_v24 = vpop.f32.mrb[90].mxu0  ;;  %v19415_v49 = vpop.f32.mrb[88].mxu1  ;;  %v6643_v6 = vsel %vm544_vm1, %v25066_v36, %v5419_v5  ;;  %v13421_v23 = vcombine.low %v6641_v38, %v6642_v19  ;;  %v3960_v56 = vrot.slane %v3938_v47, %v18240_v54  ;;  %v3967_v12 = vrot.slane %v3939_v60, %v18240_v54 }
 0x205   : > { %25063 = vst [vmem:[#allocation145_spill] sm:$0xff] %v19403_v24  ;;  %v19410_v46 = vpop.f32.mrb[91].mxu0  ;;  %v19426_v63 = vpop.f32.mrb[89].mxu1  ;;  %v6646_v24 = vsel %vm544_vm1, %v25070_v39, %v5431_v55  ;;  %v6647_v5 = vsel %vm544_vm1, %v25071_v28, %v5435_v25  ;;  %v3968_v25 = vcombine.high %v19396_v33, %v19396_v33  ;;  %v3969_v20 = vcombine.high %v3953_v40, %v3953_v40 }
 0x206   : > { %25064 = vst [vmem:[#allocation146_spill] sm:$0xff] %v19410_v46  ;;  %25068 = vst [vmem:[#allocation28_spill] sm:$0xff] %v19426_v63  ;;  %v6644_v46 = vsel %vm544_vm1, %v25069_v58, %v5423_v8  ;;  %v19439_v31 = vpop.f32.mrb[90].mxu1  ;;  %v13438_v29 = vcombine.low %v6645_v32, %v6646_v24  ;;  %v25072_v8 = vcombine.high %v25070_v39, %v25070_v39 }
 0x207   : > { %v13422_v36 = vcombine.low %v6643_v6, %v6644_v46  ;;  %v19442_v63 = vpop.f32.mrb[91].mxu1  ;;  %v13429_v38 = vrot.slane %v13421_v23, %v19183_v18  ;;  %v19457_v46 = vld [vmem:[%s17822_s8 + $0x8] sm:$0xff]   ;;  %v3970_v60 = vcombine.high %v3960_v56, %v3960_v56  ;;  %v3971_v6 = vcombine.high %v3967_v12, %v3967_v12  ;;  %v25076_v23 = vld [vmem:[#allocation13_spill] sm:$0xff] }
 0x208   : > { %v6648_v55 = vsel %vm544_vm1, %v25072_v8, %v5439_v2  ;;  %v13446_v24 = vrot.slane %v13438_v29, %v19183_v18  ;;  %v5443_v2 = vrot.slane %v19396_v33, %v18528_v59  ;;  %v5447_v39 = vrot.slane %v3960_v56, %v18528_v59 }
 0x209   : > { %v13436_v32 = vrot.slane %v13422_v36, %v19183_v18  ;;  %v13439_v47 = vcombine.low %v6647_v5, %v6648_v55  ;;  %9809 = vmatmul.mubr.bf16.gmra.mrb[196].mxu1 %v19457_v46  ;;  %v5451_v36 = vrot.slane %v3968_v25, %v18528_v59  ;;  %v5459_v8 = vrot.slane %v3953_v40, %v18528_v59 }
 0x20a   : > { %v19451_v58 = vpop.f32.mrb[92].mxu0  ;;  %9816 = vmatprep.mubr.bf16.mxu1 %v25076_v23  ;;  %v5463_v33 = vrot.slane %v3967_v12, %v18528_v59  ;;  %v5467_v56 = vrot.slane %v3969_v20, %v18528_v59  ;;  %v6650_v40 = vsel %vm544_vm1, %v18356_v10, %v5447_v39  ;;  %v25079_v20 = vcombine.high %v18356_v10, %v18356_v10 }
 0x20b   : > { %25073 = vst [vmem:[#allocation27_spill] sm:$0xff] %v19451_v58  ;;  %v19460_v19 = vpop.f32.mrb[93].mxu0  ;;  %v13437_v5 = vcombine.low %v13429_v38, %v13436_v32  ;;  %v13453_v29 = vrot.slane %v13439_v47, %v19183_v18  ;;  %v25077_v32 = vld [vmem:[#allocation29_spill] sm:$0xff]  ;;  %v25080_v39 = vcombine.high %v18348_v62, %v18348_v62 }
 0x20c   : > { %25074 = vst [vmem:[#allocation30_spill] sm:$0xff] %v19460_v19  ;;  %v19465_v28 = vpop.f32.mrb[94].mxu0  ;;  %v5455_v19 = vrot.slane %v3970_v60, %v18528_v59  ;;  %v19477_v58 = vpop.f32.mrb[92].mxu1  ;;  %v6649_v25 = vsel %vm544_vm1, %v25077_v32, %v5443_v2  ;;  %v25078_v47 = vcombine.high %v25077_v32, %v25077_v32  ;;  %v6654_v2 = vsel %vm544_vm1, %v18361_v13, %v5463_v33 }
 0x20d   : > { %25075 = vst [vmem:[#allocation147_spill] sm:$0xff] %v19465_v28  ;;  %v19471_v55 = vpop.f32.mrb[95].mxu0  ;;  %v5471_v28 = vrot.slane %v3971_v6, %v18528_v59  ;;  %v13454_v38 = vcombine.low %v13446_v24, %v13453_v29  ;;  %15921 = vst [vmem:[%s19313_s9 + $0x40] sm:$0xff] %v13437_v5  ;;  %v19488_v12 = vpop.f32.mrb[93].mxu1  ;;  %v6653_v24 = vsel %vm544_vm1, %v18348_v62, %v5459_v8  ;;  %v19514_v62 = vld [vmem:[%s24375_s2] ss:$0 sm:$0xff] }
 0x20e   : > { %v6651_v60 = vsel %vm544_vm1, %v25078_v47, %v5451_v36  ;;  %v6652_v6 = vsel %vm544_vm1, %v25079_v20, %v5455_v19  ;;  %v6655_v5 = vsel %vm544_vm1, %v25080_v39, %v5467_v56  ;;  %v19502_v29 = vpop.f32.mrb[94].mxu1  ;;  %v25081_v36 = vcombine.high %v18361_v13, %v18361_v13 }
 0x20f   : > { %15922 = vst [vmem:[%s19313_s9 + $0x48] sm:$0xff] %v13454_v38  ;;  %v13455_v19 = vcombine.low %v6649_v25, %v6650_v40  ;;  %v13456_v32 = vcombine.low %v6651_v60, %v6652_v6  ;;  %v13472_v8 = vcombine.low %v6653_v24, %v6654_v2  ;;  %v19509_v47 = vpop.f32.mrb[95].mxu1  ;;  %v3716_v56 = vadd.f32 %v19514_v62, %v19383_v45  ;;  %v19530_v6 = vld [vmem:[%s17822_s8 + $0x10] sm:$0xff]   ;;  %v25085_v2 = vld [vmem:[#allocation14_spill] sm:$0xff] }
 0x210   : > { %v6656_v10 = vsel %vm544_vm1, %v25081_v36, %v5471_v28  ;;  %v16695_v13 = vadd.f32 %v19207_v48, %v19192_v21  ;;  %v16586_v28 = vadd.f32 %v19226_v52, %v19212_v42  ;;  %v16698_v20 = vadd.f32 %v19248_v14, %v19241_v51 }
 0x211   : > { %v13473_v33 = vcombine.low %v6655_v5, %v6656_v10  ;;  %v13463_v25 = vrot.slane %v13455_v19, %v19183_v18  ;;  %v13470_v40 = vrot.slane %v13456_v32, %v19183_v18  ;;  %v13480_v60 = vrot.slane %v13472_v8, %v19183_v18  ;;  %9817 = vmatmul.mubr.bf16.gmra.mrb[200].mxu1 %v19530_v6 }
 0x212   : > { %v19522_v38 = vpop.f32.mrb[96].mxu0  ;;  %v3972_v42 = vcombine.high %v3716_v56, %v3716_v56  ;;  %v3979_v48 = vrot.slane %v3716_v56, %v18240_v54  ;;  %v3605_v52 = vadd.f32 %v16695_v13, %v19374_v4  ;;  %9824 = vmatprep.mubr.bf16.mxu1 %v25085_v2  ;;  %v3610_v51 = vadd.f32 %v16698_v20, %v16586_v28 }
 0x213   : > { %25082 = vst [vmem:[#allocation13_spill] sm:$0xff] %v19522_v38  ;;  %v19533_v45 = vpop.f32.mrb[97].mxu0  ;;  %v13487_v21 = vrot.slane %v13473_v33, %v19183_v18  ;;  %v13471_v39 = vcombine.low %v13463_v25, %v13470_v40  ;;  %v16589_v14 = vadd.f32 %v19237_v53, %v19230_v37  ;;  %v16701_v5 = vadd.f32 %v19264_v3, %v19254_v50 }
 0x214   : > { %25083 = vst [vmem:[#allocation29_spill] sm:$0xff] %v19533_v45  ;;  %v19538_v24 = vpop.f32.mrb[98].mxu0  ;;  %v3986_v19 = vrot.slane %v3972_v42, %v18240_v54  ;;  %v3987_v32 = vcombine.high %v3979_v48, %v3979_v48  ;;  %v3995_v4 = vrot.slane %v3979_v48, %v18240_v54  ;;  %v19549_v8 = vpop.f32.mrb[96].mxu1  ;;  %v3717_v33 = vadd.f32 %v19514_v62, %v3605_v52 }
 0x215   : > { %25084 = vst [vmem:[#allocation148_spill] sm:$0xff] %v19538_v24  ;;  %v19545_v36 = vpop.f32.mrb[99].mxu0  ;;  %v13488_v10 = vcombine.low %v13480_v60, %v13487_v21  ;;  %25087 = vst [vmem:[#allocation149_spill] sm:$0xff] %v19549_v8  ;;  %v19554_v56 = vadd.f32 %v19514_v62, %v3610_v51  ;;  %v19556_v37 = vadd.f32 %v16701_v5, %v16589_v14  ;;  %v19562_v53 = vpop.f32.mrb[97].mxu1  ;;  %v25091_v5 = vld [vmem:[#allocation31_spill] sm:$0xff] }
 0x216   : > { %25086 = vst [vmem:[#allocation14_spill] sm:$0xff] %v19545_v36  ;;  %15923 = vst [vmem:[%s19313_s9 + $0x50] sm:$0xff] %v13471_v39  ;;  %v19560_v3 = vadd.f32 %v19281_v17, %v19277_v7  ;;  %v3988_v50 = vcombine.high %v3986_v19, %v3986_v19  ;;  %v4002_v13 = vrot.slane %v3986_v19, %v18240_v54  ;;  %v19567_v40 = vpop.f32.mrb[98].mxu1  ;;  %v25092_v7 = vld [vmem:[#allocation15_spill] sm:$0xff] }
 0x217   : > { %25088 = vst [vmem:[#allocation150_spill] sm:$0xff] %v19562_v53  ;;  %15924 = vst [vmem:[%s19313_s9 + $0x58] sm:$0xff] %v13488_v10  ;;  %v4009_v28 = vrot.slane %v3987_v32, %v18240_v54  ;;  %v4017_v25 = vcombine.high %v3995_v4, %v3995_v4  ;;  %v5475_v60 = vrot.slane %v3995_v4, %v18528_v59  ;;  %v19573_v17 = vpop.f32.mrb[99].mxu1  ;;  %v19583_v32 = vld [vmem:[%s17822_s8 + $0x18] sm:$0xff]   ;;  %v25097_v24 = vld [vmem:[#allocation35_spill] sm:$0xff] }
 0x218   : > { %25089 = vst [vmem:[#allocation151_spill] sm:$0xff] %v19567_v40  ;;  %v4021_v20 = vcombine.high %v3717_v33, %v3717_v33  ;;  %v4028_v21 = vrot.slane %v3717_v33, %v18240_v54  ;;  %25090 = vst [vmem:[#allocation152_spill] sm:$0xff] %v19573_v17  ;;  %v4016_v42 = vrot.slane %v3988_v50, %v18240_v54  ;;  %v25095_v17 = vld [vmem:[#allocation32_spill] sm:$0xff] }
 0x219   : > { %v4018_v48 = vcombine.high %v4002_v13, %v4002_v13  ;;  %v4019_v52 = vcombine.high %v4009_v28, %v4009_v28  ;;  %v5479_v39 = vrot.slane %v4009_v28, %v18528_v59  ;;  %v5483_v51 = vrot.slane %v4017_v25, %v18528_v59  ;;  %9825 = vmatmul.mubr.bf16.gmra.mrb[204].mxu1 %v19583_v32  ;;  %v25093_v25 = vld [vmem:[#allocation33_spill] sm:$0xff] }
 0x21a   : > { %v5491_v14 = vrot.slane %v4002_v13, %v18528_v59  ;;  %v6657_v10 = vsel %vm544_vm1, %v25091_v5, %v5475_v60  ;;  %v4035_v19 = vrot.slane %v4021_v20, %v18240_v54  ;;  %v4020_v4 = vcombine.high %v4016_v42, %v4016_v42  ;;  %9832 = vmatprep.mubr.bf16.mxu1 %v25092_v7 }
 0x21b   : > { %v5487_v33 = vrot.slane %v4019_v52, %v18528_v59  ;;  %v5495_v50 = vrot.slane %v4016_v42, %v18528_v59  ;;  %v5499_v28 = vrot.slane %v4018_v48, %v18528_v59  ;;  %v6658_v13 = vsel %vm544_vm1, %v25093_v25, %v5479_v39 }
 0x21c   : > { %v25094_v60 = vcombine.high %v25091_v5, %v25091_v5  ;;  %v6661_v40 = vsel %vm544_vm1, %v25095_v17, %v5491_v14  ;;  %v4036_v36 = vcombine.high %v4028_v21, %v4028_v21  ;;  %v5503_v52 = vrot.slane %v4020_v4, %v18528_v59 }
 0x21d   : > { %v25096_v42 = vcombine.high %v25093_v25, %v25093_v25  ;;  %v6662_v53 = vsel %vm544_vm1, %v25097_v24, %v5495_v50  ;;  %v25098_v39 = vcombine.high %v25095_v17, %v25095_v17  ;;  %v4037_v14 = vcombine.high %v4035_v19, %v4035_v19 }
 0x21e   : > { %v6659_v20 = vsel %vm544_vm1, %v25094_v60, %v5483_v51  ;;  %v13489_v51 = vcombine.low %v6657_v10, %v6658_v13  ;;  %v13506_v8 = vcombine.low %v6661_v40, %v6662_v53  ;;  %v25099_v4 = vcombine.high %v25097_v24, %v25097_v24  ;;  %v19619_v40 = vpop.f32.mrb[100].mxu0 }
 0x21f   : > { %v6660_v48 = vsel %vm544_vm1, %v25096_v42, %v5487_v33  ;;  %v6663_v5 = vsel %vm544_vm1, %v25098_v39, %v5499_v28  ;;  %v4044_v25 = vrot.slane %v4028_v21, %v18240_v54  ;;  %v4051_v33 = vrot.slane %v4035_v19, %v18240_v54  ;;  %25100 = vst [vmem:[#allocation31_spill] sm:$0xff] %v19619_v40  ;;  %v19621_v28 = vpop.f32.mrb[100].mxu1  ;;  %v19632_v39 = vld [vmem:[%s17822_s8 + $0x20] sm:$0xff]  }
 0x220   : > { %v13490_v60 = vcombine.low %v6659_v20, %v6660_v48  ;;  %v6664_v45 = vsel %vm544_vm1, %v25099_v4, %v5503_v52  ;;  %v4058_v50 = vrot.slane %v4036_v36, %v18240_v54  ;;  %v13497_v42 = vrot.slane %v13489_v51, %v19183_v18  ;;  %25101 = vst [vmem:[#allocation15_spill] sm:$0xff] %v19621_v28  ;;  %v19624_v20 = vpop.f32.mrb[101].mxu0  ;;  %v19626_v36 = vpop.f32.mrb[101].mxu1  ;;  %v25104_v4 = vld [vmem:[#allocation16_spill] sm:$0xff]  ;;  %v25106_v28 = vld [vmem:[#allocation37_spill] sm:$0xff] }
 0x221   : > { %v13507_v10 = vcombine.low %v6663_v5, %v6664_v45  ;;  %v13514_v53 = vrot.slane %v13506_v8, %v19183_v18  ;;  %v4065_v24 = vrot.slane %v4037_v14, %v18240_v54  ;;  %v4066_v13 = vcombine.high %v4044_v25, %v4044_v25  ;;  %25102 = vst [vmem:[#allocation33_spill] sm:$0xff] %v19624_v20  ;;  %v25123_v20 = vld [vmem:[#allocation43_spill] sm:$0xff] }
 0x222   : > { %v13504_v17 = vrot.slane %v13490_v60, %v19183_v18  ;;  %v4067_v21 = vcombine.high %v4051_v33, %v4051_v33  ;;  %v4068_v19 = vcombine.high %v4058_v50, %v4058_v50  ;;  %25103 = vst [vmem:[#allocation32_spill] sm:$0xff] %v19626_v36  ;;  %v5507_v45 = vrot.slane %v4044_v25, %v18528_v59 }
 0x223   : > { %v13521_v48 = vrot.slane %v13507_v10, %v19183_v18  ;;  %v5511_v8 = vrot.slane %v4058_v50, %v18528_v59  ;;  %9833 = vmatmul.mubr.bf16.gmra.mrb[208].mxu1 %v19632_v39  ;;  %v4069_v5 = vcombine.high %v4065_v24, %v4065_v24  ;;  %v5515_v51 = vrot.slane %v4066_v13, %v18528_v59 }
 0x224   : > { %v13505_v52 = vcombine.low %v13497_v42, %v13504_v17  ;;  %v5519_v60 = vrot.slane %v4068_v19, %v18528_v59  ;;  %v5523_v14 = vrot.slane %v4051_v33, %v18528_v59  ;;  %9840 = vmatprep.mubr.bf16.mxu1 %v25104_v4  ;;  %v5527_v25 = vrot.slane %v4065_v24, %v18528_v59  ;;  %v25105_v17 = vld [vmem:[#allocation34_spill] sm:$0xff] }
 0x225   : > { %v13522_v42 = vcombine.low %v13514_v53, %v13521_v48  ;;  %v5531_v50 = vrot.slane %v4067_v21, %v18528_v59  ;;  %v6665_v10 = vsel %vm544_vm1, %v25105_v17, %v5507_v45  ;;  %v5535_v36 = vrot.slane %v4069_v5, %v18528_v59  ;;  %v19657_v21 = vpop.f32.mrb[102].mxu1  ;;  %v25111_v48 = vld [vmem:[#allocation36_spill] sm:$0xff]  ;;  %v25112_v5 = vld [vmem:[#allocation38_spill] sm:$0xff] }
 0x226   : > { %15929 = vst [vmem:[%s19313_s9 + $0x80] sm:$0xff] %v13505_v52  ;;  %v6666_v13 = vsel %vm544_vm1, %v25106_v28, %v5511_v8  ;;  %v25107_v19 = vcombine.high %v25105_v17, %v25105_v17  ;;  %v25108_v53 = vcombine.high %v25106_v28, %v25106_v28  ;;  %v19655_v52 = vpop.f32.mrb[102].mxu0  ;;  %25110 = vst [vmem:[#allocation16_spill] sm:$0xff] %v19657_v21 }
 0x227   : > { %25109 = vst [vmem:[#allocation35_spill] sm:$0xff] %v19655_v52  ;;  %15930 = vst [vmem:[%s19313_s9 + $0x88] sm:$0xff] %v13522_v42  ;;  %v6669_v45 = vsel %vm544_vm1, %v25111_v48, %v5523_v14  ;;  %v6670_v8 = vsel %vm544_vm1, %v25112_v5, %v5527_v25  ;;  %v25113_v17 = vcombine.high %v25111_v48, %v25111_v48  ;;  %v19668_v28 = vpop.f32.mrb[103].mxu0 }
 0x228   : > { %v6667_v33 = vsel %vm544_vm1, %v25107_v19, %v5515_v51  ;;  %v6668_v24 = vsel %vm544_vm1, %v25108_v53, %v5519_v60  ;;  %v13523_v19 = vcombine.low %v6665_v10, %v6666_v13  ;;  %25114 = vst [vmem:[#allocation34_spill] sm:$0xff] %v19668_v28  ;;  %v19670_v60 = vpop.f32.mrb[103].mxu1  ;;  %v25116_v53 = vcombine.high %v25112_v5, %v25112_v5 }
 0x229   : > { %v6671_v51 = vsel %vm544_vm1, %v25113_v17, %v5531_v50  ;;  %25115 = vst [vmem:[#allocation37_spill] sm:$0xff] %v19670_v60  ;;  %v13524_v14 = vcombine.low %v6667_v33, %v6668_v24  ;;  %v13540_v21 = vcombine.low %v6669_v45, %v6670_v8  ;;  %v4077_v25 = vrot.slane %v19554_v56, %v18240_v54 }
 0x22a   : > { %v6672_v42 = vsel %vm544_vm1, %v25116_v53, %v5535_v36  ;;  %v13531_v48 = vrot.slane %v13523_v19, %v19183_v18  ;;  %v25117_v50 = vcombine.high %v19554_v56, %v19554_v56  ;;  %v3719_v13 = vadd.f32 %v19514_v62, %v19556_v37  ;;  %v19691_v19 = vld [vmem:[%s17822_s8 + $0x28] sm:$0xff]  }
 0x22b   : > { %v13541_v52 = vcombine.low %v6671_v51, %v6672_v42  ;;  %v13538_v5 = vrot.slane %v13524_v14, %v19183_v18  ;;  %v13548_v36 = vrot.slane %v13540_v21, %v19183_v18  ;;  %v4085_v33 = vcombine.high %v4077_v25, %v4077_v25  ;;  %9841 = vmatmul.mubr.bf16.gmra.mrb[212].mxu1 %v19691_v19  ;;  %v25118_v42 = vld [vmem:[#allocation17_spill] sm:$0xff] }
 0x22c   : > { %v4084_v10 = vrot.slane %v25117_v50, %v18240_v54  ;;  %v4093_v24 = vrot.slane %v4077_v25, %v18240_v54  ;;  %v4119_v51 = vcombine.high %v3719_v13, %v3719_v13  ;;  %9848 = vmatprep.mubr.bf16.mxu1 %v25118_v42 }
 0x22d   : > { %v13555_v45 = vrot.slane %v13541_v52, %v19183_v18  ;;  %v13539_v56 = vcombine.low %v13531_v48, %v13538_v5  ;;  %v4107_v37 = vrot.slane %v4085_v33, %v18240_v54  ;;  %v25119_v48 = vld [vmem:[#allocation39_spill] sm:$0xff] }
 0x22e   : > { %v4086_v8 = vcombine.high %v4084_v10, %v4084_v10  ;;  %v4100_v17 = vrot.slane %v4084_v10, %v18240_v54  ;;  %v4115_v53 = vcombine.high %v4093_v24, %v4093_v24  ;;  %v5539_v21 = vrot.slane %v4093_v24, %v18528_v59 }
 0x22f   : > { %v13556_v14 = vcombine.low %v13548_v36, %v13555_v45  ;;  %15931 = vst [vmem:[%s19313_s9 + $0x90] sm:$0xff] %v13539_v56  ;;  %v4117_v10 = vcombine.high %v4107_v37, %v4107_v37  ;;  %v5543_v60 = vrot.slane %v4107_v37, %v18528_v59  ;;  %v25120_v45 = vld [vmem:[#allocation40_spill] sm:$0xff]  ;;  %v25121_v56 = vld [vmem:[#allocation41_spill] sm:$0xff] }
 0x230   : > { %v4114_v52 = vrot.slane %v4086_v8, %v18240_v54  ;;  %v4116_v25 = vcombine.high %v4100_v17, %v4100_v17  ;;  %v5555_v50 = vrot.slane %v4100_v17, %v18528_v59  ;;  %v5547_v28 = vrot.slane %v4115_v53, %v18528_v59 }
 0x231   : > { %v6673_v5 = vsel %vm544_vm1, %v25119_v48, %v5539_v21  ;;  %15932 = vst [vmem:[%s19313_s9 + $0x98] sm:$0xff] %v13556_v14  ;;  %v5551_v17 = vrot.slane %v4117_v10, %v18528_v59  ;;  %v6674_v37 = vsel %vm544_vm1, %v25121_v56, %v5543_v60  ;;  %v25122_v53 = vcombine.high %v25119_v48, %v25119_v48 }
 0x232   : > { %v4118_v33 = vcombine.high %v4114_v52, %v4114_v52  ;;  %v5559_v24 = vrot.slane %v4114_v52, %v18528_v59  ;;  %v5563_v36 = vrot.slane %v4116_v25, %v18528_v59  ;;  %v6677_v8 = vsel %vm544_vm1, %v25120_v45, %v5555_v50 }
 0x233   : > { %v6675_v21 = vsel %vm544_vm1, %v25122_v53, %v5547_v28  ;;  %v4126_v14 = vrot.slane %v3719_v13, %v18240_v54  ;;  %v25124_v50 = vcombine.high %v25120_v45, %v25120_v45  ;;  %v13557_v40 = vcombine.low %v6673_v5, %v6674_v37  ;;  %v19736_v5 = vld [vmem:[%s17822_s8 + $0x30] sm:$0xff]   ;;  %v19741_v37 = vpop.f32.mrb[104].mxu0 }
 0x234   : > { %v5567_v52 = vrot.slane %v4118_v33, %v18528_v59  ;;  %v6678_v25 = vsel %vm544_vm1, %v25123_v20, %v5559_v24  ;;  %v25125_v60 = vcombine.high %v25121_v56, %v25121_v56  ;;  %v4133_v28 = vrot.slane %v4119_v51, %v18240_v54  ;;  %9849 = vmatmul.mubr.bf16.gmra.mrb[216].mxu1 %v19736_v5 }
 0x235   : > { %v6679_v10 = vsel %vm544_vm1, %v25124_v50, %v5563_v36  ;;  %v13574_v38 = vcombine.low %v6677_v8, %v6678_v25  ;;  %v4134_v13 = vcombine.high %v4126_v14, %v4126_v14  ;;  %v25126_v33 = vcombine.high %v25123_v20, %v25123_v20  ;;  %25127 = vst [vmem:[#allocation36_spill] sm:$0xff] %v19741_v37  ;;  %v19743_v20 = vpop.f32.mrb[104].mxu1  ;;  %v19749_v50 = vpop.f32.mrb[105].mxu0 }
 0x236   : > { %v6676_v48 = vsel %vm544_vm1, %v25125_v60, %v5551_v17  ;;  %v13565_v45 = vrot.slane %v13557_v40, %v19183_v18  ;;  %v4142_v36 = vrot.slane %v4126_v14, %v18240_v54  ;;  %v4135_v17 = vcombine.high %v4133_v28, %v4133_v28  ;;  %25128 = vst [vmem:[#allocation38_spill] sm:$0xff] %v19743_v20  ;;  %v19788_v37 = vpop.f32.mrb[106].mxu0 }
 0x237   : > { %v6680_v24 = vsel %vm544_vm1, %v25126_v33, %v5567_v52  ;;  %v13558_v53 = vcombine.low %v6675_v21, %v6676_v48  ;;  %v13582_v8 = vrot.slane %v13574_v38, %v19183_v18  ;;  %v4149_v51 = vrot.slane %v4133_v28, %v18240_v54  ;;  %v25129_v52 = vld [vmem:[#allocation18_spill] sm:$0xff]  ;;  %25130 = vst [vmem:[#allocation17_spill] sm:$0xff] %v19749_v50  ;;  %v19751_v38 = vpop.f32.mrb[105].mxu1 }
 0x238   : > { %v13575_v56 = vcombine.low %v6679_v10, %v6680_v24  ;;  %9856 = vmatprep.mubr.bf16.mxu1 %v25129_v52  ;;  %v4156_v21 = vrot.slane %v4134_v13, %v18240_v54  ;;  %v4164_v14 = vcombine.high %v4142_v36, %v4142_v36  ;;  %v5571_v25 = vrot.slane %v4142_v36, %v18528_v59  ;;  %v19793_v52 = vld [vmem:[%s17822_s8 + $0x38] sm:$0xff]  }
 0x239   : > { %v13572_v40 = vrot.slane %v13558_v53, %v19183_v18  ;;  %25131 = vst [vmem:[#allocation39_spill] sm:$0xff] %v19751_v38  ;;  %v4163_v60 = vrot.slane %v4135_v17, %v18240_v54  ;;  %v4165_v48 = vcombine.high %v4149_v51, %v4149_v51  ;;  %v5587_v28 = vrot.slane %v4149_v51, %v18528_v59  ;;  %v25132_v17 = vld [vmem:[#allocation42_spill] sm:$0xff] }
 0x23a   : > { %v13589_v10 = vrot.slane %v13575_v56, %v19183_v18  ;;  %v4166_v24 = vcombine.high %v4156_v21, %v4156_v21  ;;  %v5575_v13 = vrot.slane %v4156_v21, %v18528_v59  ;;  %v5579_v53 = vrot.slane %v4164_v14, %v18528_v59 }
 0x23b   : > { %v13573_v33 = vcombine.low %v13565_v45, %v13572_v40  ;;  %v4167_v36 = vcombine.high %v4163_v60, %v4163_v60  ;;  %v5591_v50 = vrot.slane %v4163_v60, %v18528_v59  ;;  %v5595_v38 = vrot.slane %v4165_v48, %v18528_v59  ;;  %v25133_v45 = vld [vmem:[#allocation45_spill] sm:$0xff]  ;;  %v25136_v48 = vld [vmem:[#allocation47_spill] sm:$0xff] }
 0x23c   : > { %v13590_v20 = vcombine.low %v13582_v8, %v13589_v10  ;;  %v5583_v56 = vrot.slane %v4166_v24, %v18528_v59  ;;  %v6681_v51 = vsel %vm544_vm1, %v25132_v17, %v5571_v25  ;;  %v6682_v40 = vsel %vm544_vm1, %v25133_v45, %v5575_v13  ;;  %v25135_v10 = vld [vmem:[#allocation44_spill] sm:$0xff]  ;;  %9857 = vmatmul.mubr.bf16.gmra.mrb[220].mxu1 %v19793_v52 }
 0x23d   : > { %15937 = vst [vmem:[%s19313_s9 + $0xc0] sm:$0xff] %v13573_v33  ;;  %v25134_v8 = vcombine.high %v25132_v17, %v25132_v17  ;;  %v5599_v14 = vrot.slane %v4167_v36, %v18528_v59  ;;  %v6685_v60 = vsel %vm544_vm1, %v25135_v10, %v5587_v28  ;;  %v6686_v33 = vsel %vm544_vm1, %v25136_v48, %v5591_v50  ;;  %v16171_v28 = vld [vmem:[%s17822_s8 + $0x7c] sm:$0xf]  ;;  %v19790_v50 = vpop.f32.mrb[106].mxu1 }
 0x23e   : > { %15938 = vst [vmem:[%s19313_s9 + $0xc8] sm:$0xff] %v13590_v20  ;;  %v25137_v25 = vcombine.high %v25135_v10, %v25135_v10  ;;  %v25138_v13 = vcombine.high %v25133_v45, %v25133_v45  ;;  %v13608_v20 = vcombine.low %v6685_v60, %v6686_v33  ;;  %v16704_v36 = vadd.f32 %v19304_v15, %v19299_v16  ;;  %v19804_v15 = vpop.f32.mrb[107].mxu0  ;;  %v25143_v10 = vld [vmem:[#allocation19_spill] sm:$0xff] }
 0x23f   : > { %v6683_v21 = vsel %vm544_vm1, %v25134_v8, %v5579_v53  ;;  %v13591_v53 = vcombine.low %v6681_v51, %v6682_v40  ;;  %v16170_v8 = vld [vmem:[%s17822_s8 + $0x78] sm:$0xf]  ;;  %25139 = vst [vmem:[#allocation40_spill] sm:$0xff] %v19790_v50  ;;  %v16595_v45 = vadd.f32 %v19296_v43, %v19290_v27  ;;  %v16707_v16 = vadd.f32 %v19320_v9, %v19309_v11  ;;  %v19806_v40 = vpop.f32.mrb[107].mxu1 }
 0x240   : > { %v6687_v24 = vsel %vm544_vm1, %v25137_v25, %v5595_v38  ;;  %v6684_v17 = vsel %vm544_vm1, %v25138_v13, %v5583_v56  ;;  %v25140_v38 = vcombine.high %v25136_v48, %v25136_v48  ;;  %25141 = vst [vmem:[#allocation41_spill] sm:$0xff] %v19804_v15  ;;  %25142 = vst [vmem:[#allocation43_spill] sm:$0xff] %v19806_v40  ;;  %9864 = vmatprep.mubr.bf16.mxu1 %v25143_v10  ;;  %v25153_v15 = vld [vmem:[#allocation21_spill] sm:$0xff] }
 0x241   : > { %v13592_v51 = vcombine.low %v6683_v21, %v6684_v17  ;;  %v13599_v60 = vrot.slane %v13591_v53, %v19183_v18  ;;  %v13616_v48 = vrot.slane %v13608_v20, %v19183_v18  ;;  %v3621_v27 = vadd.f32 %v16707_v16, %v16595_v45  ;;  %v19839_v45 = vld [vmem:[%s17822_s8 + $0x40] sm:$0xff]  }
 0x242   : > { %v6688_v56 = vsel %vm544_vm1, %v25140_v38, %v5599_v14  ;;  %v3618_v14 = vadd.f32 %v16704_v36, %v19560_v3  ;;  %v308_v43 = vmul.bf16 0.0, %v16170_v8  ;;  %v309_v25 = vmul.bf16 0.0, %v16171_v28 }
 0x243   : > { %v13609_v33 = vcombine.low %v6687_v24, %v6688_v56  ;;  %v13606_v21 = vrot.slane %v13592_v51, %v19183_v18  ;;  %v16598_v13 = vadd.f32 %v19345_v26, %v19333_v1  ;;  %v16710_v24 = vadd.f32 %v19376_v61, %v19366_v30 }
 0x244   : > { %v3720_v9 = vadd.f32 %v19514_v62, %v3618_v14  ;;  %v3721_v3 = vadd.f32 %v19514_v62, %v3621_v27  ;;  %v19820_v53 = vcombine.low %v308_v43, %v309_v25  ;;  %v19824_v20 = vadd.f32 %v19361_v22, %v19353_v35  ;;  %9865 = vmatmul.mubr.bf16.gmra.mrb[224].mxu1 %v19839_v45  ;;  %v25145_v14 = vld [vmem:[#allocation20_spill] sm:$0xff] }
 0x245   : > { %v13623_v11 = vrot.slane %v13609_v33, %v19183_v18  ;;  %v13607_v17 = vcombine.low %v13599_v60, %v13606_v21  ;;  %v3626_v38 = vadd.f32 %v16710_v24, %v16598_v13  ;;  %9872 = vmatprep.mubr.bf16.mxu1 %v25145_v14 }
 0x246   : > { %25144 = vst [vmem:[#allocation42_spill] sm:$0xff] %v19820_v53  ;;  %v4168_v8 = vcombine.high %v3720_v9, %v3720_v9  ;;  %v4175_v28 = vrot.slane %v3720_v9, %v18240_v54  ;;  %v4217_v1 = vcombine.high %v3721_v3, %v3721_v3  ;;  %v4224_v26 = vrot.slane %v3721_v3, %v18240_v54 }
 0x247   : > { %v13624_v36 = vcombine.low %v13616_v48, %v13623_v11  ;;  %15939 = vst [vmem:[%s19313_s9 + $0xd0] sm:$0xff] %v13607_v17  ;;  %7195 = vmatprep.mubr.bf16.mxu0 %v19820_v53  ;;  %v24642_v30 = vshrl.u32 %v19820_v53, 16  ;;  %v19836_v51 = vadd.f32 %v19514_v62, %v3626_v38 }
 0x248   : > { %v4182_v35 = vrot.slane %v4168_v8, %v18240_v54  ;;  %v4183_v22 = vcombine.high %v4175_v28, %v4175_v28  ;;  %v4191_v56 = vrot.slane %v4175_v28, %v18240_v54  ;;  %v4231_v16 = vrot.slane %v4217_v1, %v18240_v54  ;;  %v25146_v1 = vld [vmem:[#allocation46_spill] sm:$0xff] }
 0x249   : > { %15940 = vst [vmem:[%s19313_s9 + $0xd8] sm:$0xff] %v13624_v36  ;;  %v4232_v60 = vcombine.high %v4224_v26, %v4224_v26  ;;  %v4240_v33 = vrot.slane %v4224_v26, %v18240_v54  ;;  %v19846_v48 = vrot.slane %v24642_v30, 7  ;;  %v25149_v30 = vld [vmem:[#allocation48_spill] sm:$0xff] }
 0x24a   : > { %v4184_v21 = vcombine.high %v4182_v35, %v4182_v35  ;;  %v4198_v27 = vrot.slane %v4182_v35, %v18240_v54  ;;  %v4205_v43 = vrot.slane %v4183_v22, %v18240_v54  ;;  %v4213_v25 = vcombine.high %v4191_v56, %v4191_v56 }
 0x24b   : > { %v5603_v11 = vrot.slane %v4191_v56, %v18528_v59  ;;  %v4233_v9 = vcombine.high %v4231_v16, %v4231_v16  ;;  %v4247_v13 = vrot.slane %v4231_v16, %v18240_v54  ;;  %v4254_v24 = vrot.slane %v4232_v60, %v18240_v54 }
 0x24c   : > { %v4212_v17 = vrot.slane %v4184_v21, %v18240_v54  ;;  %v4214_v3 = vcombine.high %v4198_v27, %v4198_v27  ;;  %v4215_v36 = vcombine.high %v4205_v43, %v4205_v43  ;;  %v5607_v8 = vrot.slane %v4205_v43, %v18528_v59  ;;  %v25147_v21 = vld [vmem:[#allocation49_spill] sm:$0xff] }
 0x24d   : > { %v5611_v28 = vrot.slane %v4213_v25, %v18528_v59  ;;  %v5619_v38 = vrot.slane %v4198_v27, %v18528_v59  ;;  %v6689_v26 = vsel %vm544_vm1, %v25146_v1, %v5603_v11  ;;  %v4261_v35 = vrot.slane %v4233_v9, %v18240_v54 }
 0x24e   : > { %v4216_v22 = vcombine.high %v4212_v17, %v4212_v17  ;;  %v5615_v56 = vrot.slane %v4215_v36, %v18528_v59  ;;  %v5623_v16 = vrot.slane %v4212_v17, %v18528_v59  ;;  %v5627_v60 = vrot.slane %v4214_v3, %v18528_v59  ;;  %v25151_v3 = vld [vmem:[#allocation50_spill] sm:$0xff] }
 0x24f   : > { %v6690_v43 = vsel %vm544_vm1, %v25147_v21, %v5607_v8  ;;  %v25148_v25 = vcombine.high %v25146_v1, %v25146_v1  ;;  %v6693_v11 = vsel %vm544_vm1, %v25149_v30, %v5619_v38  ;;  %v4262_v61 = vcombine.high %v4240_v33, %v4240_v33 }
 0x250   : > { %v5631_v9 = vrot.slane %v4216_v22, %v18528_v59  ;;  %v25150_v36 = vcombine.high %v25147_v21, %v25147_v21  ;;  %v6694_v40 = vsel %vm544_vm1, %v25151_v3, %v5623_v16  ;;  %v25152_v8 = vcombine.high %v25149_v30, %v25149_v30 }
 0x251   : > { %v6691_v27 = vsel %vm544_vm1, %v25148_v25, %v5611_v28  ;;  %v19884_v28 = vld [vmem:[%s17822_s8 + $0x48] sm:$0xff]   ;;  %v13625_v38 = vcombine.low %v6689_v26, %v6690_v43  ;;  %v13642_v22 = vcombine.low %v6693_v11, %v6694_v40  ;;  %v4263_v50 = vcombine.high %v4247_v13, %v4247_v13 }
 0x252   : > { %v6692_v17 = vsel %vm544_vm1, %v25150_v36, %v5615_v56  ;;  %v6695_v1 = vsel %vm544_vm1, %v25152_v8, %v5627_v60  ;;  %9873 = vmatmul.mubr.bf16.gmra.mrb[228].mxu1 %v19884_v28  ;;  %v25154_v56 = vcombine.high %v25151_v3, %v25151_v3  ;;  %v4264_v21 = vcombine.high %v4254_v24, %v4254_v24  ;;  %v19893_v60 = vpop.f32.mrb[108].mxu0  ;;  %v19895_v8 = vpop.f32.mrb[108].mxu1 }
 0x253   : > { %v13626_v25 = vcombine.low %v6691_v27, %v6692_v17  ;;  %9880 = vmatprep.mubr.bf16.mxu1 %v25153_v15  ;;  %v4265_v36 = vcombine.high %v4261_v35, %v4261_v35  ;;  %v5635_v30 = vrot.slane %v4240_v33, %v18528_v59  ;;  %25155 = vst [vmem:[#allocation45_spill] sm:$0xff] %v19895_v8  ;;  %v19900_v11 = vpop.f32.mrb[109].mxu0  ;;  %v19902_v17 = vpop.f32.mrb[109].mxu1 }
 0x254   : > { %v6696_v16 = vsel %vm544_vm1, %v25154_v56, %v5631_v9  ;;  %v13633_v26 = vrot.slane %v13625_v38, %v19183_v18  ;;  %v13650_v27 = vrot.slane %v13642_v22, %v19183_v18  ;;  %25156 = vst [vmem:[#allocation44_spill] sm:$0xff] %v19900_v11  ;;  %25157 = vst [vmem:[#allocation47_spill] sm:$0xff] %v19902_v17  ;;  %v25159_v11 = vld [vmem:[#allocation53_spill] sm:$0xff] }
 0x255   : > { %v13640_v40 = vrot.slane %v13626_v25, %v19183_v18  ;;  %v13643_v43 = vcombine.low %v6695_v1, %v6696_v16  ;;  %v5639_v9 = vrot.slane %v4254_v24, %v18528_v59  ;;  %v5643_v33 = vrot.slane %v4262_v61, %v18528_v59  ;;  %v25158_v16 = vld [vmem:[#allocation51_spill] sm:$0xff] }
 0x256   : > { %v5647_v3 = vrot.slane %v4264_v21, %v18528_v59  ;;  %v5651_v56 = vrot.slane %v4247_v13, %v18528_v59  ;;  %v5655_v1 = vrot.slane %v4261_v35, %v18528_v59  ;;  %v5659_v25 = vrot.slane %v4263_v50, %v18528_v59 }
 0x257   : > { %v13641_v8 = vcombine.low %v13633_v26, %v13640_v40  ;;  %v13657_v38 = vrot.slane %v13643_v43, %v19183_v18  ;;  %v5663_v22 = vrot.slane %v4265_v36, %v18528_v59  ;;  %v6697_v17 = vsel %vm544_vm1, %v25158_v16, %v5635_v30  ;;  %v25162_v36 = vld [vmem:[#allocation52_spill] sm:$0xff]  ;;  %v25163_v26 = vld [vmem:[#allocation54_spill] sm:$0xff]  ;;  %v19929_v43 = vpop.f32.mrb[110].mxu0 }
 0x258   : > { %v6698_v61 = vsel %vm544_vm1, %v25159_v11, %v5639_v9  ;;  %v25160_v24 = vcombine.high %v25158_v16, %v25158_v16  ;;  %v25161_v50 = vcombine.high %v25159_v11, %v25159_v11  ;;  %v6701_v30 = vsel %vm544_vm1, %v25162_v36, %v5651_v56  ;;  %v19931_v9 = vpop.f32.mrb[110].mxu1  ;;  %v19941_v56 = vpop.f32.mrb[111].mxu0 }
 0x259   : > { %v13658_v21 = vcombine.low %v13650_v27, %v13657_v38  ;;  %15945 = vst [vmem:[%s19313_s9 + $0x100] sm:$0xff] %v13641_v8  ;;  %v6702_v40 = vsel %vm544_vm1, %v25163_v26, %v5655_v1  ;;  %v25165_v27 = vcombine.high %v25163_v26, %v25163_v26  ;;  %v19943_v16 = vpop.f32.mrb[111].mxu1  ;;  %v19946_v1 = vld [vmem:[%s17822_s8 + $0x50] sm:$0xff]  }
 0x25a   : > { %v6699_v13 = vsel %vm544_vm1, %v25160_v24, %v5643_v33  ;;  %v6700_v35 = vsel %vm544_vm1, %v25161_v50, %v5647_v3  ;;  %v25164_v33 = vcombine.high %v25162_v36, %v25162_v36  ;;  %v13659_v3 = vcombine.low %v6697_v17, %v6698_v61  ;;  %9881 = vmatmul.mubr.bf16.gmra.mrb[232].mxu1 %v19946_v1  ;;  %v25167_v17 = vld [vmem:[#allocation22_spill] sm:$0xff] }
 0x25b   : > { %v6704_v11 = vsel %vm544_vm1, %v25165_v27, %v5663_v22  ;;  %v13660_v38 = vcombine.low %v6699_v13, %v6700_v35  ;;  %15946 = vst [vmem:[%s19313_s9 + $0x108] sm:$0xff] %v13658_v21  ;;  %v13676_v24 = vcombine.low %v6701_v30, %v6702_v40  ;;  %v4266_v22 = vcombine.high %v19836_v51, %v19836_v51 }
 0x25c   : > { %v6703_v8 = vsel %vm544_vm1, %v25164_v33, %v5659_v25  ;;  %v25166_v25 = vshll.u32 %v19820_v53, 16  ;;  %9888 = vmatprep.mubr.bf16.mxu1 %v25167_v17  ;;  %v13667_v61 = vrot.slane %v13659_v3, %v19183_v18  ;;  %v4273_v35 = vrot.slane %v19836_v51, %v18240_v54 }
 0x25d   : > { %v13677_v50 = vcombine.low %v6703_v8, %v6704_v11  ;;  %v13674_v13 = vrot.slane %v13660_v38, %v19183_v18  ;;  %v16713_v21 = vadd.f32 %v19385_v0, %v19380_v34  ;;  %v13684_v30 = vrot.slane %v13676_v24, %v19183_v18 }
 0x25e   : > { %v525_v36 = vor.u32 %v25166_v25, %v19846_v48  ;;  %v4280_v33 = vrot.slane %v4266_v22, %v18240_v54  ;;  %v4281_v27 = vcombine.high %v4273_v35, %v4273_v35  ;;  %v4289_v11 = vrot.slane %v4273_v35, %v18240_v54 }
 0x25f   : > { %v13691_v48 = vrot.slane %v13677_v50, %v19183_v18  ;;  %v13675_v8 = vcombine.low %v13667_v61, %v13674_v13  ;;  %v3629_v51 = vadd.f32 %v16713_v21, %v19824_v20  ;;  %v16604_v0 = vadd.f32 %v19399_v41, %v19390_v57  ;;  %v25170_v21 = vld [vmem:[#allocation56_spill] sm:$0xff] }
 0x260   : > { %v564_v40 = vsel %vm17844_vm2, 0, %v525_v36  ;;  %v4282_v38 = vcombine.high %v4280_v33, %v4280_v33  ;;  %v4296_v34 = vrot.slane %v4280_v33, %v18240_v54  ;;  %v4303_v24 = vrot.slane %v4281_v27, %v18240_v54  ;;  %v25172_v27 = vld [vmem:[#allocation23_spill] sm:$0xff] }
 0x261   : > { %7196 = vmatmul.mubr.bf16.gmra.mrb[188].mxu0 %v564_v40  ;;  %v13692_v3 = vcombine.low %v13684_v30, %v13691_v48  ;;  %15947 = vst [vmem:[%s19313_s9 + $0x110] sm:$0xff] %v13675_v8  ;;  %v4311_v50 = vcombine.high %v4289_v11, %v4289_v11  ;;  %v5667_v25 = vrot.slane %v4289_v11, %v18528_v59  ;;  %v19987_v48 = vld [vmem:[%s17822_s8 + $0x58] sm:$0xff]   ;;  %v25171_v8 = vld [vmem:[#allocation57_spill] sm:$0xff] }
 0x262   : > { %9543 = vmatprep.mubr.bf16.mxu0 %v18113_v44  ;;  %v3723_v36 = vadd.f32 %v19514_v62, %v3629_v51  ;;  %v4310_v20 = vrot.slane %v4282_v38, %v18240_v54  ;;  %v4312_v22 = vcombine.high %v4296_v34, %v4296_v34  ;;  %v5683_v61 = vrot.slane %v4296_v34, %v18528_v59  ;;  %v25169_v44 = vld [vmem:[#allocation28_spill] sm:$0xff]  ;;  %v25173_v51 = vld [vmem:[#allocation58_spill] sm:$0xff] }
 0x263   : > { %15948 = vst [vmem:[%s19313_s9 + $0x118] sm:$0xff] %v13692_v3  ;;  %v16716_v13 = vadd.f32 %v25169_v44, %v19415_v49  ;;  %v4313_v35 = vcombine.high %v4303_v24, %v4303_v24  ;;  %v5671_v57 = vrot.slane %v4303_v24, %v18528_v59  ;;  %v5675_v41 = vrot.slane %v4311_v50, %v18528_v59 }
 0x264   : > { %v6705_v30 = vsel %vm544_vm1, %v25170_v21, %v5667_v25  ;;  %9889 = vmatmul.mubr.bf16.gmra.mrb[236].mxu1 %v19987_v48  ;;  %v4314_v26 = vcombine.high %v4310_v20, %v4310_v20  ;;  %v5687_v40 = vrot.slane %v4310_v20, %v18528_v59  ;;  %v5691_v33 = vrot.slane %v4312_v22, %v18528_v59  ;;  %v25175_v25 = vld [vmem:[#allocation60_spill] sm:$0xff] }
 0x265   : > { %v6709_v49 = vsel %vm544_vm1, %v25171_v8, %v5683_v61  ;;  %9896 = vmatprep.mubr.bf16.mxu1 %v25172_v27  ;;  %v5679_v11 = vrot.slane %v4313_v35, %v18528_v59  ;;  %v6706_v3 = vsel %vm544_vm1, %v25173_v51, %v5671_v57  ;;  %v25174_v38 = vcombine.high %v25170_v21, %v25170_v21 }
 0x266   : > { %v4315_v24 = vcombine.high %v3723_v36, %v3723_v36  ;;  %v5695_v50 = vrot.slane %v4314_v26, %v18528_v59  ;;  %v6710_v20 = vsel %vm544_vm1, %v25175_v25, %v5687_v40  ;;  %v25176_v22 = vcombine.high %v25171_v8, %v25171_v8 }
 0x267   : > { %v6707_v34 = vsel %vm544_vm1, %v25174_v38, %v5675_v41  ;;  %v13693_v44 = vcombine.low %v6705_v30, %v6706_v3  ;;  %v25177_v35 = vcombine.high %v25173_v51, %v25173_v51  ;;  %v13710_v21 = vcombine.low %v6709_v49, %v6710_v20  ;;  %v20023_v3 = vpop.f32.mrb[112].mxu0 }
 0x268   : > { %v6711_v61 = vsel %vm544_vm1, %v25176_v22, %v5691_v33  ;;  %v4322_v41 = vrot.slane %v3723_v36, %v18240_v54  ;;  %v4329_v38 = vrot.slane %v4315_v24, %v18240_v54  ;;  %v25178_v26 = vcombine.high %v25175_v25, %v25175_v25 }
 0x269   : > { %v6708_v57 = vsel %vm544_vm1, %v25177_v35, %v5679_v11  ;;  %9544 = vmatmul.mubr.bf16.vlgmr.msra.gmra.mrb[192].mxu0 %v19457_v46  ;;  %v13701_v30 = vrot.slane %v13693_v44, %v19183_v18  ;;  %v3634_v33 = vadd.f32 %v16716_v13, %v16604_v0  ;;  %v13718_v49 = vrot.slane %v13710_v21, %v19183_v18  ;;  %v20025_v46 = vpop.f32.mrb[112].mxu1  ;;  %v20031_v13 = vpop.f32.mrb[113].mxu0  ;;  %v25181_v44 = vld [vmem:[#allocation146_spill] sm:$0xff] }
 0x26a   : > { %v6712_v40 = vsel %vm544_vm1, %v25178_v26, %v5695_v50  ;;  %v13694_v8 = vcombine.low %v6707_v34, %v6708_v57  ;;  %9551 = vmatprep.mubr.bf16.mxu0 %v25076_v23  ;;  %v4330_v36 = vcombine.high %v4322_v41, %v4322_v41  ;;  %v4331_v11 = vcombine.high %v4329_v38, %v4329_v38  ;;  %v20033_v23 = vpop.f32.mrb[113].mxu1  ;;  %v20041_v57 = vld [vmem:[%s17822_s8 + $0x60] sm:$0xff]  }
 0x26b   : > { %v13711_v51 = vcombine.low %v6711_v61, %v6712_v40  ;;  %v4338_v50 = vrot.slane %v4322_v41, %v18240_v54  ;;  %v4345_v34 = vrot.slane %v4329_v38, %v18240_v54  ;;  %v3724_v0 = vadd.f32 %v19514_v62, %v3634_v33  ;;  %25179 = vst [vmem:[#allocation19_spill] sm:$0xff] %v20033_v23  ;;  %v25180_v61 = vld [vmem:[#allocation145_spill] sm:$0xff]  ;;  %v25182_v40 = vld [vmem:[#allocation24_spill] sm:$0xff]  ;;  %v20054_v53 = vpop.f32.mrb[114].mxu1 }
 0x26c   : > { %v13708_v24 = vrot.slane %v13694_v8, %v19183_v18  ;;  %v4352_v20 = vrot.slane %v4330_v36, %v18240_v54  ;;  %v4359_v22 = vrot.slane %v4331_v11, %v18240_v54  ;;  %v16607_v35 = vadd.f32 %v25181_v44, %v25180_v61  ;;  %9897 = vmatmul.mubr.bf16.gmra.mrb[240].mxu1 %v20041_v57 }
 0x26d   : > { %v13725_v25 = vrot.slane %v13711_v51, %v19183_v18  ;;  %v4360_v41 = vcombine.high %v4338_v50, %v4338_v50  ;;  %v4361_v38 = vcombine.high %v4345_v34, %v4345_v34  ;;  %v5699_v26 = vrot.slane %v4338_v50, %v18528_v59  ;;  %9904 = vmatprep.mubr.bf16.mxu1 %v25182_v40 }
 0x26e   : > { %v13709_v21 = vcombine.low %v13701_v30, %v13708_v24  ;;  %v4362_v33 = vcombine.high %v4352_v20, %v4352_v20  ;;  %v4363_v51 = vcombine.high %v4359_v22, %v4359_v22  ;;  %v5703_v36 = vrot.slane %v4352_v20, %v18528_v59  ;;  %v20052_v24 = vpop.f32.mrb[114].mxu0  ;;  %25184 = vst [vmem:[#allocation46_spill] sm:$0xff] %v20054_v53  ;;  %v25191_v53 = vld [vmem:[#allocation65_spill] sm:$0xff] }
 0x26f   : > { %v13726_v8 = vcombine.low %v13718_v49, %v13725_v25  ;;  %v5707_v11 = vrot.slane %v4360_v41, %v18528_v59  ;;  %v5715_v61 = vrot.slane %v4345_v34, %v18528_v59  ;;  %v5719_v44 = vrot.slane %v4359_v22, %v18528_v59  ;;  %25183 = vst [vmem:[#allocation20_spill] sm:$0xff] %v20052_v24  ;;  %v25185_v25 = vld [vmem:[#allocation59_spill] sm:$0xff]  ;;  %v20064_v34 = vpop.f32.mrb[115].mxu0  ;;  %v20066_v22 = vpop.f32.mrb[115].mxu1 }
 0x270   : > { %15953 = vst [vmem:[%s19313_s9 + $0x140] sm:$0xff] %v13709_v21  ;;  %v5723_v30 = vrot.slane %v4361_v38, %v18528_v59  ;;  %v5711_v49 = vrot.slane %v4362_v33, %v18528_v59  ;;  %v5727_v50 = vrot.slane %v4363_v51, %v18528_v59  ;;  %v6713_v20 = vsel %vm544_vm1, %v25185_v25, %v5699_v26  ;;  %v25186_v21 = vld [vmem:[#allocation62_spill] sm:$0xff]  ;;  %v25190_v33 = vld [vmem:[#allocation61_spill] sm:$0xff] }
 0x271   : > { %15954 = vst [vmem:[%s19313_s9 + $0x148] sm:$0xff] %v13726_v8  ;;  %v6714_v41 = vsel %vm544_vm1, %v25186_v21, %v5703_v36  ;;  %9552 = vmatmul.mubr.bf16.gmra.mrb[196].mxu0 %v19530_v6  ;;  %25187 = vst [vmem:[#allocation49_spill] sm:$0xff] %v20064_v34  ;;  %v25189_v38 = vcombine.high %v25185_v25, %v25185_v25  ;;  %v6717_v51 = vsel %vm544_vm1, %v25190_v33, %v5715_v61 }
 0x272   : > { %25188 = vst [vmem:[#allocation48_spill] sm:$0xff] %v20066_v22  ;;  %v6718_v26 = vsel %vm544_vm1, %v25191_v53, %v5719_v44  ;;  %v25192_v36 = vcombine.high %v25190_v33, %v25190_v33  ;;  %9559 = vmatprep.mubr.bf16.mxu0 %v25085_v2  ;;  %v25193_v22 = vcombine.high %v25186_v21, %v25186_v21 }
 0x273   : > { %v6715_v8 = vsel %vm544_vm1, %v25189_v38, %v5707_v11  ;;  %v25194_v11 = vcombine.high %v25191_v53, %v25191_v53  ;;  %v13727_v38 = vcombine.low %v6713_v20, %v6714_v41  ;;  %v13744_v34 = vcombine.low %v6717_v51, %v6718_v26  ;;  %v20097_v53 = vld [vmem:[%s17822_s8 + $0x68] sm:$0xff]   ;;  %v25198_v51 = vld [vmem:[#allocation147_spill] sm:$0xff] }
 0x274   : > { %v6719_v6 = vsel %vm544_vm1, %v25192_v36, %v5723_v30  ;;  %v6716_v25 = vsel %vm544_vm1, %v25193_v22, %v5711_v49  ;;  %v4364_v23 = vcombine.high %v3724_v0, %v3724_v0  ;;  %v4371_v33 = vrot.slane %v3724_v0, %v18240_v54  ;;  %v25195_v49 = vld [vmem:[#allocation27_spill] sm:$0xff]  ;;  %v25196_v22 = vld [vmem:[#allocation30_spill] sm:$0xff]  ;;  %9905 = vmatmul.mubr.bf16.gmra.mrb[244].mxu1 %v20097_v53 }
 0x275   : > { %v6720_v61 = vsel %vm544_vm1, %v25194_v11, %v5727_v50  ;;  %v13728_v44 = vcombine.low %v6715_v8, %v6716_v25  ;;  %v13735_v30 = vrot.slane %v13727_v38, %v19183_v18  ;;  %v13752_v2 = vrot.slane %v13744_v34, %v19183_v18  ;;  %v25197_v8 = vld [vmem:[#allocation25_spill] sm:$0xff] }
 0x276   : > { %v13745_v24 = vcombine.low %v6719_v6, %v6720_v61  ;;  %v16719_v21 = vadd.f32 %v19442_v63, %v19439_v31  ;;  %v16610_v36 = vadd.f32 %v25196_v22, %v25195_v49  ;;  %v4378_v0 = vrot.slane %v4364_v23, %v18240_v54  ;;  %9912 = vmatprep.mubr.bf16.mxu1 %v25197_v8 }
 0x277   : > { %v13742_v50 = vrot.slane %v13728_v44, %v19183_v18  ;;  %v4379_v41 = vcombine.high %v4371_v33, %v4371_v33  ;;  %v4387_v63 = vrot.slane %v4371_v33, %v18240_v54  ;;  %v16722_v34 = vadd.f32 %v19488_v12, %v19477_v58 }
 0x278   : > { %v13759_v20 = vrot.slane %v13745_v24, %v19183_v18  ;;  %v3637_v31 = vadd.f32 %v16719_v21, %v16607_v35  ;;  %v20109_v26 = vadd.f32 %v19471_v55, %v25198_v51  ;;  %v4380_v24 = vcombine.high %v4378_v0, %v4378_v0  ;;  %v25199_v21 = vld [vmem:[#allocation63_spill] sm:$0xff]  ;;  %v20137_v51 = vld [vmem:[%s17822_s8 + $0x70] sm:$0xff]  }
 0x279   : > { %v13743_v6 = vcombine.low %v13735_v30, %v13742_v50  ;;  %v4394_v23 = vrot.slane %v4378_v0, %v18240_v54  ;;  %v4401_v11 = vrot.slane %v4379_v41, %v18240_v54  ;;  %v4409_v61 = vcombine.high %v4387_v63, %v4387_v63  ;;  %9560 = vmatmul.mubr.bf16.gmra.mrb[200].mxu0 %v19583_v32  ;;  %v25201_v41 = vld [vmem:[#allocation66_spill] sm:$0xff] }
 0x27a   : > { %v13760_v25 = vcombine.low %v13752_v2, %v13759_v20  ;;  %v5731_v38 = vrot.slane %v4387_v63, %v18528_v59  ;;  %v3725_v44 = vadd.f32 %v19514_v62, %v3637_v31  ;;  %v4408_v58 = vrot.slane %v4380_v24, %v18240_v54  ;;  %9567 = vmatprep.mubr.bf16.mxu0 %v25092_v7  ;;  %v25200_v20 = vld [vmem:[#allocation64_spill] sm:$0xff] }
 0x27b   : > { %15955 = vst [vmem:[%s19313_s9 + $0x150] sm:$0xff] %v13743_v6  ;;  %v4410_v55 = vcombine.high %v4394_v23, %v4394_v23  ;;  %v5747_v12 = vrot.slane %v4394_v23, %v18528_v59  ;;  %v3642_v35 = vadd.f32 %v16722_v34, %v16610_v36  ;;  %v4411_v33 = vcombine.high %v4401_v11, %v4401_v11 }
 0x27c   : > { %15956 = vst [vmem:[%s19313_s9 + $0x158] sm:$0xff] %v13760_v25  ;;  %v5735_v30 = vrot.slane %v4401_v11, %v18528_v59  ;;  %v5739_v2 = vrot.slane %v4409_v61, %v18528_v59  ;;  %v6721_v49 = vsel %vm544_vm1, %v25199_v21, %v5731_v38  ;;  %v4412_v32 = vcombine.high %v4408_v58, %v4408_v58  ;;  %v25203_v25 = vld [vmem:[#allocation67_spill] sm:$0xff]  ;;  %v25205_v38 = vld [vmem:[#allocation26_spill] sm:$0xff] }
 0x27d   : > { %v5751_v22 = vrot.slane %v4408_v58, %v18528_v59  ;;  %v5755_v50 = vrot.slane %v4410_v55, %v18528_v59  ;;  %v6725_v0 = vsel %vm544_vm1, %v25200_v20, %v5747_v12  ;;  %v5743_v36 = vrot.slane %v4411_v33, %v18528_v59  ;;  %9913 = vmatmul.mubr.bf16.gmra.mrb[248].mxu1 %v20137_v51 }
 0x27e   : > { %v6722_v7 = vsel %vm544_vm1, %v25201_v41, %v5735_v30  ;;  %v25202_v63 = vcombine.high %v25199_v21, %v25199_v21  ;;  %v4413_v34 = vcombine.high %v3725_v44, %v3725_v44  ;;  %v5759_v6 = vrot.slane %v4412_v32, %v18528_v59  ;;  %9920 = vmatprep.mubr.bf16.mxu1 %v25205_v38 }
 0x27f   : > { %v6726_v24 = vsel %vm544_vm1, %v25203_v25, %v5751_v22  ;;  %v25204_v23 = vcombine.high %v25200_v20, %v25200_v20  ;;  %v13761_v61 = vcombine.low %v6721_v49, %v6722_v7  ;;  %v25206_v58 = vcombine.high %v25201_v41, %v25201_v41 }
 0x280   : > { %v6723_v31 = vsel %vm544_vm1, %v25202_v63, %v5739_v2  ;;  %v13778_v12 = vcombine.low %v6725_v0, %v6726_v24  ;;  %v4420_v33 = vrot.slane %v3725_v44, %v18240_v54  ;;  %v4427_v30 = vrot.slane %v4413_v34, %v18240_v54 }
 0x281   : > { %v6727_v11 = vsel %vm544_vm1, %v25204_v23, %v5755_v50  ;;  %v6724_v55 = vsel %vm544_vm1, %v25206_v58, %v5743_v36  ;;  %v25207_v2 = vcombine.high %v25203_v25, %v25203_v25  ;;  %v13769_v49 = vrot.slane %v13761_v61, %v19183_v18  ;;  %9568 = vmatmul.mubr.bf16.gmra.mrb[204].mxu0 %v19632_v39  ;;  %v20170_v39 = vpop.f32.mrb[116].mxu0 }
 0x282   : > { %v13762_v32 = vcombine.low %v6723_v31, %v6724_v55  ;;  %v3726_v22 = vadd.f32 %v19514_v62, %v3642_v35  ;;  %v13786_v20 = vrot.slane %v13778_v12, %v19183_v18  ;;  %v4428_v41 = vcombine.high %v4420_v33, %v4420_v33  ;;  %9575 = vmatprep.mubr.bf16.mxu0 %v25104_v4 }
 0x283   : > { %v6728_v21 = vsel %vm544_vm1, %v25207_v2, %v5759_v6  ;;  %v4429_v36 = vcombine.high %v4427_v30, %v4427_v30  ;;  %v4436_v0 = vrot.slane %v4420_v33, %v18240_v54  ;;  %v4443_v7 = vrot.slane %v4427_v30, %v18240_v54  ;;  %v20172_v6 = vpop.f32.mrb[116].mxu1  ;;  %v20181_v30 = vld [vmem:[%s17822_s8 + $0x78] sm:$0xff]  }
 0x284   : > { %v13779_v50 = vcombine.low %v6727_v11, %v6728_v21  ;;  %v13776_v44 = vrot.slane %v13762_v32, %v19183_v18  ;;  %v4462_v63 = vcombine.high %v3726_v22, %v3726_v22  ;;  %v4450_v62 = vrot.slane %v4428_v41, %v18240_v54  ;;  %v20175_v11 = vpop.f32.mrb[117].mxu0  ;;  %v20177_v61 = vpop.f32.mrb[117].mxu1 }
 0x285   : > { %v4457_v35 = vrot.slane %v4429_v36, %v18240_v54  ;;  %v4469_v34 = vrot.slane %v3726_v22, %v18240_v54  ;;  %v4458_v24 = vcombine.high %v4436_v0, %v4436_v0  ;;  %v4459_v23 = vcombine.high %v4443_v7, %v4443_v7  ;;  %9921 = vmatmul.mubr.bf16.gmra.mrb[252].mxu1 %v20181_v30  ;;  %v25209_v36 = vld [vmem:[#allocation70_spill] sm:$0xff] }
 0x286   : > { %v13793_v31 = vrot.slane %v13779_v50, %v19183_v18  ;;  %v13777_v25 = vcombine.low %v13769_v49, %v13776_v44  ;;  %v5763_v4 = vrot.slane %v4436_v0, %v18528_v59  ;;  %v4460_v55 = vcombine.high %v4450_v62, %v4450_v62 }
 0x287   : > { %v4461_v12 = vcombine.high %v4457_v35, %v4457_v35  ;;  %v5767_v33 = vrot.slane %v4450_v62, %v18528_v59  ;;  %v5771_v2 = vrot.slane %v4458_v24, %v18528_v59  ;;  %v5779_v21 = vrot.slane %v4443_v7, %v18528_v59 }
 0x288   : > { %v13794_v58 = vcombine.low %v13786_v20, %v13793_v31  ;;  %15961 = vst [vmem:[%s19313_s9 + $0x180] sm:$0xff] %v13777_v25  ;;  %v5783_v32 = vrot.slane %v4457_v35, %v18528_v59  ;;  %v5787_v49 = vrot.slane %v4459_v23, %v18528_v59  ;;  %v5775_v22 = vrot.slane %v4460_v55, %v18528_v59  ;;  %v25208_v20 = vld [vmem:[#allocation68_spill] sm:$0xff]  ;;  %v25211_v31 = vld [vmem:[#allocation69_spill] sm:$0xff]  ;;  %v25212_v35 = vld [vmem:[#allocation71_spill] sm:$0xff] }
 0x289   : > { %v5791_v50 = vrot.slane %v4461_v12, %v18528_v59  ;;  %v6729_v41 = vsel %vm544_vm1, %v25208_v20, %v5763_v4  ;;  %v6730_v44 = vsel %vm544_vm1, %v25209_v36, %v5767_v33  ;;  %v25210_v0 = vcombine.high %v25208_v20, %v25208_v20  ;;  %v20208_v4 = vpop.f32.mrb[118].mxu0  ;;  %9576 = vmatmul.mubr.bf16.gmra.mrb[208].mxu0 %v19691_v19 }
 0x28a   : > { %15962 = vst [vmem:[%s19313_s9 + $0x188] sm:$0xff] %v13794_v58  ;;  %v6733_v62 = vsel %vm544_vm1, %v25211_v31, %v5779_v21  ;;  %v6734_v25 = vsel %vm544_vm1, %v25212_v35, %v5783_v32  ;;  %v25213_v24 = vcombine.high %v25211_v31, %v25211_v31  ;;  %v20210_v58 = vpop.f32.mrb[118].mxu1  ;;  %v25214_v55 = vcombine.high %v25209_v36, %v25209_v36  ;;  %v20221_v20 = vpop.f32.mrb[119].mxu0 }
 0x28b   : > { %v6731_v7 = vsel %vm544_vm1, %v25210_v0, %v5771_v2  ;;  %v25215_v33 = vcombine.high %v25212_v35, %v25212_v35  ;;  %v13795_v21 = vcombine.low %v6729_v41, %v6730_v44  ;;  %v13812_v32 = vcombine.low %v6733_v62, %v6734_v25  ;;  %9583 = vmatprep.mubr.bf16.mxu0 %v25118_v42 }
 0x28c   : > { %v6735_v23 = vsel %vm544_vm1, %v25213_v24, %v5787_v49  ;;  %v6732_v12 = vsel %vm544_vm1, %v25214_v55, %v5775_v22  ;;  %v20223_v49 = vpop.f32.mrb[119].mxu1  ;;  %v4476_v24 = vrot.slane %v4462_v63, %v18240_v54  ;;  %v4477_v36 = vcombine.high %v4469_v34, %v4469_v34 }
 0x28d   : > { %v6736_v2 = vsel %vm544_vm1, %v25215_v33, %v5791_v50  ;;  %v13796_v0 = vcombine.low %v6731_v7, %v6732_v12  ;;  %v13803_v22 = vrot.slane %v13795_v21, %v19183_v18  ;;  %v13820_v35 = vrot.slane %v13812_v32, %v19183_v18 }
 0x28e   : > { %v13813_v31 = vcombine.low %v6735_v23, %v6736_v2  ;;  %v4485_v50 = vrot.slane %v4469_v34, %v18240_v54  ;;  %v16725_v19 = vadd.f32 %v19509_v47, %v19502_v29  ;;  %v4478_v7 = vcombine.high %v4476_v24, %v4476_v24 }
 0x28f   : > { %v13810_v41 = vrot.slane %v13796_v0, %v19183_v18  ;;  %v4492_v63 = vrot.slane %v4476_v24, %v18240_v54  ;;  %v4499_v42 = vrot.slane %v4477_v36, %v18240_v54 }
 0x290   : > { %v13827_v44 = vrot.slane %v13813_v31, %v19183_v18  ;;  %v4507_v62 = vcombine.high %v4485_v50, %v4485_v50  ;;  %v5795_v25 = vrot.slane %v4485_v50, %v18528_v59  ;;  %v3645_v23 = vadd.f32 %v16725_v19, %v20109_v26  ;;  %v25216_v26 = vld [vmem:[#allocation72_spill] sm:$0xff] }
 0x291   : > { %v13811_v34 = vcombine.low %v13803_v22, %v13810_v41  ;;  %v4506_v29 = vrot.slane %v4478_v7, %v18240_v54  ;;  %v4508_v47 = vcombine.high %v4492_v63, %v4492_v63  ;;  %v4509_v12 = vcombine.high %v4499_v42, %v4499_v42  ;;  %v25217_v22 = vld [vmem:[#allocation75_spill] sm:$0xff]  ;;  %v25219_v41 = vld [vmem:[#allocation74_spill] sm:$0xff]  ;;  %9584 = vmatmul.mubr.bf16.gmra.mrb[212].mxu0 %v19736_v5 }
 0x292   : > { %v13828_v55 = vcombine.low %v13820_v35, %v13827_v44  ;;  %v5799_v33 = vrot.slane %v4499_v42, %v18528_v59  ;;  %v5803_v2 = vrot.slane %v4507_v62, %v18528_v59  ;;  %v5811_v21 = vrot.slane %v4492_v63, %v18528_v59  ;;  %v25220_v63 = vld [vmem:[#allocation78_spill] sm:$0xff]  ;;  %v20273_v5 = vld [vmem:[%s24375_s2] ss:$0 sm:$0xff] }
 0x293   : > { %15963 = vst [vmem:[%s19313_s9 + $0x190] sm:$0xff] %v13811_v34  ;;  %v4510_v32 = vcombine.high %v4506_v29, %v4506_v29  ;;  %v5815_v0 = vrot.slane %v4506_v29, %v18528_v59  ;;  %v5819_v31 = vrot.slane %v4508_v47, %v18528_v59  ;;  %v6737_v24 = vsel %vm544_vm1, %v25216_v26, %v5795_v25 }
 0x294   : > { %15964 = vst [vmem:[%s19313_s9 + $0x198] sm:$0xff] %v13828_v55  ;;  %v5807_v36 = vrot.slane %v4509_v12, %v18528_v59  ;;  %v6738_v35 = vsel %vm544_vm1, %v25217_v22, %v5799_v33  ;;  %v25218_v50 = vcombine.high %v25216_v26, %v25216_v26  ;;  %v6741_v44 = vsel %vm544_vm1, %v25219_v41, %v5811_v21  ;;  %v25222_v55 = vld [vmem:[#allocation18_spill] sm:$0xff]  ;;  %v25225_v21 = vld [vmem:[#allocation29_spill] sm:$0xff] }
 0x295   : > { %v5823_v7 = vrot.slane %v4510_v32, %v18528_v59  ;;  %v6742_v42 = vsel %vm544_vm1, %v25220_v63, %v5815_v0  ;;  %v25221_v62 = vcombine.high %v25219_v41, %v25219_v41  ;;  %v13829_v34 = vcombine.low %v6737_v24, %v6738_v35  ;;  %9591 = vmatprep.mubr.bf16.mxu0 %v25222_v55  ;;  %v25229_v55 = vld [vmem:[#allocation148_spill] sm:$0xff] }
 0x296   : > { %v6739_v19 = vsel %vm544_vm1, %v25218_v50, %v5803_v2  ;;  %v25223_v29 = vcombine.high %v25217_v22, %v25217_v22  ;;  %v13846_v12 = vcombine.low %v6741_v44, %v6742_v42  ;;  %v3727_v33 = vadd.f32 %v20273_v5, %v3645_v23  ;;  %v25224_v2 = vld [vmem:[#allocation13_spill] sm:$0xff]  ;;  %v25228_v22 = vld [vmem:[#allocation150_spill] sm:$0xff] }
 0x297   : > { %v6743_v25 = vsel %vm544_vm1, %v25221_v62, %v5819_v31  ;;  %v16616_v32 = vadd.f32 %v25225_v21, %v25224_v2  ;;  %v25226_v0 = vcombine.high %v25220_v63, %v25220_v63  ;;  %v13837_v24 = vrot.slane %v13829_v34, %v19183_v18  ;;  %v25231_v2 = vld [vmem:[#allocation151_spill] sm:$0xff]  ;;  %v20295_v21 = vpop.f32.mrb[120].mxu0 }
 0x298   : > { %v6740_v47 = vsel %vm544_vm1, %v25223_v29, %v5807_v36  ;;  %v25227_v36 = vld [vmem:[#allocation149_spill] sm:$0xff]  ;;  %v13854_v41 = vrot.slane %v13846_v12, %v19183_v18  ;;  %v4511_v44 = vcombine.high %v3727_v33, %v3727_v33  ;;  %v4518_v23 = vrot.slane %v3727_v33, %v18240_v54  ;;  %v25230_v29 = vld [vmem:[#allocation14_spill] sm:$0xff]  ;;  %v20297_v33 = vpop.f32.mrb[120].mxu1 }
 0x299   : > { %v6744_v31 = vsel %vm544_vm1, %v25226_v0, %v5823_v7  ;;  %v13830_v26 = vcombine.low %v6739_v19, %v6740_v47  ;;  %v16728_v35 = vadd.f32 %v25228_v22, %v25227_v36  ;;  %v16619_v63 = vadd.f32 %v25230_v29, %v25229_v55  ;;  %v25232_v7 = vld [vmem:[#allocation152_spill] sm:$0xff]  ;;  %25233 = vst [vmem:[#allocation50_spill] sm:$0xff] %v20297_v33  ;;  %v25235_v36 = vld [vmem:[#allocation33_spill] sm:$0xff] }
 0x29a   : > { %v13847_v50 = vcombine.low %v6743_v25, %v6744_v31  ;;  %v16731_v19 = vadd.f32 %v25232_v7, %v25231_v2  ;;  %v4525_v47 = vrot.slane %v4511_v44, %v18240_v54  ;;  %v4526_v25 = vcombine.high %v4518_v23, %v4518_v23  ;;  %9592 = vmatmul.mubr.bf16.gmra.mrb[216].mxu0 %v19793_v52 }
 0x29b   : > { %v13844_v42 = vrot.slane %v13830_v26, %v19183_v18  ;;  %v3650_v62 = vadd.f32 %v16728_v35, %v16616_v32  ;;  %v4534_v12 = vrot.slane %v4518_v23, %v18240_v54  ;;  %v25234_v26 = vld [vmem:[#allocation31_spill] sm:$0xff]  ;;  %v20306_v35 = vpop.f32.mrb[121].mxu0  ;;  %9599 = vmatprep.mubr.bf16.mxu0 %v25143_v10 }
 0x29c   : > { %v13861_v34 = vrot.slane %v13847_v50, %v19183_v18  ;;  %v20300_v31 = vadd.f32 %v16731_v19, %v16619_v63  ;;  %v20304_v22 = vadd.f32 %v25235_v36, %v25234_v26  ;;  %25236 = vst [vmem:[#allocation21_spill] sm:$0xff] %v20306_v35  ;;  %v20308_v50 = vpop.f32.mrb[121].mxu1  ;;  %v4527_v23 = vcombine.high %v4525_v47, %v4525_v47 }
 0x29d   : > { %v13845_v0 = vcombine.low %v13837_v24, %v13844_v42  ;;  %v3728_v32 = vadd.f32 %v20273_v5, %v3650_v62  ;;  %25237 = vst [vmem:[#allocation51_spill] sm:$0xff] %v20308_v50  ;;  %v4541_v55 = vrot.slane %v4525_v47, %v18240_v54  ;;  %v4548_v29 = vrot.slane %v4526_v25, %v18240_v54  ;;  %v20322_v47 = vpop.f32.mrb[122].mxu1 }
 0x29e   : > { %v13862_v44 = vcombine.low %v13854_v41, %v13861_v34  ;;  %v4556_v24 = vcombine.high %v4534_v12, %v4534_v12  ;;  %v5827_v42 = vrot.slane %v4534_v12, %v18528_v59  ;;  %v4555_v2 = vrot.slane %v4527_v23, %v18240_v54  ;;  %v20320_v34 = vpop.f32.mrb[122].mxu0  ;;  %25239 = vst [vmem:[#allocation52_spill] sm:$0xff] %v20322_v47  ;;  %v25240_v12 = vld [vmem:[#allocation73_spill] sm:$0xff]  ;;  %v20331_v26 = vpop.f32.mrb[123].mxu1 }
 0x29f   : > { %15969 = vst [vmem:[%s19313_s9 + $0x1c0] sm:$0xff] %v13845_v0  ;;  %v4560_v62 = vcombine.high %v3728_v32, %v3728_v32  ;;  %v4567_v63 = vrot.slane %v3728_v32, %v18240_v54  ;;  %v4557_v41 = vcombine.high %v4541_v55, %v4541_v55  ;;  %v4558_v7 = vcombine.high %v4548_v29, %v4548_v29  ;;  %v20329_v32 = vpop.f32.mrb[123].mxu0  ;;  %v25243_v47 = vld [vmem:[#allocation77_spill] sm:$0xff] }
 0x2a0   : > { %15970 = vst [vmem:[%s19313_s9 + $0x1c8] sm:$0xff] %v13862_v44  ;;  %v5831_v19 = vrot.slane %v4548_v29, %v18528_v59  ;;  %25238 = vst [vmem:[#allocation53_spill] sm:$0xff] %v20320_v34  ;;  %v5835_v52 = vrot.slane %v4556_v24, %v18528_v59  ;;  %v5843_v25 = vrot.slane %v4541_v55, %v18528_v59 }
 0x2a1   : > { %v6745_v0 = vsel %vm544_vm1, %v25240_v12, %v5827_v42  ;;  %v4574_v10 = vrot.slane %v4560_v62, %v18240_v54  ;;  %25241 = vst [vmem:[#allocation54_spill] sm:$0xff] %v20329_v32  ;;  %25242 = vst [vmem:[#allocation22_spill] sm:$0xff] %v20331_v26  ;;  %v4559_v36 = vcombine.high %v4555_v2, %v4555_v2  ;;  %v25245_v62 = vld [vmem:[#allocation76_spill] sm:$0xff] }
 0x2a2   : > { %v5839_v44 = vrot.slane %v4558_v7, %v18528_v59  ;;  %v5847_v23 = vrot.slane %v4555_v2, %v18528_v59  ;;  %v5851_v29 = vrot.slane %v4557_v41, %v18528_v59  ;;  %v6746_v24 = vsel %vm544_vm1, %v25243_v47, %v5831_v19  ;;  %v25247_v41 = vld [vmem:[#allocation79_spill] sm:$0xff]  ;;  %9600 = vmatmul.mubr.bf16.gmra.mrb[220].mxu0 %v19839_v45 }
 0x2a3   : > { %v25244_v55 = vcombine.high %v25240_v12, %v25240_v12  ;;  %v6749_v32 = vsel %vm544_vm1, %v25245_v62, %v5843_v25  ;;  %v4575_v34 = vcombine.high %v4567_v63, %v4567_v63  ;;  %v5855_v26 = vrot.slane %v4559_v36, %v18528_v59  ;;  %9607 = vmatprep.mubr.bf16.mxu0 %v25145_v14 }
 0x2a4   : > { %v25246_v7 = vcombine.high %v25243_v47, %v25243_v47  ;;  %v6750_v50 = vsel %vm544_vm1, %v25247_v41, %v5847_v23  ;;  %v25248_v19 = vcombine.high %v25245_v62, %v25245_v62  ;;  %v4576_v25 = vcombine.high %v4574_v10, %v4574_v10 }
 0x2a5   : > { %v6747_v42 = vsel %vm544_vm1, %v25244_v55, %v5835_v52  ;;  %v13863_v52 = vcombine.low %v6745_v0, %v6746_v24  ;;  %v13880_v33 = vcombine.low %v6749_v32, %v6750_v50  ;;  %v25249_v36 = vcombine.high %v25247_v41, %v25247_v41 }
 0x2a6   : > { %v6748_v2 = vsel %vm544_vm1, %v25246_v7, %v5839_v44  ;;  %v6751_v12 = vsel %vm544_vm1, %v25248_v19, %v5851_v29  ;;  %v4583_v47 = vrot.slane %v4567_v63, %v18240_v54  ;;  %v4590_v44 = vrot.slane %v4574_v10, %v18240_v54 }
 0x2a7   : > { %v13864_v55 = vcombine.low %v6747_v42, %v6748_v2  ;;  %v6752_v35 = vsel %vm544_vm1, %v25249_v36, %v5855_v26  ;;  %v4597_v23 = vrot.slane %v4575_v34, %v18240_v54  ;;  %v13871_v62 = vrot.slane %v13863_v52, %v19183_v18 }
 0x2a8   : > { %v13881_v29 = vcombine.low %v6751_v12, %v6752_v35  ;;  %v13888_v50 = vrot.slane %v13880_v33, %v19183_v18  ;;  %v4604_v32 = vrot.slane %v4576_v25, %v18240_v54  ;;  %v4605_v26 = vcombine.high %v4583_v47, %v4583_v47  ;;  %v25250_v12 = vld [vmem:[#allocation80_spill] sm:$0xff]  ;;  %v25251_v25 = vld [vmem:[#allocation82_spill] sm:$0xff] }
 0x2a9   : > { %v13878_v0 = vrot.slane %v13864_v55, %v19183_v18  ;;  %v4606_v63 = vcombine.high %v4590_v44, %v4590_v44  ;;  %v4607_v24 = vcombine.high %v4597_v23, %v4597_v23  ;;  %v5859_v45 = vrot.slane %v4583_v47, %v18528_v59 }
 0x2aa   : > { %v13895_v34 = vrot.slane %v13881_v29, %v19183_v18  ;;  %v5863_v42 = vrot.slane %v4597_v23, %v18528_v59  ;;  %v4608_v7 = vcombine.high %v4604_v32, %v4604_v32  ;;  %v5867_v35 = vrot.slane %v4605_v26, %v18528_v59  ;;  %9608 = vmatmul.mubr.bf16.gmra.mrb[224].mxu0 %v19884_v28  ;;  %v20417_v28 = vpop.f32.mrb[124].mxu1 }
 0x2ab   : > { %v13879_v10 = vcombine.low %v13871_v62, %v13878_v0  ;;  %v5871_v33 = vrot.slane %v4607_v24, %v18528_v59  ;;  %v5875_v14 = vrot.slane %v4590_v44, %v18528_v59  ;;  %v5879_v41 = vrot.slane %v4604_v32, %v18528_v59  ;;  %v25254_v0 = vld [vmem:[#allocation81_spill] sm:$0xff]  ;;  %9615 = vmatprep.mubr.bf16.mxu0 %v25153_v15  ;;  %v25264_v15 = vld [vmem:[#allocation36_spill] sm:$0xff] }
 0x2ac   : > { %v13896_v2 = vcombine.low %v13888_v50, %v13895_v34  ;;  %v5883_v19 = vrot.slane %v4606_v63, %v18528_v59  ;;  %v6753_v52 = vsel %vm544_vm1, %v25250_v12, %v5859_v45  ;;  %v5887_v55 = vrot.slane %v4608_v7, %v18528_v59  ;;  %v25255_v50 = vld [vmem:[#allocation83_spill] sm:$0xff] }
 0x2ad   : > { %15971 = vst [vmem:[%s19313_s9 + $0x1d0] sm:$0xff] %v13879_v10  ;;  %v6754_v36 = vsel %vm544_vm1, %v25251_v25, %v5863_v42  ;;  %v25252_v47 = vcombine.high %v25250_v12, %v25250_v12  ;;  %v25253_v44 = vcombine.high %v25251_v25, %v25251_v25  ;;  %v6757_v29 = vsel %vm544_vm1, %v25254_v0, %v5875_v14  ;;  %v25258_v14 = vld [vmem:[#allocation15_spill] sm:$0xff]  ;;  %v25261_v12 = vld [vmem:[#allocation34_spill] sm:$0xff] }
 0x2ae   : > { %15972 = vst [vmem:[%s19313_s9 + $0x1d8] sm:$0xff] %v13896_v2  ;;  %v6758_v32 = vsel %vm544_vm1, %v25255_v50, %v5879_v41  ;;  %v25256_v26 = vcombine.high %v25254_v0, %v25254_v0  ;;  %v13897_v24 = vcombine.low %v6753_v52, %v6754_v36  ;;  %v25257_v10 = vcombine.high %v25255_v50, %v25255_v50  ;;  %v25259_v2 = vld [vmem:[#allocation32_spill] sm:$0xff]  ;;  %v25263_v0 = vld [vmem:[#allocation37_spill] sm:$0xff] }
 0x2af   : > { %v6755_v23 = vsel %vm544_vm1, %v25252_v47, %v5867_v35  ;;  %v6756_v62 = vsel %vm544_vm1, %v25253_v44, %v5871_v33  ;;  %v13914_v42 = vcombine.low %v6757_v29, %v6758_v32  ;;  %v3729_v7 = vadd.f32 %v20273_v5, %v20300_v31  ;;  %v20415_v47 = vpop.f32.mrb[124].mxu0  ;;  %v25265_v50 = vld [vmem:[#allocation17_spill] sm:$0xff] }
 0x2b0   : > { %v6759_v63 = vsel %vm544_vm1, %v25256_v26, %v5883_v19  ;;  %v6760_v34 = vsel %vm544_vm1, %v25257_v10, %v5887_v55  ;;  %v13898_v45 = vcombine.low %v6755_v23, %v6756_v62  ;;  %v13905_v35 = vrot.slane %v13897_v24, %v19183_v18  ;;  %v25260_v19 = vld [vmem:[#allocation35_spill] sm:$0xff]  ;;  %v25262_v62 = vld [vmem:[#allocation16_spill] sm:$0xff]  ;;  %v20427_v26 = vpop.f32.mrb[125].mxu0 }
 0x2b1   : > { %v13915_v33 = vcombine.low %v6759_v63, %v6760_v34  ;;  %v16734_v41 = vadd.f32 %v25259_v2, %v25258_v14  ;;  %v16625_v52 = vadd.f32 %v25261_v12, %v25260_v19  ;;  %v13922_v25 = vrot.slane %v13914_v42, %v19183_v18  ;;  %v20429_v63 = vpop.f32.mrb[125].mxu1  ;;  %v25267_v14 = vld [vmem:[#allocation39_spill] sm:$0xff] }
 0x2b2   : > { %v13912_v55 = vrot.slane %v13898_v45, %v19183_v18  ;;  %v4609_v36 = vcombine.high %v3729_v7, %v3729_v7  ;;  %v4616_v31 = vrot.slane %v3729_v7, %v18240_v54  ;;  %v16737_v29 = vadd.f32 %v25263_v0, %v25262_v62  ;;  %9616 = vmatmul.mubr.bf16.gmra.mrb[228].mxu0 %v19946_v1 }
 0x2b3   : > { %v13929_v23 = vrot.slane %v13915_v33, %v19183_v18  ;;  %v3658_v44 = vadd.f32 %v16734_v41, %v20304_v22  ;;  %v20425_v32 = vadd.f32 %v25265_v50, %v25264_v15  ;;  %v25266_v33 = vld [vmem:[#allocation38_spill] sm:$0xff]  ;;  %v25268_v15 = vld [vmem:[#allocation84_spill] sm:$0xff]  ;;  %9623 = vmatprep.mubr.bf16.mxu0 %v25167_v17  ;;  %v25274_v17 = vld [vmem:[#allocation85_spill] sm:$0xff] }
 0x2b4   : > { %v13913_v24 = vcombine.low %v13905_v35, %v13912_v55  ;;  %v4623_v10 = vrot.slane %v4609_v36, %v18240_v54  ;;  %v4624_v34 = vcombine.high %v4616_v31, %v4616_v31  ;;  %v4632_v45 = vrot.slane %v4616_v31, %v18240_v54 }
 0x2b5   : > { %v13930_v42 = vcombine.low %v13922_v25, %v13929_v23  ;;  %v3730_v22 = vadd.f32 %v20273_v5, %v3658_v44  ;;  %v3661_v7 = vadd.f32 %v16737_v29, %v16625_v52  ;;  %v20436_v2 = vadd.f32 %v25267_v14, %v25266_v33  ;;  %v25272_v14 = vld [vmem:[#allocation86_spill] sm:$0xff] }
 0x2b6   : > { %15977 = vst [vmem:[%s19313_s9 + $0x200] sm:$0xff] %v13913_v24  ;;  %v4625_v41 = vcombine.high %v4623_v10, %v4623_v10  ;;  %v4639_v19 = vrot.slane %v4623_v10, %v18240_v54  ;;  %v4646_v12 = vrot.slane %v4624_v34, %v18240_v54  ;;  %v4654_v35 = vcombine.high %v4632_v45, %v4632_v45  ;;  %v20455_v10 = vpop.f32.mrb[126].mxu0  ;;  %v20457_v34 = vpop.f32.mrb[126].mxu1 }
 0x2b7   : > { %15978 = vst [vmem:[%s19313_s9 + $0x208] sm:$0xff] %v13930_v42  ;;  %v5891_v55 = vrot.slane %v4632_v45, %v18528_v59  ;;  %v4658_v36 = vcombine.high %v3730_v22, %v3730_v22  ;;  %v4665_v25 = vrot.slane %v3730_v22, %v18240_v54  ;;  %v20445_v31 = vadd.f32 %v20273_v5, %v3661_v7  ;;  %v20463_v7 = vpop.f32.mrb[127].mxu0  ;;  %v20465_v33 = vpop.f32.mrb[127].mxu1 }
 0x2b8   : > { %v4653_v52 = vrot.slane %v4625_v41, %v18240_v54  ;;  %v4655_v23 = vcombine.high %v4639_v19, %v4639_v19  ;;  %v4656_v44 = vcombine.high %v4646_v12, %v4646_v12  ;;  %v5895_v62 = vrot.slane %v4646_v12, %v18528_v59  ;;  %25269 = vst [vmem:[#allocation11_spill] sm:$0xff] %v20457_v34 }
 0x2b9   : > { %v5899_v0 = vrot.slane %v4654_v35, %v18528_v59  ;;  %v5907_v29 = vrot.slane %v4639_v19, %v18528_v59  ;;  %v6761_v50 = vsel %vm544_vm1, %v25268_v15, %v5891_v55  ;;  %v4672_v24 = vrot.slane %v4658_v36, %v18240_v54  ;;  %25270 = vst [vmem:[#allocation28_spill] sm:$0xff] %v20463_v7 }
 0x2ba   : > { %v4657_v45 = vcombine.high %v4653_v52, %v4653_v52  ;;  %v5903_v42 = vrot.slane %v4656_v44, %v18528_v59  ;;  %v5911_v1 = vrot.slane %v4653_v52, %v18528_v59  ;;  %v5915_v22 = vrot.slane %v4655_v23, %v18528_v59  ;;  %25271 = vst [vmem:[#allocation56_spill] sm:$0xff] %v20465_v33  ;;  %v25276_v44 = vld [vmem:[#allocation87_spill] sm:$0xff] }
 0x2bb   : > { %v6762_v41 = vsel %vm544_vm1, %v25272_v14, %v5895_v62  ;;  %v25273_v19 = vcombine.high %v25268_v15, %v25268_v15  ;;  %v6765_v35 = vsel %vm544_vm1, %v25274_v17, %v5907_v29  ;;  %v4673_v55 = vcombine.high %v4665_v25, %v4665_v25  ;;  %9624 = vmatmul.mubr.bf16.gmra.mrb[232].mxu0 %v19987_v48 }
 0x2bc   : > { %v5919_v36 = vrot.slane %v4657_v45, %v18528_v59  ;;  %v25275_v52 = vcombine.high %v25272_v14, %v25272_v14  ;;  %v6766_v33 = vsel %vm544_vm1, %v25276_v44, %v5911_v1  ;;  %v25277_v62 = vcombine.high %v25274_v17, %v25274_v17  ;;  %9631 = vmatprep.mubr.bf16.mxu0 %v25172_v27 }
 0x2bd   : > { %v6763_v12 = vsel %vm544_vm1, %v25273_v19, %v5899_v0  ;;  %v13931_v0 = vcombine.low %v6761_v50, %v6762_v41  ;;  %v13948_v34 = vcombine.low %v6765_v35, %v6766_v33  ;;  %v4674_v29 = vcombine.high %v4672_v24, %v4672_v24 }
 0x2be   : > { %v6764_v23 = vsel %vm544_vm1, %v25275_v52, %v5903_v42  ;;  %v6767_v15 = vsel %vm544_vm1, %v25277_v62, %v5915_v22  ;;  %v25278_v45 = vcombine.high %v25276_v44, %v25276_v44  ;;  %v4681_v14 = vrot.slane %v4665_v25, %v18240_v54 }
 0x2bf   : > { %v13932_v19 = vcombine.low %v6763_v12, %v6764_v23  ;;  %v4688_v42 = vrot.slane %v4672_v24, %v18240_v54  ;;  %v4695_v1 = vrot.slane %v4673_v55, %v18240_v54  ;;  %v13939_v52 = vrot.slane %v13931_v0, %v19183_v18  ;;  %v25279_v0 = vld [vmem:[#allocation88_spill] sm:$0xff] }
 0x2c0   : > { %v6768_v7 = vsel %vm544_vm1, %v25278_v45, %v5919_v36  ;;  %v13956_v50 = vrot.slane %v13948_v34, %v19183_v18  ;;  %v4702_v33 = vrot.slane %v4674_v29, %v18240_v54  ;;  %v4703_v41 = vcombine.high %v4681_v14, %v4681_v14  ;;  %v25280_v45 = vld [vmem:[#allocation90_spill] sm:$0xff] }
 0x2c1   : > { %v13946_v17 = vrot.slane %v13932_v19, %v19183_v18  ;;  %v13949_v22 = vcombine.low %v6767_v15, %v6768_v7  ;;  %v4704_v12 = vcombine.high %v4688_v42, %v4688_v42  ;;  %v4705_v35 = vcombine.high %v4695_v1, %v4695_v1 }
 0x2c2   : > { %v5923_v55 = vrot.slane %v4681_v14, %v18528_v59  ;;  %v5927_v36 = vrot.slane %v4695_v1, %v18528_v59  ;;  %v4706_v7 = vcombine.high %v4702_v33, %v4702_v33  ;;  %v5931_v34 = vrot.slane %v4703_v41, %v18528_v59 }
 0x2c3   : > { %v13947_v25 = vcombine.low %v13939_v52, %v13946_v17  ;;  %v13963_v24 = vrot.slane %v13949_v22, %v19183_v18  ;;  %v5935_v23 = vrot.slane %v4705_v35, %v18528_v59  ;;  %v5939_v44 = vrot.slane %v4688_v42, %v18528_v59  ;;  %v25283_v17 = vld [vmem:[#allocation89_spill] sm:$0xff]  ;;  %9632 = vmatmul.mubr.bf16.gmra.mrb[236].mxu0 %v20041_v57  ;;  %v20558_v57 = vpop.f32.mrb[128].mxu0 }
 0x2c4   : > { %v5943_v48 = vrot.slane %v4702_v33, %v18528_v59  ;;  %v5947_v15 = vrot.slane %v4704_v12, %v18528_v59  ;;  %v6769_v19 = vsel %vm544_vm1, %v25279_v0, %v5923_v55  ;;  %v5951_v29 = vrot.slane %v4706_v7, %v18528_v59  ;;  %9639 = vmatprep.mubr.bf16.mxu0 %v25182_v40  ;;  %v20564_v40 = vpop.f32.mrb[129].mxu0 }
 0x2c5   : > { %v13964_v62 = vcombine.low %v13956_v50, %v13963_v24  ;;  %15979 = vst [vmem:[%s19313_s9 + $0x210] sm:$0xff] %v13947_v25  ;;  %v6770_v27 = vsel %vm544_vm1, %v25280_v45, %v5927_v36  ;;  %v25281_v14 = vcombine.high %v25279_v0, %v25279_v0  ;;  %v25282_v42 = vcombine.high %v25280_v45, %v25280_v45  ;;  %v25284_v50 = vld [vmem:[#allocation92_spill] sm:$0xff] }
 0x2c6   : > { %v6773_v22 = vsel %vm544_vm1, %v25283_v17, %v5939_v44  ;;  %v6774_v33 = vsel %vm544_vm1, %v25284_v50, %v5943_v48  ;;  %v25285_v41 = vcombine.high %v25283_v17, %v25283_v17  ;;  %v13965_v35 = vcombine.low %v6769_v19, %v6770_v27  ;;  %v25287_v19 = vld [vmem:[#allocation41_spill] sm:$0xff]  ;;  %v20560_v17 = vpop.f32.mrb[128].mxu1 }
 0x2c7   : > { %v6771_v1 = vsel %vm544_vm1, %v25281_v14, %v5931_v34  ;;  %v6772_v52 = vsel %vm544_vm1, %v25282_v42, %v5935_v23  ;;  %15980 = vst [vmem:[%s19313_s9 + $0x218] sm:$0xff] %v13964_v62  ;;  %v25286_v25 = vcombine.high %v25284_v50, %v25284_v50  ;;  %v13982_v36 = vcombine.low %v6773_v22, %v6774_v33  ;;  %v25288_v42 = vld [vmem:[#allocation40_spill] sm:$0xff] }
 0x2c8   : > { %v6775_v12 = vsel %vm544_vm1, %v25285_v41, %v5947_v15  ;;  %v13966_v55 = vcombine.low %v6771_v1, %v6772_v52  ;;  %v4707_v7 = vcombine.high %v20445_v31, %v20445_v31  ;;  %v13973_v34 = vrot.slane %v13965_v35, %v19183_v18  ;;  %v25289_v52 = vld [vmem:[#allocation43_spill] sm:$0xff] }
 0x2c9   : > { %v6776_v24 = vsel %vm544_vm1, %v25286_v25, %v5951_v29  ;;  %v4714_v44 = vrot.slane %v20445_v31, %v18240_v54  ;;  %v3666_v62 = vadd.f32 %v20436_v2, %v20425_v32  ;;  %v13990_v15 = vrot.slane %v13982_v36, %v19183_v18  ;;  %v20571_v36 = vpop.f32.mrb[130].mxu0 }
 0x2ca   : > { %v13983_v23 = vcombine.low %v6775_v12, %v6776_v24  ;;  %v13980_v48 = vrot.slane %v13966_v55, %v19183_v18  ;;  %v4721_v0 = vrot.slane %v4707_v7, %v18240_v54  ;;  %v20546_v29 = vadd.f32 %v25287_v19, %v19788_v37  ;;  %v20566_v12 = vpop.f32.mrb[129].mxu1 }
 0x2cb   : > { %v4722_v27 = vcombine.high %v4714_v44, %v4714_v44  ;;  %v4730_v31 = vrot.slane %v4714_v44, %v18240_v54  ;;  %v3732_v32 = vadd.f32 %v20273_v5, %v3666_v62  ;;  %v20556_v37 = vadd.f32 %v25289_v52, %v25288_v42  ;;  %v20573_v7 = vpop.f32.mrb[130].mxu1  ;;  %v25290_v62 = vld [vmem:[#allocation91_spill] sm:$0xff]  ;;  %9640 = vmatmul.mubr.bf16.gmra.mrb[240].mxu0 %v20097_v53 }
 0x2cc   : > { %v13997_v45 = vrot.slane %v13983_v23, %v19183_v18  ;;  %v13981_v2 = vcombine.low %v13973_v34, %v13980_v48  ;;  %v4723_v14 = vcombine.high %v4721_v0, %v4721_v0  ;;  %v4737_v1 = vrot.slane %v4721_v0, %v18240_v54  ;;  %v20582_v0 = vpop.f32.mrb[131].mxu1  ;;  %9647 = vmatprep.mubr.bf16.mxu0 %v25197_v8 }
 0x2cd   : > { %v4744_v50 = vrot.slane %v4722_v27, %v18240_v54  ;;  %v4752_v33 = vcombine.high %v4730_v31, %v4730_v31  ;;  %v5955_v41 = vrot.slane %v4730_v31, %v18528_v59  ;;  %v4756_v55 = vcombine.high %v3732_v32, %v3732_v32  ;;  %v25291_v31 = vld [vmem:[#allocation93_spill] sm:$0xff] }
 0x2ce   : > { %v13998_v22 = vcombine.low %v13990_v15, %v13997_v45  ;;  %15985 = vst [vmem:[%s19313_s9 + $0x240] sm:$0xff] %v13981_v2  ;;  %v4751_v35 = vrot.slane %v4723_v14, %v18240_v54  ;;  %v4753_v25 = vcombine.high %v4737_v1, %v4737_v1  ;;  %v5971_v24 = vrot.slane %v4737_v1, %v18528_v59  ;;  %v20580_v15 = vpop.f32.mrb[131].mxu0  ;;  %v25292_v1 = vld [vmem:[#allocation94_spill] sm:$0xff] }
 0x2cf   : > { %v4754_v34 = vcombine.high %v4744_v50, %v4744_v50  ;;  %v5959_v23 = vrot.slane %v4744_v50, %v18528_v59  ;;  %v5963_v44 = vrot.slane %v4752_v33, %v18528_v59  ;;  %v6777_v48 = vsel %vm544_vm1, %v25290_v62, %v5955_v41  ;;  %v25294_v41 = vld [vmem:[#allocation96_spill] sm:$0xff] }
 0x2d0   : > { %15986 = vst [vmem:[%s19313_s9 + $0x248] sm:$0xff] %v13998_v22  ;;  %v4755_v19 = vcombine.high %v4751_v35, %v4751_v35  ;;  %v5975_v45 = vrot.slane %v4751_v35, %v18528_v59  ;;  %v5979_v27 = vrot.slane %v4753_v25, %v18528_v59  ;;  %v6781_v2 = vsel %vm544_vm1, %v25291_v31, %v5971_v24 }
 0x2d1   : > { %v5967_v14 = vrot.slane %v4754_v34, %v18528_v59  ;;  %v6778_v42 = vsel %vm544_vm1, %v25292_v1, %v5959_v23  ;;  %v25293_v52 = vcombine.high %v25290_v62, %v25290_v62  ;;  %v4763_v50 = vrot.slane %v3732_v32, %v18240_v54 }
 0x2d2   : > { %v5983_v33 = vrot.slane %v4755_v19, %v18528_v59  ;;  %v6782_v35 = vsel %vm544_vm1, %v25294_v41, %v5975_v45  ;;  %v25295_v25 = vcombine.high %v25291_v31, %v25291_v31  ;;  %v13999_v34 = vcombine.low %v6777_v48, %v6778_v42 }
 0x2d3   : > { %v6779_v22 = vsel %vm544_vm1, %v25293_v52, %v5963_v44  ;;  %v25296_v23 = vcombine.high %v25292_v1, %v25292_v1  ;;  %v14016_v62 = vcombine.low %v6781_v2, %v6782_v35  ;;  %v4770_v32 = vrot.slane %v4756_v55, %v18240_v54  ;;  %9648 = vmatmul.mubr.bf16.gmra.mrb[244].mxu0 %v20137_v51 }
 0x2d4   : > { %v6783_v24 = vsel %vm544_vm1, %v25295_v25, %v5979_v27  ;;  %v4771_v19 = vcombine.high %v4763_v50, %v4763_v50  ;;  %v25297_v45 = vcombine.high %v25294_v41, %v25294_v41  ;;  %v14007_v48 = vrot.slane %v13999_v34, %v19183_v18  ;;  %9655 = vmatprep.mubr.bf16.mxu0 %v25205_v38  ;;  %v25311_v38 = vld [vmem:[#allocation45_spill] sm:$0xff] }
 0x2d5   : > { %v6780_v44 = vsel %vm544_vm1, %v25296_v23, %v5967_v14  ;;  %v4779_v53 = vrot.slane %v4763_v50, %v18240_v54  ;;  %v14024_v1 = vrot.slane %v14016_v62, %v19183_v18  ;;  %v4772_v14 = vcombine.high %v4770_v32, %v4770_v32  ;;  %v20628_v62 = vpop.f32.mrb[132].mxu1 }
 0x2d6   : > { %v6784_v31 = vsel %vm544_vm1, %v25297_v45, %v5983_v33  ;;  %v14000_v27 = vcombine.low %v6779_v22, %v6780_v44  ;;  %v4786_v2 = vrot.slane %v4770_v32, %v18240_v54  ;;  %v4793_v8 = vrot.slane %v4771_v19, %v18240_v54  ;;  %v20626_v44 = vpop.f32.mrb[132].mxu0 }
 0x2d7   : > { %v14017_v42 = vcombine.low %v6783_v24, %v6784_v31  ;;  %v4801_v52 = vcombine.high %v4779_v53, %v4779_v53  ;;  %v5987_v41 = vrot.slane %v4779_v53, %v18528_v59  ;;  %v4800_v22 = vrot.slane %v4772_v14, %v18240_v54  ;;  %v20634_v53 = vpop.f32.mrb[133].mxu1 }
 0x2d8   : > { %v14014_v55 = vrot.slane %v14000_v27, %v19183_v18  ;;  %v4802_v35 = vcombine.high %v4786_v2, %v4786_v2  ;;  %v6003_v50 = vrot.slane %v4786_v2, %v18528_v59  ;;  %v4803_v24 = vcombine.high %v4793_v8, %v4793_v8  ;;  %v20632_v27 = vpop.f32.mrb[133].mxu0  ;;  %v25299_v2 = vld [vmem:[#allocation98_spill] sm:$0xff] }
 0x2d9   : > { %v14031_v33 = vrot.slane %v14017_v42, %v19183_v18  ;;  %v5991_v34 = vrot.slane %v4793_v8, %v18528_v59  ;;  %v5995_v23 = vrot.slane %v4801_v52, %v18528_v59  ;;  %v4804_v19 = vcombine.high %v4800_v22, %v4800_v22  ;;  %v25298_v42 = vld [vmem:[#allocation95_spill] sm:$0xff]  ;;  %v20646_v52 = vpop.f32.mrb[134].mxu0 }
 0x2da   : > { %v14015_v25 = vcombine.low %v14007_v48, %v14014_v55  ;;  %v6007_v45 = vrot.slane %v4800_v22, %v18528_v59  ;;  %v6011_v31 = vrot.slane %v4802_v35, %v18528_v59  ;;  %v5999_v48 = vrot.slane %v4803_v24, %v18528_v59  ;;  %25301 = vst [vmem:[#allocation57_spill] sm:$0xff] %v20646_v52  ;;  %v25303_v35 = vld [vmem:[#allocation97_spill] sm:$0xff] }
 0x2db   : > { %v14032_v32 = vcombine.low %v14024_v1, %v14031_v33  ;;  %v6785_v14 = vsel %vm544_vm1, %v25298_v42, %v5987_v41  ;;  %v6786_v55 = vsel %vm544_vm1, %v25299_v2, %v5991_v34  ;;  %v25300_v1 = vcombine.high %v25298_v42, %v25298_v42  ;;  %v20648_v33 = vpop.f32.mrb[134].mxu1  ;;  %v20661_v42 = vpop.f32.mrb[135].mxu0  ;;  %9656 = vmatmul.mubr.bf16.gmra.mrb[248].mxu0 %v20181_v30 }
 0x2dc   : > { %15987 = vst [vmem:[%s19313_s9 + $0x250] sm:$0xff] %v14015_v25  ;;  %25302 = vst [vmem:[#allocation23_spill] sm:$0xff] %v20648_v33  ;;  %v6015_v22 = vrot.slane %v4804_v19, %v18528_v59  ;;  %v6789_v41 = vsel %vm544_vm1, %v25303_v35, %v6003_v50  ;;  %v25304_v25 = vld [vmem:[#allocation99_spill] sm:$0xff]  ;;  %v25305_v34 = vcombine.high %v25303_v35, %v25303_v35 }
 0x2dd   : > { %v6787_v8 = vsel %vm544_vm1, %v25300_v1, %v5995_v23  ;;  %15988 = vst [vmem:[%s19313_s9 + $0x258] sm:$0xff] %v14032_v32  ;;  %v6790_v24 = vsel %vm544_vm1, %v25304_v25, %v6007_v45  ;;  %25306 = vst [vmem:[#allocation58_spill] sm:$0xff] %v20661_v42  ;;  %v20663_v1 = vpop.f32.mrb[135].mxu1  ;;  %v25308_v51 = vcombine.high %v25299_v2, %v25299_v2  ;;  %v25312_v42 = vld [vmem:[#allocation47_spill] sm:$0xff] }
 0x2de   : > { %v6791_v23 = vsel %vm544_vm1, %v25305_v34, %v6011_v31  ;;  %25307 = vst [vmem:[#allocation60_spill] sm:$0xff] %v20663_v1  ;;  %v14033_v50 = vcombine.low %v6785_v14, %v6786_v55  ;;  %v14050_v19 = vcombine.low %v6789_v41, %v6790_v24  ;;  %v3669_v45 = vadd.f32 %v20556_v37, %v20546_v29  ;;  %v25310_v1 = vld [vmem:[#allocation44_spill] sm:$0xff] }
 0x2df   : > { %v6788_v32 = vsel %vm544_vm1, %v25308_v51, %v5999_v48  ;;  %v25309_v35 = vcombine.high %v25304_v25, %v25304_v25  ;;  %v16634_v33 = vadd.f32 %v25310_v1, %v19893_v60  ;;  %v16746_v52 = vadd.f32 %v25312_v42, %v25311_v38  ;;  %v20694_v42 = vpop.f32.mrb[136].mxu1 }
 0x2e0   : > { %v14034_v34 = vcombine.low %v6787_v8, %v6788_v32  ;;  %v14041_v2 = vrot.slane %v14033_v50, %v19183_v18  ;;  %v14058_v14 = vrot.slane %v14050_v19, %v19183_v18  ;;  %v3733_v55 = vadd.f32 %v20273_v5, %v3669_v45  ;;  %v20701_v1 = vpop.f32.mrb[137].mxu1 }
 0x2e1   : > { %v6792_v31 = vsel %vm544_vm1, %v25309_v35, %v6015_v22  ;;  %v3674_v37 = vadd.f32 %v16746_v52, %v16634_v33  ;;  %v16637_v22 = vadd.f32 %v19941_v56, %v19929_v43  ;;  %v16749_v8 = vadd.f32 %v19943_v16, %v19931_v9  ;;  %v25313_v56 = vld [vmem:[#allocation19_spill] sm:$0xff]  ;;  %v20707_v19 = vpop.f32.mrb[138].mxu1 }
 0x2e2   : > { %v14051_v48 = vcombine.low %v6791_v23, %v6792_v31  ;;  %v14048_v29 = vrot.slane %v14034_v34, %v19183_v18  ;;  %v4805_v41 = vcombine.high %v3733_v55, %v3733_v55  ;;  %v4812_v25 = vrot.slane %v3733_v55, %v18240_v54  ;;  %v20692_v23 = vpop.f32.mrb[136].mxu0  ;;  %25314 = vst [vmem:[#allocation145_spill] sm:$0xff] %v20707_v19  ;;  %v20719_v38 = vpop.f32.mrb[139].mxu1 }
 0x2e3   : > { %v16640_v24 = vadd.f32 %v20031_v13, %v20023_v3  ;;  %v3734_v33 = vadd.f32 %v20273_v5, %v3674_v37  ;;  %v3677_v43 = vadd.f32 %v16749_v8, %v16637_v22  ;;  %v16752_v9 = vadd.f32 %v25313_v56, %v20025_v46  ;;  %v20699_v16 = vpop.f32.mrb[137].mxu0  ;;  %25316 = vst [vmem:[#allocation24_spill] sm:$0xff] %v20719_v38  ;;  %v25326_v38 = vld [vmem:[#allocation103_spill] sm:$0xff] }
 0x2e4   : > { %v14065_v60 = vrot.slane %v14051_v48, %v19183_v18  ;;  %v14049_v52 = vcombine.low %v14041_v2, %v14048_v29  ;;  %v4819_v3 = vrot.slane %v4805_v41, %v18240_v54  ;;  %v4820_v13 = vcombine.high %v4812_v25, %v4812_v25  ;;  %v20705_v50 = vpop.f32.mrb[138].mxu0 }
 0x2e5   : > { %v4828_v32 = vrot.slane %v4812_v25, %v18240_v54  ;;  %v4854_v45 = vcombine.high %v3734_v33, %v3734_v33  ;;  %v4861_v46 = vrot.slane %v3734_v33, %v18240_v54  ;;  %v20713_v35 = vadd.f32 %v20273_v5, %v3677_v43  ;;  %v20717_v34 = vpop.f32.mrb[139].mxu0  ;;  %v25317_v33 = vld [vmem:[#allocation100_spill] sm:$0xff] }
 0x2e6   : > { %v14066_v51 = vcombine.low %v14058_v14, %v14065_v60  ;;  %15993 = vst [vmem:[%s19313_s9 + $0x280] sm:$0xff] %v14049_v52  ;;  %v20715_v31 = vadd.f32 %v16752_v9, %v16640_v24  ;;  %25315 = vst [vmem:[#allocation146_spill] sm:$0xff] %v20717_v34  ;;  %v4821_v2 = vcombine.high %v4819_v3, %v4819_v3 }
 0x2e7   : > { %v4835_v48 = vrot.slane %v4819_v3, %v18240_v54  ;;  %v4842_v14 = vrot.slane %v4820_v13, %v18240_v54  ;;  %v4850_v30 = vcombine.high %v4828_v32, %v4828_v32  ;;  %v6019_v55 = vrot.slane %v4828_v32, %v18528_v59  ;;  %v20736_v32 = vpop.f32.mrb[140].mxu0 }
 0x2e8   : > { %15994 = vst [vmem:[%s19313_s9 + $0x288] sm:$0xff] %v14066_v51  ;;  %v4868_v29 = vrot.slane %v4854_v45, %v18240_v54  ;;  %v4869_v37 = vcombine.high %v4861_v46, %v4861_v46  ;;  %v4877_v22 = vrot.slane %v4861_v46, %v18240_v54  ;;  %v4849_v8 = vrot.slane %v4821_v2, %v18240_v54  ;;  %v20738_v45 = vpop.f32.mrb[140].mxu1  ;;  %v25320_v46 = vld [vmem:[#allocation102_spill] sm:$0xff] }
 0x2e9   : > { %v4851_v60 = vcombine.high %v4835_v48, %v4835_v48  ;;  %v4852_v41 = vcombine.high %v4842_v14, %v4842_v14  ;;  %v6023_v25 = vrot.slane %v4842_v14, %v18528_v59  ;;  %v6027_v24 = vrot.slane %v4850_v30, %v18528_v59  ;;  %25318 = vst [vmem:[#allocation59_spill] sm:$0xff] %v20736_v32  ;;  %v25322_v30 = vld [vmem:[#allocation101_spill] sm:$0xff] }
 0x2ea   : > { %v6035_v52 = vrot.slane %v4835_v48, %v18528_v59  ;;  %v6793_v43 = vsel %vm544_vm1, %v25317_v33, %v6019_v55  ;;  %v4870_v56 = vcombine.high %v4868_v29, %v4868_v29  ;;  %v4853_v9 = vcombine.high %v4849_v8, %v4849_v8  ;;  %25319 = vst [vmem:[#allocation62_spill] sm:$0xff] %v20738_v45 }
 0x2eb   : > { %v6031_v51 = vrot.slane %v4852_v41, %v18528_v59  ;;  %v6039_v3 = vrot.slane %v4849_v8, %v18528_v59  ;;  %v6043_v13 = vrot.slane %v4851_v60, %v18528_v59  ;;  %v6794_v2 = vsel %vm544_vm1, %v25320_v46, %v6023_v25  ;;  %v20749_v8 = vpop.f32.mrb[141].mxu0  ;;  %v20751_v60 = vpop.f32.mrb[141].mxu1 }
 0x2ec   : > { %v25321_v48 = vcombine.high %v25317_v33, %v25317_v33  ;;  %v6797_v55 = vsel %vm544_vm1, %v25322_v30, %v6035_v52  ;;  %v4884_v41 = vrot.slane %v4868_v29, %v18240_v54  ;;  %25323 = vst [vmem:[#allocation61_spill] sm:$0xff] %v20749_v8  ;;  %25324 = vst [vmem:[#allocation65_spill] sm:$0xff] %v20751_v60  ;;  %v20765_v19 = vpop.f32.mrb[142].mxu0 }
 0x2ed   : > { %v6047_v32 = vrot.slane %v4853_v9, %v18528_v59  ;;  %v25325_v45 = vcombine.high %v25320_v46, %v25320_v46  ;;  %v6798_v33 = vsel %vm544_vm1, %v25326_v38, %v6039_v3  ;;  %v14067_v29 = vcombine.low %v6793_v43, %v6794_v2  ;;  %v20767_v9 = vpop.f32.mrb[142].mxu1  ;;  %v20774_v34 = vpop.f32.mrb[143].mxu0 }
 0x2ee   : > { %v6795_v14 = vsel %vm544_vm1, %v25321_v48, %v6027_v24  ;;  %v25327_v24 = vcombine.high %v25322_v30, %v25322_v30  ;;  %v14084_v8 = vcombine.low %v6797_v55, %v6798_v33  ;;  %v4891_v60 = vrot.slane %v4869_v37, %v18240_v54  ;;  %25328 = vst [vmem:[#allocation27_spill] sm:$0xff] %v20767_v9  ;;  %v20776_v43 = vpop.f32.mrb[143].mxu1 }
 0x2ef   : > { %v6796_v25 = vsel %vm544_vm1, %v25325_v45, %v6031_v51  ;;  %v25329_v51 = vcombine.high %v25326_v38, %v25326_v38  ;;  %v4898_v3 = vrot.slane %v4870_v56, %v18240_v54  ;;  %v4899_v46 = vcombine.high %v4877_v22, %v4877_v22  ;;  %25330 = vst [vmem:[#allocation30_spill] sm:$0xff] %v20776_v43 }
 0x2f0   : > { %v6799_v52 = vsel %vm544_vm1, %v25327_v24, %v6043_v13  ;;  %v14068_v48 = vcombine.low %v6795_v14, %v6796_v25  ;;  %v4900_v30 = vcombine.high %v4884_v41, %v4884_v41  ;;  %v14075_v13 = vrot.slane %v14067_v29, %v19183_v18 }
 0x2f1   : > { %v6800_v45 = vsel %vm544_vm1, %v25329_v51, %v6047_v32  ;;  %v14092_v14 = vrot.slane %v14084_v8, %v19183_v18  ;;  %v4901_v55 = vcombine.high %v4891_v60, %v4891_v60  ;;  %v4902_v38 = vcombine.high %v4898_v3, %v4898_v3 }
 0x2f2   : > { %v14082_v37 = vrot.slane %v14068_v48, %v19183_v18  ;;  %v14085_v2 = vcombine.low %v6799_v52, %v6800_v45  ;;  %v6051_v32 = vrot.slane %v4877_v22, %v18528_v59  ;;  %v6055_v56 = vrot.slane %v4891_v60, %v18528_v59  ;;  %v25331_v22 = vld [vmem:[#allocation104_spill] sm:$0xff] }
 0x2f3   : > { %v6059_v24 = vrot.slane %v4899_v46, %v18528_v59  ;;  %v6067_v51 = vrot.slane %v4884_v41, %v18528_v59  ;;  %v6063_v29 = vrot.slane %v4901_v55, %v18528_v59  ;;  %v6071_v52 = vrot.slane %v4898_v3, %v18528_v59  ;;  %v25336_v55 = vld [vmem:[#allocation108_spill] sm:$0xff] }
 0x2f4   : > { %v14083_v25 = vcombine.low %v14075_v13, %v14082_v37  ;;  %v14099_v33 = vrot.slane %v14085_v2, %v19183_v18  ;;  %v6075_v8 = vrot.slane %v4900_v30, %v18528_v59  ;;  %v6079_v48 = vrot.slane %v4902_v38, %v18528_v59  ;;  %v25332_v13 = vld [vmem:[#allocation106_spill] sm:$0xff]  ;;  %v25335_v2 = vld [vmem:[#allocation105_spill] sm:$0xff] }
 0x2f5   : > { %v6801_v60 = vsel %vm544_vm1, %v25331_v22, %v6051_v32  ;;  %v6802_v37 = vsel %vm544_vm1, %v25332_v13, %v6055_v56  ;;  %v25333_v41 = vcombine.high %v25331_v22, %v25331_v22  ;;  %v25334_v3 = vcombine.high %v25332_v13, %v25332_v13 }
 0x2f6   : > { %v14100_v45 = vcombine.low %v14092_v14, %v14099_v33  ;;  %15995 = vst [vmem:[%s19313_s9 + $0x290] sm:$0xff] %v14083_v25  ;;  %v6805_v14 = vsel %vm544_vm1, %v25335_v2, %v6067_v51  ;;  %v6806_v38 = vsel %vm544_vm1, %v25336_v55, %v6071_v52  ;;  %v25337_v32 = vcombine.high %v25335_v2, %v25335_v2  ;;  %v20811_v25 = vpop.f32.mrb[144].mxu0  ;;  %v20813_v33 = vpop.f32.mrb[144].mxu1 }
 0x2f7   : > { %v6803_v46 = vsel %vm544_vm1, %v25333_v41, %v6059_v24  ;;  %v6804_v30 = vsel %vm544_vm1, %v25334_v3, %v6063_v29  ;;  %25338 = vst [vmem:[#allocation25_spill] sm:$0xff] %v20811_v25  ;;  %25339 = vst [vmem:[#allocation147_spill] sm:$0xff] %v20813_v33  ;;  %v25340_v24 = vcombine.high %v25336_v55, %v25336_v55  ;;  %v20820_v41 = vpop.f32.mrb[145].mxu0  ;;  %v20822_v52 = vpop.f32.mrb[145].mxu1 }
 0x2f8   : > { %v6807_v56 = vsel %vm544_vm1, %v25337_v32, %v6075_v8  ;;  %15996 = vst [vmem:[%s19313_s9 + $0x298] sm:$0xff] %v14100_v45  ;;  %v14101_v22 = vcombine.low %v6801_v60, %v6802_v37  ;;  %v14102_v51 = vcombine.low %v6803_v46, %v6804_v30  ;;  %v14118_v13 = vcombine.low %v6805_v14, %v6806_v38  ;;  %v20830_v55 = vpop.f32.mrb[146].mxu0  ;;  %v25345_v30 = vld [vmem:[#allocation20_spill] sm:$0xff]  ;;  %v25346_v14 = vld [vmem:[#allocation49_spill] sm:$0xff] }
 0x2f9   : > { %v6808_v29 = vsel %vm544_vm1, %v25340_v24, %v6079_v48  ;;  %25341 = vst [vmem:[#allocation63_spill] sm:$0xff] %v20820_v41  ;;  %25342 = vst [vmem:[#allocation64_spill] sm:$0xff] %v20822_v52  ;;  %v4903_v8 = vcombine.high %v20713_v35, %v20713_v35  ;;  %v4910_v2 = vrot.slane %v20713_v35, %v18240_v54  ;;  %v20832_v48 = vpop.f32.mrb[146].mxu1  ;;  %v20841_v32 = vpop.f32.mrb[147].mxu0 }
 0x2fa   : > { %v14119_v3 = vcombine.low %v6807_v56, %v6808_v29  ;;  %v3736_v45 = vadd.f32 %v20273_v5, %v20715_v31  ;;  %25343 = vst [vmem:[#allocation66_spill] sm:$0xff] %v20830_v55  ;;  %25344 = vst [vmem:[#allocation67_spill] sm:$0xff] %v20832_v48  ;;  %v14109_v60 = vrot.slane %v14101_v22, %v19183_v18  ;;  %v20843_v35 = vpop.f32.mrb[147].mxu1  ;;  %v25350_v48 = vld [vmem:[#allocation48_spill] sm:$0xff] }
 0x2fb   : > { %v14116_v37 = vrot.slane %v14102_v51, %v19183_v18  ;;  %v14126_v46 = vrot.slane %v14118_v13, %v19183_v18  ;;  %v20839_v38 = vadd.f32 %v25346_v14, %v25345_v30  ;;  %25347 = vst [vmem:[#allocation26_spill] sm:$0xff] %v20841_v32  ;;  %25348 = vst [vmem:[#allocation68_spill] sm:$0xff] %v20843_v35  ;;  %v25349_v13 = vld [vmem:[#allocation46_spill] sm:$0xff] }
 0x2fc   : > { %v14133_v5 = vrot.slane %v14119_v3, %v19183_v18  ;;  %v4917_v31 = vrot.slane %v4903_v8, %v18240_v54  ;;  %v4918_v56 = vcombine.high %v4910_v2, %v4910_v2  ;;  %v4926_v24 = vrot.slane %v4910_v2, %v18240_v54 }
 0x2fd   : > { %v14117_v29 = vcombine.low %v14109_v60, %v14116_v37  ;;  %v4952_v22 = vcombine.high %v3736_v45, %v3736_v45  ;;  %v4959_v51 = vrot.slane %v3736_v45, %v18240_v54  ;;  %v20851_v30 = vadd.f32 %v25350_v48, %v25349_v13 }
 0x2fe   : > { %v14134_v14 = vcombine.low %v14126_v46, %v14133_v5  ;;  %v4919_v32 = vcombine.high %v4917_v31, %v4917_v31  ;;  %v4933_v35 = vrot.slane %v4917_v31, %v18240_v54  ;;  %v4940_v3 = vrot.slane %v4918_v56, %v18240_v54  ;;  %v25351_v31 = vld [vmem:[#allocation107_spill] sm:$0xff] }
 0x2ff   : > { %16001 = vst [vmem:[%s19313_s9 + $0x2c0] sm:$0xff] %v14117_v29  ;;  %v4948_v8 = vcombine.high %v4926_v24, %v4926_v24  ;;  %v6083_v55 = vrot.slane %v4926_v24, %v18528_v59  ;;  %v4966_v2 = vrot.slane %v4952_v22, %v18240_v54  ;;  %v4967_v60 = vcombine.high %v4959_v51, %v4959_v51 }
 0x300   : > { %16002 = vst [vmem:[%s19313_s9 + $0x2c8] sm:$0xff] %v14134_v14  ;;  %v4947_v45 = vrot.slane %v4919_v32, %v18240_v54  ;;  %v4949_v37 = vcombine.high %v4933_v35, %v4933_v35  ;;  %v4950_v52 = vcombine.high %v4940_v3, %v4940_v3  ;;  %v6087_v48 = vrot.slane %v4940_v3, %v18528_v59  ;;  %v25352_v32 = vld [vmem:[#allocation110_spill] sm:$0xff] }
 0x301   : > { %v6091_v46 = vrot.slane %v4948_v8, %v18528_v59  ;;  %v6099_v5 = vrot.slane %v4933_v35, %v18528_v59  ;;  %v6809_v56 = vsel %vm544_vm1, %v25351_v31, %v6083_v55  ;;  %v4968_v29 = vcombine.high %v4966_v2, %v4966_v2  ;;  %v25354_v35 = vld [vmem:[#allocation109_spill] sm:$0xff] }
 0x302   : > { %v4951_v13 = vcombine.high %v4947_v45, %v4947_v45  ;;  %v6095_v24 = vrot.slane %v4950_v52, %v18528_v59  ;;  %v6103_v22 = vrot.slane %v4947_v45, %v18528_v59  ;;  %v6107_v14 = vrot.slane %v4949_v37, %v18528_v59  ;;  %v25356_v37 = vld [vmem:[#allocation111_spill] sm:$0xff] }
 0x303   : > { %v6810_v33 = vsel %vm544_vm1, %v25352_v32, %v6087_v48  ;;  %v25353_v3 = vcombine.high %v25351_v31, %v25351_v31  ;;  %v6813_v41 = vsel %vm544_vm1, %v25354_v35, %v6099_v5  ;;  %v4975_v55 = vrot.slane %v4959_v51, %v18240_v54 }
 0x304   : > { %v6111_v25 = vrot.slane %v4951_v13, %v18528_v59  ;;  %v25355_v52 = vcombine.high %v25352_v32, %v25352_v32  ;;  %v6814_v48 = vsel %vm544_vm1, %v25356_v37, %v6103_v22  ;;  %v25357_v31 = vcombine.high %v25354_v35, %v25354_v35 }
 0x305   : > { %v6811_v8 = vsel %vm544_vm1, %v25353_v3, %v6091_v46  ;;  %v14135_v3 = vcombine.low %v6809_v56, %v6810_v33  ;;  %v14152_v5 = vcombine.low %v6813_v41, %v6814_v48  ;;  %v4982_v51 = vrot.slane %v4966_v2, %v18240_v54  ;;  %v20904_v48 = vpop.f32.mrb[148].mxu1 }
 0x306   : > { %v6812_v45 = vsel %vm544_vm1, %v25355_v52, %v6095_v24  ;;  %v6815_v46 = vsel %vm544_vm1, %v25357_v31, %v6107_v14  ;;  %v25358_v13 = vcombine.high %v25356_v37, %v25356_v37  ;;  %v4989_v24 = vrot.slane %v4967_v60, %v18240_v54  ;;  %v20902_v37 = vpop.f32.mrb[148].mxu0 }
 0x307   : > { %v14136_v43 = vcombine.low %v6811_v8, %v6812_v45  ;;  %v4996_v52 = vrot.slane %v4968_v29, %v18240_v54  ;;  %v4997_v22 = vcombine.high %v4975_v55, %v4975_v55  ;;  %v14143_v9 = vrot.slane %v14135_v3, %v19183_v18 }
 0x308   : > { %v6816_v32 = vsel %vm544_vm1, %v25358_v13, %v6111_v25  ;;  %v14160_v33 = vrot.slane %v14152_v5, %v19183_v18  ;;  %v4998_v41 = vcombine.high %v4982_v51, %v4982_v51  ;;  %v4999_v56 = vcombine.high %v4989_v24, %v4989_v24 }
 0x309   : > { %v14150_v35 = vrot.slane %v14136_v43, %v19183_v18  ;;  %v14153_v14 = vcombine.low %v6815_v46, %v6816_v32  ;;  %v5000_v2 = vcombine.high %v4996_v52, %v4996_v52  ;;  %v6115_v8 = vrot.slane %v4975_v55, %v18528_v59  ;;  %v20912_v55 = vpop.f32.mrb[149].mxu1  ;;  %v25359_v32 = vld [vmem:[#allocation112_spill] sm:$0xff] }
 0x30a   : > { %v6119_v60 = vrot.slane %v4989_v24, %v18528_v59  ;;  %v6123_v29 = vrot.slane %v4997_v22, %v18528_v59  ;;  %v6127_v43 = vrot.slane %v4999_v56, %v18528_v59  ;;  %v6131_v31 = vrot.slane %v4982_v51, %v18528_v59  ;;  %v25360_v22 = vld [vmem:[#allocation115_spill] sm:$0xff] }
 0x30b   : > { %v14151_v45 = vcombine.low %v14143_v9, %v14150_v35  ;;  %v14167_v25 = vrot.slane %v14153_v14, %v19183_v18  ;;  %v6135_v46 = vrot.slane %v4996_v52, %v18528_v59  ;;  %v6139_v3 = vrot.slane %v4998_v41, %v18528_v59  ;;  %v20910_v9 = vpop.f32.mrb[149].mxu0  ;;  %v20922_v52 = vpop.f32.mrb[150].mxu1 }
 0x30c   : > { %v6143_v13 = vrot.slane %v5000_v2, %v18528_v59  ;;  %v6817_v24 = vsel %vm544_vm1, %v25359_v32, %v6115_v8  ;;  %v6818_v35 = vsel %vm544_vm1, %v25360_v22, %v6119_v60  ;;  %v20920_v51 = vpop.f32.mrb[150].mxu0  ;;  %25362 = vst [vmem:[#allocation69_spill] sm:$0xff] %v20922_v52  ;;  %v25363_v14 = vcombine.high %v25359_v32, %v25359_v32  ;;  %v25365_v2 = vld [vmem:[#allocation114_spill] sm:$0xff] }
 0x30d   : > { %v14168_v5 = vcombine.low %v14160_v33, %v14167_v25  ;;  %16003 = vst [vmem:[%s19313_s9 + $0x2d0] sm:$0xff] %v14151_v45  ;;  %25361 = vst [vmem:[#allocation70_spill] sm:$0xff] %v20920_v51  ;;  %v25364_v33 = vcombine.high %v25360_v22, %v25360_v22  ;;  %v6821_v8 = vsel %vm544_vm1, %v25365_v2, %v6131_v31  ;;  %v25366_v45 = vld [vmem:[#allocation118_spill] sm:$0xff]  ;;  %v20936_v60 = vpop.f32.mrb[151].mxu0  ;;  %v20938_v51 = vpop.f32.mrb[151].mxu1 }
 0x30e   : > { %v6819_v41 = vsel %vm544_vm1, %v25363_v14, %v6123_v29  ;;  %v6822_v25 = vsel %vm544_vm1, %v25366_v45, %v6135_v46  ;;  %25367 = vst [vmem:[#allocation71_spill] sm:$0xff] %v20938_v51  ;;  %v25368_v32 = vcombine.high %v25365_v2, %v25365_v2  ;;  %v25369_v22 = vcombine.high %v25366_v45, %v25366_v45 }
 0x30f   : > { %v6820_v56 = vsel %vm544_vm1, %v25364_v33, %v6127_v43  ;;  %16004 = vst [vmem:[%s19313_s9 + $0x2d8] sm:$0xff] %v14168_v5  ;;  %v14169_v14 = vcombine.low %v6817_v24, %v6818_v35  ;;  %v14186_v33 = vcombine.low %v6821_v8, %v6822_v25  ;;  %v3685_v46 = vadd.f32 %v20851_v30, %v20839_v38  ;;  %v20964_v38 = vld [vmem:[%s24375_s2] ss:$0 sm:$0xff]  ;;  %v20975_v8 = vpop.f32.mrb[152].mxu1 }
 0x310   : > { %v6823_v29 = vsel %vm544_vm1, %v25368_v32, %v6139_v3  ;;  %v6824_v43 = vsel %vm544_vm1, %v25369_v22, %v6143_v13  ;;  %v14170_v31 = vcombine.low %v6819_v41, %v6820_v56  ;;  %v16646_v5 = vadd.f32 %v20175_v11, %v20170_v39  ;;  %v25372_v41 = vld [vmem:[#allocation51_spill] sm:$0xff]  ;;  %25373 = vst [vmem:[#allocation72_spill] sm:$0xff] %v20975_v8 }
 0x311   : > { %v14187_v52 = vcombine.low %v6823_v29, %v6824_v43  ;;  %v14177_v51 = vrot.slane %v14169_v14, %v19183_v18  ;;  %v16758_v3 = vadd.f32 %v20177_v61, %v20172_v6  ;;  %v16649_v13 = vadd.f32 %v20221_v20, %v20208_v4  ;;  %v25370_v61 = vld [vmem:[#allocation21_spill] sm:$0xff]  ;;  %v25371_v20 = vld [vmem:[#allocation50_spill] sm:$0xff] }
 0x312   : > { %v14184_v2 = vrot.slane %v14170_v31, %v19183_v18  ;;  %v14194_v24 = vrot.slane %v14186_v33, %v19183_v18  ;;  %v3737_v39 = vadd.f32 %v20964_v38, %v3685_v46  ;;  %v16761_v11 = vadd.f32 %v20223_v49, %v20210_v58  ;;  %v20980_v58 = vpop.f32.mrb[153].mxu1  ;;  %v25376_v43 = vld [vmem:[#allocation54_spill] sm:$0xff]  ;;  %v25377_v31 = vld [vmem:[#allocation52_spill] sm:$0xff] }
 0x313   : > { %v14201_v35 = vrot.slane %v14187_v52, %v19183_v18  ;;  %v3690_v6 = vadd.f32 %v16758_v3, %v16646_v5  ;;  %v16652_v4 = vadd.f32 %v25370_v61, %v20295_v21  ;;  %v16764_v56 = vadd.f32 %v25372_v41, %v25371_v20  ;;  %v20973_v52 = vpop.f32.mrb[152].mxu0  ;;  %25374 = vst [vmem:[#allocation75_spill] sm:$0xff] %v20980_v58  ;;  %v25378_v33 = vld [vmem:[#allocation22_spill] sm:$0xff]  ;;  %v25394_v58 = vld [vmem:[#allocation119_spill] sm:$0xff] }
 0x314   : > { %v14185_v30 = vcombine.low %v14177_v51, %v14184_v2  ;;  %v5001_v25 = vcombine.high %v3737_v39, %v3737_v39  ;;  %v5008_v32 = vrot.slane %v3737_v39, %v18240_v54  ;;  %v3693_v29 = vadd.f32 %v16761_v11, %v16649_v13  ;;  %v20978_v22 = vpop.f32.mrb[153].mxu0  ;;  %v25375_v51 = vld [vmem:[#allocation53_spill] sm:$0xff]  ;;  %v20990_v2 = vpop.f32.mrb[154].mxu1 }
 0x315   : > { %v14202_v45 = vcombine.low %v14194_v24, %v14201_v35  ;;  %v3738_v49 = vadd.f32 %v20964_v38, %v3690_v6  ;;  %v3698_v21 = vadd.f32 %v16764_v56, %v16652_v4  ;;  %v16655_v14 = vadd.f32 %v25376_v43, %v25375_v51  ;;  %v20988_v5 = vpop.f32.mrb[154].mxu0  ;;  %25380 = vst [vmem:[#allocation78_spill] sm:$0xff] %v20990_v2  ;;  %v21000_v11 = vpop.f32.mrb[155].mxu1 }
 0x316   : > { %16009 = vst [vmem:[%s19313_s9 + $0x300] sm:$0xff] %v14185_v30  ;;  %v16767_v46 = vadd.f32 %v25378_v33, %v25377_v31  ;;  %25379 = vst [vmem:[#allocation74_spill] sm:$0xff] %v20988_v5  ;;  %v5015_v3 = vrot.slane %v5001_v25, %v18240_v54  ;;  %v5016_v13 = vcombine.high %v5008_v32, %v5008_v32  ;;  %v20998_v39 = vpop.f32.mrb[155].mxu0 }
 0x317   : > { %16010 = vst [vmem:[%s19313_s9 + $0x308] sm:$0xff] %v14202_v45  ;;  %v5024_v24 = vrot.slane %v5008_v32, %v18240_v54  ;;  %v20996_v35 = vadd.f32 %v20964_v38, %v3693_v29  ;;  %25381 = vst [vmem:[#allocation18_spill] sm:$0xff] %v20998_v39  ;;  %v5050_v30 = vcombine.high %v3738_v49, %v3738_v49 }
 0x318   : > { %25382 = vst [vmem:[#allocation13_spill] sm:$0xff] %v21000_v11  ;;  %v5057_v6 = vrot.slane %v3738_v49, %v18240_v54  ;;  %v21004_v61 = vadd.f32 %v20964_v38, %v3698_v21  ;;  %v21006_v4 = vadd.f32 %v16767_v46, %v16655_v14  ;;  %v5017_v20 = vcombine.high %v5015_v3, %v5015_v3  ;;  %v25383_v46 = vld [vmem:[#allocation113_spill] sm:$0xff] }
 0x319   : > { %v5031_v41 = vrot.slane %v5015_v3, %v18240_v54  ;;  %v5038_v56 = vrot.slane %v5016_v13, %v18240_v54  ;;  %v5046_v45 = vcombine.high %v5024_v24, %v5024_v24  ;;  %v6147_v25 = vrot.slane %v5024_v24, %v18528_v59  ;;  %v21019_v24 = vpop.f32.mrb[156].mxu0 }
 0x31a   : > { %v5064_v32 = vrot.slane %v5050_v30, %v18240_v54  ;;  %v5065_v29 = vcombine.high %v5057_v6, %v5057_v6  ;;  %v5073_v51 = vrot.slane %v5057_v6, %v18240_v54  ;;  %v5045_v49 = vrot.slane %v5017_v20, %v18240_v54  ;;  %25384 = vst [vmem:[#allocation29_spill] sm:$0xff] %v21019_v24  ;;  %v21021_v30 = vpop.f32.mrb[156].mxu1 }
 0x31b   : > { %v5047_v43 = vcombine.high %v5031_v41, %v5031_v41  ;;  %v5048_v21 = vcombine.high %v5038_v56, %v5038_v56  ;;  %v6151_v14 = vrot.slane %v5038_v56, %v18528_v59  ;;  %v6155_v31 = vrot.slane %v5046_v45, %v18528_v59  ;;  %25385 = vst [vmem:[#allocation149_spill] sm:$0xff] %v21021_v30  ;;  %v21026_v56 = vpop.f32.mrb[157].mxu0  ;;  %v21028_v45 = vpop.f32.mrb[157].mxu1  ;;  %v25390_v30 = vld [vmem:[#allocation116_spill] sm:$0xff] }
 0x31c   : > { %v6163_v33 = vrot.slane %v5031_v41, %v18528_v59  ;;  %v6825_v3 = vsel %vm544_vm1, %v25383_v46, %v6147_v25  ;;  %v5066_v13 = vcombine.high %v5064_v32, %v5064_v32  ;;  %v5049_v11 = vcombine.high %v5045_v49, %v5045_v49  ;;  %25386 = vst [vmem:[#allocation150_spill] sm:$0xff] %v21026_v56  ;;  %v25388_v41 = vld [vmem:[#allocation117_spill] sm:$0xff] }
 0x31d   : > { %v6159_v6 = vrot.slane %v5048_v21, %v18528_v59  ;;  %v6167_v20 = vrot.slane %v5045_v49, %v18528_v59  ;;  %v6171_v2 = vrot.slane %v5047_v43, %v18528_v59  ;;  %25387 = vst [vmem:[#allocation148_spill] sm:$0xff] %v21028_v45  ;;  %v6826_v39 = vsel %vm544_vm1, %v25388_v41, %v6151_v14  ;;  %v21039_v49 = vpop.f32.mrb[158].mxu0  ;;  %v21041_v43 = vpop.f32.mrb[158].mxu1 }
 0x31e   : > { %v25389_v25 = vcombine.high %v25383_v46, %v25383_v46  ;;  %v6829_v5 = vsel %vm544_vm1, %v25390_v30, %v6163_v33  ;;  %v5080_v21 = vrot.slane %v5064_v32, %v18240_v54  ;;  %25391 = vst [vmem:[#allocation14_spill] sm:$0xff] %v21039_v49  ;;  %25392 = vst [vmem:[#allocation151_spill] sm:$0xff] %v21041_v43  ;;  %v21054_v32 = vpop.f32.mrb[159].mxu0 }
 0x31f   : > { %v6175_v56 = vrot.slane %v5049_v11, %v18528_v59  ;;  %v25393_v45 = vcombine.high %v25388_v41, %v25388_v41  ;;  %v6830_v46 = vsel %vm544_vm1, %v25394_v58, %v6167_v20  ;;  %25396 = vst [vmem:[#allocation152_spill] sm:$0xff] %v21054_v32  ;;  %v14203_v43 = vcombine.low %v6825_v3, %v6826_v39 }
 0x320   : > { %v6827_v24 = vsel %vm544_vm1, %v25389_v25, %v6155_v31  ;;  %v25395_v31 = vcombine.high %v25390_v30, %v25390_v30  ;;  %v21056_v25 = vpop.f32.mrb[159].mxu1  ;;  %v14220_v11 = vcombine.low %v6829_v5, %v6830_v46  ;;  %v5087_v8 = vrot.slane %v5065_v29, %v18240_v54 }
 0x321   : > { %v6828_v14 = vsel %vm544_vm1, %v25393_v45, %v6159_v6  ;;  %v25397_v6 = vcombine.high %v25394_v58, %v25394_v58  ;;  %v5094_v20 = vrot.slane %v5066_v13, %v18240_v54  ;;  %v5095_v41 = vcombine.high %v5073_v51, %v5073_v51 }
 0x322   : > { %v6831_v33 = vsel %vm544_vm1, %v25395_v31, %v6171_v2  ;;  %v14204_v49 = vcombine.low %v6827_v24, %v6828_v14  ;;  %v5096_v30 = vcombine.high %v5080_v21, %v5080_v21  ;;  %v14211_v2 = vrot.slane %v14203_v43, %v19183_v18  ;;  %v21072_v43 = vpop.f32.mrb[160].mxu0 }
 0x323   : > { %v6832_v45 = vsel %vm544_vm1, %v25397_v6, %v6175_v56  ;;  %v14228_v39 = vrot.slane %v14220_v11, %v19183_v18  ;;  %v5097_v3 = vcombine.high %v5087_v8, %v5087_v8  ;;  %v5098_v5 = vcombine.high %v5094_v20, %v5094_v20 }
 0x324   : > { %v14218_v31 = vrot.slane %v14204_v49, %v19183_v18  ;;  %v14221_v32 = vcombine.low %v6831_v33, %v6832_v45  ;;  %v6179_v29 = vrot.slane %v5073_v51, %v18528_v59  ;;  %v6183_v58 = vrot.slane %v5087_v8, %v18528_v59  ;;  %v21074_v49 = vpop.f32.mrb[160].mxu1  ;;  %v21080_v8 = vpop.f32.mrb[161].mxu0 }
 0x325   : > { %v6187_v13 = vrot.slane %v5095_v41, %v18528_v59  ;;  %v6195_v14 = vrot.slane %v5080_v21, %v18528_v59  ;;  %25398 = vst [vmem:[#allocation31_spill] sm:$0xff] %v21074_v49  ;;  %v6191_v46 = vrot.slane %v5097_v3, %v18528_v59  ;;  %v6199_v33 = vrot.slane %v5094_v20, %v18528_v59  ;;  %v25401_v21 = vld [vmem:[#allocation120_spill] sm:$0xff]  ;;  %v25402_v41 = vld [vmem:[#allocation122_spill] sm:$0xff] }
 0x326   : > { %v14219_v24 = vcombine.low %v14211_v2, %v14218_v31  ;;  %v14235_v56 = vrot.slane %v14221_v32, %v19183_v18  ;;  %v6203_v11 = vrot.slane %v5096_v30, %v18528_v59  ;;  %v6207_v51 = vrot.slane %v5098_v5, %v18528_v59  ;;  %25399 = vst [vmem:[#allocation33_spill] sm:$0xff] %v21080_v8  ;;  %v21082_v32 = vpop.f32.mrb[161].mxu1  ;;  %v21093_v31 = vpop.f32.mrb[162].mxu0 }
 0x327   : > { %25400 = vst [vmem:[#allocation73_spill] sm:$0xff] %v21082_v32  ;;  %v6833_v45 = vsel %vm544_vm1, %v25401_v21, %v6179_v29  ;;  %v6834_v2 = vsel %vm544_vm1, %v25402_v41, %v6183_v58  ;;  %v25403_v20 = vcombine.high %v25401_v21, %v25401_v21  ;;  %25404 = vst [vmem:[#allocation77_spill] sm:$0xff] %v21093_v31  ;;  %v21095_v3 = vpop.f32.mrb[162].mxu1 }
 0x328   : > { %v14236_v6 = vcombine.low %v14228_v39, %v14235_v56  ;;  %16011 = vst [vmem:[%s19313_s9 + $0x310] sm:$0xff] %v14219_v24  ;;  %25405 = vst [vmem:[#allocation76_spill] sm:$0xff] %v21095_v3  ;;  %v25406_v5 = vcombine.high %v25402_v41, %v25402_v41  ;;  %v25407_v24 = vld [vmem:[#allocation121_spill] sm:$0xff]  ;;  %v25408_v56 = vld [vmem:[#allocation123_spill] sm:$0xff]  ;;  %v21111_v31 = vpop.f32.mrb[163].mxu1 }
 0x329   : > { %v6835_v30 = vsel %vm544_vm1, %v25403_v20, %v6187_v13  ;;  %v6837_v29 = vsel %vm544_vm1, %v25407_v24, %v6195_v14  ;;  %v6838_v58 = vsel %vm544_vm1, %v25408_v56, %v6199_v33  ;;  %v25409_v21 = vcombine.high %v25407_v24, %v25407_v24  ;;  %v21109_v20 = vpop.f32.mrb[163].mxu0  ;;  %25411 = vst [vmem:[#allocation80_spill] sm:$0xff] %v21111_v31  ;;  %v25422_v31 = vld [vmem:[#allocation127_spill] sm:$0xff] }
 0x32a   : > { %v6836_v39 = vsel %vm544_vm1, %v25406_v5, %v6191_v46  ;;  %25410 = vst [vmem:[#allocation79_spill] sm:$0xff] %v21109_v20  ;;  %16012 = vst [vmem:[%s19313_s9 + $0x318] sm:$0xff] %v14236_v6  ;;  %v25412_v41 = vcombine.high %v25408_v56, %v25408_v56  ;;  %v14237_v5 = vcombine.low %v6833_v45, %v6834_v2 }
 0x32b   : > { %v6839_v13 = vsel %vm544_vm1, %v25409_v21, %v6203_v11  ;;  %v14238_v14 = vcombine.low %v6835_v30, %v6836_v39  ;;  %v14254_v3 = vcombine.low %v6837_v29, %v6838_v58  ;;  %v5099_v33 = vcombine.high %v20996_v35, %v20996_v35 }
 0x32c   : > { %v6840_v46 = vsel %vm544_vm1, %v25412_v41, %v6207_v51  ;;  %v5106_v11 = vrot.slane %v20996_v35, %v18240_v54  ;;  %v5148_v24 = vcombine.high %v21004_v61, %v21004_v61  ;;  %v14245_v6 = vrot.slane %v14237_v5, %v19183_v18  ;;  %v21138_v41 = vpop.f32.mrb[164].mxu1 }
 0x32d   : > { %v14255_v32 = vcombine.low %v6839_v13, %v6840_v46  ;;  %v14252_v21 = vrot.slane %v14238_v14, %v19183_v18  ;;  %v14262_v56 = vrot.slane %v14254_v3, %v19183_v18  ;;  %v5155_v51 = vrot.slane %v21004_v61, %v18240_v54  ;;  %v21136_v3 = vpop.f32.mrb[164].mxu0  ;;  %25414 = vst [vmem:[#allocation81_spill] sm:$0xff] %v21138_v41 }
 0x32e   : > { %v5113_v2 = vrot.slane %v5099_v33, %v18240_v54  ;;  %v5114_v30 = vcombine.high %v5106_v11, %v5106_v11  ;;  %v5122_v35 = vrot.slane %v5106_v11, %v18240_v54  ;;  %v5162_v29 = vrot.slane %v5148_v24, %v18240_v54  ;;  %25413 = vst [vmem:[#allocation82_spill] sm:$0xff] %v21136_v3  ;;  %v21142_v14 = vpop.f32.mrb[165].mxu0  ;;  %v21144_v33 = vpop.f32.mrb[165].mxu1 }
 0x32f   : > { %v14269_v45 = vrot.slane %v14255_v32, %v19183_v18  ;;  %v14253_v39 = vcombine.low %v14245_v6, %v14252_v21  ;;  %v5163_v58 = vcombine.high %v5155_v51, %v5155_v51  ;;  %v21134_v13 = vrot.slane %v5155_v51, %v18240_v54  ;;  %25415 = vst [vmem:[#allocation83_spill] sm:$0xff] %v21142_v14  ;;  %v21151_v51 = vpop.f32.mrb[166].mxu0  ;;  %v25421_v14 = vld [vmem:[#allocation124_spill] sm:$0xff] }
 0x330   : > { %v5115_v32 = vcombine.high %v5113_v2, %v5113_v2  ;;  %v5129_v46 = vrot.slane %v5113_v2, %v18240_v54  ;;  %v5136_v5 = vrot.slane %v5114_v30, %v18240_v54  ;;  %25416 = vst [vmem:[#allocation15_spill] sm:$0xff] %v21144_v33  ;;  %v5144_v11 = vcombine.high %v5122_v35, %v5122_v35  ;;  %v21158_v33 = vpop.f32.mrb[167].mxu0 }
 0x331   : > { %v14270_v61 = vcombine.low %v14262_v56, %v14269_v45  ;;  %16017 = vst [vmem:[%s19313_s9 + $0x340] sm:$0xff] %v14253_v39  ;;  %v6211_v24 = vrot.slane %v5122_v35, %v18528_v59  ;;  %v5164_v6 = vcombine.high %v5162_v29, %v5162_v29  ;;  %v21149_v21 = vrot.slane %v5162_v29, %v18240_v54  ;;  %v21153_v56 = vpop.f32.mrb[166].mxu1 }
 0x332   : > { %25417 = vst [vmem:[#allocation32_spill] sm:$0xff] %v21151_v51  ;;  %25418 = vst [vmem:[#allocation35_spill] sm:$0xff] %v21153_v56  ;;  %v5143_v45 = vrot.slane %v5115_v32, %v18240_v54  ;;  %v5145_v2 = vcombine.high %v5129_v46, %v5129_v46  ;;  %v5146_v30 = vcombine.high %v5136_v5, %v5136_v5  ;;  %v21160_v39 = vpop.f32.mrb[167].mxu1 }
 0x333   : > { %16018 = vst [vmem:[%s19313_s9 + $0x348] sm:$0xff] %v14270_v61  ;;  %v6215_v41 = vrot.slane %v5136_v5, %v18528_v59  ;;  %25419 = vst [vmem:[#allocation34_spill] sm:$0xff] %v21158_v33  ;;  %v6219_v35 = vrot.slane %v5144_v11, %v18528_v59  ;;  %v6227_v29 = vrot.slane %v5129_v46, %v18528_v59  ;;  %v21194_v8 = vpop.f32.mrb[168].mxu1 }
 0x334   : > { %25420 = vst [vmem:[#allocation16_spill] sm:$0xff] %v21160_v39  ;;  %v6841_v51 = vsel %vm544_vm1, %v25421_v14, %v6211_v24  ;;  %v5185_v56 = vrot.slane %v5163_v58, %v18240_v54  ;;  %v5147_v61 = vcombine.high %v5143_v45, %v5143_v45  ;;  %v6223_v32 = vrot.slane %v5146_v30, %v18528_v59  ;;  %v25424_v39 = vld [vmem:[#allocation126_spill] sm:$0xff] }
 0x335   : > { %v6231_v3 = vrot.slane %v5143_v45, %v18528_v59  ;;  %v6235_v5 = vrot.slane %v5145_v2, %v18528_v59  ;;  %v6842_v33 = vsel %vm544_vm1, %v25422_v31, %v6215_v41  ;;  %v25423_v11 = vcombine.high %v25421_v14, %v25421_v14  ;;  %v25426_v30 = vld [vmem:[#allocation130_spill] sm:$0xff] }
 0x336   : > { %v6845_v24 = vsel %vm544_vm1, %v25424_v39, %v6227_v29  ;;  %v5192_v58 = vrot.slane %v5164_v6, %v18240_v54  ;;  %v6239_v20 = vrot.slane %v5147_v61, %v18528_v59  ;;  %v25425_v45 = vcombine.high %v25422_v31, %v25422_v31  ;;  %v21192_v61 = vpop.f32.mrb[168].mxu0 }
 0x337   : > { %v6843_v46 = vsel %vm544_vm1, %v25423_v11, %v6219_v35  ;;  %v6846_v41 = vsel %vm544_vm1, %v25426_v30, %v6231_v3  ;;  %v25427_v14 = vcombine.high %v25424_v39, %v25424_v39  ;;  %v14271_v11 = vcombine.low %v6841_v51, %v6842_v33  ;;  %v21202_v33 = vpop.f32.mrb[169].mxu0  ;;  %v21204_v51 = vpop.f32.mrb[169].mxu1 }
 0x338   : > { %v6844_v2 = vsel %vm544_vm1, %v25425_v45, %v6223_v32  ;;  %v14288_v29 = vcombine.low %v6845_v24, %v6846_v41  ;;  %v5193_v6 = vcombine.high %v21134_v13, %v21134_v13  ;;  %v25428_v31 = vcombine.high %v25426_v30, %v25426_v30  ;;  %25429 = vst [vmem:[#allocation37_spill] sm:$0xff] %v21204_v51  ;;  %v21209_v41 = vpop.f32.mrb[170].mxu0  ;;  %v21211_v30 = vpop.f32.mrb[170].mxu1 }
 0x339   : > { %v6847_v35 = vsel %vm544_vm1, %v25427_v14, %v6235_v5  ;;  %v14272_v49 = vcombine.low %v6843_v46, %v6844_v2  ;;  %v5194_v39 = vcombine.high %v21149_v21, %v21149_v21  ;;  %v5195_v32 = vcombine.high %v5185_v56, %v5185_v56  ;;  %25430 = vst [vmem:[#allocation36_spill] sm:$0xff] %v21209_v41  ;;  %v25435_v41 = vld [vmem:[#allocation129_spill] sm:$0xff] }
 0x33a   : > { %v6848_v3 = vsel %vm544_vm1, %v25428_v31, %v6239_v20  ;;  %v5196_v5 = vcombine.high %v5192_v58, %v5192_v58  ;;  %v14279_v46 = vrot.slane %v14271_v11, %v19183_v18  ;;  %v14296_v2 = vrot.slane %v14288_v29, %v19183_v18  ;;  %25431 = vst [vmem:[#allocation17_spill] sm:$0xff] %v21211_v30  ;;  %v21218_v11 = vpop.f32.mrb[171].mxu0 }
 0x33b   : > { %v14286_v24 = vrot.slane %v14272_v49, %v19183_v18  ;;  %v14289_v45 = vcombine.low %v6847_v35, %v6848_v3  ;;  %v6243_v20 = vrot.slane %v21134_v13, %v18528_v59  ;;  %v6247_v14 = vrot.slane %v5185_v56, %v18528_v59  ;;  %25432 = vst [vmem:[#allocation38_spill] sm:$0xff] %v21218_v11  ;;  %v21220_v49 = vpop.f32.mrb[171].mxu1 }
 0x33c   : > { %v6251_v31 = vrot.slane %v5193_v6, %v18528_v59  ;;  %v6255_v51 = vrot.slane %v5195_v32, %v18528_v59  ;;  %25433 = vst [vmem:[#allocation39_spill] sm:$0xff] %v21220_v49  ;;  %v6259_v3 = vrot.slane %v21149_v21, %v18528_v59  ;;  %v6263_v30 = vrot.slane %v5192_v58, %v18528_v59  ;;  %v25434_v6 = vld [vmem:[#allocation125_spill] sm:$0xff] }
 0x33d   : > { %v14287_v35 = vcombine.low %v14279_v46, %v14286_v24  ;;  %v14303_v29 = vrot.slane %v14289_v45, %v19183_v18  ;;  %v6267_v13 = vrot.slane %v5194_v39, %v18528_v59  ;;  %v6271_v56 = vrot.slane %v5196_v5, %v18528_v59  ;;  %v25438_v39 = vld [vmem:[#allocation128_spill] sm:$0xff]  ;;  %v25439_v45 = vld [vmem:[#allocation131_spill] sm:$0xff] }
 0x33e   : > { %v6849_v32 = vsel %vm544_vm1, %v25434_v6, %v6243_v20  ;;  %v6850_v11 = vsel %vm544_vm1, %v25435_v41, %v6247_v14  ;;  %v25436_v46 = vcombine.high %v25434_v6, %v25434_v6  ;;  %v25437_v21 = vcombine.high %v25435_v41, %v25435_v41 }
 0x33f   : > { %v14304_v49 = vcombine.low %v14296_v2, %v14303_v29  ;;  %16019 = vst [vmem:[%s19313_s9 + $0x350] sm:$0xff] %v14287_v35  ;;  %v6853_v5 = vsel %vm544_vm1, %v25438_v39, %v6259_v3  ;;  %v6854_v20 = vsel %vm544_vm1, %v25439_v45, %v6263_v30  ;;  %v25440_v2 = vcombine.high %v25438_v39, %v25438_v39  ;;  %v21258_v30 = vpop.f32.mrb[172].mxu1 }
 0x340   : > { %v6851_v24 = vsel %vm544_vm1, %v25436_v46, %v6251_v31  ;;  %v6852_v58 = vsel %vm544_vm1, %v25437_v21, %v6255_v51  ;;  %v25441_v35 = vcombine.high %v25439_v45, %v25439_v45  ;;  %v14305_v29 = vcombine.low %v6849_v32, %v6850_v11  ;;  %v21256_v46 = vpop.f32.mrb[172].mxu0  ;;  %v25442_v11 = vld [vmem:[#allocation28_spill] sm:$0xff] }
 0x341   : > { %v6855_v14 = vsel %vm544_vm1, %v25440_v2, %v6267_v13  ;;  %16020 = vst [vmem:[%s19313_s9 + $0x358] sm:$0xff] %v14304_v49  ;;  %v14306_v41 = vcombine.low %v6851_v24, %v6852_v58  ;;  %v14322_v51 = vcombine.low %v6853_v5, %v6854_v20  ;;  %v3741_v3 = vadd.f32 %v20964_v38, %v21006_v4  ;;  %v21267_v32 = vpop.f32.mrb[173].mxu0  ;;  %v21269_v24 = vpop.f32.mrb[173].mxu1 }
 0x342   : > { %v6856_v31 = vsel %vm544_vm1, %v25441_v35, %v6271_v56  ;;  %v14313_v21 = vrot.slane %v14305_v29, %v19183_v18  ;;  %v16658_v13 = vadd.f32 %v20427_v26, %v20415_v47  ;;  %v16770_v56 = vadd.f32 %v20429_v63, %v20417_v28  ;;  %v21274_v45 = vpop.f32.mrb[174].mxu0  ;;  %v21276_v47 = vpop.f32.mrb[174].mxu1  ;;  %v25443_v63 = vld [vmem:[#allocation11_spill] sm:$0xff] }
 0x343   : > { %v14323_v6 = vcombine.low %v6855_v14, %v6856_v31  ;;  %v16661_v49 = vadd.f32 %v25442_v11, %v20455_v10  ;;  %v14320_v4 = vrot.slane %v14306_v41, %v19183_v18  ;;  %v14330_v58 = vrot.slane %v14322_v51, %v19183_v18  ;;  %v25444_v10 = vld [vmem:[#allocation56_spill] sm:$0xff]  ;;  %v21283_v14 = vpop.f32.mrb[175].mxu0  ;;  %v21285_v35 = vpop.f32.mrb[175].mxu1 }
 0x344   : > { %v5197_v5 = vcombine.high %v3741_v3, %v3741_v3  ;;  %v5204_v28 = vrot.slane %v3741_v3, %v18240_v54  ;;  %v3706_v26 = vadd.f32 %v16770_v56, %v16658_v13  ;;  %v16773_v20 = vadd.f32 %v25444_v10, %v25443_v63  ;;  %25445 = vst [vmem:[#allocation84_spill] sm:$0xff] %v21285_v35  ;;  %v21310_v63 = vpop.f32.mrb[176].mxu1 }
 0x345   : > { %v14337_v39 = vrot.slane %v14323_v6, %v19183_v18  ;;  %v16792_v2 = vadd.f32 %v20564_v40, %v20558_v57  ;;  %v14321_v31 = vcombine.low %v14313_v21, %v14320_v4  ;;  %v16904_v51 = vadd.f32 %v20566_v12, %v20560_v17  ;;  %25447 = vst [vmem:[#allocation85_spill] sm:$0xff] %v21310_v63 }
 0x346   : > { %v5211_v41 = vrot.slane %v5197_v5, %v18240_v54  ;;  %v5212_v6 = vcombine.high %v5204_v28, %v5204_v28  ;;  %v5220_v3 = vrot.slane %v5204_v28, %v18240_v54  ;;  %v3742_v13 = vadd.f32 %v20964_v38, %v3706_v26  ;;  %v21308_v26 = vpop.f32.mrb[176].mxu0 }
 0x347   : > { %v14338_v29 = vcombine.low %v14330_v58, %v14337_v39  ;;  %v21292_v56 = vadd.f32 %v16773_v20, %v16661_v49  ;;  %16025 = vst [vmem:[%s19313_s9 + $0x380] sm:$0xff] %v14321_v31  ;;  %v21297_v11 = vadd.f32 %v16904_v51, %v16792_v2  ;;  %v21301_v21 = vadd.f32 %v20580_v15, %v20571_v36  ;;  %v25448_v20 = vld [vmem:[#allocation132_spill] sm:$0xff]  ;;  %v21316_v31 = vpop.f32.mrb[177].mxu0 }
 0x348   : > { %v5213_v57 = vcombine.high %v5211_v41, %v5211_v41  ;;  %v5227_v40 = vrot.slane %v5211_v41, %v18240_v54  ;;  %v5234_v17 = vrot.slane %v5212_v6, %v18240_v54  ;;  %v5242_v12 = vcombine.high %v5220_v3, %v5220_v3  ;;  %25446 = vst [vmem:[#allocation86_spill] sm:$0xff] %v21308_v26 }
 0x349   : > { %16026 = vst [vmem:[%s19313_s9 + $0x388] sm:$0xff] %v14338_v29  ;;  %v6275_v4 = vrot.slane %v5220_v3, %v18528_v59  ;;  %v5246_v58 = vcombine.high %v3742_v13, %v3742_v13  ;;  %v5253_v28 = vrot.slane %v3742_v13, %v18240_v54  ;;  %25449 = vst [vmem:[#allocation87_spill] sm:$0xff] %v21316_v31  ;;  %v21318_v29 = vpop.f32.mrb[177].mxu1  ;;  %v25451_v3 = vld [vmem:[#allocation133_spill] sm:$0xff] }
 0x34a   : > { %v5241_v49 = vrot.slane %v5213_v57, %v18240_v54  ;;  %v5243_v39 = vcombine.high %v5227_v40, %v5227_v40  ;;  %v6291_v5 = vrot.slane %v5227_v40, %v18528_v59  ;;  %v5244_v10 = vcombine.high %v5234_v17, %v5234_v17  ;;  %25450 = vst [vmem:[#allocation88_spill] sm:$0xff] %v21318_v29  ;;  %v21324_v57 = vpop.f32.mrb[178].mxu0  ;;  %v21326_v40 = vpop.f32.mrb[178].mxu1 }
 0x34b   : > { %v6279_v36 = vrot.slane %v5234_v17, %v18528_v59  ;;  %v6283_v15 = vrot.slane %v5242_v12, %v18528_v59  ;;  %v6857_v2 = vsel %vm544_vm1, %v25448_v20, %v6275_v4  ;;  %25452 = vst [vmem:[#allocation90_spill] sm:$0xff] %v21324_v57  ;;  %25453 = vst [vmem:[#allocation89_spill] sm:$0xff] %v21326_v40  ;;  %v25454_v12 = vld [vmem:[#allocation134_spill] sm:$0xff]  ;;  %v21338_v31 = vpop.f32.mrb[179].mxu1  ;;  %v25458_v57 = vld [vmem:[#allocation135_spill] sm:$0xff] }
 0x34c   : > { %v5245_v41 = vcombine.high %v5241_v49, %v5241_v49  ;;  %v6295_v51 = vrot.slane %v5241_v49, %v18528_v59  ;;  %v6299_v6 = vrot.slane %v5243_v39, %v18528_v59  ;;  %v6861_v13 = vsel %vm544_vm1, %v25451_v3, %v6291_v5  ;;  %v21336_v39 = vpop.f32.mrb[179].mxu0  ;;  %25457 = vst [vmem:[#allocation41_spill] sm:$0xff] %v21338_v31 }
 0x34d   : > { %v6287_v17 = vrot.slane %v5244_v10, %v18528_v59  ;;  %v6858_v4 = vsel %vm544_vm1, %v25454_v12, %v6279_v36  ;;  %v25455_v29 = vcombine.high %v25448_v20, %v25448_v20  ;;  %v5260_v49 = vrot.slane %v5246_v58, %v18240_v54  ;;  %25456 = vst [vmem:[#allocation92_spill] sm:$0xff] %v21336_v39 }
 0x34e   : > { %v6303_v5 = vrot.slane %v5245_v41, %v18528_v59  ;;  %v6862_v40 = vsel %vm544_vm1, %v25458_v57, %v6295_v51  ;;  %v25459_v10 = vcombine.high %v25451_v3, %v25451_v3  ;;  %v14339_v26 = vcombine.low %v6857_v2, %v6858_v4 }
 0x34f   : > { %v6859_v63 = vsel %vm544_vm1, %v25455_v29, %v6283_v15  ;;  %v25460_v15 = vcombine.high %v25454_v12, %v25454_v12  ;;  %v14356_v20 = vcombine.low %v6861_v13, %v6862_v40  ;;  %v5261_v29 = vcombine.high %v5253_v28, %v5253_v28 }
 0x350   : > { %v6863_v36 = vsel %vm544_vm1, %v25459_v10, %v6299_v6  ;;  %v5262_v39 = vcombine.high %v5260_v49, %v5260_v49  ;;  %v25461_v41 = vcombine.high %v25458_v57, %v25458_v57  ;;  %v14347_v35 = vrot.slane %v14339_v26, %v19183_v18 }
 0x351   : > { %v6860_v58 = vsel %vm544_vm1, %v25460_v15, %v6287_v17  ;;  %v5269_v3 = vrot.slane %v5253_v28, %v18240_v54  ;;  %v14364_v2 = vrot.slane %v14356_v20, %v19183_v18  ;;  %v5276_v12 = vrot.slane %v5260_v49, %v18240_v54 }
 0x352   : > { %v6864_v31 = vsel %vm544_vm1, %v25461_v41, %v6303_v5  ;;  %v14340_v51 = vcombine.low %v6859_v63, %v6860_v58  ;;  %v5283_v17 = vrot.slane %v5261_v29, %v18240_v54  ;;  %v5290_v40 = vrot.slane %v5262_v39, %v18240_v54  ;;  %v21363_v5 = vpop.f32.mrb[180].mxu0  ;;  %v21365_v63 = vpop.f32.mrb[180].mxu1 }
 0x353   : > { %v14357_v6 = vcombine.low %v6863_v36, %v6864_v31  ;;  %v5291_v4 = vcombine.high %v5269_v3, %v5269_v3  ;;  %v6307_v57 = vrot.slane %v5269_v3, %v18528_v59  ;;  %25462 = vst [vmem:[#allocation40_spill] sm:$0xff] %v21365_v63  ;;  %v5292_v26 = vcombine.high %v5276_v12, %v5276_v12  ;;  %v21369_v10 = vpop.f32.mrb[181].mxu0  ;;  %v21371_v36 = vpop.f32.mrb[181].mxu1 }
 0x354   : > { %v14354_v13 = vrot.slane %v14340_v51, %v19183_v18  ;;  %v5293_v31 = vcombine.high %v5283_v17, %v5283_v17  ;;  %v6311_v49 = vrot.slane %v5283_v17, %v18528_v59  ;;  %v5294_v39 = vcombine.high %v5290_v40, %v5290_v40  ;;  %v21375_v29 = vpop.f32.mrb[182].mxu0  ;;  %v21377_v41 = vpop.f32.mrb[182].mxu1 }
 0x355   : > { %v14371_v28 = vrot.slane %v14357_v6, %v19183_v18  ;;  %v6315_v58 = vrot.slane %v5291_v4, %v18528_v59  ;;  %v6323_v20 = vrot.slane %v5276_v12, %v18528_v59  ;;  %25463 = vst [vmem:[#allocation43_spill] sm:$0xff] %v21375_v29  ;;  %25464 = vst [vmem:[#allocation91_spill] sm:$0xff] %v21377_v41  ;;  %v21382_v63 = vpop.f32.mrb[183].mxu0  ;;  %v25467_v4 = vld [vmem:[#allocation136_spill] sm:$0xff]  ;;  %v25468_v29 = vld [vmem:[#allocation138_spill] sm:$0xff] }
 0x356   : > { %v14355_v15 = vcombine.low %v14347_v35, %v14354_v13  ;;  %v6319_v3 = vrot.slane %v5293_v31, %v18528_v59  ;;  %v6327_v6 = vrot.slane %v5290_v40, %v18528_v59  ;;  %v6331_v17 = vrot.slane %v5292_v26, %v18528_v59  ;;  %25465 = vst [vmem:[#allocation93_spill] sm:$0xff] %v21382_v63  ;;  %v21384_v35 = vpop.f32.mrb[183].mxu1  ;;  %v25471_v31 = vld [vmem:[#allocation137_spill] sm:$0xff] }
 0x357   : > { %v14372_v51 = vcombine.low %v14364_v2, %v14371_v28  ;;  %25466 = vst [vmem:[#allocation94_spill] sm:$0xff] %v21384_v35  ;;  %v6335_v13 = vrot.slane %v5294_v39, %v18528_v59  ;;  %v6865_v12 = vsel %vm544_vm1, %v25467_v4, %v6307_v57  ;;  %v6866_v41 = vsel %vm544_vm1, %v25468_v29, %v6311_v49  ;;  %v25472_v39 = vld [vmem:[#allocation140_spill] sm:$0xff] }
 0x358   : > { %16027 = vst [vmem:[%s19313_s9 + $0x390] sm:$0xff] %v14355_v15  ;;  %v25469_v2 = vcombine.high %v25467_v4, %v25467_v4  ;;  %v25470_v28 = vcombine.high %v25468_v29, %v25468_v29  ;;  %v6869_v15 = vsel %vm544_vm1, %v25471_v31, %v6323_v20  ;;  %v6870_v57 = vsel %vm544_vm1, %v25472_v39, %v6327_v6 }
 0x359   : > { %16028 = vst [vmem:[%s19313_s9 + $0x398] sm:$0xff] %v14372_v51  ;;  %v25473_v49 = vcombine.high %v25471_v31, %v25471_v31  ;;  %v14373_v4 = vcombine.low %v6865_v12, %v6866_v41  ;;  %v3743_v20 = vadd.f32 %v20964_v38, %v21292_v56  ;;  %v7461_v6 = vadd.f32 %v20964_v38, %v21297_v11 }
 0x35a   : > { %v6867_v40 = vsel %vm544_vm1, %v25469_v2, %v6315_v58  ;;  %v6868_v26 = vsel %vm544_vm1, %v25470_v28, %v6319_v3  ;;  %v25474_v58 = vcombine.high %v25472_v39, %v25472_v39  ;;  %v14390_v2 = vcombine.low %v6869_v15, %v6870_v57 }
 0x35b   : > { %v6871_v35 = vsel %vm544_vm1, %v25473_v49, %v6331_v17  ;;  %v14374_v29 = vcombine.low %v6867_v40, %v6868_v26  ;;  %v16907_v28 = vadd.f32 %v20582_v0, %v20573_v7  ;;  %v14381_v17 = vrot.slane %v14373_v4, %v19183_v18 }
 0x35c   : > { %v6872_v51 = vsel %vm544_vm1, %v25474_v58, %v6335_v13  ;;  %v14398_v39 = vrot.slane %v14390_v2, %v19183_v18  ;;  %v21424_v41 = vadd.f32 %v20632_v27, %v20626_v44  ;;  %v21428_v13 = vpop.f32.mrb[184].mxu1  ;;  %v5295_v11 = vcombine.high %v3743_v20, %v3743_v20 }
 0x35d   : > { %v14391_v3 = vcombine.low %v6871_v35, %v6872_v51  ;;  %v14388_v31 = vrot.slane %v14374_v29, %v19183_v18  ;;  %v21426_v35 = vpop.f32.mrb[184].mxu0  ;;  %25476 = vst [vmem:[#allocation95_spill] sm:$0xff] %v21428_v13  ;;  %v5302_v12 = vrot.slane %v3743_v20, %v18240_v54  ;;  %v7525_v7 = vcombine.high %v7461_v6, %v7461_v6  ;;  %v21434_v40 = vpop.f32.mrb[185].mxu1  ;;  %v25483_v20 = vld [vmem:[#allocation142_spill] sm:$0xff] }
 0x35e   : > { %25475 = vst [vmem:[#allocation96_spill] sm:$0xff] %v21426_v35  ;;  %v21432_v0 = vpop.f32.mrb[185].mxu0  ;;  %25478 = vst [vmem:[#allocation97_spill] sm:$0xff] %v21434_v40  ;;  %v7532_v15 = vrot.slane %v7461_v6, %v18240_v54  ;;  %v7338_v44 = vadd.f32 %v16907_v28, %v21301_v21  ;;  %v21440_v27 = vadd.f32 %v20634_v53, %v20628_v62  ;;  %v21444_v49 = vpop.f32.mrb[186].mxu1  ;;  %v25484_v6 = vld [vmem:[#allocation143_spill] sm:$0xff]  ;;  %v25485_v53 = vld [vmem:[#allocation144_spill] sm:$0xff] }
 0x35f   : > { %v14405_v56 = vrot.slane %v14391_v3, %v19183_v18  ;;  %25477 = vst [vmem:[#allocation98_spill] sm:$0xff] %v21432_v0  ;;  %v14389_v26 = vcombine.low %v14381_v17, %v14388_v31  ;;  %v21442_v57 = vpop.f32.mrb[186].mxu0  ;;  %25480 = vst [vmem:[#allocation44_spill] sm:$0xff] %v21444_v49  ;;  %v5309_v51 = vrot.slane %v5295_v11, %v18240_v54  ;;  %v21450_v3 = vpop.f32.mrb[187].mxu1 }
 0x360   : > { %25479 = vst [vmem:[#allocation99_spill] sm:$0xff] %v21442_v57  ;;  %v5310_v4 = vcombine.high %v5302_v12, %v5302_v12  ;;  %v5318_v29 = vrot.slane %v5302_v12, %v18240_v54  ;;  %v21448_v2 = vpop.f32.mrb[187].mxu0  ;;  %25482 = vst [vmem:[#allocation47_spill] sm:$0xff] %v21450_v3  ;;  %v2873_v21 = vcombine.high %v25483_v20, %v25483_v20 }
 0x361   : > { %v14406_v58 = vcombine.low %v14398_v39, %v14405_v56  ;;  %25481 = vst [vmem:[#allocation45_spill] sm:$0xff] %v21448_v2  ;;  %v2874_v62 = vcombine.high %v25484_v6, %v25484_v6  ;;  %v2875_v28 = vcombine.high %v25485_v53, %v25485_v53  ;;  %16033 = vst [vmem:[%s19313_s9 + $0x3c0] sm:$0xff] %v14389_v26  ;;  %v21474_v0 = vpop.f32.mrb[188].mxu0 }
 0x362   : > { %v7539_v17 = vrot.slane %v7525_v7, %v18240_v54  ;;  %v5311_v31 = vcombine.high %v5309_v51, %v5309_v51  ;;  %v5325_v39 = vrot.slane %v5309_v51, %v18240_v54  ;;  %v5332_v56 = vrot.slane %v5310_v4, %v18240_v54  ;;  %v25487_v4 = vld [vmem:[#allocation139_spill] sm:$0xff]  ;;  %25488 = vst [vmem:[#allocation100_spill] sm:$0xff] %v21474_v0 }
 0x363   : > { %16034 = vst [vmem:[%s19313_s9 + $0x3c8] sm:$0xff] %v14406_v58  ;;  %v5340_v11 = vcombine.high %v5318_v29, %v5318_v29  ;;  %v6339_v12 = vrot.slane %v5318_v29, %v18528_v59  ;;  %v7540_v3 = vcombine.high %v7532_v15, %v7532_v15  ;;  %v21465_v49 = vrot.slane %v7532_v15, %v18240_v54  ;;  %v21476_v15 = vpop.f32.mrb[188].mxu1 }
 0x364   : > { %v7462_v2 = vadd.f32 %v20964_v38, %v7338_v44  ;;  %v5339_v57 = vrot.slane %v5311_v31, %v18240_v54  ;;  %v5341_v26 = vcombine.high %v5325_v39, %v5325_v39  ;;  %v5342_v40 = vcombine.high %v5332_v56, %v5332_v56  ;;  %25489 = vst [vmem:[#allocation102_spill] sm:$0xff] %v21476_v15 }
 0x365   : > { %25486 = vst [vmem:[#allocation19_spill] sm:$0xff] %v21465_v49  ;;  %v6343_v7 = vrot.slane %v5332_v56, %v18528_v59  ;;  %v6347_v58 = vrot.slane %v5340_v11, %v18528_v59  ;;  %v6355_v51 = vrot.slane %v5325_v39, %v18528_v59  ;;  %v6873_v13 = vsel %vm544_vm1, %v25487_v4, %v6339_v12  ;;  %v21481_v56 = vpop.f32.mrb[189].mxu0  ;;  %v21483_v11 = vpop.f32.mrb[189].mxu1 }
 0x366   : > { %v7541_v29 = vcombine.high %v7539_v17, %v7539_v17  ;;  %v5343_v35 = vcombine.high %v5339_v57, %v5339_v57  ;;  %v6351_v44 = vrot.slane %v5342_v40, %v18528_v59  ;;  %v6359_v31 = vrot.slane %v5339_v57, %v18528_v59  ;;  %25490 = vst [vmem:[#allocation101_spill] sm:$0xff] %v21481_v56  ;;  %v21496_v57 = vpop.f32.mrb[190].mxu0 }
 0x367   : > { %v6363_v63 = vrot.slane %v5341_v26, %v18528_v59  ;;  %25491 = vst [vmem:[#allocation103_spill] sm:$0xff] %v21483_v11  ;;  %v6874_v39 = vsel %vm544_vm1, %v25484_v6, %v6343_v7  ;;  %v25492_v12 = vcombine.high %v25487_v4, %v25487_v4  ;;  %v6877_v15 = vsel %vm544_vm1, %v25483_v20, %v6355_v51  ;;  %v21498_v26 = vpop.f32.mrb[190].mxu1 }
 0x368   : > { %v21494_v40 = vrot.slane %v7539_v17, %v18240_v54  ;;  %25494 = vst [vmem:[#allocation106_spill] sm:$0xff] %v21498_v26  ;;  %v6367_v11 = vrot.slane %v5343_v35, %v18528_v59  ;;  %v6876_v56 = vsel %vm544_vm1, %v2874_v62, %v6351_v44  ;;  %v6878_v6 = vsel %vm544_vm1, %v25485_v53, %v6359_v31  ;;  %v21507_v4 = vpop.f32.mrb[191].mxu1  ;;  %v25536_v59 = vld [vmem:[#allocation67_spill] sm:$0xff] }
 0x369   : > { %v6875_v0 = vsel %vm544_vm1, %v25492_v12, %v6347_v58  ;;  %v6879_v7 = vsel %vm544_vm1, %v2873_v21, %v6363_v63  ;;  %v21505_v58 = vpop.f32.mrb[191].mxu0  ;;  %v14407_v20 = vcombine.low %v6873_v13, %v6874_v39  ;;  %v14424_v51 = vcombine.low %v6877_v15, %v6878_v6  ;;  %v25498_v15 = vld [vmem:[#allocation58_spill] sm:$0xff]  ;;  %v25499_v39 = vld [vmem:[#allocation23_spill] sm:$0xff]  ;;  %v25500_v6 = vld [vmem:[#allocation60_spill] sm:$0xff] }
 0x36a   : > { %25493 = vst [vmem:[#allocation104_spill] sm:$0xff] %v21494_v40  ;;  %v14408_v17 = vcombine.low %v6875_v0, %v6876_v56  ;;  %v21510_v12 = vrot.slane %v7540_v3, %v18240_v54  ;;  %v6880_v26 = vsel %vm544_vm1, %v2875_v28, %v6367_v11  ;;  %v21514_v35 = vrot.slane %v7541_v29, %v18240_v54  ;;  %v25497_v29 = vld [vmem:[#allocation57_spill] sm:$0xff] }
 0x36b   : > { %v7574_v53 = vcombine.high %v7462_v2, %v7462_v2  ;;  %v14415_v63 = vrot.slane %v14407_v20, %v19183_v18  ;;  %v14425_v44 = vcombine.low %v6879_v7, %v6880_v26  ;;  %v14432_v13 = vrot.slane %v14424_v51, %v19183_v18  ;;  %v21532_v7 = vpop.f32.mrb[192].mxu0 }
 0x36c   : > { %25495 = vst [vmem:[#allocation105_spill] sm:$0xff] %v21510_v12  ;;  %25496 = vst [vmem:[#allocation108_spill] sm:$0xff] %v21514_v35  ;;  %v14422_v21 = vrot.slane %v14408_v17, %v19183_v18  ;;  %v7581_v0 = vrot.slane %v7462_v2, %v18240_v54  ;;  %v7343_v28 = vadd.f32 %v21440_v27, %v21424_v41  ;;  %v21534_v2 = vpop.f32.mrb[192].mxu1  ;;  %v25507_v17 = vld [vmem:[#allocation24_spill] sm:$0xff]  ;;  %v25509_v35 = vld [vmem:[#allocation59_spill] sm:$0xff] }
 0x36d   : > { %v7588_v3 = vrot.slane %v7574_v53, %v18240_v54  ;;  %v16801_v31 = vadd.f32 %v25498_v15, %v25497_v29  ;;  %v14439_v11 = vrot.slane %v14425_v44, %v19183_v18  ;;  %v16913_v20 = vadd.f32 %v25500_v6, %v25499_v39  ;;  %v21541_v53 = vpop.f32.mrb[193].mxu0 }
 0x36e   : > { %v14423_v56 = vcombine.low %v14415_v63, %v14422_v21  ;;  %v16804_v26 = vadd.f32 %v20699_v16, %v20692_v23  ;;  %v7589_v41 = vcombine.high %v7581_v0, %v7581_v0  ;;  %v21539_v51 = vrot.slane %v7581_v0, %v18240_v54  ;;  %v21543_v63 = vpop.f32.mrb[193].mxu1  ;;  %v21549_v29 = vpop.f32.mrb[194].mxu0  ;;  %v25506_v0 = vld [vmem:[#allocation145_spill] sm:$0xff] }
 0x36f   : > { %v7590_v27 = vcombine.high %v7588_v3, %v7588_v3  ;;  %v14440_v21 = vcombine.low %v14432_v13, %v14439_v11  ;;  %v7463_v23 = vadd.f32 %v20964_v38, %v7343_v28  ;;  %v7346_v16 = vadd.f32 %v16913_v20, %v16801_v31  ;;  %v21551_v15 = vpop.f32.mrb[194].mxu1  ;;  %v21563_v28 = vpop.f32.mrb[195].mxu0 }
 0x370   : > { %25501 = vst [vmem:[#allocation20_spill] sm:$0xff] %v21539_v51  ;;  %16035 = vst [vmem:[%s19313_s9 + $0x3d0] sm:$0xff] %v14423_v56  ;;  %v16916_v44 = vadd.f32 %v20701_v1, %v20694_v42  ;;  %v21558_v6 = vrot.slane %v7588_v3, %v18240_v54  ;;  %v21561_v13 = vrot.slane %v7589_v41, %v18240_v54  ;;  %v21565_v31 = vpop.f32.mrb[195].mxu1  ;;  %v25505_v41 = vld [vmem:[#allocation146_spill] sm:$0xff]  ;;  %v25510_v3 = vld [vmem:[#allocation61_spill] sm:$0xff] }
 0x371   : > { %16036 = vst [vmem:[%s19313_s9 + $0x3d8] sm:$0xff] %v14440_v21  ;;  %v7623_v42 = vcombine.high %v7463_v23, %v7463_v23  ;;  %v7630_v1 = vrot.slane %v7463_v23, %v18240_v54  ;;  %v7464_v56 = vadd.f32 %v20964_v38, %v7346_v16  ;;  %v21571_v20 = vrot.slane %v7590_v27, %v18240_v54 }
 0x372   : > { %25502 = vst [vmem:[#allocation49_spill] sm:$0xff] %v21558_v6  ;;  %25503 = vst [vmem:[#allocation46_spill] sm:$0xff] %v21561_v13  ;;  %v7351_v11 = vadd.f32 %v16916_v44, %v16804_v26  ;;  %v16807_v39 = vadd.f32 %v25505_v41, %v20705_v50  ;;  %v16919_v62 = vadd.f32 %v25507_v17, %v25506_v0  ;;  %v25527_v13 = vld [vmem:[#allocation63_spill] sm:$0xff] }
 0x373   : > { %25504 = vst [vmem:[#allocation48_spill] sm:$0xff] %v21571_v20  ;;  %v7637_v21 = vrot.slane %v7623_v42, %v18240_v54  ;;  %v7638_v18 = vcombine.high %v7630_v1, %v7630_v1  ;;  %v21581_v23 = vrot.slane %v7630_v1, %v18240_v54  ;;  %v7672_v16 = vcombine.high %v7464_v56, %v7464_v56  ;;  %v25521_v20 = vld [vmem:[#allocation65_spill] sm:$0xff] }
 0x374   : > { %v7679_v26 = vrot.slane %v7464_v56, %v18240_v54  ;;  %v7465_v27 = vadd.f32 %v20964_v38, %v7351_v11  ;;  %v7354_v44 = vadd.f32 %v16919_v62, %v16807_v39  ;;  %v16810_v51 = vadd.f32 %v25510_v3, %v25509_v35  ;;  %v21631_v35 = vpop.f32.mrb[196].mxu1 }
 0x375   : > { %25508 = vst [vmem:[#allocation107_spill] sm:$0xff] %v21581_v23  ;;  %v7639_v41 = vcombine.high %v7637_v21, %v7637_v21  ;;  %v21590_v17 = vrot.slane %v7637_v21, %v18240_v54  ;;  %v21593_v0 = vrot.slane %v7638_v18, %v18240_v54  ;;  %v7686_v42 = vrot.slane %v7672_v16, %v18240_v54  ;;  %v21629_v23 = vpop.f32.mrb[196].mxu0 }
 0x376   : > { %v7687_v1 = vcombine.high %v7679_v26, %v7679_v26  ;;  %v21597_v56 = vrot.slane %v7679_v26, %v18240_v54  ;;  %v7721_v62 = vcombine.high %v7465_v27, %v7465_v27  ;;  %v7728_v3 = vrot.slane %v7465_v27, %v18240_v54 }
 0x377   : > { %25511 = vst [vmem:[#allocation110_spill] sm:$0xff] %v21590_v17  ;;  %25512 = vst [vmem:[#allocation109_spill] sm:$0xff] %v21593_v0  ;;  %v21604_v11 = vrot.slane %v7639_v41, %v18240_v54  ;;  %v7688_v21 = vcombine.high %v7686_v42, %v7686_v42  ;;  %v21610_v16 = vrot.slane %v7686_v42, %v18240_v54  ;;  %v21642_v0 = vpop.f32.mrb[197].mxu1 }
 0x378   : > { %25513 = vst [vmem:[#allocation111_spill] sm:$0xff] %v21597_v56  ;;  %v21613_v26 = vrot.slane %v7687_v1, %v18240_v54  ;;  %v7735_v39 = vrot.slane %v7721_v62, %v18240_v54  ;;  %v7736_v50 = vcombine.high %v7728_v3, %v7728_v3  ;;  %v21619_v41 = vrot.slane %v7728_v3, %v18240_v54  ;;  %v25520_v56 = vld [vmem:[#allocation62_spill] sm:$0xff] }
 0x379   : > { %25514 = vst [vmem:[#allocation112_spill] sm:$0xff] %v21604_v11  ;;  %25515 = vst [vmem:[#allocation115_spill] sm:$0xff] %v21610_v16  ;;  %v21624_v18 = vrot.slane %v7688_v21, %v18240_v54  ;;  %v7466_v1 = vadd.f32 %v20964_v38, %v7354_v44  ;;  %v21640_v21 = vpop.f32.mrb[197].mxu0  ;;  %v16922_v62 = vadd.f32 %v25521_v20, %v25520_v56  ;;  %v25524_v56 = vld [vmem:[#allocation27_spill] sm:$0xff]  ;;  %v25525_v3 = vld [vmem:[#allocation30_spill] sm:$0xff] }
 0x37a   : > { %25516 = vst [vmem:[#allocation114_spill] sm:$0xff] %v21613_v26  ;;  %25517 = vst [vmem:[#allocation118_spill] sm:$0xff] %v21619_v41  ;;  %v7737_v17 = vcombine.high %v7735_v39, %v7735_v39  ;;  %v21638_v27 = vrot.slane %v7735_v39, %v18240_v54  ;;  %v21652_v16 = vrot.slane %v7736_v50, %v18240_v54  ;;  %v25528_v39 = vld [vmem:[#allocation147_spill] sm:$0xff]  ;;  %v25529_v41 = vld [vmem:[#allocation64_spill] sm:$0xff] }
 0x37b   : > { %25518 = vst [vmem:[#allocation21_spill] sm:$0xff] %v21624_v18  ;;  %v7770_v44 = vcombine.high %v7466_v1, %v7466_v1  ;;  %v7777_v42 = vrot.slane %v7466_v1, %v18240_v54  ;;  %v16813_v11 = vadd.f32 %v20774_v34, %v20765_v19  ;;  %v7359_v6 = vadd.f32 %v16922_v62, %v16810_v51  ;;  %v25526_v18 = vld [vmem:[#allocation25_spill] sm:$0xff]  ;;  %v21679_v62 = vpop.f32.mrb[198].mxu0 }
 0x37c   : > { %25519 = vst [vmem:[#allocation50_spill] sm:$0xff] %v21638_v27  ;;  %25522 = vst [vmem:[#allocation51_spill] sm:$0xff] %v21652_v16  ;;  %v21659_v38 = vrot.slane %v7737_v17, %v18240_v54  ;;  %v16925_v50 = vadd.f32 %v25525_v3, %v25524_v56  ;;  %v16816_v40 = vadd.f32 %v25527_v13, %v25526_v18  ;;  %v21686_v13 = vld [vmem:[%s24375_s2] ss:$0 sm:$0xff]  ;;  %v25533_v3 = vld [vmem:[#allocation66_spill] sm:$0xff]  ;;  %v21691_v56 = vpop.f32.mrb[199].mxu0 }
 0x37d   : > { %v7784_v1 = vrot.slane %v7770_v44, %v18240_v54  ;;  %v7785_v26 = vcombine.high %v7777_v42, %v7777_v42  ;;  %v16928_v12 = vadd.f32 %v25529_v41, %v25528_v39  ;;  %v21671_v34 = vrot.slane %v7777_v42, %v18240_v54  ;;  %v21681_v44 = vpop.f32.mrb[198].mxu1  ;;  %v25534_v39 = vld [vmem:[#allocation26_spill] sm:$0xff] }
 0x37e   : > { %25523 = vst [vmem:[#allocation53_spill] sm:$0xff] %v21659_v38  ;;  %v7467_v18 = vadd.f32 %v21686_v13, %v7359_v6  ;;  %v7362_v41 = vadd.f32 %v16925_v50, %v16813_v11  ;;  %v25537_v6 = vld [vmem:[#allocation68_spill] sm:$0xff] }
 0x37f   : > { %v7786_v19 = vcombine.high %v7784_v1, %v7784_v1  ;;  %25530 = vst [vmem:[#allocation54_spill] sm:$0xff] %v21671_v34  ;;  %v21674_v17 = vrot.slane %v7784_v1, %v18240_v54  ;;  %v21677_v51 = vrot.slane %v7785_v26, %v18240_v54  ;;  %v7367_v42 = vadd.f32 %v16928_v12, %v16816_v40  ;;  %v21693_v26 = vpop.f32.mrb[199].mxu1 }
 0x380   : > { %v16819_v1 = vadd.f32 %v25534_v39, %v25533_v3  ;;  %v16931_v11 = vadd.f32 %v25537_v6, %v25536_v59  ;;  %v7819_v40 = vcombine.high %v7467_v18, %v7467_v18  ;;  %v7826_v12 = vrot.slane %v7467_v18, %v18240_v54 }
 0x381   : > { %25531 = vst [vmem:[#allocation52_spill] sm:$0xff] %v21674_v17  ;;  %25532 = vst [vmem:[#allocation22_spill] sm:$0xff] %v21677_v51  ;;  %v21700_v49 = vrot.slane %v7786_v19, %v18240_v54  ;;  %v7468_v50 = vadd.f32 %v21686_v13, %v7362_v41  ;;  %v7469_v3 = vadd.f32 %v21686_v13, %v7367_v42 }
 0x382   : > { %v7370_v27 = vadd.f32 %v16931_v11, %v16819_v1  ;;  %v16822_v19 = vadd.f32 %v20910_v9, %v20902_v37  ;;  %v7833_v6 = vrot.slane %v7819_v40, %v18240_v54  ;;  %v7834_v18 = vcombine.high %v7826_v12, %v7826_v12 }
 0x383   : > { %25535 = vst [vmem:[#allocation113_spill] sm:$0xff] %v21700_v49  ;;  %v7868_v38 = vcombine.high %v7468_v50, %v7468_v50  ;;  %v21717_v41 = vrot.slane %v7826_v12, %v18240_v54  ;;  %v7875_v42 = vrot.slane %v7468_v50, %v18240_v54  ;;  %v7917_v39 = vcombine.high %v7469_v3, %v7469_v3  ;;  %v25543_v49 = vld [vmem:[#allocation42_spill] sm:$0xff] }
 0x384   : > { %v7924_v34 = vrot.slane %v7469_v3, %v18240_v54  ;;  %v7835_v11 = vcombine.high %v7833_v6, %v7833_v6  ;;  %v21724_v37 = vrot.slane %v7833_v6, %v18240_v54  ;;  %v21727_v9 = vrot.slane %v7834_v18, %v18240_v54 }
 0x385   : > { %25538 = vst [vmem:[#allocation117_spill] sm:$0xff] %v21717_v41  ;;  %v7882_v40 = vrot.slane %v7868_v38, %v18240_v54  ;;  %v7883_v20 = vcombine.high %v7875_v42, %v7875_v42  ;;  %v21731_v12 = vrot.slane %v7875_v42, %v18240_v54  ;;  %v7931_v50 = vrot.slane %v7917_v39, %v18240_v54  ;;  %v21782_v39 = vpop.f32.mrb[200].mxu1  ;;  %v25565_v41 = vld [vmem:[#allocation13_spill] sm:$0xff] }
 0x386   : > { %25539 = vst [vmem:[#allocation116_spill] sm:$0xff] %v21724_v37  ;;  %25540 = vst [vmem:[#allocation119_spill] sm:$0xff] %v21727_v9  ;;  %v21735_v3 = vrot.slane %v7835_v11, %v18240_v54  ;;  %v7932_v59 = vcombine.high %v7924_v34, %v7924_v34  ;;  %v7470_v1 = vadd.f32 %v21686_v13, %v7370_v27  ;;  %v25544_v6 = vshll.u32 %v25543_v49, 16 }
 0x387   : > { %25541 = vst [vmem:[#allocation120_spill] sm:$0xff] %v21731_v12  ;;  %v7884_v51 = vcombine.high %v7882_v40, %v7882_v40  ;;  %v21743_v38 = vrot.slane %v7882_v40, %v18240_v54  ;;  %v21746_v42 = vrot.slane %v7883_v20, %v18240_v54  ;;  %v7933_v11 = vcombine.high %v7931_v50, %v7931_v50 }
 0x388   : > { %25542 = vst [vmem:[#allocation122_spill] sm:$0xff] %v21735_v3  ;;  %v599_v17 = vrot.slane %v25544_v6, 1  ;;  %v21751_v16 = vrot.slane %v7924_v34, %v18240_v54  ;;  %v21754_v27 = vrot.slane %v7931_v50, %v18240_v54  ;;  %v21770_v50 = vrot.slane %v7932_v59, %v18240_v54  ;;  %v21780_v3 = vpop.f32.mrb[200].mxu0  ;;  %v25556_v59 = vld [vmem:[#allocation69_spill] sm:$0xff] }
 0x389   : > { %25545 = vst [vmem:[#allocation121_spill] sm:$0xff] %v21743_v38  ;;  %25546 = vst [vmem:[#allocation123_spill] sm:$0xff] %v21746_v42  ;;  %v21761_v18 = vrot.slane %v7884_v51, %v18240_v54  ;;  %v7966_v37 = vcombine.high %v7470_v1, %v7470_v1  ;;  %v21773_v6 = vrot.slane %v7933_v11, %v18240_v54  ;;  %v25552_v20 = vshrl.u32 %v25543_v49, 16  ;;  %v25553_v38 = vld [vmem:[#allocation70_spill] sm:$0xff]  ;;  %v25558_v42 = vld [vmem:[#allocation72_spill] sm:$0xff] }
 0x38a   : > { %25547 = vst [vmem:[#allocation124_spill] sm:$0xff] %v21751_v16  ;;  %25548 = vst [vmem:[#allocation127_spill] sm:$0xff] %v21754_v27  ;;  %v7973_v40 = vrot.slane %v7470_v1, %v18240_v54  ;;  %v16934_v11 = vadd.f32 %v20912_v55, %v20904_v48  ;;  %v16825_v51 = vadd.f32 %v20936_v60, %v25553_v38  ;;  %v21791_v16 = vpop.f32.mrb[201].mxu0  ;;  %v21793_v1 = vpop.f32.mrb[201].mxu1  ;;  %v25557_v27 = vld [vmem:[#allocation71_spill] sm:$0xff] }
 0x38b   : > { %25549 = vst [vmem:[#allocation126_spill] sm:$0xff] %v21761_v18  ;;  %25550 = vst [vmem:[#allocation130_spill] sm:$0xff] %v21770_v50  ;;  %v600_v12 = vor.u32 %v599_v17, %v25552_v20  ;;  %v7980_v34 = vrot.slane %v7966_v37, %v18240_v54  ;;  %v16937_v37 = vadd.f32 %v25557_v27, %v25556_v59  ;;  %v25559_v27 = vld [vmem:[#allocation75_spill] sm:$0xff] }
 0x38c   : > { %25551 = vst [vmem:[#allocation125_spill] sm:$0xff] %v21773_v6  ;;  %v7981_v17 = vcombine.high %v7973_v40, %v7973_v40  ;;  %v21796_v20 = vrot.slane %v7973_v40, %v18240_v54  ;;  %v7375_v60 = vadd.f32 %v16934_v11, %v16822_v19  ;;  %v16828_v38 = vadd.f32 %v20978_v22, %v20973_v52  ;;  %v25562_v22 = vld [vmem:[#allocation74_spill] sm:$0xff]  ;;  %v25567_v6 = vld [vmem:[#allocation29_spill] sm:$0xff] }
 0x38d   : > { %v639_v9 = vsel %vm18089_vm5, %v600_v12, 0  ;;  %v7982_v55 = vcombine.high %v7980_v34, %v7980_v34  ;;  %v7378_v12 = vadd.f32 %v16937_v37, %v16825_v51  ;;  %v16940_v59 = vadd.f32 %v25559_v27, %v25558_v42  ;;  %v25564_v37 = vld [vmem:[#allocation78_spill] sm:$0xff] }
 0x38e   : > { %25554 = vst [vmem:[#allocation129_spill] sm:$0xff] %v21796_v20  ;;  %9663 = vmatprep.mubr.bf16.mxu0 %v639_v9  ;;  %v21814_v48 = vrot.slane %v7980_v34, %v18240_v54  ;;  %v21817_v19 = vrot.slane %v7981_v17, %v18240_v54  ;;  %v7471_v52 = vadd.f32 %v21686_v13, %v7375_v60  ;;  %v25563_v9 = vld [vmem:[#allocation18_spill] sm:$0xff] }
 0x38f   : > { %9664 = vmatmul.mubr.bf16.gmra.mrb[252].mxu0 %v25543_v49  ;;  %v16831_v11 = vadd.f32 %v25563_v9, %v25562_v22  ;;  %v7472_v49 = vadd.f32 %v21686_v13, %v7378_v12  ;;  %v7383_v51 = vadd.f32 %v16940_v59, %v16828_v38  ;;  %v16943_v42 = vadd.f32 %v25565_v41, %v25564_v37  ;;  %v25568_v60 = vld [vmem:[#allocation150_spill] sm:$0xff]  ;;  %v21835_v12 = vpop.f32.mrb[202].mxu0  ;;  %v21837_v38 = vpop.f32.mrb[202].mxu1  ;;  %v25572_v37 = vld [vmem:[#allocation148_spill] sm:$0xff] }
 0x390   : > { %25560 = vst [vmem:[#allocation128_spill] sm:$0xff] %v21814_v48  ;;  %25561 = vst [vmem:[#allocation131_spill] sm:$0xff] %v21817_v19  ;;  %v21828_v34 = vrot.slane %v7982_v55, %v18240_v54  ;;  %v8015_v27 = vcombine.high %v7471_v52, %v7471_v52  ;;  %v8022_v17 = vrot.slane %v7471_v52, %v18240_v54  ;;  %v25571_v52 = vld [vmem:[#allocation149_spill] sm:$0xff] }
 0x391   : > { %v16834_v50 = vadd.f32 %v25568_v60, %v25567_v6  ;;  %v8064_v18 = vcombine.high %v7472_v49, %v7472_v49  ;;  %v8071_v22 = vrot.slane %v7472_v49, %v18240_v54  ;;  %v7473_v9 = vadd.f32 %v21686_v13, %v7383_v51  ;;  %25569 = vst [vmem:[#allocation11_spill] sm:$0xff] %v21837_v38  ;;  %v21845_v6 = vpop.f32.mrb[203].mxu0 }
 0x392   : > { %25566 = vst [vmem:[#allocation28_spill] sm:$0xff] %v21828_v34  ;;  %v7386_v40 = vadd.f32 %v16943_v42, %v16831_v11  ;;  %v8029_v41 = vrot.slane %v8015_v27, %v18240_v54  ;;  %v8030_v55 = vcombine.high %v8022_v17, %v8022_v17  ;;  %v21841_v59 = vrot.slane %v8022_v17, %v18240_v54 }
 0x393   : > { %v16946_v20 = vadd.f32 %v25572_v37, %v25571_v52  ;;  %25573 = vst [vmem:[#allocation132_spill] sm:$0xff] %v21845_v6  ;;  %v8078_v49 = vrot.slane %v8064_v18, %v18240_v54  ;;  %v8079_v60 = vcombine.high %v8071_v22, %v8071_v22  ;;  %v21849_v11 = vrot.slane %v8071_v22, %v18240_v54  ;;  %v21859_v52 = vpop.f32.mrb[203].mxu1 }
 0x394   : > { %25570 = vst [vmem:[#allocation56_spill] sm:$0xff] %v21841_v59  ;;  %v8113_v51 = vcombine.high %v7473_v9, %v7473_v9  ;;  %v8031_v27 = vcombine.high %v8029_v41, %v8029_v41  ;;  %v21854_v38 = vrot.slane %v8029_v41, %v18240_v54  ;;  %v21857_v17 = vrot.slane %v8030_v55, %v18240_v54 }
 0x395   : > { %25574 = vst [vmem:[#allocation133_spill] sm:$0xff] %v21849_v11  ;;  %25577 = vst [vmem:[#allocation136_spill] sm:$0xff] %v21859_v52  ;;  %v8080_v37 = vcombine.high %v8078_v49, %v8078_v49  ;;  %v21864_v22 = vrot.slane %v8078_v49, %v18240_v54  ;;  %v21867_v6 = vrot.slane %v8079_v60, %v18240_v54  ;;  %v25613_v52 = vld [vmem:[#allocation34_spill] sm:$0xff] }
 0x396   : > { %25575 = vst [vmem:[#allocation134_spill] sm:$0xff] %v21854_v38  ;;  %25576 = vst [vmem:[#allocation135_spill] sm:$0xff] %v21857_v17  ;;  %v21872_v41 = vrot.slane %v8031_v27, %v18240_v54  ;;  %v8120_v48 = vrot.slane %v7473_v9, %v18240_v54  ;;  %v8127_v19 = vrot.slane %v8113_v51, %v18240_v54 }
 0x397   : > { %25578 = vst [vmem:[#allocation138_spill] sm:$0xff] %v21864_v22  ;;  %25579 = vst [vmem:[#allocation137_spill] sm:$0xff] %v21867_v6  ;;  %v21880_v49 = vrot.slane %v8080_v37, %v18240_v54  ;;  %v7474_v9 = vadd.f32 %v21686_v13, %v7386_v40  ;;  %v7391_v38 = vadd.f32 %v16946_v20, %v16834_v50  ;;  %v25585_v37 = vld [vmem:[#allocation14_spill] sm:$0xff]  ;;  %v25586_v22 = vld [vmem:[#allocation152_spill] sm:$0xff] }
 0x398   : > { %25580 = vst [vmem:[#allocation140_spill] sm:$0xff] %v21872_v41  ;;  %v8128_v42 = vcombine.high %v8120_v48, %v8120_v48  ;;  %v21888_v34 = vrot.slane %v8120_v48, %v18240_v54  ;;  %v8129_v55 = vcombine.high %v8127_v19, %v8127_v19  ;;  %v21898_v60 = vrot.slane %v8127_v19, %v18240_v54 }
 0x399   : > { %25581 = vst [vmem:[#allocation142_spill] sm:$0xff] %v21880_v49  ;;  %v8162_v27 = vcombine.high %v7474_v9, %v7474_v9  ;;  %v8169_v48 = vrot.slane %v7474_v9, %v18240_v54  ;;  %v7475_v18 = vadd.f32 %v21686_v13, %v7391_v38  ;;  %v16837_v50 = vadd.f32 %v25586_v22, %v25585_v37  ;;  %v25589_v49 = vld [vmem:[#allocation151_spill] sm:$0xff] }
 0x39a   : > { %25582 = vst [vmem:[#allocation143_spill] sm:$0xff] %v21888_v34  ;;  %25583 = vst [vmem:[#allocation144_spill] sm:$0xff] %v21898_v60  ;;  %v21904_v11 = vrot.slane %v8128_v42, %v18240_v54  ;;  %v21910_v20 = vrot.slane %v8129_v55, %v18240_v54  ;;  %v16949_v38 = vadd.f32 %v21056_v25, %v25589_v49  ;;  %v21942_v60 = vpop.f32.mrb[204].mxu0 }
 0x39b   : > { %v8176_v51 = vrot.slane %v8162_v27, %v18240_v54  ;;  %v8177_v9 = vcombine.high %v8169_v48, %v8169_v48  ;;  %v21916_v6 = vrot.slane %v8169_v48, %v18240_v54  ;;  %v8211_v40 = vcombine.high %v7475_v18, %v7475_v18  ;;  %25595 = vst [vmem:[#allocation24_spill] sm:$0xff] %v21942_v60  ;;  %v21952_v25 = vpop.f32.mrb[205].mxu0  ;;  %v25612_v60 = vld [vmem:[#allocation32_spill] sm:$0xff] }
 0x39c   : > { %25584 = vst [vmem:[#allocation139_spill] sm:$0xff] %v21904_v11  ;;  %25587 = vst [vmem:[#allocation57_spill] sm:$0xff] %v21910_v20  ;;  %v8218_v42 = vrot.slane %v7475_v18, %v18240_v54  ;;  %v7394_v18 = vadd.f32 %v16949_v38, %v16837_v50  ;;  %v25600_v20 = vld [vmem:[#allocation31_spill] sm:$0xff]  ;;  %v25601_v11 = vld [vmem:[#allocation73_spill] sm:$0xff] }
 0x39d   : > { %25588 = vst [vmem:[#allocation58_spill] sm:$0xff] %v21916_v6  ;;  %v8178_v55 = vcombine.high %v8176_v51, %v8176_v51  ;;  %v21924_v37 = vrot.slane %v8176_v51, %v18240_v54  ;;  %v21927_v19 = vrot.slane %v8177_v9, %v18240_v54  ;;  %v8225_v27 = vrot.slane %v8211_v40, %v18240_v54  ;;  %v25594_v51 = vld [vmem:[#allocation33_spill] sm:$0xff]  ;;  %v21944_v40 = vpop.f32.mrb[204].mxu1  ;;  %v25603_v6 = vld [vmem:[#allocation79_spill] sm:$0xff] }
 0x39e   : > { %v8226_v48 = vcombine.high %v8218_v42, %v8218_v42  ;;  %v21931_v34 = vrot.slane %v8218_v42, %v18240_v54  ;;  %v16840_v9 = vadd.f32 %v25594_v51, %v21072_v43  ;;  %25596 = vst [vmem:[#allocation59_spill] sm:$0xff] %v21944_v40  ;;  %25597 = vst [vmem:[#allocation61_spill] sm:$0xff] %v21952_v25  ;;  %v25602_v42 = vld [vmem:[#allocation77_spill] sm:$0xff] }
 0x39f   : > { %25590 = vst [vmem:[#allocation23_spill] sm:$0xff] %v21924_v37  ;;  %25591 = vst [vmem:[#allocation60_spill] sm:$0xff] %v21927_v19  ;;  %v21938_v22 = vrot.slane %v8178_v55, %v18240_v54  ;;  %v8227_v49 = vcombine.high %v8225_v27, %v8225_v27  ;;  %v21954_v55 = vpop.f32.mrb[205].mxu1  ;;  %v21957_v43 = vrot.slane %v8225_v27, %v18240_v54  ;;  %v25605_v19 = vld [vmem:[#allocation76_spill] sm:$0xff]  ;;  %v25610_v50 = vld [vmem:[#allocation81_spill] sm:$0xff] }
 0x3a0   : > { %25592 = vst [vmem:[#allocation146_spill] sm:$0xff] %v21931_v34  ;;  %25598 = vst [vmem:[#allocation62_spill] sm:$0xff] %v21954_v55  ;;  %v7476_v51 = vadd.f32 %v21686_v13, %v7394_v18  ;;  %v16952_v41 = vadd.f32 %v25601_v11, %v25600_v20  ;;  %v16843_v17 = vadd.f32 %v25603_v6, %v25602_v42  ;;  %v25606_v27 = vld [vmem:[#allocation80_spill] sm:$0xff]  ;;  %v25607_v11 = vld [vmem:[#allocation82_spill] sm:$0xff] }
 0x3a1   : > { %25593 = vst [vmem:[#allocation145_spill] sm:$0xff] %v21938_v22  ;;  %25599 = vst [vmem:[#allocation65_spill] sm:$0xff] %v21957_v43  ;;  %v21967_v38 = vrot.slane %v8226_v48, %v18240_v54  ;;  %v16955_v59 = vadd.f32 %v25606_v27, %v25605_v19  ;;  %v25608_v20 = vld [vmem:[#allocation83_spill] sm:$0xff]  ;;  %v21977_v6 = vrot.slane %v8227_v49, %v18240_v54 }
 0x3a2   : > { %v8260_v55 = vcombine.high %v7476_v51, %v7476_v51  ;;  %v8267_v18 = vrot.slane %v7476_v51, %v18240_v54  ;;  %v7399_v40 = vadd.f32 %v16952_v41, %v16840_v9  ;;  %v16846_v25 = vadd.f32 %v25608_v20, %v25607_v11  ;;  %v25611_v48 = vld [vmem:[#allocation15_spill] sm:$0xff]  ;;  %v25615_v20 = vld [vmem:[#allocation16_spill] sm:$0xff] }
 0x3a3   : > { %25604 = vst [vmem:[#allocation27_spill] sm:$0xff] %v21967_v38  ;;  %25609 = vst [vmem:[#allocation30_spill] sm:$0xff] %v21977_v6  ;;  %v7402_v42 = vadd.f32 %v16955_v59, %v16843_v17  ;;  %v16958_v22 = vadd.f32 %v25611_v48, %v25610_v50  ;;  %v16849_v37 = vadd.f32 %v25613_v52, %v25612_v60  ;;  %v25614_v49 = vld [vmem:[#allocation35_spill] sm:$0xff]  ;;  %v22002_v48 = vpop.f32.mrb[206].mxu0 }
 0x3a4   : > { %v8274_v27 = vrot.slane %v8260_v55, %v18240_v54  ;;  %v8275_v51 = vcombine.high %v8267_v18, %v8267_v18  ;;  %v7477_v41 = vadd.f32 %v21686_v13, %v7399_v40  ;;  %v16961_v59 = vadd.f32 %v25615_v20, %v25614_v49  ;;  %v22004_v49 = vpop.f32.mrb[206].mxu1  ;;  %v22015_v20 = vpop.f32.mrb[207].mxu0 }
 0x3a5   : > { %v7478_v9 = vadd.f32 %v21686_v13, %v7402_v42  ;;  %v7407_v11 = vadd.f32 %v16958_v22, %v16846_v25  ;;  %v16852_v17 = vadd.f32 %v21202_v33, %v21192_v61  ;;  %v21995_v50 = vrot.slane %v8267_v18, %v18240_v54 }
 0x3a6   : > { %v8276_v60 = vcombine.high %v8274_v27, %v8274_v27  ;;  %v21998_v55 = vrot.slane %v8274_v27, %v18240_v54  ;;  %v8309_v40 = vcombine.high %v7477_v41, %v7477_v41  ;;  %v8316_v42 = vrot.slane %v7477_v41, %v18240_v54  ;;  %v22017_v41 = vpop.f32.mrb[207].mxu1 }
 0x3a7   : > { %25616 = vst [vmem:[#allocation25_spill] sm:$0xff] %v21995_v50  ;;  %v8358_v22 = vcombine.high %v7478_v9, %v7478_v9  ;;  %v8365_v25 = vrot.slane %v7478_v9, %v18240_v54  ;;  %v22009_v33 = vrot.slane %v8275_v51, %v18240_v54  ;;  %v7479_v27 = vadd.f32 %v21686_v13, %v7407_v11  ;;  %v25658_v50 = vld [vmem:[#allocation92_spill] sm:$0xff] }
 0x3a8   : > { %25617 = vst [vmem:[#allocation63_spill] sm:$0xff] %v21998_v55  ;;  %v22012_v18 = vrot.slane %v8276_v60, %v18240_v54  ;;  %v8323_v9 = vrot.slane %v8309_v40, %v18240_v54  ;;  %v8324_v19 = vcombine.high %v8316_v42, %v8316_v42  ;;  %v22021_v52 = vrot.slane %v8316_v42, %v18240_v54 }
 0x3a9   : > { %25618 = vst [vmem:[#allocation147_spill] sm:$0xff] %v22009_v33  ;;  %v8372_v61 = vrot.slane %v8358_v22, %v18240_v54  ;;  %v8373_v6 = vcombine.high %v8365_v25, %v8365_v25  ;;  %v22027_v60 = vrot.slane %v8365_v25, %v18240_v54  ;;  %v8407_v11 = vcombine.high %v7479_v27, %v7479_v27 }
 0x3aa   : > { %25619 = vst [vmem:[#allocation64_spill] sm:$0xff] %v22012_v18  ;;  %25620 = vst [vmem:[#allocation66_spill] sm:$0xff] %v22021_v52  ;;  %v8325_v38 = vcombine.high %v8323_v9, %v8323_v9  ;;  %v22032_v40 = vrot.slane %v8323_v9, %v18240_v54  ;;  %v22035_v42 = vrot.slane %v8324_v19, %v18240_v54 }
 0x3ab   : > { %25621 = vst [vmem:[#allocation26_spill] sm:$0xff] %v22027_v60  ;;  %v8374_v34 = vcombine.high %v8372_v61, %v8372_v61  ;;  %v22040_v51 = vrot.slane %v8372_v61, %v18240_v54  ;;  %v22043_v25 = vrot.slane %v8373_v6, %v18240_v54  ;;  %v8414_v9 = vrot.slane %v7479_v27, %v18240_v54  ;;  %v25630_v60 = vld [vmem:[#allocation36_spill] sm:$0xff] }
 0x3ac   : > { %25622 = vst [vmem:[#allocation67_spill] sm:$0xff] %v22032_v40  ;;  %25623 = vst [vmem:[#allocation68_spill] sm:$0xff] %v22035_v42  ;;  %v22048_v55 = vrot.slane %v8325_v38, %v18240_v54  ;;  %v8421_v33 = vrot.slane %v8407_v11, %v18240_v54  ;;  %v7410_v19 = vadd.f32 %v16961_v59, %v16849_v37  ;;  %v25629_v40 = vld [vmem:[#allocation37_spill] sm:$0xff]  ;;  %v25631_v37 = vld [vmem:[#allocation38_spill] sm:$0xff] }
 0x3ad   : > { %25624 = vst [vmem:[#allocation42_spill] sm:$0xff] %v22040_v51  ;;  %25625 = vst [vmem:[#allocation70_spill] sm:$0xff] %v22043_v25  ;;  %v22056_v61 = vrot.slane %v8374_v34, %v18240_v54  ;;  %v8422_v43 = vcombine.high %v8414_v9, %v8414_v9  ;;  %v22064_v18 = vrot.slane %v8414_v9, %v18240_v54  ;;  %v25634_v25 = vld [vmem:[#allocation17_spill] sm:$0xff] }
 0x3ae   : > { %25626 = vst [vmem:[#allocation12_spill] sm:$0xff] %v22048_v55  ;;  %v8423_v22 = vcombine.high %v8421_v33, %v8421_v33  ;;  %v16964_v6 = vadd.f32 %v25629_v40, %v21194_v8  ;;  %v7480_v9 = vadd.f32 %v21686_v13, %v7410_v19  ;;  %v16855_v59 = vadd.f32 %v25631_v37, %v25630_v60  ;;  %v25635_v8 = vld [vmem:[#allocation39_spill] sm:$0xff]  ;;  %v22092_v60 = vpop.f32.mrb[208].mxu0 }
 0x3af   : > { %25627 = vst [vmem:[#allocation69_spill] sm:$0xff] %v22056_v61  ;;  %25628 = vst [vmem:[#allocation71_spill] sm:$0xff] %v22064_v18  ;;  %v22080_v27 = vrot.slane %v8421_v33, %v18240_v54  ;;  %v22083_v34 = vrot.slane %v8422_v43, %v18240_v54  ;;  %v16967_v40 = vadd.f32 %v25635_v8, %v25634_v25  ;;  %v22094_v33 = vpop.f32.mrb[208].mxu1  ;;  %v22102_v37 = vpop.f32.mrb[209].mxu0 }
 0x3b0   : > { %v7415_v51 = vadd.f32 %v16964_v6, %v16852_v17  ;;  %v8456_v55 = vcombine.high %v7480_v9, %v7480_v9  ;;  %v8463_v38 = vrot.slane %v7480_v9, %v18240_v54  ;;  %v16858_v19 = vadd.f32 %v21267_v32, %v21256_v46  ;;  %v22104_v8 = vpop.f32.mrb[209].mxu1 }
 0x3b1   : > { %25632 = vst [vmem:[#allocation72_spill] sm:$0xff] %v22080_v27  ;;  %25633 = vst [vmem:[#allocation75_spill] sm:$0xff] %v22083_v34  ;;  %v22097_v43 = vrot.slane %v8423_v22, %v18240_v54  ;;  %v7418_v6 = vadd.f32 %v16967_v40, %v16855_v59  ;;  %v16970_v25 = vadd.f32 %v21269_v24, %v21258_v30  ;;  %v22141_v30 = vpop.f32.mrb[210].mxu0 }
 0x3b2   : > { %v7481_v17 = vadd.f32 %v21686_v13, %v7415_v51  ;;  %v8470_v9 = vrot.slane %v8456_v55, %v18240_v54  ;;  %v8471_v46 = vcombine.high %v8463_v38, %v8463_v38  ;;  %v22108_v32 = vrot.slane %v8463_v38, %v18240_v54 }
 0x3b3   : > { %25636 = vst [vmem:[#allocation74_spill] sm:$0xff] %v22097_v43  ;;  %v16861_v22 = vadd.f32 %v21283_v14, %v21274_v45  ;;  %v7482_v59 = vadd.f32 %v21686_v13, %v7418_v6  ;;  %v7423_v40 = vadd.f32 %v16970_v25, %v16858_v19  ;;  %v22143_v19 = vpop.f32.mrb[210].mxu1 }
 0x3b4   : > { %25637 = vst [vmem:[#allocation18_spill] sm:$0xff] %v22108_v32  ;;  %v8505_v11 = vcombine.high %v7481_v17, %v7481_v17  ;;  %v8512_v51 = vrot.slane %v7481_v17, %v18240_v54  ;;  %v8472_v24 = vcombine.high %v8470_v9, %v8470_v9  ;;  %v22117_v18 = vrot.slane %v8470_v9, %v18240_v54  ;;  %v22152_v9 = vpop.f32.mrb[211].mxu0 }
 0x3b5   : > { %v22120_v55 = vrot.slane %v8471_v46, %v18240_v54  ;;  %v8554_v14 = vcombine.high %v7482_v59, %v7482_v59  ;;  %v8561_v25 = vrot.slane %v7482_v59, %v18240_v54  ;;  %25643 = vst [vmem:[#allocation148_spill] sm:$0xff] %v22143_v19  ;;  %v7483_v32 = vadd.f32 %v21686_v13, %v7423_v40  ;;  %v25656_v40 = vld [vmem:[#allocation88_spill] sm:$0xff] }
 0x3b6   : > { %25638 = vst [vmem:[#allocation78_spill] sm:$0xff] %v22117_v18  ;;  %v8519_v38 = vrot.slane %v8505_v11, %v18240_v54  ;;  %v8520_v61 = vcombine.high %v8512_v51, %v8512_v51  ;;  %v22124_v45 = vrot.slane %v8512_v51, %v18240_v54  ;;  %v22131_v6 = vrot.slane %v8472_v24, %v18240_v54  ;;  %v22154_v11 = vpop.f32.mrb[211].mxu1 }
 0x3b7   : > { %25639 = vst [vmem:[#allocation13_spill] sm:$0xff] %v22120_v55  ;;  %v8568_v24 = vrot.slane %v8554_v14, %v18240_v54  ;;  %v8569_v59 = vcombine.high %v8561_v25, %v8561_v25  ;;  %v22150_v43 = vrot.slane %v8561_v25, %v18240_v54  ;;  %25646 = vst [vmem:[#allocation151_spill] sm:$0xff] %v22154_v11  ;;  %v25659_v25 = vld [vmem:[#allocation89_spill] sm:$0xff] }
 0x3b8   : > { %25640 = vst [vmem:[#allocation29_spill] sm:$0xff] %v22124_v45  ;;  %25641 = vst [vmem:[#allocation150_spill] sm:$0xff] %v22131_v6  ;;  %v8521_v46 = vcombine.high %v8519_v38, %v8519_v38  ;;  %v22139_v51 = vrot.slane %v8519_v38, %v18240_v54  ;;  %v22146_v17 = vrot.slane %v8520_v61, %v18240_v54  ;;  %v25650_v61 = vld [vmem:[#allocation84_spill] sm:$0xff] }
 0x3b9   : > { %25645 = vst [vmem:[#allocation152_spill] sm:$0xff] %v22150_v43  ;;  %v8570_v27 = vcombine.high %v8568_v24, %v8568_v24  ;;  %v22169_v34 = vrot.slane %v8568_v24, %v18240_v54  ;;  %v22172_v38 = vrot.slane %v8569_v59, %v18240_v54  ;;  %v8603_v55 = vcombine.high %v7483_v32, %v7483_v32  ;;  %v25652_v24 = vld [vmem:[#allocation86_spill] sm:$0xff]  ;;  %v25660_v43 = vld [vmem:[#allocation41_spill] sm:$0xff] }
 0x3ba   : > { %25642 = vst [vmem:[#allocation149_spill] sm:$0xff] %v22139_v51  ;;  %25644 = vst [vmem:[#allocation14_spill] sm:$0xff] %v22146_v17  ;;  %v22164_v14 = vrot.slane %v8521_v46, %v18240_v54  ;;  %v8610_v18 = vrot.slane %v7483_v32, %v18240_v54  ;;  %v16973_v45 = vadd.f32 %v25650_v61, %v21276_v47  ;;  %v25653_v51 = vld [vmem:[#allocation87_spill] sm:$0xff]  ;;  %v25655_v61 = vld [vmem:[#allocation85_spill] sm:$0xff] }
 0x3bb   : > { %25648 = vst [vmem:[#allocation31_spill] sm:$0xff] %v22169_v34  ;;  %25649 = vst [vmem:[#allocation73_spill] sm:$0xff] %v22172_v38  ;;  %v22180_v46 = vrot.slane %v8570_v27, %v18240_v54  ;;  %v16864_v6 = vadd.f32 %v25653_v51, %v25652_v24  ;;  %v8617_v59 = vrot.slane %v8603_v55, %v18240_v54  ;;  %v25657_v17 = vld [vmem:[#allocation90_spill] sm:$0xff] }
 0x3bc   : > { %25647 = vst [vmem:[#allocation33_spill] sm:$0xff] %v22164_v14  ;;  %v8618_v42 = vcombine.high %v8610_v18, %v8610_v18  ;;  %v22188_v32 = vrot.slane %v8610_v18, %v18240_v54  ;;  %v7426_v52 = vadd.f32 %v16973_v45, %v16861_v22  ;;  %v16976_v27 = vadd.f32 %v25656_v40, %v25655_v61  ;;  %v25663_v61 = vld [vmem:[#allocation40_spill] sm:$0xff]  ;;  %v25668_v18 = vld [vmem:[#allocation94_spill] sm:$0xff] }
 0x3bd   : > { %25651 = vst [vmem:[#allocation77_spill] sm:$0xff] %v22180_v46  ;;  %v16867_v11 = vadd.f32 %v25658_v50, %v25657_v17  ;;  %v16979_v19 = vadd.f32 %v25660_v43, %v25659_v25  ;;  %v8619_v51 = vcombine.high %v8617_v59, %v8617_v59  ;;  %v22203_v22 = vrot.slane %v8617_v59, %v18240_v54  ;;  %v25667_v43 = vld [vmem:[#allocation91_spill] sm:$0xff] }
 0x3be   : > { %25654 = vst [vmem:[#allocation79_spill] sm:$0xff] %v22188_v32  ;;  %v7484_v45 = vadd.f32 %v21686_v13, %v7426_v52  ;;  %v7431_v24 = vadd.f32 %v16976_v27, %v16864_v6  ;;  %v16870_v50 = vadd.f32 %v21369_v10, %v21363_v5  ;;  %v22211_v17 = vrot.slane %v8618_v42, %v18240_v54  ;;  %v25666_v42 = vld [vmem:[#allocation93_spill] sm:$0xff] }
 0x3bf   : > { %25661 = vst [vmem:[#allocation76_spill] sm:$0xff] %v22203_v22  ;;  %v7434_v40 = vadd.f32 %v16979_v19, %v16867_v11  ;;  %v16982_v59 = vadd.f32 %v21371_v36, %v25663_v61  ;;  %v22221_v5 = vrot.slane %v8619_v51, %v18240_v54  ;;  %v25665_v11 = vld [vmem:[#allocation43_spill] sm:$0xff]  ;;  %v16985_v25 = vadd.f32 %v25668_v18, %v25667_v43 }
 0x3c0   : > { %25662 = vst [vmem:[#allocation80_spill] sm:$0xff] %v22211_v17  ;;  %v8652_v55 = vcombine.high %v7484_v45, %v7484_v45  ;;  %v8659_v52 = vrot.slane %v7484_v45, %v18240_v54  ;;  %v7485_v19 = vadd.f32 %v21686_v13, %v7431_v24  ;;  %v16873_v27 = vadd.f32 %v25666_v42, %v25665_v11  ;;  %v22230_v24 = vpop.f32.mrb[212].mxu0 }
 0x3c1   : > { %v7486_v6 = vadd.f32 %v21686_v13, %v7434_v40  ;;  %25664 = vst [vmem:[#allocation82_spill] sm:$0xff] %v22221_v5  ;;  %v7439_v10 = vadd.f32 %v16982_v59, %v16870_v50  ;;  %v22232_v40 = vpop.f32.mrb[212].mxu1  ;;  %v22239_v18 = vpop.f32.mrb[213].mxu0 }
 0x3c2   : > { %v8666_v61 = vrot.slane %v8652_v55, %v18240_v54  ;;  %v8667_v45 = vcombine.high %v8659_v52, %v8659_v52  ;;  %v8701_v47 = vcombine.high %v7485_v19, %v7485_v19  ;;  %v22235_v51 = vrot.slane %v8659_v52, %v18240_v54  ;;  %v22241_v43 = vpop.f32.mrb[213].mxu1 }
 0x3c3   : > { %v8708_v50 = vrot.slane %v7485_v19, %v18240_v54  ;;  %v8750_v59 = vcombine.high %v7486_v6, %v7486_v6  ;;  %v8757_v11 = vrot.slane %v7486_v6, %v18240_v54 }
 0x3c4   : > { %25669 = vst [vmem:[#allocation83_spill] sm:$0xff] %v22235_v51  ;;  %v8668_v42 = vcombine.high %v8666_v61, %v8666_v61  ;;  %v22246_v36 = vrot.slane %v8666_v61, %v18240_v54  ;;  %v22249_v22 = vrot.slane %v8667_v45, %v18240_v54  ;;  %v8715_v52 = vrot.slane %v8701_v47, %v18240_v54 }
 0x3c5   : > { %v8716_v19 = vcombine.high %v8708_v50, %v8708_v50  ;;  %v22253_v32 = vrot.slane %v8708_v50, %v18240_v54  ;;  %v8764_v6 = vrot.slane %v8750_v59, %v18240_v54  ;;  %v8765_v17 = vcombine.high %v8757_v11, %v8757_v11 }
 0x3c6   : > { %25670 = vst [vmem:[#allocation81_spill] sm:$0xff] %v22246_v36  ;;  %25671 = vst [vmem:[#allocation15_spill] sm:$0xff] %v22249_v22  ;;  %v22259_v55 = vrot.slane %v8668_v42, %v18240_v54  ;;  %v7487_v61 = vadd.f32 %v21686_v13, %v7439_v10  ;;  %v8717_v34 = vcombine.high %v8715_v52, %v8715_v52 }
 0x3c7   : > { %25672 = vst [vmem:[#allocation32_spill] sm:$0xff] %v22253_v32  ;;  %v22265_v47 = vrot.slane %v8715_v52, %v18240_v54  ;;  %v22268_v50 = vrot.slane %v8716_v19, %v18240_v54  ;;  %v8766_v46 = vcombine.high %v8764_v6, %v8764_v6  ;;  %v22273_v42 = vrot.slane %v8757_v11, %v18240_v54  ;;  %v25682_v11 = vld [vmem:[#allocation98_spill] sm:$0xff]  ;;  %v25684_v32 = vld [vmem:[#allocation97_spill] sm:$0xff]  ;;  %v22315_v19 = vpop.f32.mrb[214].mxu1 }
 0x3c8   : > { %25673 = vst [vmem:[#allocation34_spill] sm:$0xff] %v22259_v55  ;;  %v22276_v5 = vrot.slane %v8764_v6, %v18240_v54  ;;  %v22283_v45 = vrot.slane %v8717_v34, %v18240_v54  ;;  %v22292_v6 = vrot.slane %v8765_v17, %v18240_v54  ;;  %v8799_v36 = vcombine.high %v7487_v61, %v7487_v61  ;;  %v25683_v17 = vld [vmem:[#allocation95_spill] sm:$0xff] }
 0x3c9   : > { %25674 = vst [vmem:[#allocation35_spill] sm:$0xff] %v22265_v47  ;;  %25675 = vst [vmem:[#allocation16_spill] sm:$0xff] %v22268_v50  ;;  %v22295_v10 = vrot.slane %v8766_v46, %v18240_v54  ;;  %v8806_v52 = vrot.slane %v7487_v61, %v18240_v54  ;;  %v7442_v55 = vadd.f32 %v16985_v25, %v16873_v27  ;;  %v25681_v47 = vld [vmem:[#allocation96_spill] sm:$0xff]  ;;  %v25687_v61 = vld [vmem:[#allocation45_spill] sm:$0xff]  ;;  %v22313_v27 = vpop.f32.mrb[214].mxu0 }
 0x3ca   : > { %25676 = vst [vmem:[#allocation37_spill] sm:$0xff] %v22273_v42  ;;  %25677 = vst [vmem:[#allocation36_spill] sm:$0xff] %v22276_v5  ;;  %v8813_v59 = vrot.slane %v8799_v36, %v18240_v54  ;;  %v16876_v50 = vadd.f32 %v25682_v11, %v25681_v47  ;;  %v16988_v22 = vadd.f32 %v25684_v32, %v25683_v17  ;;  %v25686_v42 = vld [vmem:[#allocation99_spill] sm:$0xff]  ;;  %v25688_v5 = vld [vmem:[#allocation44_spill] sm:$0xff]  ;;  %v22321_v38 = vpop.f32.mrb[215].mxu0 }
 0x3cb   : > { %25678 = vst [vmem:[#allocation38_spill] sm:$0xff] %v22283_v45  ;;  %25679 = vst [vmem:[#allocation17_spill] sm:$0xff] %v22292_v6  ;;  %v8814_v51 = vcombine.high %v8806_v52, %v8806_v52  ;;  %v22308_v46 = vrot.slane %v8806_v52, %v18240_v54  ;;  %v7488_v34 = vadd.f32 %v21686_v13, %v7442_v55  ;;  %v25689_v32 = vld [vmem:[#allocation47_spill] sm:$0xff]  ;;  %v22323_v52 = vpop.f32.mrb[215].mxu1 }
 0x3cc   : > { %25680 = vst [vmem:[#allocation39_spill] sm:$0xff] %v22295_v10  ;;  %v16879_v25 = vadd.f32 %v25687_v61, %v25686_v42  ;;  %v8815_v47 = vcombine.high %v8813_v59, %v8813_v59  ;;  %v7447_v11 = vadd.f32 %v16988_v22, %v16876_v50  ;;  %v16991_v17 = vadd.f32 %v25689_v32, %v25688_v5 }
 0x3cd   : > { %25685 = vst [vmem:[#allocation84_spill] sm:$0xff] %v22308_v46  ;;  %v22328_v42 = vrot.slane %v8813_v59, %v18240_v54  ;;  %v8848_v61 = vcombine.high %v7488_v34, %v7488_v34  ;;  %v8855_v14 = vrot.slane %v7488_v34, %v18240_v54  ;;  %v22334_v22 = vrot.slane %v8814_v51, %v18240_v54 }
 0x3ce   : > { %v7489_v5 = vadd.f32 %v21686_v13, %v7447_v11  ;;  %v7450_v50 = vadd.f32 %v16991_v17, %v16879_v25  ;;  %v22338_v32 = vrot.slane %v8815_v47, %v18240_v54 }
 0x3cf   : > { %25690 = vst [vmem:[#allocation86_spill] sm:$0xff] %v22328_v42  ;;  %25691 = vst [vmem:[#allocation87_spill] sm:$0xff] %v22334_v22  ;;  %v8862_v59 = vrot.slane %v8848_v61, %v18240_v54  ;;  %v8863_v6 = vcombine.high %v8855_v14, %v8855_v14  ;;  %v22344_v34 = vrot.slane %v8855_v14, %v18240_v54 }
 0x3d0   : > { %25692 = vst [vmem:[#allocation85_spill] sm:$0xff] %v22338_v32  ;;  %v8897_v45 = vcombine.high %v7489_v5, %v7489_v5  ;;  %v8904_v36 = vrot.slane %v7489_v5, %v18240_v54  ;;  %v7490_v51 = vadd.f32 %v21686_v13, %v7450_v50  ;;  %v22406_v5 = vpop.f32.mrb[216].mxu0 }
 0x3d1   : > { %25693 = vst [vmem:[#allocation88_spill] sm:$0xff] %v22344_v34  ;;  %v8864_v11 = vcombine.high %v8862_v59, %v8862_v59  ;;  %v22351_v47 = vrot.slane %v8862_v59, %v18240_v54  ;;  %v22354_v17 = vrot.slane %v8863_v6, %v18240_v54  ;;  %v25703_v34 = vld [vmem:[#allocation101_spill] sm:$0xff] }
 0x3d2   : > { %v8911_v61 = vrot.slane %v8897_v45, %v18240_v54  ;;  %v8912_v55 = vcombine.high %v8904_v36, %v8904_v36  ;;  %v22358_v14 = vrot.slane %v8904_v36, %v18240_v54  ;;  %v8946_v46 = vcombine.high %v7490_v51, %v7490_v51 }
 0x3d3   : > { %25694 = vst [vmem:[#allocation90_spill] sm:$0xff] %v22351_v47  ;;  %25695 = vst [vmem:[#allocation92_spill] sm:$0xff] %v22354_v17  ;;  %v22365_v25 = vrot.slane %v8864_v11, %v18240_v54  ;;  %v8953_v59 = vrot.slane %v7490_v51, %v18240_v54  ;;  %v25706_v17 = vld [vmem:[#allocation103_spill] sm:$0xff] }
 0x3d4   : > { %25696 = vst [vmem:[#allocation89_spill] sm:$0xff] %v22358_v14  ;;  %v8913_v45 = vcombine.high %v8911_v61, %v8911_v61  ;;  %v22371_v42 = vrot.slane %v8911_v61, %v18240_v54  ;;  %v22374_v36 = vrot.slane %v8912_v55, %v18240_v54  ;;  %v8960_v50 = vrot.slane %v8946_v46, %v18240_v54  ;;  %v25702_v55 = vld [vmem:[#allocation100_spill] sm:$0xff]  ;;  %v22408_v14 = vpop.f32.mrb[216].mxu1 }
 0x3d5   : > { %25697 = vst [vmem:[#allocation41_spill] sm:$0xff] %v22365_v25  ;;  %v8961_v32 = vcombine.high %v8953_v59, %v8953_v59  ;;  %v22380_v11 = vrot.slane %v8953_v59, %v18240_v54  ;;  %v16882_v22 = vadd.f32 %v25703_v34, %v25702_v55  ;;  %v16885_v61 = vadd.f32 %v21505_v58, %v21496_v57  ;;  %v25707_v34 = vld [vmem:[#allocation106_spill] sm:$0xff]  ;;  %v22419_v57 = vpop.f32.mrb[217].mxu0  ;;  %v22421_v58 = vpop.f32.mrb[217].mxu1 }
 0x3d6   : > { %25698 = vst [vmem:[#allocation40_spill] sm:$0xff] %v22371_v42  ;;  %25699 = vst [vmem:[#allocation43_spill] sm:$0xff] %v22374_v36  ;;  %v22385_v6 = vrot.slane %v8913_v45, %v18240_v54  ;;  %v8962_v47 = vcombine.high %v8960_v50, %v8960_v50  ;;  %v22398_v51 = vrot.slane %v8960_v50, %v18240_v54  ;;  %v25705_v45 = vld [vmem:[#allocation102_spill] sm:$0xff] }
 0x3d7   : > { %25700 = vst [vmem:[#allocation93_spill] sm:$0xff] %v22380_v11  ;;  %v16994_v10 = vadd.f32 %v25706_v17, %v25705_v45  ;;  %v16997_v55 = vadd.f32 %v21507_v4, %v25707_v34  ;;  %v22413_v59 = vrot.slane %v8961_v32, %v18240_v54  ;;  %v17016_v17 = vadd.f32 %v21541_v53, %v21532_v7 }
 0x3d8   : > { %25701 = vst [vmem:[#allocation91_spill] sm:$0xff] %v22385_v6  ;;  %25704 = vst [vmem:[#allocation94_spill] sm:$0xff] %v22398_v51  ;;  %v17128_v34 = vadd.f32 %v21543_v63, %v21534_v2  ;;  %v17019_v46 = vadd.f32 %v21563_v28, %v21549_v29  ;;  %v22428_v32 = vrot.slane %v8962_v47, %v18240_v54 }
 0x3d9   : > { %25708 = vst [vmem:[#allocation96_spill] sm:$0xff] %v22413_v59  ;;  %v7455_v4 = vadd.f32 %v16994_v10, %v16882_v22  ;;  %v7458_v45 = vadd.f32 %v16997_v55, %v16885_v61  ;;  %v17131_v50 = vadd.f32 %v21565_v31, %v21551_v15  ;;  %v17022_v7 = vadd.f32 %v21640_v21, %v21629_v23  ;;  %v25723_v59 = vld [vmem:[#allocation108_spill] sm:$0xff] }
 0x3da   : > { %25709 = vst [vmem:[#allocation98_spill] sm:$0xff] %v22428_v32  ;;  %v17134_v53 = vadd.f32 %v21642_v0, %v21631_v35  ;;  %v9803_v2 = vadd.f32 %v17128_v34, %v17016_v17  ;;  %v17025_v63 = vadd.f32 %v21691_v56, %v21679_v62  ;;  %v17137_v47 = vadd.f32 %v21693_v26, %v21681_v44  ;;  %v22455_v44 = vpop.f32.mrb[218].mxu0 }
 0x3db   : > { %v7491_v10 = vadd.f32 %v21686_v13, %v7455_v4  ;;  %v7492_v22 = vadd.f32 %v21686_v13, %v7458_v45  ;;  %v9806_v29 = vadd.f32 %v17131_v50, %v17019_v46  ;;  %v22444_v15 = vadd.f32 %v21791_v16, %v21780_v3  ;;  %v22457_v16 = vpop.f32.mrb[218].mxu1  ;;  %v22464_v50 = vpop.f32.mrb[219].mxu0 }
 0x3dc   : > { %v9811_v28 = vadd.f32 %v17134_v53, %v17022_v7  ;;  %v9929_v56 = vadd.f32 %v21686_v13, %v9803_v2  ;;  %v22453_v61 = vadd.f32 %v17137_v47, %v17025_v63  ;;  %v22466_v17 = vpop.f32.mrb[219].mxu1  ;;  %v22537_v11 = vpop.f32.mrb[220].mxu0 }
 0x3dd   : > { %v8995_v31 = vcombine.high %v7491_v10, %v7491_v10  ;;  %v9002_v23 = vrot.slane %v7491_v10, %v18240_v54  ;;  %v9044_v0 = vcombine.high %v7492_v22, %v7492_v22  ;;  %v9051_v35 = vrot.slane %v7492_v22, %v18240_v54 }
 0x3de   : > { %v9993_v34 = vcombine.high %v9929_v56, %v9929_v56  ;;  %v10000_v7 = vrot.slane %v9929_v56, %v18240_v54 }
 0x3df   : > { %v9009_v26 = vrot.slane %v8995_v31, %v18240_v54  ;;  %v9010_v3 = vcombine.high %v9002_v23, %v9002_v23  ;;  %v22461_v46 = vrot.slane %v9002_v23, %v18240_v54  ;;  %v9058_v55 = vrot.slane %v9044_v0, %v18240_v54 }
 0x3e0   : > { %v9059_v4 = vcombine.high %v9051_v35, %v9051_v35  ;;  %v22469_v45 = vrot.slane %v9051_v35, %v18240_v54  ;;  %v9930_v31 = vadd.f32 %v21686_v13, %v9806_v29  ;;  %v22485_v23 = vadd.f32 %v21686_v13, %v9811_v28 }
 0x3e1   : > { %25710 = vst [vmem:[#allocation95_spill] sm:$0xff] %v22461_v46  ;;  %v9011_v10 = vcombine.high %v9009_v26, %v9009_v26  ;;  %v22475_v22 = vrot.slane %v9009_v26, %v18240_v54  ;;  %v22478_v2 = vrot.slane %v9010_v3, %v18240_v54  ;;  %v9060_v63 = vcombine.high %v9058_v55, %v9058_v55 }
 0x3e2   : > { %25711 = vst [vmem:[#allocation97_spill] sm:$0xff] %v22469_v45  ;;  %v22481_v47 = vrot.slane %v9058_v55, %v18240_v54  ;;  %v22490_v35 = vrot.slane %v9059_v4, %v18240_v54  ;;  %v10007_v26 = vrot.slane %v9993_v34, %v18240_v54  ;;  %v10008_v28 = vcombine.high %v10000_v7, %v10000_v7  ;;  %v25718_v45 = vld [vmem:[#allocation55_spill] sm:$0xff] }
 0x3e3   : > { %25712 = vst [vmem:[#allocation99_spill] sm:$0xff] %v22475_v22  ;;  %25713 = vst [vmem:[#allocation45_spill] sm:$0xff] %v22478_v2  ;;  %v22496_v3 = vrot.slane %v9011_v10, %v18240_v54  ;;  %v22503_v55 = vrot.slane %v9060_v63, %v18240_v54  ;;  %v10016_v0 = vrot.slane %v10000_v7, %v18240_v54 }
 0x3e4   : > { %25714 = vst [vmem:[#allocation44_spill] sm:$0xff] %v22481_v47  ;;  %25715 = vst [vmem:[#allocation47_spill] sm:$0xff] %v22490_v35  ;;  %v10009_v4 = vcombine.high %v10007_v26, %v10007_v26  ;;  %v10023_v56 = vrot.slane %v10007_v26, %v18240_v54  ;;  %v10030_v10 = vrot.slane %v10008_v28, %v18240_v54  ;;  %v25719_v47 = vld [vmem:[#allocation19_spill] sm:$0xff] }
 0x3e5   : > { %25716 = vst [vmem:[#allocation100_spill] sm:$0xff] %v22496_v3  ;;  %25717 = vst [vmem:[#allocation101_spill] sm:$0xff] %v22503_v55  ;;  %v10042_v53 = vcombine.high %v9930_v31, %v9930_v31  ;;  %v10049_v29 = vrot.slane %v9930_v31, %v18240_v54  ;;  %v10038_v13 = vcombine.high %v10016_v0, %v10016_v0  ;;  %v25727_v55 = vld [vmem:[#allocation141_spill] sm:$0xff] }
 0x3e6   : > { %v10037_v21 = vrot.slane %v10009_v4, %v18240_v54  ;;  %v10039_v62 = vcombine.high %v10023_v56, %v10023_v56  ;;  %v11564_v63 = vrot.slane %v10016_v0, %v25718_v45  ;;  %v10040_v22 = vcombine.high %v10030_v10, %v10030_v10  ;;  %v25720_v0 = vld [vmem:[#allocation105_spill] sm:$0xff] }
 0x3e7   : > { %v11568_v2 = vrot.slane %v10030_v10, %v25718_v45  ;;  %v11580_v7 = vrot.slane %v10023_v56, %v25718_v45  ;;  %v10056_v26 = vrot.slane %v10042_v53, %v18240_v54  ;;  %v11572_v34 = vrot.slane %v10038_v13, %v25718_v45  ;;  %v25721_v10 = vld [vmem:[#allocation104_spill] sm:$0xff] }
 0x3e8   : > { %v10041_v46 = vcombine.high %v10037_v21, %v10037_v21  ;;  %v11584_v28 = vrot.slane %v10037_v21, %v25718_v45  ;;  %v11588_v31 = vrot.slane %v10039_v62, %v25718_v45  ;;  %v11576_v4 = vrot.slane %v10040_v22, %v25718_v45 }
 0x3e9   : > { %v12841_v32 = vsel %vm544_vm1, %v25719_v47, %v11564_v63  ;;  %v12842_v51 = vsel %vm544_vm1, %v25720_v0, %v11568_v2  ;;  %v12845_v56 = vsel %vm544_vm1, %v25721_v10, %v11580_v7  ;;  %v25722_v13 = vcombine.high %v25719_v47, %v25719_v47  ;;  %v22539_v2 = vpop.f32.mrb[220].mxu1 }
 0x3ea   : > { %v11592_v53 = vrot.slane %v10041_v46, %v25718_v45  ;;  %v12846_v62 = vsel %vm544_vm1, %v25723_v59, %v11584_v28  ;;  %v25724_v22 = vcombine.high %v25721_v10, %v25721_v10  ;;  %v25725_v46 = vcombine.high %v25720_v0, %v25720_v0  ;;  %v22547_v28 = vpop.f32.mrb[221].mxu1 }
 0x3eb   : > { %v12843_v21 = vsel %vm544_vm1, %v25722_v13, %v11572_v34  ;;  %v14761_v47 = vcombine.low %v12841_v32, %v12842_v51  ;;  %v14778_v6 = vcombine.low %v12845_v56, %v12846_v62  ;;  %v10057_v34 = vcombine.high %v10049_v29, %v10049_v29  ;;  %v22545_v13 = vpop.f32.mrb[221].mxu0 }
 0x3ec   : > { %v12847_v63 = vsel %vm544_vm1, %v25724_v22, %v11588_v31  ;;  %v12844_v7 = vsel %vm544_vm1, %v25725_v46, %v11576_v4  ;;  %v25726_v10 = vcombine.high %v25723_v59, %v25723_v59  ;;  %v10058_v42 = vcombine.high %v10056_v26, %v10056_v26 }
 0x3ed   : > { %v14762_v22 = vcombine.low %v12843_v21, %v12844_v7  ;;  %v10065_v36 = vrot.slane %v10049_v29, %v18240_v54  ;;  %v14769_v0 = vrot.slane %v14761_v47, %v25727_v55  ;;  %v14786_v51 = vrot.slane %v14778_v6, %v25727_v55 }
 0x3ee   : > { %v12848_v31 = vsel %vm544_vm1, %v25726_v10, %v11592_v53  ;;  %v10072_v32 = vrot.slane %v10056_v26, %v18240_v54  ;;  %v10079_v56 = vrot.slane %v10057_v34, %v18240_v54  ;;  %v10086_v62 = vrot.slane %v10058_v42, %v18240_v54 }
 0x3ef   : > { %v14779_v35 = vcombine.low %v12847_v63, %v12848_v31  ;;  %v14776_v4 = vrot.slane %v14762_v22, %v25727_v55  ;;  %v10087_v59 = vcombine.high %v10065_v36, %v10065_v36  ;;  %v11596_v29 = vrot.slane %v10065_v36, %v25718_v45  ;;  %v22567_v31 = vpop.f32.mrb[222].mxu0 }
 0x3f0   : > { %v10088_v21 = vcombine.high %v10072_v32, %v10072_v32  ;;  %v11612_v46 = vrot.slane %v10072_v32, %v25718_v45  ;;  %v10089_v6 = vcombine.high %v10079_v56, %v10079_v56  ;;  %v10090_v7 = vcombine.high %v10086_v62, %v10086_v62 }
 0x3f1   : > { %v14793_v53 = vrot.slane %v14779_v35, %v25727_v55  ;;  %v14777_v63 = vcombine.low %v14769_v0, %v14776_v4  ;;  %v11600_v26 = vrot.slane %v10079_v56, %v25718_v45  ;;  %v11604_v34 = vrot.slane %v10087_v59, %v25718_v45  ;;  %v22569_v35 = vpop.f32.mrb[222].mxu1  ;;  %v25729_v0 = vld [vmem:[#allocation20_spill] sm:$0xff]  ;;  %v25730_v4 = vld [vmem:[#allocation46_spill] sm:$0xff]  ;;  %v22578_v56 = vpop.f32.mrb[223].mxu0 }
 0x3f2   : > { %v11616_v42 = vrot.slane %v10086_v62, %v25718_v45  ;;  %v11620_v10 = vrot.slane %v10088_v21, %v25718_v45  ;;  %25728 = vst [vmem:[#allocation102_spill] sm:$0xff] %v22569_v35  ;;  %v11608_v36 = vrot.slane %v10089_v6, %v25718_v45  ;;  %v11624_v22 = vrot.slane %v10090_v7, %v25718_v45 }
 0x3f3   : > { %v14794_v47 = vcombine.low %v14786_v51, %v14793_v53  ;;  %15917 = vst [vmem:[%s19313_s9 + $0x20] sm:$0xff] %v14777_v63  ;;  %v12849_v32 = vsel %vm544_vm1, %v25729_v0, %v11596_v29  ;;  %v12850_v51 = vsel %vm544_vm1, %v25730_v4, %v11600_v26  ;;  %v25731_v62 = vcombine.high %v25729_v0, %v25729_v0  ;;  %v25732_v53 = vld [vmem:[#allocation49_spill] sm:$0xff]  ;;  %v25733_v63 = vld [vmem:[#allocation48_spill] sm:$0xff] }
 0x3f4   : > { %v12853_v21 = vsel %vm544_vm1, %v25732_v53, %v11612_v46  ;;  %v12854_v6 = vsel %vm544_vm1, %v25733_v63, %v11616_v42  ;;  %v25734_v29 = vcombine.high %v25732_v53, %v25732_v53  ;;  %v25735_v26 = vcombine.high %v25730_v4, %v25730_v4  ;;  %v22605_v53 = vpop.f32.mrb[223].mxu1 }
 0x3f5   : > { %15918 = vst [vmem:[%s19313_s9 + $0x28] sm:$0xff] %v14794_v47  ;;  %v12851_v59 = vsel %vm544_vm1, %v25731_v62, %v11604_v34  ;;  %v25736_v0 = vcombine.high %v25733_v63, %v25733_v63  ;;  %v14795_v62 = vcombine.low %v12849_v32, %v12850_v51  ;;  %v14812_v46 = vcombine.low %v12853_v21, %v12854_v6 }
 0x3f6   : > { %v12855_v7 = vsel %vm544_vm1, %v25734_v29, %v11620_v10  ;;  %v12852_v47 = vsel %vm544_vm1, %v25735_v26, %v11608_v36  ;;  %v10091_v42 = vcombine.high %v22485_v23, %v22485_v23  ;;  %v10098_v10 = vrot.slane %v22485_v23, %v18240_v54  ;;  %25737 = vst [vmem:[#allocation103_spill] sm:$0xff] %v22605_v53  ;;  %v22656_v53 = vpop.f32.mrb[224].mxu0 }
 0x3f7   : > { %v12856_v34 = vsel %vm544_vm1, %v25736_v0, %v11624_v22  ;;  %v14796_v3 = vcombine.low %v12851_v59, %v12852_v47  ;;  %v14803_v4 = vrot.slane %v14795_v62, %v25727_v55  ;;  %v14820_v36 = vrot.slane %v14812_v46, %v25727_v55  ;;  %v22612_v22 = vld [vmem:[%s24375_s2] ss:$0 sm:$0xff]  ;;  %v22666_v35 = vpop.f32.mrb[225].mxu0 }
 0x3f8   : > { %v14813_v25 = vcombine.low %v12855_v7, %v12856_v34  ;;  %v9932_v32 = vadd.f32 %v22612_v22, %v22453_v61  ;;  %v17140_v51 = vadd.f32 %v21793_v1, %v21782_v39  ;;  %v10105_v21 = vrot.slane %v10091_v42, %v18240_v54  ;;  %25746 = vst [vmem:[#allocation55_spill] sm:$0xff] %v22666_v35 }
 0x3f9   : > { %v14810_v59 = vrot.slane %v14796_v3, %v25727_v55  ;;  %v10106_v63 = vcombine.high %v10098_v10, %v10098_v10  ;;  %v10114_v6 = vrot.slane %v10098_v10, %v18240_v54 }
 0x3fa   : > { %v14827_v23 = vrot.slane %v14813_v25, %v25727_v55  ;;  %v10140_v29 = vcombine.high %v9932_v32, %v9932_v32  ;;  %v10147_v7 = vrot.slane %v9932_v32, %v18240_v54  ;;  %v22624_v26 = vadd.f32 %v17140_v51, %v22444_v15  ;;  %v25738_v32 = vld [vmem:[#allocation107_spill] sm:$0xff] }
 0x3fb   : > { %v14811_v61 = vcombine.low %v14803_v4, %v14810_v59  ;;  %v10107_v39 = vcombine.high %v10105_v21, %v10105_v21  ;;  %v10121_v1 = vrot.slane %v10105_v21, %v18240_v54  ;;  %v10128_v3 = vrot.slane %v10106_v63, %v18240_v54  ;;  %v25739_v63 = vld [vmem:[#allocation110_spill] sm:$0xff] }
 0x3fc   : > { %v14828_v47 = vcombine.low %v14820_v36, %v14827_v23  ;;  %v10136_v25 = vcombine.high %v10114_v6, %v10114_v6  ;;  %v11628_v0 = vrot.slane %v10114_v6, %v25718_v45  ;;  %v10154_v34 = vrot.slane %v10140_v29, %v18240_v54 }
 0x3fd   : > { %15919 = vst [vmem:[%s19313_s9 + $0x30] sm:$0xff] %v14811_v61  ;;  %v10135_v62 = vrot.slane %v10107_v39, %v18240_v54  ;;  %v10137_v46 = vcombine.high %v10121_v1, %v10121_v1  ;;  %v11644_v15 = vrot.slane %v10121_v1, %v25718_v45  ;;  %v10155_v42 = vcombine.high %v10147_v7, %v10147_v7  ;;  %v25740_v61 = vld [vmem:[#allocation109_spill] sm:$0xff] }
 0x3fe   : > { %15920 = vst [vmem:[%s19313_s9 + $0x38] sm:$0xff] %v14828_v47  ;;  %v10138_v10 = vcombine.high %v10128_v3, %v10128_v3  ;;  %v11632_v4 = vrot.slane %v10128_v3, %v25718_v45  ;;  %v11636_v36 = vrot.slane %v10136_v25, %v25718_v45  ;;  %v12857_v51 = vsel %vm544_vm1, %v25738_v32, %v11628_v0  ;;  %v25742_v0 = vld [vmem:[#allocation112_spill] sm:$0xff] }
 0x3ff   : > { %v10139_v59 = vcombine.high %v10135_v62, %v10135_v62  ;;  %v11648_v23 = vrot.slane %v10135_v62, %v25718_v45  ;;  %v11652_v21 = vrot.slane %v10137_v46, %v25718_v45  ;;  %v12861_v6 = vsel %vm544_vm1, %v25739_v63, %v11644_v15 }
 0x400   : > { %v11640_v29 = vrot.slane %v10138_v10, %v25718_v45  ;;  %v12858_v47 = vsel %vm544_vm1, %v25740_v61, %v11632_v4  ;;  %v25741_v39 = vcombine.high %v25738_v32, %v25738_v32  ;;  %v10156_v3 = vcombine.high %v10154_v34, %v10154_v34  ;;  %v22658_v4 = vpop.f32.mrb[224].mxu1 }
 0x401   : > { %v11656_v25 = vrot.slane %v10139_v59, %v25718_v45  ;;  %v12862_v62 = vsel %vm544_vm1, %v25742_v0, %v11648_v23  ;;  %v25743_v46 = vcombine.high %v25739_v63, %v25739_v63  ;;  %v14829_v10 = vcombine.low %v12857_v51, %v12858_v47  ;;  %25744 = vst [vmem:[#allocation106_spill] sm:$0xff] %v22658_v4  ;;  %v22668_v63 = vpop.f32.mrb[225].mxu1  ;;  %v22690_v4 = vpop.f32.mrb[226].mxu0 }
 0x402   : > { %v12859_v1 = vsel %vm544_vm1, %v25741_v39, %v11636_v36  ;;  %v25745_v32 = vcombine.high %v25740_v61, %v25740_v61  ;;  %v14846_v39 = vcombine.low %v12861_v6, %v12862_v62  ;;  %v10163_v59 = vrot.slane %v10147_v7, %v18240_v54  ;;  %25747 = vst [vmem:[#allocation19_spill] sm:$0xff] %v22668_v63 }
 0x403   : > { %v12863_v15 = vsel %vm544_vm1, %v25743_v46, %v11652_v21  ;;  %v10170_v23 = vrot.slane %v10154_v34, %v18240_v54  ;;  %v25748_v51 = vcombine.high %v25742_v0, %v25742_v0  ;;  %v14837_v46 = vrot.slane %v14829_v10, %v25727_v55  ;;  %25750 = vst [vmem:[#allocation105_spill] sm:$0xff] %v22690_v4  ;;  %v25764_v4 = vld [vmem:[#allocation61_spill] sm:$0xff] }
 0x404   : > { %v12860_v36 = vsel %vm544_vm1, %v25745_v32, %v11640_v29  ;;  %v10177_v61 = vrot.slane %v10155_v42, %v18240_v54  ;;  %v14854_v6 = vrot.slane %v14846_v39, %v25727_v55  ;;  %v10184_v7 = vrot.slane %v10156_v3, %v18240_v54 }
 0x405   : > { %v12864_v21 = vsel %vm544_vm1, %v25748_v51, %v11656_v25  ;;  %v14830_v47 = vcombine.low %v12859_v1, %v12860_v36  ;;  %v10185_v34 = vcombine.high %v10163_v59, %v10163_v59  ;;  %v10186_v32 = vcombine.high %v10170_v23, %v10170_v23 }
 0x406   : > { %v14847_v29 = vcombine.low %v12863_v15, %v12864_v21  ;;  %v10187_v63 = vcombine.high %v10177_v61, %v10177_v61  ;;  %v11660_v0 = vrot.slane %v10163_v59, %v25718_v45  ;;  %v10188_v1 = vcombine.high %v10184_v7, %v10184_v7 }
 0x407   : > { %v14844_v62 = vrot.slane %v14830_v47, %v25727_v55  ;;  %v11664_v10 = vrot.slane %v10177_v61, %v25718_v45  ;;  %v11668_v42 = vrot.slane %v10185_v34, %v25718_v45  ;;  %v11676_v3 = vrot.slane %v10170_v23, %v25718_v45  ;;  %v25749_v47 = vld [vmem:[#allocation111_spill] sm:$0xff]  ;;  %v22692_v61 = vpop.f32.mrb[226].mxu1 }
 0x408   : > { %v14861_v25 = vrot.slane %v14847_v29, %v25727_v55  ;;  %v11672_v36 = vrot.slane %v10187_v63, %v25718_v45  ;;  %v11680_v39 = vrot.slane %v10184_v7, %v25718_v45  ;;  %v11684_v21 = vrot.slane %v10186_v32, %v25718_v45  ;;  %25751 = vst [vmem:[#allocation104_spill] sm:$0xff] %v22692_v61  ;;  %v22729_v35 = vpop.f32.mrb[227].mxu1 }
 0x409   : > { %v14845_v15 = vcombine.low %v14837_v46, %v14844_v62  ;;  %v11688_v59 = vrot.slane %v10188_v1, %v25718_v45  ;;  %v12865_v29 = vsel %vm544_vm1, %v25749_v47, %v11660_v0  ;;  %v25752_v46 = vld [vmem:[#allocation114_spill] sm:$0xff]  ;;  %v25753_v23 = vcombine.high %v25749_v47, %v25749_v47  ;;  %v25755_v62 = vld [vmem:[#allocation115_spill] sm:$0xff]  ;;  %v22707_v0 = vpop.f32.mrb[227].mxu0 }
 0x40a   : > { %v14862_v51 = vcombine.low %v14854_v6, %v14861_v25  ;;  %v12866_v63 = vsel %vm544_vm1, %v25752_v46, %v11664_v10  ;;  %v25754_v7 = vcombine.high %v25752_v46, %v25752_v46  ;;  %v12869_v32 = vsel %vm544_vm1, %v25755_v62, %v11676_v3  ;;  %25756 = vst [vmem:[#allocation108_spill] sm:$0xff] %v22707_v0  ;;  %v25757_v25 = vld [vmem:[#allocation21_spill] sm:$0xff]  ;;  %v25762_v0 = vld [vmem:[#allocation136_spill] sm:$0xff] }
 0x40b   : > { %15925 = vst [vmem:[%s19313_s9 + $0x60] sm:$0xff] %v14845_v15  ;;  %v12867_v6 = vsel %vm544_vm1, %v25753_v23, %v11668_v42  ;;  %v12870_v1 = vsel %vm544_vm1, %v25757_v25, %v11680_v39  ;;  %v25758_v10 = vcombine.high %v25755_v62, %v25755_v62  ;;  %v25759_v42 = vcombine.high %v25757_v25, %v25757_v25  ;;  %v25760_v39 = vld [vmem:[#allocation132_spill] sm:$0xff]  ;;  %v25761_v62 = vld [vmem:[#allocation11_spill] sm:$0xff] }
 0x40c   : > { %v12868_v34 = vsel %vm544_vm1, %v25754_v7, %v11672_v36  ;;  %15926 = vst [vmem:[%s19313_s9 + $0x68] sm:$0xff] %v14862_v51  ;;  %v14863_v36 = vcombine.low %v12865_v29, %v12866_v63  ;;  %v14880_v23 = vcombine.low %v12869_v32, %v12870_v1  ;;  %v9933_v51 = vadd.f32 %v22612_v22, %v22624_v26  ;;  %v25766_v32 = vld [vmem:[#allocation62_spill] sm:$0xff] }
 0x40d   : > { %v12871_v15 = vsel %vm544_vm1, %v25758_v10, %v11684_v21  ;;  %v12872_v47 = vsel %vm544_vm1, %v25759_v42, %v11688_v59  ;;  %v14864_v46 = vcombine.low %v12867_v6, %v12868_v34  ;;  %v17031_v61 = vadd.f32 %v25760_v39, %v21835_v12  ;;  %v25763_v10 = vld [vmem:[#allocation24_spill] sm:$0xff]  ;;  %v25765_v34 = vld [vmem:[#allocation59_spill] sm:$0xff] }
 0x40e   : > { %v14881_v3 = vcombine.low %v12871_v15, %v12872_v47  ;;  %v14871_v7 = vrot.slane %v14863_v36, %v25727_v55  ;;  %v17143_v21 = vadd.f32 %v25762_v0, %v25761_v62  ;;  %v17034_v25 = vadd.f32 %v25764_v4, %v25763_v10 }
 0x40f   : > { %v14878_v59 = vrot.slane %v14864_v46, %v25727_v55  ;;  %v14888_v29 = vrot.slane %v14880_v23, %v25727_v55  ;;  %v10189_v63 = vcombine.high %v9933_v51, %v9933_v51  ;;  %v10196_v6 = vrot.slane %v9933_v51, %v18240_v54 }
 0x410   : > { %v14895_v26 = vrot.slane %v14881_v3, %v25727_v55  ;;  %v9822_v12 = vadd.f32 %v17143_v21, %v17031_v61  ;;  %v17146_v0 = vadd.f32 %v25766_v32, %v25765_v34  ;;  %v17037_v4 = vadd.f32 %v22015_v20, %v22002_v48  ;;  %v25768_v34 = vld [vmem:[#allocation50_spill] sm:$0xff] }
 0x411   : > { %v14879_v1 = vcombine.low %v14871_v7, %v14878_v59  ;;  %v10203_v42 = vrot.slane %v10189_v63, %v18240_v54  ;;  %v17149_v47 = vadd.f32 %v22017_v41, %v22004_v49  ;;  %v10204_v36 = vcombine.high %v10196_v6, %v10196_v6 }
 0x412   : > { %v14896_v15 = vcombine.low %v14888_v29, %v14895_v26  ;;  %v10212_v46 = vrot.slane %v10196_v6, %v18240_v54  ;;  %v9934_v23 = vadd.f32 %v22612_v22, %v9822_v12  ;;  %v22744_v3 = vadd.f32 %v17146_v0, %v17034_v25 }
 0x413   : > { %15927 = vst [vmem:[%s19313_s9 + $0x70] sm:$0xff] %v14879_v1  ;;  %v10205_v61 = vcombine.high %v10203_v42, %v10203_v42  ;;  %v10219_v51 = vrot.slane %v10203_v42, %v18240_v54  ;;  %v22749_v48 = vadd.f32 %v17149_v47, %v17037_v4  ;;  %v22753_v20 = vadd.f32 %v22102_v37, %v22092_v60  ;;  %v25767_v60 = vld [vmem:[#allocation118_spill] sm:$0xff]  ;;  %v25769_v4 = vld [vmem:[#allocation51_spill] sm:$0xff] }
 0x414   : > { %15928 = vst [vmem:[%s19313_s9 + $0x78] sm:$0xff] %v14896_v15  ;;  %v10226_v49 = vrot.slane %v10204_v36, %v18240_v54  ;;  %v10234_v41 = vcombine.high %v10212_v46, %v10212_v46  ;;  %v11692_v7 = vrot.slane %v10212_v46, %v25718_v45  ;;  %v10238_v39 = vcombine.high %v9934_v23, %v9934_v23  ;;  %v22776_v36 = vpop.f32.mrb[228].mxu0  ;;  %v22778_v46 = vpop.f32.mrb[228].mxu1 }
 0x415   : > { %v10233_v62 = vrot.slane %v10205_v61, %v18240_v54  ;;  %v10235_v21 = vcombine.high %v10219_v51, %v10219_v51  ;;  %v11708_v10 = vrot.slane %v10219_v51, %v25718_v45  ;;  %v10245_v25 = vrot.slane %v9934_v23, %v18240_v54  ;;  %v25771_v61 = vld [vmem:[#allocation53_spill] sm:$0xff] }
 0x416   : > { %v10236_v59 = vcombine.high %v10226_v49, %v10226_v49  ;;  %v11696_v29 = vrot.slane %v10226_v49, %v25718_v45  ;;  %v11700_v26 = vrot.slane %v10234_v41, %v25718_v45  ;;  %v12873_v37 = vsel %vm544_vm1, %v25767_v60, %v11692_v7 }
 0x417   : > { %v10237_v63 = vcombine.high %v10233_v62, %v10233_v62  ;;  %v11712_v6 = vrot.slane %v10233_v62, %v25718_v45  ;;  %v11716_v12 = vrot.slane %v10235_v21, %v25718_v45  ;;  %v12877_v32 = vsel %vm544_vm1, %v25768_v34, %v11708_v10  ;;  %v22787_v62 = vpop.f32.mrb[229].mxu0  ;;  %v22789_v21 = vpop.f32.mrb[229].mxu1 }
 0x418   : > { %v11704_v0 = vrot.slane %v10236_v59, %v25718_v45  ;;  %v12874_v1 = vsel %vm544_vm1, %v25769_v4, %v11696_v29  ;;  %v25770_v15 = vcombine.high %v25767_v60, %v25767_v60  ;;  %v10252_v47 = vrot.slane %v10238_v39, %v18240_v54 }
 0x419   : > { %v11720_v23 = vrot.slane %v10237_v63, %v25718_v45  ;;  %v12878_v51 = vsel %vm544_vm1, %v25771_v61, %v11712_v6  ;;  %v25772_v49 = vcombine.high %v25768_v34, %v25768_v34  ;;  %v14897_v7 = vcombine.low %v12873_v37, %v12874_v1 }
 0x41a   : > { %v12875_v42 = vsel %vm544_vm1, %v25770_v15, %v11700_v26  ;;  %v25773_v39 = vcombine.high %v25769_v4, %v25769_v4  ;;  %v14914_v59 = vcombine.low %v12877_v32, %v12878_v51  ;;  %v10253_v29 = vcombine.high %v10245_v25, %v10245_v25 }
 0x41b   : > { %v12879_v41 = vsel %vm544_vm1, %v25772_v49, %v11716_v12  ;;  %v10254_v26 = vcombine.high %v10252_v47, %v10252_v47  ;;  %v25774_v60 = vcombine.high %v25771_v61, %v25771_v61  ;;  %v14905_v37 = vrot.slane %v14897_v7, %v25727_v55 }
 0x41c   : > { %v12876_v10 = vsel %vm544_vm1, %v25773_v39, %v11704_v0  ;;  %v10261_v12 = vrot.slane %v10245_v25, %v18240_v54  ;;  %v14922_v1 = vrot.slane %v14914_v59, %v25727_v55  ;;  %v10268_v4 = vrot.slane %v10252_v47, %v18240_v54 }
 0x41d   : > { %v12880_v63 = vsel %vm544_vm1, %v25774_v60, %v11720_v23  ;;  %v14898_v6 = vcombine.low %v12875_v42, %v12876_v10  ;;  %v10275_v0 = vrot.slane %v10253_v29, %v18240_v54  ;;  %v10282_v15 = vrot.slane %v10254_v26, %v18240_v54 }
 0x41e   : > { %v14915_v34 = vcombine.low %v12879_v41, %v12880_v63  ;;  %v10283_v61 = vcombine.high %v10261_v12, %v10261_v12  ;;  %v11724_v23 = vrot.slane %v10261_v12, %v25718_v45  ;;  %v10284_v51 = vcombine.high %v10268_v4, %v10268_v4  ;;  %v25775_v63 = vld [vmem:[#allocation54_spill] sm:$0xff] }
 0x41f   : > { %v14912_v32 = vrot.slane %v14898_v6, %v25727_v55  ;;  %v10285_v49 = vcombine.high %v10275_v0, %v10275_v0  ;;  %v11728_v25 = vrot.slane %v10275_v0, %v25718_v45  ;;  %v10286_v7 = vcombine.high %v10282_v15, %v10282_v15  ;;  %v25776_v12 = vld [vmem:[#allocation22_spill] sm:$0xff]  ;;  %v22826_v0 = vpop.f32.mrb[230].mxu1 }
 0x420   : > { %v14929_v42 = vrot.slane %v14915_v34, %v25727_v55  ;;  %v11732_v47 = vrot.slane %v10283_v61, %v25718_v45  ;;  %v11740_v39 = vrot.slane %v10268_v4, %v25718_v45  ;;  %v11744_v29 = vrot.slane %v10282_v15, %v25718_v45  ;;  %v22824_v4 = vpop.f32.mrb[230].mxu0  ;;  %25778 = vst [vmem:[#allocation141_spill] sm:$0xff] %v22826_v0  ;;  %v25780_v61 = vld [vmem:[#allocation52_spill] sm:$0xff] }
 0x421   : > { %v14913_v41 = vcombine.low %v14905_v37, %v14912_v32  ;;  %v11736_v59 = vrot.slane %v10285_v49, %v25718_v45  ;;  %v11748_v26 = vrot.slane %v10284_v51, %v25718_v45  ;;  %v11752_v60 = vrot.slane %v10286_v7, %v25718_v45  ;;  %v22843_v7 = vpop.f32.mrb[231].mxu1 }
 0x422   : > { %v14930_v10 = vcombine.low %v14922_v1, %v14929_v42  ;;  %v12881_v6 = vsel %vm544_vm1, %v25775_v63, %v11724_v23  ;;  %v12882_v37 = vsel %vm544_vm1, %v25776_v12, %v11728_v25  ;;  %v25777_v34 = vcombine.high %v25775_v63, %v25775_v63  ;;  %v25781_v42 = vld [vmem:[#allocation113_spill] sm:$0xff]  ;;  %25784 = vst [vmem:[#allocation46_spill] sm:$0xff] %v22843_v7 }
 0x423   : > { %15933 = vst [vmem:[%s19313_s9 + $0xa0] sm:$0xff] %v14913_v41  ;;  %v25779_v32 = vcombine.high %v25776_v12, %v25776_v12  ;;  %v12885_v23 = vsel %vm544_vm1, %v25780_v61, %v11740_v39  ;;  %v12886_v51 = vsel %vm544_vm1, %v25781_v42, %v11744_v29  ;;  %v25782_v49 = vcombine.high %v25780_v61, %v25780_v61  ;;  %v22841_v41 = vpop.f32.mrb[231].mxu0 }
 0x424   : > { %v12883_v1 = vsel %vm544_vm1, %v25777_v34, %v11732_v47  ;;  %15934 = vst [vmem:[%s19313_s9 + $0xa8] sm:$0xff] %v14930_v10  ;;  %25783 = vst [vmem:[#allocation20_spill] sm:$0xff] %v22841_v41  ;;  %v25785_v47 = vcombine.high %v25781_v42, %v25781_v42  ;;  %v14948_v39 = vcombine.low %v12885_v23, %v12886_v51  ;;  %v25786_v23 = vld [vmem:[#allocation148_spill] sm:$0xff]  ;;  %v25787_v42 = vld [vmem:[#allocation151_spill] sm:$0xff] }
 0x425   : > { %v12884_v15 = vsel %vm544_vm1, %v25779_v32, %v11736_v59  ;;  %v12887_v25 = vsel %vm544_vm1, %v25782_v49, %v11748_v26  ;;  %v14931_v59 = vcombine.low %v12881_v6, %v12882_v37  ;;  %v9935_v29 = vadd.f32 %v22612_v22, %v22744_v3 }
 0x426   : > { %v12888_v10 = vsel %vm544_vm1, %v25785_v47, %v11752_v60  ;;  %v14932_v63 = vcombine.low %v12883_v1, %v12884_v15  ;;  %v9936_v34 = vadd.f32 %v22612_v22, %v22749_v48  ;;  %v17152_v26 = vadd.f32 %v22104_v8, %v22094_v33 }
 0x427   : > { %v14949_v12 = vcombine.low %v12887_v25, %v12888_v10  ;;  %v14939_v32 = vrot.slane %v14931_v59, %v25727_v55  ;;  %v14956_v60 = vrot.slane %v14948_v39, %v25727_v55  ;;  %v22860_v6 = vadd.f32 %v22152_v9, %v22141_v30 }
 0x428   : > { %v14946_v61 = vrot.slane %v14932_v63, %v25727_v55  ;;  %v10287_v3 = vcombine.high %v9935_v29, %v9935_v29  ;;  %v10294_v48 = vrot.slane %v9935_v29, %v18240_v54  ;;  %v10336_v1 = vcombine.high %v9936_v34, %v9936_v34 }
 0x429   : > { %v14963_v37 = vrot.slane %v14949_v12, %v25727_v55  ;;  %v10343_v33 = vrot.slane %v9936_v34, %v18240_v54  ;;  %v9835_v8 = vadd.f32 %v17152_v26, %v22753_v20  ;;  %v22868_v51 = vadd.f32 %v25787_v42, %v25786_v23 }
 0x42a   : > { %v14947_v15 = vcombine.low %v14939_v32, %v14946_v61  ;;  %v10301_v30 = vrot.slane %v10287_v3, %v18240_v54  ;;  %v10302_v9 = vcombine.high %v10294_v48, %v10294_v48  ;;  %v10310_v25 = vrot.slane %v10294_v48, %v18240_v54 }
 0x42b   : > { %v14964_v49 = vcombine.low %v14956_v60, %v14963_v37  ;;  %v10350_v47 = vrot.slane %v10336_v1, %v18240_v54  ;;  %v10351_v10 = vcombine.high %v10343_v33, %v10343_v33  ;;  %v10359_v59 = vrot.slane %v10343_v33, %v18240_v54  ;;  %v25788_v33 = vld [vmem:[#allocation117_spill] sm:$0xff] }
 0x42c   : > { %15935 = vst [vmem:[%s19313_s9 + $0xb0] sm:$0xff] %v14947_v15  ;;  %v22876_v63 = vadd.f32 %v22612_v22, %v9835_v8  ;;  %v10303_v20 = vcombine.high %v10301_v30, %v10301_v30  ;;  %v10317_v39 = vrot.slane %v10301_v30, %v18240_v54  ;;  %v10324_v12 = vrot.slane %v10302_v9, %v18240_v54 }
 0x42d   : > { %15936 = vst [vmem:[%s19313_s9 + $0xb8] sm:$0xff] %v14964_v49  ;;  %v10332_v29 = vcombine.high %v10310_v25, %v10310_v25  ;;  %v11756_v34 = vrot.slane %v10310_v25, %v25718_v45  ;;  %v10352_v26 = vcombine.high %v10350_v47, %v10350_v47  ;;  %v10366_v32 = vrot.slane %v10350_v47, %v18240_v54  ;;  %v22894_v25 = vpop.f32.mrb[232].mxu0  ;;  %v22896_v47 = vpop.f32.mrb[232].mxu1 }
 0x42e   : > { %v10373_v61 = vrot.slane %v10351_v10, %v18240_v54  ;;  %v10331_v60 = vrot.slane %v10303_v20, %v18240_v54  ;;  %v10333_v37 = vcombine.high %v10317_v39, %v10317_v39  ;;  %v10334_v3 = vcombine.high %v10324_v12, %v10324_v12  ;;  %25789 = vst [vmem:[#allocation49_spill] sm:$0xff] %v22894_v25  ;;  %v25791_v10 = vld [vmem:[#allocation119_spill] sm:$0xff]  ;;  %v25797_v25 = vld [vmem:[#allocation122_spill] sm:$0xff] }
 0x42f   : > { %v11760_v48 = vrot.slane %v10324_v12, %v25718_v45  ;;  %v11764_v1 = vrot.slane %v10332_v29, %v25718_v45  ;;  %v11772_v15 = vrot.slane %v10317_v39, %v25718_v45  ;;  %v12889_v8 = vsel %vm544_vm1, %v25788_v33, %v11756_v34  ;;  %25790 = vst [vmem:[#allocation48_spill] sm:$0xff] %v22896_v47  ;;  %v25793_v29 = vld [vmem:[#allocation116_spill] sm:$0xff] }
 0x430   : > { %v10380_v23 = vrot.slane %v10352_v26, %v18240_v54  ;;  %v10335_v42 = vcombine.high %v10331_v60, %v10331_v60  ;;  %v11768_v49 = vrot.slane %v10334_v3, %v25718_v45  ;;  %v11776_v30 = vrot.slane %v10331_v60, %v25718_v45  ;;  %v22906_v3 = vpop.f32.mrb[233].mxu0  ;;  %v22908_v60 = vpop.f32.mrb[233].mxu1 }
 0x431   : > { %v11780_v9 = vrot.slane %v10333_v37, %v25718_v45  ;;  %v12890_v20 = vsel %vm544_vm1, %v25791_v10, %v11760_v48  ;;  %v25792_v39 = vcombine.high %v25788_v33, %v25788_v33  ;;  %v12893_v34 = vsel %vm544_vm1, %v25793_v29, %v11772_v15  ;;  %25794 = vst [vmem:[#allocation107_spill] sm:$0xff] %v22906_v3 }
 0x432   : > { %v10381_v26 = vcombine.high %v10359_v59, %v10359_v59  ;;  %25795 = vst [vmem:[#allocation110_spill] sm:$0xff] %v22908_v60  ;;  %v11784_v37 = vrot.slane %v10335_v42, %v25718_v45  ;;  %v25796_v47 = vcombine.high %v25791_v10, %v25791_v10  ;;  %v12894_v33 = vsel %vm544_vm1, %v25797_v25, %v11776_v30 }
 0x433   : > { %v12891_v12 = vsel %vm544_vm1, %v25792_v39, %v11764_v1  ;;  %v25798_v1 = vcombine.high %v25793_v29, %v25793_v29  ;;  %v14965_v39 = vcombine.low %v12889_v8, %v12890_v20  ;;  %v14982_v3 = vcombine.low %v12893_v34, %v12894_v33  ;;  %v25801_v33 = vld [vmem:[#allocation123_spill] sm:$0xff] }
 0x434   : > { %v12892_v48 = vsel %vm544_vm1, %v25796_v47, %v11768_v49  ;;  %v10382_v0 = vcombine.high %v10366_v32, %v10366_v32  ;;  %v25799_v42 = vcombine.high %v25797_v25, %v25797_v25  ;;  %v10383_v10 = vcombine.high %v10373_v61, %v10373_v61 }
 0x435   : > { %v12895_v15 = vsel %vm544_vm1, %v25798_v1, %v11780_v9  ;;  %v14966_v7 = vcombine.low %v12891_v12, %v12892_v48  ;;  %v10384_v41 = vcombine.high %v10380_v23, %v10380_v23  ;;  %v11788_v49 = vrot.slane %v10359_v59, %v25718_v45 }
 0x436   : > { %v12896_v60 = vsel %vm544_vm1, %v25799_v42, %v11784_v37  ;;  %v14973_v30 = vrot.slane %v14965_v39, %v25727_v55  ;;  %v14990_v8 = vrot.slane %v14982_v3, %v25727_v55  ;;  %v11792_v9 = vrot.slane %v10373_v61, %v25718_v45  ;;  %v25805_v39 = vld [vmem:[#allocation126_spill] sm:$0xff] }
 0x437   : > { %v14980_v47 = vrot.slane %v14966_v7, %v25727_v55  ;;  %v14983_v29 = vcombine.low %v12895_v15, %v12896_v60  ;;  %v11796_v20 = vrot.slane %v10381_v26, %v25718_v45  ;;  %v11800_v25 = vrot.slane %v10383_v10, %v25718_v45  ;;  %v25800_v60 = vld [vmem:[#allocation120_spill] sm:$0xff]  ;;  %v22954_v10 = vpop.f32.mrb[234].mxu0 }
 0x438   : > { %v11804_v12 = vrot.slane %v10366_v32, %v25718_v45  ;;  %v11808_v59 = vrot.slane %v10380_v23, %v25718_v45  ;;  %v11812_v48 = vrot.slane %v10382_v0, %v25718_v45  ;;  %v11816_v7 = vrot.slane %v10384_v41, %v25718_v45  ;;  %v25804_v41 = vld [vmem:[#allocation121_spill] sm:$0xff] }
 0x439   : > { %v14981_v34 = vcombine.low %v14973_v30, %v14980_v47  ;;  %v14997_v37 = vrot.slane %v14983_v29, %v25727_v55  ;;  %v12897_v3 = vsel %vm544_vm1, %v25800_v60, %v11788_v49  ;;  %v12898_v61 = vsel %vm544_vm1, %v25801_v33, %v11792_v9  ;;  %v22956_v49 = vpop.f32.mrb[234].mxu1 }
 0x43a   : > { %v25802_v26 = vcombine.high %v25800_v60, %v25800_v60  ;;  %v25803_v23 = vcombine.high %v25801_v33, %v25801_v33  ;;  %v12901_v15 = vsel %vm544_vm1, %v25804_v41, %v11804_v12  ;;  %v12902_v42 = vsel %vm544_vm1, %v25805_v39, %v11808_v59  ;;  %v22968_v12 = vpop.f32.mrb[235].mxu1 }
 0x43b   : > { %v14998_v1 = vcombine.low %v14990_v8, %v14997_v37  ;;  %15941 = vst [vmem:[%s19313_s9 + $0xe0] sm:$0xff] %v14981_v34  ;;  %v25806_v30 = vcombine.high %v25804_v41, %v25804_v41  ;;  %v25807_v29 = vcombine.high %v25805_v39, %v25805_v39  ;;  %v14999_v9 = vcombine.low %v12897_v3, %v12898_v61 }
 0x43c   : > { %v12899_v32 = vsel %vm544_vm1, %v25802_v26, %v11796_v20  ;;  %v12900_v0 = vsel %vm544_vm1, %v25803_v23, %v11800_v25  ;;  %v22966_v25 = vpop.f32.mrb[235].mxu0  ;;  %v15016_v34 = vcombine.low %v12901_v15, %v12902_v42  ;;  %v10385_v59 = vcombine.high %v22876_v63, %v22876_v63 }
 0x43d   : > { %v12903_v47 = vsel %vm544_vm1, %v25806_v30, %v11812_v48  ;;  %v12904_v8 = vsel %vm544_vm1, %v25807_v29, %v11816_v7  ;;  %v15000_v20 = vcombine.low %v12899_v32, %v12900_v0  ;;  %15942 = vst [vmem:[%s19313_s9 + $0xe8] sm:$0xff] %v14998_v1  ;;  %v10392_v48 = vrot.slane %v22876_v63, %v18240_v54 }
 0x43e   : > { %v15017_v37 = vcombine.low %v12903_v47, %v12904_v8  ;;  %v15007_v60 = vrot.slane %v14999_v9, %v25727_v55  ;;  %v9838_v3 = vadd.f32 %v22868_v51, %v22860_v6  ;;  %v22981_v33 = vadd.f32 %v22239_v18, %v22230_v24 }
 0x43f   : > { %v15014_v7 = vrot.slane %v15000_v20, %v25727_v55  ;;  %v15024_v61 = vrot.slane %v15016_v34, %v25727_v55  ;;  %v10399_v32 = vrot.slane %v10385_v59, %v18240_v54  ;;  %v10400_v63 = vcombine.high %v10392_v48, %v10392_v48  ;;  %v25808_v20 = vld [vmem:[#allocation124_spill] sm:$0xff] }
 0x440   : > { %v15031_v26 = vrot.slane %v15017_v37, %v25727_v55  ;;  %v10408_v23 = vrot.slane %v10392_v48, %v18240_v54  ;;  %v9938_v0 = vadd.f32 %v22612_v22, %v9838_v3  ;;  %v22990_v6 = vadd.f32 %v22241_v43, %v22232_v40  ;;  %v25809_v3 = vld [vmem:[#allocation130_spill] sm:$0xff] }
 0x441   : > { %v15015_v1 = vcombine.low %v15007_v60, %v15014_v7  ;;  %v10401_v24 = vcombine.high %v10399_v32, %v10399_v32  ;;  %v10415_v18 = vrot.slane %v10399_v32, %v18240_v54  ;;  %v10422_v41 = vrot.slane %v10400_v63, %v18240_v54  ;;  %v25811_v63 = vld [vmem:[#allocation127_spill] sm:$0xff] }
 0x442   : > { %v15032_v51 = vcombine.low %v15024_v61, %v15031_v26  ;;  %v10430_v15 = vcombine.high %v10408_v23, %v10408_v23  ;;  %v11820_v39 = vrot.slane %v10408_v23, %v25718_v45  ;;  %v10434_v42 = vcombine.high %v9938_v0, %v9938_v0 }
 0x443   : > { %15943 = vst [vmem:[%s19313_s9 + $0xf0] sm:$0xff] %v15015_v1  ;;  %v10441_v30 = vrot.slane %v9938_v0, %v18240_v54  ;;  %v10429_v47 = vrot.slane %v10401_v24, %v18240_v54  ;;  %v10431_v29 = vcombine.high %v10415_v18, %v10415_v18  ;;  %v10432_v8 = vcombine.high %v10422_v41, %v10422_v41 }
 0x444   : > { %15944 = vst [vmem:[%s19313_s9 + $0xf8] sm:$0xff] %v15032_v51  ;;  %v11824_v40 = vrot.slane %v10422_v41, %v25718_v45  ;;  %v11828_v43 = vrot.slane %v10430_v15, %v25718_v45  ;;  %v11836_v9 = vrot.slane %v10415_v18, %v25718_v45  ;;  %v12905_v34 = vsel %vm544_vm1, %v25808_v20, %v11820_v39  ;;  %v25813_v18 = vld [vmem:[#allocation125_spill] sm:$0xff] }
 0x445   : > { %v10448_v37 = vrot.slane %v10434_v42, %v18240_v54  ;;  %v10433_v59 = vcombine.high %v10429_v47, %v10429_v47  ;;  %v11832_v48 = vrot.slane %v10432_v8, %v25718_v45  ;;  %v11840_v60 = vrot.slane %v10429_v47, %v25718_v45 }
 0x446   : > { %v11844_v7 = vrot.slane %v10431_v29, %v25718_v45  ;;  %v12906_v61 = vsel %vm544_vm1, %v25809_v3, %v11824_v40  ;;  %v25810_v26 = vcombine.high %v25808_v20, %v25808_v20  ;;  %v12909_v1 = vsel %vm544_vm1, %v25811_v63, %v11836_v9  ;;  %v23027_v40 = vpop.f32.mrb[236].mxu0 }
 0x447   : > { %v10449_v23 = vcombine.high %v10441_v30, %v10441_v30  ;;  %v11848_v0 = vrot.slane %v10433_v59, %v25718_v45  ;;  %v25812_v51 = vcombine.high %v25809_v3, %v25809_v3  ;;  %v12910_v41 = vsel %vm544_vm1, %v25813_v18, %v11840_v60 }
 0x448   : > { %v12907_v32 = vsel %vm544_vm1, %v25810_v26, %v11828_v43  ;;  %v25814_v15 = vcombine.high %v25811_v63, %v25811_v63  ;;  %v15033_v42 = vcombine.low %v12905_v34, %v12906_v61  ;;  %v15050_v29 = vcombine.low %v12909_v1, %v12910_v41  ;;  %v23029_v43 = vpop.f32.mrb[236].mxu1 }
 0x449   : > { %v12908_v24 = vsel %vm544_vm1, %v25812_v51, %v11832_v48  ;;  %v10450_v8 = vcombine.high %v10448_v37, %v10448_v37  ;;  %v25815_v9 = vcombine.high %v25813_v18, %v25813_v18  ;;  %v10457_v59 = vrot.slane %v10441_v30, %v18240_v54  ;;  %v23040_v34 = vpop.f32.mrb[237].mxu1 }
 0x44a   : > { %v12911_v39 = vsel %vm544_vm1, %v25814_v15, %v11844_v7  ;;  %v15034_v47 = vcombine.low %v12907_v32, %v12908_v24  ;;  %v10464_v48 = vrot.slane %v10448_v37, %v18240_v54  ;;  %v10471_v60 = vrot.slane %v10449_v23, %v18240_v54  ;;  %v23038_v7 = vpop.f32.mrb[237].mxu0 }
 0x44b   : > { %v12912_v20 = vsel %vm544_vm1, %v25815_v9, %v11848_v0  ;;  %v15041_v3 = vrot.slane %v15033_v42, %v25727_v55  ;;  %v15058_v32 = vrot.slane %v15050_v29, %v25727_v55  ;;  %v10478_v63 = vrot.slane %v10450_v8, %v18240_v54  ;;  %v25816_v8 = vld [vmem:[#allocation129_spill] sm:$0xff] }
 0x44c   : > { %v15048_v61 = vrot.slane %v15034_v47, %v25727_v55  ;;  %v15051_v26 = vcombine.low %v12911_v39, %v12912_v20  ;;  %v10479_v1 = vcombine.high %v10457_v59, %v10457_v59  ;;  %v10480_v30 = vcombine.high %v10464_v48, %v10464_v48  ;;  %v23057_v20 = vpop.f32.mrb[238].mxu0 }
 0x44d   : > { %v10481_v0 = vcombine.high %v10471_v60, %v10471_v60  ;;  %v11852_v51 = vrot.slane %v10457_v59, %v25718_v45  ;;  %v11856_v24 = vrot.slane %v10471_v60, %v25718_v45  ;;  %v10482_v18 = vcombine.high %v10478_v63, %v10478_v63  ;;  %v23059_v59 = vpop.f32.mrb[238].mxu1 }
 0x44e   : > { %v15049_v37 = vcombine.low %v15041_v3, %v15048_v61  ;;  %v15065_v23 = vrot.slane %v15051_v26, %v25727_v55  ;;  %v11860_v41 = vrot.slane %v10479_v1, %v25718_v45  ;;  %v11868_v39 = vrot.slane %v10464_v48, %v25718_v45  ;;  %v25817_v3 = vld [vmem:[#allocation131_spill] sm:$0xff]  ;;  %v23072_v1 = vpop.f32.mrb[239].mxu0 }
 0x44f   : > { %v11864_v15 = vrot.slane %v10481_v0, %v25718_v45  ;;  %v11872_v47 = vrot.slane %v10478_v63, %v25718_v45  ;;  %v11876_v29 = vrot.slane %v10480_v30, %v25718_v45  ;;  %v12913_v9 = vsel %vm544_vm1, %v25816_v8, %v11852_v51  ;;  %v23074_v30 = vpop.f32.mrb[239].mxu1  ;;  %v25820_v0 = vld [vmem:[#allocation128_spill] sm:$0xff] }
 0x450   : > { %v15066_v42 = vcombine.low %v15058_v32, %v15065_v23  ;;  %15949 = vst [vmem:[%s19313_s9 + $0x120] sm:$0xff] %v15049_v37  ;;  %v11880_v60 = vrot.slane %v10482_v18, %v25718_v45  ;;  %v12914_v61 = vsel %vm544_vm1, %v25817_v3, %v11856_v24  ;;  %v25818_v48 = vcombine.high %v25816_v8, %v25816_v8  ;;  %v25821_v23 = vld [vmem:[#allocation28_spill] sm:$0xff] }
 0x451   : > { %v25819_v32 = vcombine.high %v25817_v3, %v25817_v3  ;;  %v12917_v37 = vsel %vm544_vm1, %v25820_v0, %v11868_v39  ;;  %v12918_v51 = vsel %vm544_vm1, %v25821_v23, %v11872_v47  ;;  %v25822_v24 = vcombine.high %v25820_v0, %v25820_v0 }
 0x452   : > { %v12915_v26 = vsel %vm544_vm1, %v25818_v48, %v11860_v41  ;;  %15950 = vst [vmem:[%s19313_s9 + $0x128] sm:$0xff] %v15066_v42  ;;  %v15067_v41 = vcombine.low %v12913_v9, %v12914_v61  ;;  %v15084_v48 = vcombine.low %v12917_v37, %v12918_v51  ;;  %v9843_v42 = vadd.f32 %v22990_v6, %v22981_v33 }
 0x453   : > { %v12916_v63 = vsel %vm544_vm1, %v25819_v32, %v11864_v15  ;;  %v12919_v18 = vsel %vm544_vm1, %v25822_v24, %v11876_v29  ;;  %v25823_v15 = vcombine.high %v25821_v23, %v25821_v23  ;;  %v17049_v47 = vadd.f32 %v22321_v38, %v22313_v27 }
 0x454   : > { %v15068_v3 = vcombine.low %v12915_v26, %v12916_v63  ;;  %v15075_v39 = vrot.slane %v15067_v41, %v25727_v55  ;;  %v17161_v29 = vadd.f32 %v22323_v52, %v22315_v19  ;;  %v15092_v61 = vrot.slane %v15084_v48, %v25727_v55 }
 0x455   : > { %v12920_v8 = vsel %vm544_vm1, %v25823_v15, %v11880_v60  ;;  %v9939_v60 = vadd.f32 %v22612_v22, %v9843_v42  ;;  %v17052_v26 = vadd.f32 %v22419_v57, %v22406_v5  ;;  %v17164_v38 = vadd.f32 %v22421_v58, %v22408_v14 }
 0x456   : > { %v15085_v32 = vcombine.low %v12919_v18, %v12920_v8  ;;  %v15082_v9 = vrot.slane %v15068_v3, %v25727_v55  ;;  %v9846_v6 = vadd.f32 %v17161_v29, %v17049_v47  ;;  %v17055_v19 = vadd.f32 %v22464_v50, %v22455_v44  ;;  %v25824_v29 = vld [vmem:[#allocation56_spill] sm:$0xff] }
 0x457   : > { %v10483_v52 = vcombine.high %v9939_v60, %v9939_v60  ;;  %v10490_v63 = vrot.slane %v9939_v60, %v18240_v54  ;;  %v17167_v0 = vadd.f32 %v22466_v17, %v22457_v16  ;;  %v9851_v57 = vadd.f32 %v17164_v38, %v17052_v26  ;;  %v23142_v38 = vpop.f32.mrb[240].mxu0 }
 0x458   : > { %v15099_v33 = vrot.slane %v15085_v32, %v25727_v55  ;;  %v15083_v27 = vcombine.low %v15075_v39, %v15082_v9  ;;  %v9940_v5 = vadd.f32 %v22612_v22, %v9846_v6  ;;  %v23112_v23 = vadd.f32 %v22545_v13, %v22537_v11 }
 0x459   : > { %v10497_v14 = vrot.slane %v10483_v52, %v18240_v54  ;;  %v10498_v58 = vcombine.high %v10490_v63, %v10490_v63  ;;  %v10506_v44 = vrot.slane %v10490_v63, %v18240_v54  ;;  %v23117_v50 = vadd.f32 %v17167_v0, %v17055_v19  ;;  %v23144_v19 = vpop.f32.mrb[240].mxu1 }
 0x45a   : > { %v15100_v37 = vcombine.low %v15092_v61, %v15099_v33  ;;  %15951 = vst [vmem:[%s19313_s9 + $0x130] sm:$0xff] %v15083_v27  ;;  %v10532_v51 = vcombine.high %v9940_v5, %v9940_v5  ;;  %v10539_v16 = vrot.slane %v9940_v5, %v18240_v54  ;;  %v23122_v17 = vadd.f32 %v22612_v22, %v9851_v57  ;;  %v25825_v27 = vld [vmem:[#allocation135_spill] sm:$0xff] }
 0x45b   : > { %v23126_v24 = vadd.f32 %v22547_v28, %v22539_v2  ;;  %v10499_v11 = vcombine.high %v10497_v14, %v10497_v14  ;;  %v10513_v13 = vrot.slane %v10497_v14, %v18240_v54  ;;  %v10520_v18 = vrot.slane %v10498_v58, %v18240_v54  ;;  %v23155_v14 = vpop.f32.mrb[241].mxu0  ;;  %v23157_v58 = vpop.f32.mrb[241].mxu1 }
 0x45c   : > { %15952 = vst [vmem:[%s19313_s9 + $0x138] sm:$0xff] %v15100_v37  ;;  %v10528_v41 = vcombine.high %v10506_v44, %v10506_v44  ;;  %v11884_v15 = vrot.slane %v10506_v44, %v25718_v45  ;;  %v10546_v8 = vrot.slane %v10532_v51, %v18240_v54  ;;  %v10547_v3 = vcombine.high %v10539_v16, %v10539_v16  ;;  %v25827_v37 = vld [vmem:[#allocation134_spill] sm:$0xff] }
 0x45d   : > { %v10555_v48 = vrot.slane %v10539_v16, %v18240_v54  ;;  %v10527_v42 = vrot.slane %v10499_v11, %v18240_v54  ;;  %v10529_v39 = vcombine.high %v10513_v13, %v10513_v13  ;;  %v10530_v32 = vcombine.high %v10520_v18, %v10520_v18  ;;  %v25829_v11 = vld [vmem:[#allocation140_spill] sm:$0xff] }
 0x45e   : > { %v11888_v2 = vrot.slane %v10520_v18, %v25718_v45  ;;  %v11892_v28 = vrot.slane %v10528_v41, %v25718_v45  ;;  %v11900_v47 = vrot.slane %v10513_v13, %v25718_v45  ;;  %v12921_v9 = vsel %vm544_vm1, %v25824_v29, %v11884_v15 }
 0x45f   : > { %v10548_v61 = vcombine.high %v10546_v8, %v10546_v8  ;;  %v10531_v60 = vcombine.high %v10527_v42, %v10527_v42  ;;  %v11896_v26 = vrot.slane %v10530_v32, %v25718_v45  ;;  %v11904_v33 = vrot.slane %v10527_v42, %v25718_v45 }
 0x460   : > { %v11908_v6 = vrot.slane %v10529_v39, %v25718_v45  ;;  %v12922_v52 = vsel %vm544_vm1, %v25825_v27, %v11888_v2  ;;  %v25826_v63 = vcombine.high %v25824_v29, %v25824_v29  ;;  %v12925_v5 = vsel %vm544_vm1, %v25827_v37, %v11900_v47 }
 0x461   : > { %v10562_v57 = vrot.slane %v10546_v8, %v18240_v54  ;;  %v11912_v44 = vrot.slane %v10531_v60, %v25718_v45  ;;  %v25828_v51 = vcombine.high %v25825_v27, %v25825_v27  ;;  %v12926_v13 = vsel %vm544_vm1, %v25829_v11, %v11904_v33 }
 0x462   : > { %v12923_v0 = vsel %vm544_vm1, %v25826_v63, %v11892_v28  ;;  %v25830_v18 = vcombine.high %v25827_v37, %v25827_v37  ;;  %v15101_v15 = vcombine.low %v12921_v9, %v12922_v52  ;;  %v15118_v42 = vcombine.low %v12925_v5, %v12926_v13 }
 0x463   : > { %v12924_v16 = vsel %vm544_vm1, %v25828_v51, %v11896_v26  ;;  %v10569_v39 = vrot.slane %v10547_v3, %v18240_v54  ;;  %v25831_v32 = vcombine.high %v25829_v11, %v25829_v11  ;;  %v10576_v28 = vrot.slane %v10548_v61, %v18240_v54 }
 0x464   : > { %v12927_v41 = vsel %vm544_vm1, %v25830_v18, %v11908_v6  ;;  %v15102_v8 = vcombine.low %v12923_v0, %v12924_v16  ;;  %v10577_v47 = vcombine.high %v10555_v48, %v10555_v48  ;;  %v10578_v29 = vcombine.high %v10562_v57, %v10562_v57  ;;  %v25833_v18 = vld [vmem:[#allocation137_spill] sm:$0xff] }
 0x465   : > { %v12928_v2 = vsel %vm544_vm1, %v25831_v32, %v11912_v44  ;;  %v15109_v60 = vrot.slane %v15101_v15, %v25727_v55  ;;  %v15126_v9 = vrot.slane %v15118_v42, %v25727_v55  ;;  %v10579_v6 = vcombine.high %v10569_v39, %v10569_v39 }
 0x466   : > { %v15116_v26 = vrot.slane %v15102_v8, %v25727_v55  ;;  %v15119_v33 = vcombine.low %v12927_v41, %v12928_v2  ;;  %v10580_v27 = vcombine.high %v10576_v28, %v10576_v28  ;;  %v11916_v3 = vrot.slane %v10555_v48, %v25718_v45  ;;  %v25832_v48 = vld [vmem:[#allocation133_spill] sm:$0xff]  ;;  %v25837_v2 = vld [vmem:[#allocation142_spill] sm:$0xff] }
 0x467   : > { %v11920_v52 = vrot.slane %v10569_v39, %v25718_v45  ;;  %v11924_v61 = vrot.slane %v10577_v47, %v25718_v45  ;;  %v11932_v37 = vrot.slane %v10562_v57, %v25718_v45  ;;  %v11928_v5 = vrot.slane %v10579_v6, %v25718_v45  ;;  %v25836_v39 = vld [vmem:[#allocation138_spill] sm:$0xff] }
 0x468   : > { %v15117_v63 = vcombine.low %v15109_v60, %v15116_v26  ;;  %v15133_v0 = vrot.slane %v15119_v33, %v25727_v55  ;;  %v11936_v44 = vrot.slane %v10576_v28, %v25718_v45  ;;  %v11940_v51 = vrot.slane %v10578_v29, %v25718_v45  ;;  %v23209_v60 = vpop.f32.mrb[242].mxu0  ;;  %v23211_v26 = vpop.f32.mrb[242].mxu1 }
 0x469   : > { %v11944_v16 = vrot.slane %v10580_v27, %v25718_v45  ;;  %v12929_v13 = vsel %vm544_vm1, %v25832_v48, %v11916_v3  ;;  %v12930_v41 = vsel %vm544_vm1, %v25833_v18, %v11920_v52  ;;  %v25834_v57 = vcombine.high %v25832_v48, %v25832_v48  ;;  %v23218_v52 = vpop.f32.mrb[243].mxu0 }
 0x46a   : > { %v15134_v11 = vcombine.low %v15126_v9, %v15133_v0  ;;  %15957 = vst [vmem:[%s19313_s9 + $0x160] sm:$0xff] %v15117_v63  ;;  %v25835_v8 = vcombine.high %v25833_v18, %v25833_v18  ;;  %v12933_v32 = vsel %vm544_vm1, %v25836_v39, %v11932_v37  ;;  %v12934_v28 = vsel %vm544_vm1, %v25837_v2, %v11936_v44  ;;  %v23220_v63 = vpop.f32.mrb[243].mxu1 }
 0x46b   : > { %v12931_v15 = vsel %vm544_vm1, %v25834_v57, %v11924_v61  ;;  %v25838_v47 = vcombine.high %v25836_v39, %v25836_v39  ;;  %v25839_v33 = vcombine.high %v25837_v2, %v25837_v2  ;;  %v15135_v6 = vcombine.low %v12929_v13, %v12930_v41 }
 0x46c   : > { %v12932_v42 = vsel %vm544_vm1, %v25835_v8, %v11928_v5  ;;  %15958 = vst [vmem:[%s19313_s9 + $0x168] sm:$0xff] %v15134_v11  ;;  %v15152_v3 = vcombine.low %v12933_v32, %v12934_v28  ;;  %v10581_v61 = vcombine.high %v23122_v17, %v23122_v17  ;;  %v10588_v37 = vrot.slane %v23122_v17, %v18240_v54 }
 0x46d   : > { %v12935_v29 = vsel %vm544_vm1, %v25838_v47, %v11940_v51  ;;  %v12936_v9 = vsel %vm544_vm1, %v25839_v33, %v11944_v16  ;;  %v15136_v27 = vcombine.low %v12931_v15, %v12932_v42  ;;  %v9942_v5 = vadd.f32 %v22612_v22, %v23117_v50 }
 0x46e   : > { %v15153_v0 = vcombine.low %v12935_v29, %v12936_v9  ;;  %v15143_v44 = vrot.slane %v15135_v6, %v25727_v55  ;;  %v15160_v16 = vrot.slane %v15152_v3, %v25727_v55  ;;  %v9859_v11 = vadd.f32 %v23126_v24, %v23112_v23 }
 0x46f   : > { %v15150_v51 = vrot.slane %v15136_v27, %v25727_v55  ;;  %v10595_v13 = vrot.slane %v10581_v61, %v18240_v54  ;;  %v10596_v18 = vcombine.high %v10588_v37, %v10588_v37  ;;  %v10604_v17 = vrot.slane %v10588_v37, %v18240_v54  ;;  %v25840_v27 = vld [vmem:[#allocation143_spill] sm:$0xff] }
 0x470   : > { %v15167_v48 = vrot.slane %v15153_v0, %v25727_v55  ;;  %v10630_v50 = vcombine.high %v9942_v5, %v9942_v5  ;;  %v10637_v57 = vrot.slane %v9942_v5, %v18240_v54  ;;  %v23238_v15 = vadd.f32 %v22612_v22, %v9859_v11 }
 0x471   : > { %v15151_v41 = vcombine.low %v15143_v44, %v15150_v51  ;;  %v10597_v42 = vcombine.high %v10595_v13, %v10595_v13  ;;  %v10611_v39 = vrot.slane %v10595_v13, %v18240_v54  ;;  %v10618_v23 = vrot.slane %v10596_v18, %v18240_v54  ;;  %v25841_v51 = vld [vmem:[#allocation139_spill] sm:$0xff]  ;;  %v25843_v13 = vld [vmem:[#allocation144_spill] sm:$0xff] }
 0x472   : > { %v15168_v8 = vcombine.low %v15160_v16, %v15167_v48  ;;  %v10626_v24 = vcombine.high %v10604_v17, %v10604_v17  ;;  %v11948_v32 = vrot.slane %v10604_v17, %v25718_v45  ;;  %v10644_v2 = vrot.slane %v10630_v50, %v18240_v54 }
 0x473   : > { %15959 = vst [vmem:[%s19313_s9 + $0x170] sm:$0xff] %v15151_v41  ;;  %v10645_v28 = vcombine.high %v10637_v57, %v10637_v57  ;;  %v10625_v47 = vrot.slane %v10597_v42, %v18240_v54  ;;  %v10627_v29 = vcombine.high %v10611_v39, %v10611_v39  ;;  %v10628_v33 = vcombine.high %v10618_v23, %v10618_v23  ;;  %v25845_v42 = vld [vmem:[#allocation57_spill] sm:$0xff] }
 0x474   : > { %15960 = vst [vmem:[%s19313_s9 + $0x178] sm:$0xff] %v15168_v8  ;;  %v11952_v22 = vrot.slane %v10618_v23, %v25718_v45  ;;  %v11956_v9 = vrot.slane %v10626_v24, %v25718_v45  ;;  %v11964_v6 = vrot.slane %v10611_v39, %v25718_v45  ;;  %v12937_v3 = vsel %vm544_vm1, %v25840_v27, %v11948_v32 }
 0x475   : > { %v10646_v0 = vcombine.high %v10644_v2, %v10644_v2  ;;  %v10629_v61 = vcombine.high %v10625_v47, %v10625_v47  ;;  %v11960_v37 = vrot.slane %v10628_v33, %v25718_v45  ;;  %v11968_v5 = vrot.slane %v10625_v47, %v25718_v45  ;;  %v23276_v33 = vpop.f32.mrb[244].mxu0 }
 0x476   : > { %v11972_v44 = vrot.slane %v10627_v29, %v25718_v45  ;;  %v12938_v16 = vsel %vm544_vm1, %v25841_v51, %v11952_v22  ;;  %v25842_v11 = vcombine.high %v25840_v27, %v25840_v27  ;;  %v12941_v18 = vsel %vm544_vm1, %v25843_v13, %v11964_v6  ;;  %v23278_v22 = vpop.f32.mrb[244].mxu1 }
 0x477   : > { %v10653_v17 = vrot.slane %v10637_v57, %v18240_v54  ;;  %v11976_v41 = vrot.slane %v10629_v61, %v25718_v45  ;;  %v25844_v50 = vcombine.high %v25841_v51, %v25841_v51  ;;  %v12942_v39 = vsel %vm544_vm1, %v25845_v42, %v11968_v5  ;;  %v23286_v5 = vpop.f32.mrb[245].mxu0 }
 0x478   : > { %v12939_v48 = vsel %vm544_vm1, %v25842_v11, %v11956_v9  ;;  %v25846_v23 = vcombine.high %v25843_v13, %v25843_v13  ;;  %v15169_v32 = vcombine.low %v12937_v3, %v12938_v16  ;;  %v15186_v29 = vcombine.low %v12941_v18, %v12942_v39  ;;  %v23288_v3 = vpop.f32.mrb[245].mxu1 }
 0x479   : > { %v12940_v8 = vsel %vm544_vm1, %v25844_v50, %v11960_v37  ;;  %v10660_v57 = vrot.slane %v10644_v2, %v18240_v54  ;;  %v25847_v9 = vcombine.high %v25845_v42, %v25845_v42  ;;  %v10667_v27 = vrot.slane %v10645_v28, %v18240_v54 }
 0x47a   : > { %v12943_v24 = vsel %vm544_vm1, %v25846_v23, %v11972_v44  ;;  %v15170_v47 = vcombine.low %v12939_v48, %v12940_v8  ;;  %v10674_v61 = vrot.slane %v10646_v0, %v18240_v54  ;;  %v10675_v37 = vcombine.high %v10653_v17, %v10653_v17 }
 0x47b   : > { %v12944_v6 = vsel %vm544_vm1, %v25847_v9, %v11976_v41  ;;  %v15177_v2 = vrot.slane %v15169_v32, %v25727_v55  ;;  %v15194_v16 = vrot.slane %v15186_v29, %v25727_v55  ;;  %v10676_v11 = vcombine.high %v10660_v57, %v10660_v57  ;;  %v25848_v32 = vld [vmem:[#allocation58_spill] sm:$0xff]  ;;  %v25849_v29 = vld [vmem:[#allocation60_spill] sm:$0xff] }
 0x47c   : > { %v15184_v44 = vrot.slane %v15170_v47, %v25727_v55  ;;  %v15187_v51 = vcombine.low %v12943_v24, %v12944_v6  ;;  %v10677_v48 = vcombine.high %v10667_v27, %v10667_v27  ;;  %v10678_v13 = vcombine.high %v10674_v61, %v10674_v61 }
 0x47d   : > { %v11980_v28 = vrot.slane %v10653_v17, %v25718_v45  ;;  %v11984_v41 = vrot.slane %v10667_v27, %v25718_v45  ;;  %v11988_v50 = vrot.slane %v10675_v37, %v25718_v45  ;;  %v11996_v42 = vrot.slane %v10660_v57, %v25718_v45  ;;  %v25852_v37 = vld [vmem:[#allocation23_spill] sm:$0xff] }
 0x47e   : > { %v15185_v18 = vcombine.low %v15177_v2, %v15184_v44  ;;  %v15201_v0 = vrot.slane %v15187_v51, %v25727_v55  ;;  %v11992_v8 = vrot.slane %v10677_v48, %v25718_v45  ;;  %v12000_v39 = vrot.slane %v10674_v61, %v25718_v45  ;;  %v25853_v44 = vld [vmem:[#allocation145_spill] sm:$0xff] }
 0x47f   : > { %v12004_v23 = vrot.slane %v10676_v11, %v25718_v45  ;;  %v12008_v17 = vrot.slane %v10678_v13, %v25718_v45  ;;  %v12945_v47 = vsel %vm544_vm1, %v25848_v32, %v11980_v28  ;;  %v12946_v9 = vsel %vm544_vm1, %v25849_v29, %v11984_v41  ;;  %v23321_v11 = vpop.f32.mrb[246].mxu1 }
 0x480   : > { %v15202_v24 = vcombine.low %v15194_v16, %v15201_v0  ;;  %15965 = vst [vmem:[%s19313_s9 + $0x1a0] sm:$0xff] %v15185_v18  ;;  %v25850_v6 = vcombine.high %v25848_v32, %v25848_v32  ;;  %v25851_v57 = vcombine.high %v25849_v29, %v25849_v29  ;;  %v12949_v2 = vsel %vm544_vm1, %v25852_v37, %v11996_v42  ;;  %v23319_v16 = vpop.f32.mrb[246].mxu0 }
 0x481   : > { %v12950_v51 = vsel %vm544_vm1, %v25853_v44, %v12000_v39  ;;  %v25854_v48 = vcombine.high %v25852_v37, %v25852_v37  ;;  %v25855_v28 = vcombine.high %v25853_v44, %v25853_v44  ;;  %v15203_v0 = vcombine.low %v12945_v47, %v12946_v9  ;;  %v25857_v47 = vld [vmem:[#allocation102_spill] sm:$0xff]  ;;  %v25858_v9 = vld [vmem:[#allocation103_spill] sm:$0xff] }
 0x482   : > { %v12947_v27 = vsel %vm544_vm1, %v25850_v6, %v11988_v50  ;;  %v12948_v61 = vsel %vm544_vm1, %v25851_v57, %v11992_v8  ;;  %15966 = vst [vmem:[%s19313_s9 + $0x1a8] sm:$0xff] %v15202_v24  ;;  %v23332_v50 = vpop.f32.mrb[247].mxu0  ;;  %v23334_v8 = vpop.f32.mrb[247].mxu1  ;;  %v15220_v42 = vcombine.low %v12949_v2, %v12950_v51  ;;  %v10679_v24 = vcombine.high %v23238_v15, %v23238_v15  ;;  %v25859_v51 = vld [vmem:[#allocation55_spill] sm:$0xff] }
 0x483   : > { %v12951_v13 = vsel %vm544_vm1, %v25854_v48, %v12004_v23  ;;  %v12952_v18 = vsel %vm544_vm1, %v25855_v28, %v12008_v17  ;;  %v15204_v41 = vcombine.low %v12947_v27, %v12948_v61  ;;  %25856 = vst [vmem:[#allocation109_spill] sm:$0xff] %v23334_v8  ;;  %v10686_v32 = vrot.slane %v23238_v15, %v18240_v54 }
 0x484   : > { %v15221_v39 = vcombine.low %v12951_v13, %v12952_v18  ;;  %v15211_v23 = vrot.slane %v15203_v0, %v25727_v55  ;;  %v17061_v17 = vadd.f32 %v22578_v56, %v22567_v31  ;;  %v17173_v6 = vadd.f32 %v25858_v9, %v25857_v47 }
 0x485   : > { %v15218_v29 = vrot.slane %v15204_v41, %v25727_v55  ;;  %v15228_v27 = vrot.slane %v15220_v42, %v25727_v55  ;;  %v10693_v61 = vrot.slane %v10679_v24, %v18240_v54  ;;  %v10694_v37 = vcombine.high %v10686_v32, %v10686_v32  ;;  %v23359_v41 = vld [vmem:[%s24375_s2] ss:$0 sm:$0xff] }
 0x486   : > { %v15235_v57 = vrot.slane %v15221_v39, %v25727_v55  ;;  %v10702_v2 = vrot.slane %v10686_v32, %v18240_v54  ;;  %v9862_v44 = vadd.f32 %v17173_v6, %v17061_v17  ;;  %v17064_v48 = vadd.f32 %v25859_v51, %v22656_v53  ;;  %v25860_v39 = vld [vmem:[#allocation106_spill] sm:$0xff]  ;;  %v25861_v24 = vld [vmem:[#allocation19_spill] sm:$0xff] }
 0x487   : > { %v15219_v15 = vcombine.low %v15211_v23, %v15218_v29  ;;  %v10695_v31 = vcombine.high %v10693_v61, %v10693_v61  ;;  %v10709_v56 = vrot.slane %v10693_v61, %v18240_v54  ;;  %v10716_v28 = vrot.slane %v10694_v37, %v18240_v54  ;;  %v25862_v6 = vld [vmem:[#allocation146_spill] sm:$0xff] }
 0x488   : > { %v15236_v13 = vcombine.low %v15228_v27, %v15235_v57  ;;  %v10724_v18 = vcombine.high %v10702_v2, %v10702_v2  ;;  %v12012_v0 = vrot.slane %v10702_v2, %v25718_v45  ;;  %v9944_v42 = vadd.f32 %v23359_v41, %v9862_v44  ;;  %v25863_v44 = vld [vmem:[#allocation27_spill] sm:$0xff] }
 0x489   : > { %15967 = vst [vmem:[%s19313_s9 + $0x1b0] sm:$0xff] %v15219_v15  ;;  %v17176_v53 = vadd.f32 %v25861_v24, %v25860_v39  ;;  %v10723_v32 = vrot.slane %v10695_v31, %v18240_v54  ;;  %v10725_v23 = vcombine.high %v10709_v56, %v10709_v56  ;;  %v10726_v29 = vcombine.high %v10716_v28, %v10716_v28 }
 0x48a   : > { %15968 = vst [vmem:[%s19313_s9 + $0x1b8] sm:$0xff] %v15236_v13  ;;  %v12016_v17 = vrot.slane %v10716_v28, %v25718_v45  ;;  %v12020_v47 = vrot.slane %v10724_v18, %v25718_v45  ;;  %v12028_v9 = vrot.slane %v10709_v56, %v25718_v45  ;;  %v12953_v27 = vsel %vm544_vm1, %v25862_v6, %v12012_v0  ;;  %v25865_v56 = vld [vmem:[#allocation65_spill] sm:$0xff] }
 0x48b   : > { %v10728_v57 = vcombine.high %v9944_v42, %v9944_v42  ;;  %v10727_v61 = vcombine.high %v10723_v32, %v10723_v32  ;;  %v12024_v37 = vrot.slane %v10726_v29, %v25718_v45  ;;  %v12032_v15 = vrot.slane %v10723_v32, %v25718_v45  ;;  %v25867_v32 = vld [vmem:[#allocation30_spill] sm:$0xff] }
 0x48c   : > { %v12036_v2 = vrot.slane %v10725_v23, %v25718_v45  ;;  %v12954_v51 = vsel %vm544_vm1, %v25863_v44, %v12016_v17  ;;  %v25864_v13 = vcombine.high %v25862_v6, %v25862_v6  ;;  %v12957_v28 = vsel %vm544_vm1, %v25865_v56, %v12028_v9 }
 0x48d   : > { %v10735_v18 = vrot.slane %v9944_v42, %v18240_v54  ;;  %v12040_v0 = vrot.slane %v10727_v61, %v25718_v45  ;;  %v25866_v39 = vcombine.high %v25863_v44, %v25863_v44  ;;  %v12958_v23 = vsel %vm544_vm1, %v25867_v32, %v12032_v15  ;;  %v23397_v61 = vpop.f32.mrb[248].mxu1 }
 0x48e   : > { %v12955_v31 = vsel %vm544_vm1, %v25864_v13, %v12020_v47  ;;  %v25868_v29 = vcombine.high %v25865_v56, %v25865_v56  ;;  %v15237_v47 = vcombine.low %v12953_v27, %v12954_v51  ;;  %v15254_v9 = vcombine.low %v12957_v28, %v12958_v23  ;;  %v23395_v13 = vpop.f32.mrb[248].mxu0  ;;  %25869 = vst [vmem:[#allocation112_spill] sm:$0xff] %v23397_v61  ;;  %v23406_v27 = vpop.f32.mrb[249].mxu1  ;;  %v25883_v61 = vld [vmem:[#allocation104_spill] sm:$0xff] }
 0x48f   : > { %v12956_v24 = vsel %vm544_vm1, %v25866_v39, %v12024_v37  ;;  %v10742_v42 = vrot.slane %v10728_v57, %v18240_v54  ;;  %v25870_v37 = vcombine.high %v25867_v32, %v25867_v32  ;;  %v10743_v15 = vcombine.high %v10735_v18, %v10735_v18  ;;  %v23404_v8 = vpop.f32.mrb[249].mxu0  ;;  %25872 = vst [vmem:[#allocation114_spill] sm:$0xff] %v23406_v27  ;;  %v25882_v27 = vld [vmem:[#allocation108_spill] sm:$0xff] }
 0x490   : > { %v12959_v17 = vsel %vm544_vm1, %v25868_v29, %v12036_v2  ;;  %v15238_v6 = vcombine.low %v12955_v31, %v12956_v24  ;;  %v10751_v39 = vrot.slane %v10735_v18, %v18240_v54  ;;  %v9867_v56 = vadd.f32 %v17176_v53, %v17064_v48  ;;  %25871 = vst [vmem:[#allocation111_spill] sm:$0xff] %v23404_v8  ;;  %v23456_v8 = vpop.f32.mrb[250].mxu0 }
 0x491   : > { %v12960_v44 = vsel %vm544_vm1, %v25870_v37, %v12040_v0  ;;  %v15245_v2 = vrot.slane %v15237_v47, %v25727_v55  ;;  %v15262_v31 = vrot.slane %v15254_v9, %v25727_v55  ;;  %v10744_v28 = vcombine.high %v10742_v42, %v10742_v42 }
 0x492   : > { %v15252_v57 = vrot.slane %v15238_v6, %v25727_v55  ;;  %v15255_v51 = vcombine.low %v12959_v17, %v12960_v44  ;;  %v10758_v24 = vrot.slane %v10742_v42, %v18240_v54  ;;  %v10765_v0 = vrot.slane %v10743_v15, %v18240_v54  ;;  %v25873_v44 = vld [vmem:[#allocation25_spill] sm:$0xff] }
 0x493   : > { %v10773_v32 = vcombine.high %v10751_v39, %v10751_v39  ;;  %v12044_v53 = vrot.slane %v10751_v39, %v25718_v45  ;;  %v9945_v23 = vadd.f32 %v23359_v41, %v9867_v56  ;;  %v10772_v29 = vrot.slane %v10744_v28, %v18240_v54 }
 0x494   : > { %v15253_v18 = vcombine.low %v15245_v2, %v15252_v57  ;;  %v15269_v48 = vrot.slane %v15255_v51, %v25727_v55  ;;  %v10774_v47 = vcombine.high %v10758_v24, %v10758_v24  ;;  %v10775_v17 = vcombine.high %v10765_v0, %v10765_v0  ;;  %v25874_v51 = vld [vmem:[#allocation147_spill] sm:$0xff] }
 0x495   : > { %v12048_v6 = vrot.slane %v10765_v0, %v25718_v45  ;;  %v12052_v42 = vrot.slane %v10773_v32, %v25718_v45  ;;  %v12060_v37 = vrot.slane %v10758_v24, %v25718_v45  ;;  %v12961_v15 = vsel %vm544_vm1, %v25873_v44, %v12044_v53  ;;  %v25876_v24 = vld [vmem:[#allocation63_spill] sm:$0xff] }
 0x496   : > { %v15270_v9 = vcombine.low %v15262_v31, %v15269_v48  ;;  %15973 = vst [vmem:[%s19313_s9 + $0x1e0] sm:$0xff] %v15253_v18  ;;  %v10776_v2 = vcombine.high %v10772_v29, %v10772_v29  ;;  %v12056_v39 = vrot.slane %v10775_v17, %v25718_v45  ;;  %v12064_v56 = vrot.slane %v10772_v29, %v25718_v45 }
 0x497   : > { %v12068_v57 = vrot.slane %v10774_v47, %v25718_v45  ;;  %v12962_v28 = vsel %vm544_vm1, %v25874_v51, %v12048_v6  ;;  %v25875_v31 = vcombine.high %v25873_v44, %v25873_v44  ;;  %v12965_v32 = vsel %vm544_vm1, %v25876_v24, %v12060_v37  ;;  %v25878_v47 = vld [vmem:[#allocation64_spill] sm:$0xff] }
 0x498   : > { %15974 = vst [vmem:[%s19313_s9 + $0x1e8] sm:$0xff] %v15270_v9  ;;  %v10777_v18 = vcombine.high %v9945_v23, %v9945_v23  ;;  %v12072_v48 = vrot.slane %v10776_v2, %v25718_v45  ;;  %v25877_v53 = vcombine.high %v25874_v51, %v25874_v51  ;;  %v12966_v17 = vsel %vm544_vm1, %v25878_v47, %v12064_v56 }
 0x499   : > { %v12963_v0 = vsel %vm544_vm1, %v25875_v31, %v12052_v42  ;;  %v25879_v6 = vcombine.high %v25876_v24, %v25876_v24  ;;  %v15271_v42 = vcombine.low %v12961_v15, %v12962_v28  ;;  %v15288_v31 = vcombine.low %v12965_v32, %v12966_v17  ;;  %v23458_v15 = vpop.f32.mrb[250].mxu1  ;;  %v23463_v32 = vpop.f32.mrb[251].mxu0 }
 0x49a   : > { %v12964_v29 = vsel %vm544_vm1, %v25877_v53, %v12056_v39  ;;  %v10784_v37 = vrot.slane %v9945_v23, %v18240_v54  ;;  %v25880_v2 = vcombine.high %v25878_v47, %v25878_v47  ;;  %v10791_v39 = vrot.slane %v10777_v18, %v18240_v54  ;;  %v25881_v53 = vld [vmem:[#allocation105_spill] sm:$0xff]  ;;  %v23465_v18 = vpop.f32.mrb[251].mxu1 }
 0x49b   : > { %v12967_v9 = vsel %vm544_vm1, %v25879_v6, %v12068_v57  ;;  %v15272_v44 = vcombine.low %v12963_v0, %v12964_v29  ;;  %v17067_v56 = vadd.f32 %v25882_v27, %v25881_v53  ;;  %v17179_v24 = vadd.f32 %v22729_v35, %v25883_v61 }
 0x49c   : > { %v12968_v51 = vsel %vm544_vm1, %v25880_v2, %v12072_v48  ;;  %v15279_v57 = vrot.slane %v15271_v42, %v25727_v55  ;;  %v15296_v0 = vrot.slane %v15288_v31, %v25727_v55  ;;  %v10792_v27 = vcombine.high %v10784_v37, %v10784_v37 }
 0x49d   : > { %v15286_v23 = vrot.slane %v15272_v44, %v25727_v55  ;;  %v15289_v28 = vcombine.low %v12967_v9, %v12968_v51  ;;  %v10793_v48 = vcombine.high %v10791_v39, %v10791_v39  ;;  %v10800_v35 = vrot.slane %v10784_v37, %v18240_v54 }
 0x49e   : > { %v10807_v61 = vrot.slane %v10791_v39, %v18240_v54  ;;  %v9870_v17 = vadd.f32 %v17179_v24, %v17067_v56  ;;  %v17070_v6 = vadd.f32 %v22787_v62, %v22776_v36  ;;  %v10814_v9 = vrot.slane %v10792_v27, %v18240_v54 }
 0x49f   : > { %v15287_v29 = vcombine.low %v15279_v57, %v15286_v23  ;;  %v15303_v47 = vrot.slane %v15289_v28, %v25727_v55  ;;  %v10821_v42 = vrot.slane %v10793_v48, %v18240_v54  ;;  %v10822_v44 = vcombine.high %v10800_v35, %v10800_v35  ;;  %v25884_v23 = vld [vmem:[#allocation66_spill] sm:$0xff] }
 0x4a0   : > { %v10823_v31 = vcombine.high %v10807_v61, %v10807_v61  ;;  %v12076_v37 = vrot.slane %v10800_v35, %v25718_v45  ;;  %v12092_v51 = vrot.slane %v10807_v61, %v25718_v45  ;;  %v9946_v39 = vadd.f32 %v23359_v41, %v9870_v17  ;;  %v25886_v61 = vld [vmem:[#allocation68_spill] sm:$0xff] }
 0x4a1   : > { %v15304_v2 = vcombine.low %v15296_v0, %v15303_v47  ;;  %15975 = vst [vmem:[%s19313_s9 + $0x1f0] sm:$0xff] %v15287_v29  ;;  %v10824_v53 = vcombine.high %v10814_v9, %v10814_v9  ;;  %v10825_v57 = vcombine.high %v10821_v42, %v10821_v42  ;;  %v12080_v56 = vrot.slane %v10814_v9, %v25718_v45  ;;  %v25885_v0 = vld [vmem:[#allocation67_spill] sm:$0xff]  ;;  %v25888_v9 = vld [vmem:[#allocation12_spill] sm:$0xff] }
 0x4a2   : > { %v12084_v36 = vrot.slane %v10822_v44, %v25718_v45  ;;  %v12096_v62 = vrot.slane %v10821_v42, %v25718_v45  ;;  %v12100_v24 = vrot.slane %v10823_v31, %v25718_v45  ;;  %v12969_v28 = vsel %vm544_vm1, %v25884_v23, %v12076_v37 }
 0x4a3   : > { %15976 = vst [vmem:[%s19313_s9 + $0x1f8] sm:$0xff] %v15304_v2  ;;  %v12973_v27 = vsel %vm544_vm1, %v25885_v0, %v12092_v51  ;;  %v12088_v48 = vrot.slane %v10824_v53, %v25718_v45  ;;  %v12104_v35 = vrot.slane %v10825_v57, %v25718_v45  ;;  %v12970_v29 = vsel %vm544_vm1, %v25886_v61, %v12080_v56 }
 0x4a4   : > { %v25887_v47 = vcombine.high %v25884_v23, %v25884_v23  ;;  %v12974_v42 = vsel %vm544_vm1, %v25888_v9, %v12096_v62  ;;  %v25889_v44 = vcombine.high %v25885_v0, %v25885_v0  ;;  %v15305_v2 = vcombine.low %v12969_v28, %v12970_v29 }
 0x4a5   : > { %v10826_v37 = vcombine.high %v9946_v39, %v9946_v39  ;;  %v25890_v51 = vcombine.high %v25886_v61, %v25886_v61  ;;  %v25891_v57 = vcombine.high %v25888_v9, %v25888_v9  ;;  %v10833_v62 = vrot.slane %v9946_v39, %v18240_v54 }
 0x4a6   : > { %v12971_v17 = vsel %vm544_vm1, %v25887_v47, %v12084_v36  ;;  %v12975_v31 = vsel %vm544_vm1, %v25889_v44, %v12100_v24  ;;  %v15322_v36 = vcombine.low %v12973_v27, %v12974_v42  ;;  %v15313_v0 = vrot.slane %v15305_v2, %v25727_v55  ;;  %v23521_v42 = vpop.f32.mrb[252].mxu1 }
 0x4a7   : > { %v12972_v53 = vsel %vm544_vm1, %v25890_v51, %v12088_v48  ;;  %v12976_v56 = vsel %vm544_vm1, %v25891_v57, %v12104_v35  ;;  %v10840_v24 = vrot.slane %v10826_v37, %v18240_v54  ;;  %v10841_v29 = vcombine.high %v10833_v62, %v10833_v62 }
 0x4a8   : > { %v15306_v23 = vcombine.low %v12971_v17, %v12972_v53  ;;  %v15323_v47 = vcombine.low %v12975_v31, %v12976_v56  ;;  %v15330_v28 = vrot.slane %v15322_v36, %v25727_v55  ;;  %v10849_v61 = vrot.slane %v10833_v62, %v18240_v54  ;;  %v23519_v17 = vpop.f32.mrb[252].mxu0 }
 0x4a9   : > { %v17182_v48 = vadd.f32 %v22789_v21, %v22778_v46  ;;  %v10842_v35 = vcombine.high %v10840_v24, %v10840_v24  ;;  %v10856_v39 = vrot.slane %v10840_v24, %v18240_v54  ;;  %v10863_v44 = vrot.slane %v10841_v29, %v18240_v54  ;;  %v23525_v46 = vpop.f32.mrb[253].mxu0  ;;  %v23527_v21 = vpop.f32.mrb[253].mxu1 }
 0x4aa   : > { %v15320_v9 = vrot.slane %v15306_v23, %v25727_v55  ;;  %v15337_v27 = vrot.slane %v15323_v47, %v25727_v55  ;;  %v10871_v31 = vcombine.high %v10849_v61, %v10849_v61  ;;  %v12108_v2 = vrot.slane %v10849_v61, %v25718_v45  ;;  %25892 = vst [vmem:[#allocation115_spill] sm:$0xff] %v23527_v21  ;;  %v25893_v61 = vld [vmem:[#allocation26_spill] sm:$0xff] }
 0x4ab   : > { %v9875_v37 = vadd.f32 %v17182_v48, %v17070_v6  ;;  %v10870_v57 = vrot.slane %v10842_v35, %v18240_v54  ;;  %v10872_v56 = vcombine.high %v10856_v39, %v10856_v39  ;;  %v10873_v36 = vcombine.high %v10863_v44, %v10863_v44  ;;  %v25894_v48 = vld [vmem:[#allocation70_spill] sm:$0xff] }
 0x4ac   : > { %v15321_v51 = vcombine.low %v15313_v0, %v15320_v9  ;;  %v15338_v53 = vcombine.low %v15330_v28, %v15337_v27  ;;  %v12112_v62 = vrot.slane %v10863_v44, %v25718_v45  ;;  %v12116_v23 = vrot.slane %v10871_v31, %v25718_v45 }
 0x4ad   : > { %v12124_v47 = vrot.slane %v10856_v39, %v25718_v45  ;;  %v10874_v24 = vcombine.high %v10870_v57, %v10870_v57  ;;  %v12128_v6 = vrot.slane %v10870_v57, %v25718_v45  ;;  %v12132_v29 = vrot.slane %v10872_v56, %v25718_v45  ;;  %v25896_v39 = vld [vmem:[#allocation42_spill] sm:$0xff] }
 0x4ae   : > { %15981 = vst [vmem:[%s19313_s9 + $0x220] sm:$0xff] %v15321_v51  ;;  %15982 = vst [vmem:[%s19313_s9 + $0x228] sm:$0xff] %v15338_v53  ;;  %v12977_v0 = vsel %vm544_vm1, %v25893_v61, %v12108_v2  ;;  %v12120_v28 = vrot.slane %v10873_v36, %v25718_v45  ;;  %v12978_v9 = vsel %vm544_vm1, %v25894_v48, %v12112_v62  ;;  %v25897_v51 = vld [vmem:[#allocation69_spill] sm:$0xff] }
 0x4af   : > { %v25895_v27 = vcombine.high %v25893_v61, %v25893_v61  ;;  %v12981_v44 = vsel %vm544_vm1, %v25896_v39, %v12124_v47  ;;  %v12136_v31 = vrot.slane %v10874_v24, %v25718_v45  ;;  %v12982_v53 = vsel %vm544_vm1, %v25897_v51, %v12128_v6  ;;  %v25900_v47 = vld [vmem:[#allocation20_spill] sm:$0xff]  ;;  %v23564_v6 = vpop.f32.mrb[254].mxu1 }
 0x4b0   : > { %v25898_v2 = vcombine.high %v25896_v39, %v25896_v39  ;;  %v15339_v56 = vcombine.low %v12977_v0, %v12978_v9  ;;  %v25899_v36 = vcombine.high %v25894_v48, %v25894_v48  ;;  %v9947_v61 = vadd.f32 %v23359_v41, %v9875_v37  ;;  %25902 = vst [vmem:[#allocation132_spill] sm:$0xff] %v23564_v6  ;;  %v25904_v9 = vld [vmem:[#allocation141_spill] sm:$0xff]  ;;  %v23575_v37 = vpop.f32.mrb[255].mxu1  ;;  %v25911_v6 = vld [vmem:[#allocation110_spill] sm:$0xff] }
 0x4b1   : > { %v12979_v35 = vsel %vm544_vm1, %v25895_v27, %v12116_v23  ;;  %v15356_v23 = vcombine.low %v12981_v44, %v12982_v53  ;;  %v17073_v24 = vadd.f32 %v25900_v47, %v22824_v4  ;;  %v23562_v27 = vpop.f32.mrb[254].mxu0  ;;  %v25903_v39 = vcombine.high %v25897_v51, %v25897_v51  ;;  %25907 = vst [vmem:[#allocation136_spill] sm:$0xff] %v23575_v37 }
 0x4b2   : > { %v12983_v57 = vsel %vm544_vm1, %v25898_v2, %v12132_v29  ;;  %v12980_v62 = vsel %vm544_vm1, %v25899_v36, %v12120_v28  ;;  %25901 = vst [vmem:[#allocation21_spill] sm:$0xff] %v23562_v27  ;;  %v15347_v48 = vrot.slane %v15339_v56, %v25727_v55  ;;  %v25905_v28 = vld [vmem:[#allocation46_spill] sm:$0xff]  ;;  %v23573_v53 = vpop.f32.mrb[255].mxu0  ;;  %v10875_v36 = vcombine.high %v9947_v61, %v9947_v61 }
 0x4b3   : > { %v12984_v29 = vsel %vm544_vm1, %v25903_v39, %v12136_v31  ;;  %v15340_v0 = vcombine.low %v12979_v35, %v12980_v62  ;;  %v17185_v44 = vadd.f32 %v25905_v28, %v25904_v9  ;;  %25906 = vst [vmem:[#allocation11_spill] sm:$0xff] %v23573_v53  ;;  %v15364_v2 = vrot.slane %v15356_v23, %v25727_v55  ;;  %v25908_v35 = vld [vmem:[#allocation49_spill] sm:$0xff]  ;;  %v25909_v62 = vld [vmem:[#allocation107_spill] sm:$0xff]  ;;  %v25910_v39 = vld [vmem:[#allocation48_spill] sm:$0xff] }
 0x4b4   : > { %v15357_v4 = vcombine.low %v12983_v57, %v12984_v29  ;;  %v10882_v47 = vrot.slane %v9947_v61, %v18240_v54  ;;  %v17076_v56 = vadd.f32 %v25909_v62, %v25908_v35  ;;  %v17188_v9 = vadd.f32 %v25911_v6, %v25910_v39 }
 0x4b5   : > { %v15354_v51 = vrot.slane %v15340_v0, %v25727_v55  ;;  %v9878_v31 = vadd.f32 %v17185_v44, %v17073_v24  ;;  %v10889_v37 = vrot.slane %v10875_v36, %v18240_v54  ;;  %v23592_v24 = vadd.f32 %v22966_v25, %v22954_v10 }
 0x4b6   : > { %v15371_v28 = vrot.slane %v15357_v4, %v25727_v55  ;;  %v10890_v57 = vcombine.high %v10882_v47, %v10882_v47  ;;  %v10898_v23 = vrot.slane %v10882_v47, %v18240_v54  ;;  %v23588_v0 = vadd.f32 %v17188_v9, %v17076_v56 }
 0x4b7   : > { %v15355_v29 = vcombine.low %v15347_v48, %v15354_v51  ;;  %v9948_v61 = vadd.f32 %v23359_v41, %v9878_v31  ;;  %v10891_v35 = vcombine.high %v10889_v37, %v10889_v37  ;;  %v10905_v6 = vrot.slane %v10889_v37, %v18240_v54 }
 0x4b8   : > { %v15372_v44 = vcombine.low %v15364_v2, %v15371_v28  ;;  %v10912_v4 = vrot.slane %v10890_v57, %v18240_v54  ;;  %v10920_v36 = vcombine.high %v10898_v23, %v10898_v23  ;;  %v12140_v62 = vrot.slane %v10898_v23, %v25718_v45  ;;  %v25912_v2 = vld [vmem:[#allocation71_spill] sm:$0xff] }
 0x4b9   : > { %15983 = vst [vmem:[%s19313_s9 + $0x230] sm:$0xff] %v15355_v29  ;;  %v10924_v47 = vcombine.high %v9948_v61, %v9948_v61  ;;  %v10931_v48 = vrot.slane %v9948_v61, %v18240_v54  ;;  %v10919_v51 = vrot.slane %v10891_v35, %v18240_v54  ;;  %v10921_v31 = vcombine.high %v10905_v6, %v10905_v6  ;;  %v25913_v61 = vld [vmem:[#allocation75_spill] sm:$0xff] }
 0x4ba   : > { %15984 = vst [vmem:[%s19313_s9 + $0x238] sm:$0xff] %v15372_v44  ;;  %v10922_v56 = vcombine.high %v10912_v4, %v10912_v4  ;;  %v12144_v10 = vrot.slane %v10912_v4, %v25718_v45  ;;  %v12148_v25 = vrot.slane %v10920_v36, %v25718_v45  ;;  %v12156_v37 = vrot.slane %v10905_v6, %v25718_v45  ;;  %v25915_v4 = vld [vmem:[#allocation72_spill] sm:$0xff] }
 0x4bb   : > { %v12985_v39 = vsel %vm544_vm1, %v25912_v2, %v12140_v62  ;;  %v10938_v9 = vrot.slane %v10924_v47, %v18240_v54  ;;  %v10923_v28 = vcombine.high %v10919_v51, %v10919_v51  ;;  %v12160_v23 = vrot.slane %v10919_v51, %v25718_v45 }
 0x4bc   : > { %v12152_v57 = vrot.slane %v10922_v56, %v25718_v45  ;;  %v12164_v29 = vrot.slane %v10921_v31, %v25718_v45  ;;  %v12986_v44 = vsel %vm544_vm1, %v25913_v61, %v12144_v10  ;;  %v25914_v35 = vcombine.high %v25912_v2, %v25912_v2  ;;  %v25917_v31 = vld [vmem:[#allocation74_spill] sm:$0xff] }
 0x4bd   : > { %v12989_v36 = vsel %vm544_vm1, %v25915_v4, %v12156_v37  ;;  %v10939_v62 = vcombine.high %v10931_v48, %v10931_v48  ;;  %v12168_v47 = vrot.slane %v10923_v28, %v25718_v45  ;;  %v25916_v56 = vcombine.high %v25913_v61, %v25913_v61 }
 0x4be   : > { %v12987_v6 = vsel %vm544_vm1, %v25914_v35, %v12148_v25  ;;  %v12990_v53 = vsel %vm544_vm1, %v25917_v31, %v12160_v23  ;;  %v25918_v10 = vcombine.high %v25915_v4, %v25915_v4  ;;  %v15373_v25 = vcombine.low %v12985_v39, %v12986_v44 }
 0x4bf   : > { %v12988_v51 = vsel %vm544_vm1, %v25916_v56, %v12152_v57  ;;  %v15390_v27 = vcombine.low %v12989_v36, %v12990_v53  ;;  %v10940_v37 = vcombine.high %v10938_v9, %v10938_v9  ;;  %v25919_v28 = vcombine.high %v25917_v31, %v25917_v31 }
 0x4c0   : > { %v12991_v2 = vsel %vm544_vm1, %v25918_v10, %v12164_v29  ;;  %v15374_v35 = vcombine.low %v12987_v6, %v12988_v51  ;;  %v10947_v61 = vrot.slane %v10931_v48, %v18240_v54  ;;  %v10954_v57 = vrot.slane %v10938_v9, %v18240_v54 }
 0x4c1   : > { %v12992_v21 = vsel %vm544_vm1, %v25919_v28, %v12168_v47  ;;  %v10961_v23 = vrot.slane %v10939_v62, %v18240_v54  ;;  %v15381_v56 = vrot.slane %v15373_v25, %v25727_v55  ;;  %v15398_v53 = vrot.slane %v15390_v27, %v25727_v55 }
 0x4c2   : > { %v15388_v4 = vrot.slane %v15374_v35, %v25727_v55  ;;  %v15391_v39 = vcombine.low %v12991_v2, %v12992_v21  ;;  %v10968_v29 = vrot.slane %v10940_v37, %v18240_v54  ;;  %v10969_v44 = vcombine.high %v10947_v61, %v10947_v61  ;;  %v25920_v35 = vld [vmem:[#allocation18_spill] sm:$0xff] }
 0x4c3   : > { %v10970_v6 = vcombine.high %v10954_v57, %v10954_v57  ;;  %v10971_v36 = vcombine.high %v10961_v23, %v10961_v23  ;;  %v12172_v9 = vrot.slane %v10947_v61, %v25718_v45  ;;  %v12176_v62 = vrot.slane %v10961_v23, %v25718_v45  ;;  %v25921_v61 = vld [vmem:[#allocation13_spill] sm:$0xff] }
 0x4c4   : > { %v15389_v47 = vcombine.low %v15381_v56, %v15388_v4  ;;  %v15405_v48 = vrot.slane %v15391_v39, %v25727_v55  ;;  %v10972_v51 = vcombine.high %v10968_v29, %v10968_v29  ;;  %v12180_v31 = vrot.slane %v10969_v44, %v25718_v45  ;;  %v25925_v44 = vld [vmem:[#allocation150_spill] sm:$0xff] }
 0x4c5   : > { %v12184_v21 = vrot.slane %v10971_v36, %v25718_v45  ;;  %v12188_v27 = vrot.slane %v10954_v57, %v25718_v45  ;;  %v12192_v2 = vrot.slane %v10968_v29, %v25718_v45  ;;  %v12196_v25 = vrot.slane %v10970_v6, %v25718_v45 }
 0x4c6   : > { %v15406_v10 = vcombine.low %v15398_v53, %v15405_v48  ;;  %15989 = vst [vmem:[%s19313_s9 + $0x260] sm:$0xff] %v15389_v47  ;;  %v12993_v37 = vsel %vm544_vm1, %v25920_v35, %v12172_v9  ;;  %v12200_v28 = vrot.slane %v10972_v51, %v25718_v45  ;;  %v12994_v23 = vsel %vm544_vm1, %v25921_v61, %v12176_v62  ;;  %v25924_v53 = vld [vmem:[#allocation78_spill] sm:$0xff] }
 0x4c7   : > { %v25922_v56 = vcombine.high %v25920_v35, %v25920_v35  ;;  %v25923_v57 = vcombine.high %v25921_v61, %v25921_v61  ;;  %v12997_v29 = vsel %vm544_vm1, %v25924_v53, %v12188_v27  ;;  %v12998_v6 = vsel %vm544_vm1, %v25925_v44, %v12192_v2 }
 0x4c8   : > { %15990 = vst [vmem:[%s19313_s9 + $0x268] sm:$0xff] %v15406_v10  ;;  %v25926_v36 = vcombine.high %v25924_v53, %v25924_v53  ;;  %v15407_v48 = vcombine.low %v12993_v37, %v12994_v23  ;;  %v25927_v9 = vcombine.high %v25925_v44, %v25925_v44  ;;  %v17191_v2 = vadd.f32 %v22968_v12, %v22956_v49 }
 0x4c9   : > { %v12995_v4 = vsel %vm544_vm1, %v25922_v56, %v12180_v31  ;;  %v12996_v39 = vsel %vm544_vm1, %v25923_v57, %v12184_v21  ;;  %v15424_v31 = vcombine.low %v12997_v29, %v12998_v6  ;;  %v9949_v21 = vadd.f32 %v23359_v41, %v23588_v0 }
 0x4ca   : > { %v12999_v47 = vsel %vm544_vm1, %v25926_v36, %v12196_v25  ;;  %v13000_v62 = vsel %vm544_vm1, %v25927_v9, %v12200_v28  ;;  %v15408_v51 = vcombine.low %v12995_v4, %v12996_v39  ;;  %v15415_v27 = vrot.slane %v15407_v48, %v25727_v55 }
 0x4cb   : > { %v15425_v10 = vcombine.low %v12999_v47, %v13000_v62  ;;  %v17082_v25 = vadd.f32 %v23038_v7, %v23027_v40  ;;  %v15432_v37 = vrot.slane %v15424_v31, %v25727_v55  ;;  %v10973_v28 = vcombine.high %v9949_v21, %v9949_v21 }
 0x4cc   : > { %v15422_v35 = vrot.slane %v15408_v51, %v25727_v55  ;;  %v10980_v61 = vrot.slane %v9949_v21, %v18240_v54  ;;  %v9886_v0 = vadd.f32 %v17191_v2, %v23592_v24  ;;  %v17194_v56 = vadd.f32 %v23040_v34, %v23029_v43  ;;  %v25928_v51 = vld [vmem:[#allocation29_spill] sm:$0xff] }
 0x4cd   : > { %v15439_v23 = vrot.slane %v15425_v10, %v25727_v55  ;;  %v23691_v49 = vadd.f32 %v23072_v1, %v23057_v20  ;;  %v10987_v40 = vrot.slane %v10973_v28, %v18240_v54  ;;  %v23698_v24 = vadd.f32 %v23074_v30, %v23059_v59 }
 0x4ce   : > { %v15423_v12 = vcombine.low %v15415_v27, %v15422_v35  ;;  %v10988_v7 = vcombine.high %v10980_v61, %v10980_v61  ;;  %v10996_v4 = vrot.slane %v10980_v61, %v18240_v54  ;;  %v9950_v39 = vadd.f32 %v23359_v41, %v9886_v0  ;;  %v25929_v35 = vld [vmem:[#allocation14_spill] sm:$0xff] }
 0x4cf   : > { %v15440_v57 = vcombine.low %v15432_v37, %v15439_v23  ;;  %v9891_v53 = vadd.f32 %v17194_v56, %v17082_v25  ;;  %v10989_v43 = vcombine.high %v10987_v40, %v10987_v40  ;;  %v11003_v34 = vrot.slane %v10987_v40, %v18240_v54  ;;  %v25931_v23 = vld [vmem:[#allocation149_spill] sm:$0xff] }
 0x4d0   : > { %15991 = vst [vmem:[%s19313_s9 + $0x270] sm:$0xff] %v15423_v12  ;;  %v11010_v20 = vrot.slane %v10988_v7, %v18240_v54  ;;  %v11018_v1 = vcombine.high %v10996_v4, %v10996_v4  ;;  %v12204_v29 = vrot.slane %v10996_v4, %v25718_v45  ;;  %v11022_v44 = vcombine.high %v9950_v39, %v9950_v39  ;;  %v25933_v4 = vld [vmem:[#allocation33_spill] sm:$0xff] }
 0x4d1   : > { %15992 = vst [vmem:[%s19313_s9 + $0x278] sm:$0xff] %v15440_v57  ;;  %v11029_v6 = vrot.slane %v9950_v39, %v18240_v54  ;;  %v23707_v36 = vadd.f32 %v23359_v41, %v9891_v53  ;;  %v11017_v47 = vrot.slane %v10989_v43, %v18240_v54  ;;  %v11019_v59 = vcombine.high %v11003_v34, %v11003_v34 }
 0x4d2   : > { %v11020_v30 = vcombine.high %v11010_v20, %v11010_v20  ;;  %v12208_v48 = vrot.slane %v11010_v20, %v25718_v45  ;;  %v12212_v9 = vrot.slane %v11018_v1, %v25718_v45  ;;  %v12220_v62 = vrot.slane %v11003_v34, %v25718_v45 }
 0x4d3   : > { %v13001_v31 = vsel %vm544_vm1, %v25928_v51, %v12204_v29  ;;  %v11036_v21 = vrot.slane %v11022_v44, %v18240_v54  ;;  %v11021_v27 = vcombine.high %v11017_v47, %v11017_v47  ;;  %v12224_v2 = vrot.slane %v11017_v47, %v25718_v45 }
 0x4d4   : > { %v12216_v10 = vrot.slane %v11020_v30, %v25718_v45  ;;  %v12228_v25 = vrot.slane %v11019_v59, %v25718_v45  ;;  %v13002_v37 = vsel %vm544_vm1, %v25929_v35, %v12208_v48  ;;  %v25930_v28 = vcombine.high %v25928_v51, %v25928_v51 }
 0x4d5   : > { %v13005_v0 = vsel %vm544_vm1, %v25931_v23, %v12220_v62  ;;  %v11037_v56 = vcombine.high %v11029_v6, %v11029_v6  ;;  %v12232_v12 = vrot.slane %v11021_v27, %v25718_v45  ;;  %v25932_v40 = vcombine.high %v25929_v35, %v25929_v35 }
 0x4d6   : > { %v13003_v61 = vsel %vm544_vm1, %v25930_v28, %v12212_v9  ;;  %v13006_v57 = vsel %vm544_vm1, %v25933_v4, %v12224_v2  ;;  %v25934_v39 = vcombine.high %v25931_v23, %v25931_v23  ;;  %v15441_v43 = vcombine.low %v13001_v31, %v13002_v37 }
 0x4d7   : > { %v13004_v7 = vsel %vm544_vm1, %v25932_v40, %v12216_v10  ;;  %v15458_v20 = vcombine.low %v13005_v0, %v13006_v57  ;;  %v11038_v1 = vcombine.high %v11036_v21, %v11036_v21  ;;  %v25935_v29 = vcombine.high %v25933_v4, %v25933_v4  ;;  %v25936_v40 = vld [vmem:[#allocation152_spill] sm:$0xff]  ;;  %v25937_v57 = vld [vmem:[#allocation73_spill] sm:$0xff] }
 0x4d8   : > { %v13007_v53 = vsel %vm544_vm1, %v25934_v39, %v12228_v25  ;;  %v15442_v34 = vcombine.low %v13003_v61, %v13004_v7  ;;  %v11045_v47 = vrot.slane %v11029_v6, %v18240_v54  ;;  %v11052_v59 = vrot.slane %v11036_v21, %v18240_v54 }
 0x4d9   : > { %v13008_v44 = vsel %vm544_vm1, %v25935_v29, %v12232_v12  ;;  %v11059_v30 = vrot.slane %v11037_v56, %v18240_v54  ;;  %v15449_v48 = vrot.slane %v15441_v43, %v25727_v55  ;;  %v15466_v51 = vrot.slane %v15458_v20, %v25727_v55 }
 0x4da   : > { %v15456_v9 = vrot.slane %v15442_v34, %v25727_v55  ;;  %v15459_v62 = vcombine.low %v13007_v53, %v13008_v44  ;;  %v11066_v31 = vrot.slane %v11038_v1, %v18240_v54  ;;  %v11067_v27 = vcombine.high %v11045_v47, %v11045_v47  ;;  %v25940_v1 = vld [vmem:[#allocation31_spill] sm:$0xff]  ;;  %v25941_v44 = vld [vmem:[#allocation77_spill] sm:$0xff] }
 0x4db   : > { %v11068_v10 = vcombine.high %v11052_v59, %v11052_v59  ;;  %v11069_v2 = vcombine.high %v11059_v30, %v11059_v30  ;;  %v12236_v21 = vrot.slane %v11045_v47, %v25718_v45  ;;  %v12240_v35 = vrot.slane %v11059_v30, %v25718_v45 }
 0x4dc   : > { %v15457_v25 = vcombine.low %v15449_v48, %v15456_v9  ;;  %v15473_v6 = vrot.slane %v15459_v62, %v25727_v55  ;;  %v11070_v37 = vcombine.high %v11066_v31, %v11066_v31  ;;  %v12244_v28 = vrot.slane %v11067_v27, %v25718_v45 }
 0x4dd   : > { %v12248_v61 = vrot.slane %v11069_v2, %v25718_v45  ;;  %v12252_v23 = vrot.slane %v11052_v59, %v25718_v45  ;;  %v12256_v56 = vrot.slane %v11066_v31, %v25718_v45  ;;  %v12260_v12 = vrot.slane %v11068_v10, %v25718_v45 }
 0x4de   : > { %v15474_v0 = vcombine.low %v15466_v51, %v15473_v6  ;;  %15997 = vst [vmem:[%s19313_s9 + $0x2a0] sm:$0xff] %v15457_v25  ;;  %v13009_v7 = vsel %vm544_vm1, %v25936_v40, %v12236_v21  ;;  %v12264_v4 = vrot.slane %v11070_v37, %v25718_v45  ;;  %v13010_v39 = vsel %vm544_vm1, %v25937_v57, %v12240_v35 }
 0x4df   : > { %v25938_v53 = vcombine.high %v25936_v40, %v25936_v40  ;;  %v25939_v34 = vcombine.high %v25937_v57, %v25937_v57  ;;  %v13013_v29 = vsel %vm544_vm1, %v25940_v1, %v12252_v23  ;;  %v13014_v47 = vsel %vm544_vm1, %v25941_v44, %v12256_v56 }
 0x4e0   : > { %15998 = vst [vmem:[%s19313_s9 + $0x2a8] sm:$0xff] %v15474_v0  ;;  %v25942_v59 = vcombine.high %v25940_v1, %v25940_v1  ;;  %v15475_v48 = vcombine.low %v13009_v7, %v13010_v39  ;;  %v25943_v9 = vcombine.high %v25941_v44, %v25941_v44  ;;  %v15492_v31 = vcombine.low %v13013_v29, %v13014_v47  ;;  %v25945_v47 = vld [vmem:[#allocation76_spill] sm:$0xff] }
 0x4e1   : > { %v13011_v43 = vsel %vm544_vm1, %v25938_v53, %v12244_v28  ;;  %v13012_v20 = vsel %vm544_vm1, %v25939_v34, %v12248_v61  ;;  %v11071_v27 = vcombine.high %v23707_v36, %v23707_v36  ;;  %v11078_v25 = vrot.slane %v23707_v36, %v18240_v54 }
 0x4e2   : > { %v13015_v30 = vsel %vm544_vm1, %v25942_v59, %v12260_v12  ;;  %v13016_v62 = vsel %vm544_vm1, %v25943_v9, %v12264_v4  ;;  %v15476_v51 = vcombine.low %v13011_v43, %v13012_v20  ;;  %v15483_v10 = vrot.slane %v15475_v48, %v25727_v55  ;;  %v25946_v48 = vld [vmem:[#allocation80_spill] sm:$0xff] }
 0x4e3   : > { %v15493_v2 = vcombine.low %v13015_v30, %v13016_v62  ;;  %v9894_v6 = vadd.f32 %v23698_v24, %v23691_v49  ;;  %v15500_v35 = vrot.slane %v15492_v31, %v25727_v55  ;;  %v11085_v37 = vrot.slane %v11071_v27, %v18240_v54 }
 0x4e4   : > { %v15490_v21 = vrot.slane %v15476_v51, %v25727_v55  ;;  %v23796_v28 = vadd.f32 %v23155_v14, %v23142_v38  ;;  %v11086_v23 = vcombine.high %v11078_v25, %v11078_v25  ;;  %v11094_v36 = vrot.slane %v11078_v25, %v18240_v54 }
 0x4e5   : > { %v15507_v61 = vrot.slane %v15493_v2, %v25727_v55  ;;  %v9952_v0 = vadd.f32 %v23359_v41, %v9894_v6  ;;  %v11087_v24 = vcombine.high %v11085_v37, %v11085_v37  ;;  %v11101_v56 = vrot.slane %v11085_v37, %v18240_v54 }
 0x4e6   : > { %v15491_v49 = vcombine.low %v15483_v10, %v15490_v21  ;;  %v23804_v12 = vadd.f32 %v23157_v58, %v23144_v19  ;;  %v11108_v38 = vrot.slane %v11086_v23, %v18240_v54  ;;  %v11116_v14 = vcombine.high %v11094_v36, %v11094_v36  ;;  %v25944_v58 = vld [vmem:[#allocation79_spill] sm:$0xff]  ;;  %v25948_v10 = vld [vmem:[#allocation82_spill] sm:$0xff] }
 0x4e7   : > { %v15508_v40 = vcombine.low %v15500_v35, %v15507_v61  ;;  %v12268_v7 = vrot.slane %v11094_v36, %v25718_v45  ;;  %v11115_v4 = vrot.slane %v11087_v24, %v18240_v54  ;;  %v11117_v57 = vcombine.high %v11101_v56, %v11101_v56 }
 0x4e8   : > { %15999 = vst [vmem:[%s19313_s9 + $0x2b0] sm:$0xff] %v15491_v49  ;;  %v12284_v39 = vrot.slane %v11101_v56, %v25718_v45  ;;  %v11120_v53 = vcombine.high %v9952_v0, %v9952_v0  ;;  %v11118_v43 = vcombine.high %v11108_v38, %v11108_v38  ;;  %v12272_v34 = vrot.slane %v11108_v38, %v25718_v45 }
 0x4e9   : > { %16000 = vst [vmem:[%s19313_s9 + $0x2b8] sm:$0xff] %v15508_v40  ;;  %v12276_v19 = vrot.slane %v11116_v14, %v25718_v45  ;;  %v13017_v20 = vsel %vm544_vm1, %v25944_v58, %v12268_v7  ;;  %v11119_v1 = vcombine.high %v11115_v4, %v11115_v4  ;;  %v12288_v29 = vrot.slane %v11115_v4, %v25718_v45 }
 0x4ea   : > { %v12292_v44 = vrot.slane %v11117_v57, %v25718_v45  ;;  %v13021_v59 = vsel %vm544_vm1, %v25945_v47, %v12284_v39  ;;  %v12280_v30 = vrot.slane %v11118_v43, %v25718_v45  ;;  %v13018_v9 = vsel %vm544_vm1, %v25946_v48, %v12272_v34 }
 0x4eb   : > { %v25947_v62 = vcombine.high %v25944_v58, %v25944_v58  ;;  %v11127_v31 = vrot.slane %v9952_v0, %v18240_v54  ;;  %v12296_v27 = vrot.slane %v11119_v1, %v25718_v45  ;;  %v13022_v2 = vsel %vm544_vm1, %v25948_v10, %v12288_v29 }
 0x4ec   : > { %v25949_v25 = vcombine.high %v25945_v47, %v25945_v47  ;;  %v15509_v21 = vcombine.low %v13017_v20, %v13018_v9  ;;  %v25950_v35 = vcombine.high %v25946_v48, %v25946_v48  ;;  %v15526_v61 = vcombine.low %v13021_v59, %v13022_v2 }
 0x4ed   : > { %v13019_v51 = vsel %vm544_vm1, %v25947_v62, %v12276_v19  ;;  %v11134_v23 = vrot.slane %v11120_v53, %v18240_v54  ;;  %v11135_v36 = vcombine.high %v11127_v31, %v11127_v31  ;;  %v25951_v0 = vcombine.high %v25948_v10, %v25948_v10 }
 0x4ee   : > { %v13023_v6 = vsel %vm544_vm1, %v25949_v25, %v12292_v44  ;;  %v13020_v37 = vsel %vm544_vm1, %v25950_v35, %v12280_v30  ;;  %v15517_v56 = vrot.slane %v15509_v21, %v25727_v55  ;;  %v11143_v40 = vrot.slane %v11127_v31, %v18240_v54  ;;  %v25955_v21 = vld [vmem:[#allocation81_spill] sm:$0xff] }
 0x4ef   : > { %v13024_v49 = vsel %vm544_vm1, %v25951_v0, %v12296_v27  ;;  %v15510_v24 = vcombine.low %v13019_v51, %v13020_v37  ;;  %v15534_v14 = vrot.slane %v15526_v61, %v25727_v55  ;;  %v11136_v7 = vcombine.high %v11134_v23, %v11134_v23  ;;  %v25952_v51 = vld [vmem:[#allocation83_spill] sm:$0xff]  ;;  %v25956_v37 = vld [vmem:[#allocation34_spill] sm:$0xff] }
 0x4f0   : > { %v15527_v38 = vcombine.low %v13023_v6, %v13024_v49  ;;  %v11150_v4 = vrot.slane %v11134_v23, %v18240_v54  ;;  %v11157_v39 = vrot.slane %v11135_v36, %v18240_v54  ;;  %v11165_v53 = vcombine.high %v11143_v40, %v11143_v40  ;;  %v25953_v27 = vld [vmem:[#allocation15_spill] sm:$0xff] }
 0x4f1   : > { %v15524_v57 = vrot.slane %v15510_v24, %v25727_v55  ;;  %v12300_v43 = vrot.slane %v11143_v40, %v25718_v45  ;;  %v11164_v19 = vrot.slane %v11136_v7, %v18240_v54  ;;  %v25954_v2 = vcombine.high %v25952_v51, %v25952_v51 }
 0x4f2   : > { %v15541_v34 = vrot.slane %v15527_v38, %v25727_v55  ;;  %v11166_v58 = vcombine.high %v11150_v4, %v11150_v4  ;;  %v12316_v20 = vrot.slane %v11150_v4, %v25718_v45  ;;  %v11167_v29 = vcombine.high %v11157_v39, %v11157_v39 }
 0x4f3   : > { %v15525_v1 = vcombine.low %v15517_v56, %v15524_v57  ;;  %v12304_v44 = vrot.slane %v11157_v39, %v25718_v45  ;;  %v12308_v47 = vrot.slane %v11165_v53, %v25718_v45  ;;  %v11168_v30 = vcombine.high %v11164_v19, %v11164_v19 }
 0x4f4   : > { %v15542_v59 = vcombine.low %v15534_v14, %v15541_v34  ;;  %v12320_v48 = vrot.slane %v11164_v19, %v25718_v45  ;;  %v12324_v9 = vrot.slane %v11166_v58, %v25718_v45  ;;  %v12312_v62 = vrot.slane %v11167_v29, %v25718_v45 }
 0x4f5   : > { %16005 = vst [vmem:[%s19313_s9 + $0x2e0] sm:$0xff] %v15525_v1  ;;  %v13025_v31 = vsel %vm544_vm1, %v25952_v51, %v12300_v43  ;;  %v13026_v10 = vsel %vm544_vm1, %v25953_v27, %v12304_v44  ;;  %v13027_v25 = vsel %vm544_vm1, %v25954_v2, %v12308_v47  ;;  %v12328_v6 = vrot.slane %v11168_v30, %v25718_v45  ;;  %v25960_v44 = vld [vmem:[#allocation109_spill] sm:$0xff] }
 0x4f6   : > { %16006 = vst [vmem:[%s19313_s9 + $0x2e8] sm:$0xff] %v15542_v59  ;;  %v13029_v35 = vsel %vm544_vm1, %v25955_v21, %v12316_v20  ;;  %v13030_v61 = vsel %vm544_vm1, %v25956_v37, %v12320_v48  ;;  %v25957_v23 = vcombine.high %v25955_v21, %v25955_v21  ;;  %v25958_v0 = vcombine.high %v25953_v27, %v25953_v27 }
 0x4f7   : > { %v15543_v24 = vcombine.low %v13025_v31, %v13026_v10  ;;  %v15560_v56 = vcombine.low %v13029_v35, %v13030_v61  ;;  %v9899_v40 = vadd.f32 %v23804_v12, %v23796_v28  ;;  %v25959_v38 = vcombine.high %v25956_v37, %v25956_v37  ;;  %v25961_v37 = vld [vmem:[#allocation32_spill] sm:$0xff] }
 0x4f8   : > { %v13031_v36 = vsel %vm544_vm1, %v25957_v23, %v12324_v9  ;;  %v13028_v49 = vsel %vm544_vm1, %v25958_v0, %v12312_v62  ;;  %v17091_v4 = vadd.f32 %v23218_v52, %v23209_v60  ;;  %v17203_v57 = vadd.f32 %v23220_v63, %v23211_v26 }
 0x4f9   : > { %v13032_v14 = vsel %vm544_vm1, %v25959_v38, %v12328_v6  ;;  %v15544_v7 = vcombine.low %v13027_v25, %v13028_v49  ;;  %v15551_v39 = vrot.slane %v15543_v24, %v25727_v55  ;;  %v15568_v43 = vrot.slane %v15560_v56, %v25727_v55  ;;  %v25962_v56 = vld [vmem:[#allocation16_spill] sm:$0xff] }
 0x4fa   : > { %v15561_v53 = vcombine.low %v13031_v36, %v13032_v14  ;;  %v9953_v34 = vadd.f32 %v23359_v41, %v9899_v40  ;;  %v9902_v12 = vadd.f32 %v17203_v57, %v17091_v4  ;;  %v17094_v19 = vadd.f32 %v23286_v5, %v23276_v33 }
 0x4fb   : > { %v15558_v28 = vrot.slane %v15544_v7, %v25727_v55  ;;  %v17206_v60 = vadd.f32 %v23288_v3, %v23278_v22  ;;  %v17097_v58 = vadd.f32 %v23332_v50, %v23319_v16  ;;  %v17209_v47 = vadd.f32 %v25960_v44, %v23321_v11  ;;  %v25964_v7 = vld [vmem:[#allocation35_spill] sm:$0xff] }
 0x4fc   : > { %v15575_v52 = vrot.slane %v15561_v53, %v25727_v55  ;;  %v11169_v26 = vcombine.high %v9953_v34, %v9953_v34  ;;  %v11176_v63 = vrot.slane %v9953_v34, %v18240_v54  ;;  %v9954_v1 = vadd.f32 %v23359_v41, %v9902_v12  ;;  %v25966_v34 = vld [vmem:[#allocation38_spill] sm:$0xff] }
 0x4fd   : > { %v15559_v20 = vcombine.low %v15551_v39, %v15558_v28  ;;  %v9907_v29 = vadd.f32 %v17206_v60, %v17094_v19  ;;  %v23914_v16 = vadd.f32 %v17209_v47, %v17097_v58  ;;  %v25963_v38 = vcombine.high %v25961_v37, %v25961_v37 }
 0x4fe   : > { %v15576_v33 = vcombine.low %v15568_v43, %v15575_v52  ;;  %v11183_v5 = vrot.slane %v11169_v26, %v18240_v54  ;;  %v11184_v22 = vcombine.high %v11176_v63, %v11176_v63  ;;  %v11192_v3 = vrot.slane %v11176_v63, %v18240_v54 }
 0x4ff   : > { %16007 = vst [vmem:[%s19313_s9 + $0x2f0] sm:$0xff] %v15559_v20  ;;  %v11218_v59 = vcombine.high %v9954_v1, %v9954_v1  ;;  %v11225_v30 = vrot.slane %v9954_v1, %v18240_v54  ;;  %v23912_v48 = vadd.f32 %v23359_v41, %v9907_v29  ;;  %v25965_v53 = vcombine.high %v25962_v56, %v25962_v56 }
 0x500   : > { %16008 = vst [vmem:[%s19313_s9 + $0x2f8] sm:$0xff] %v15576_v33  ;;  %v11185_v50 = vcombine.high %v11183_v5, %v11183_v5  ;;  %v11199_v9 = vrot.slane %v11183_v5, %v18240_v54  ;;  %v11206_v11 = vrot.slane %v11184_v22, %v18240_v54  ;;  %v11214_v62 = vcombine.high %v11192_v3, %v11192_v3 }
 0x501   : > { %v12332_v51 = vrot.slane %v11192_v3, %v25718_v45  ;;  %v11232_v31 = vrot.slane %v11218_v59, %v18240_v54  ;;  %v11233_v27 = vcombine.high %v11225_v30, %v11225_v30  ;;  %v11241_v10 = vrot.slane %v11225_v30, %v18240_v54 }
 0x502   : > { %v11213_v2 = vrot.slane %v11185_v50, %v18240_v54  ;;  %v11215_v41 = vcombine.high %v11199_v9, %v11199_v9  ;;  %v11216_v25 = vcombine.high %v11206_v11, %v11206_v11  ;;  %v12336_v6 = vrot.slane %v11206_v11, %v25718_v45 }
 0x503   : > { %v12340_v21 = vrot.slane %v11214_v62, %v25718_v45  ;;  %v12348_v35 = vrot.slane %v11199_v9, %v25718_v45  ;;  %v13033_v61 = vsel %vm544_vm1, %v25961_v37, %v12332_v51  ;;  %v11234_v23 = vcombine.high %v11232_v31, %v11232_v31 }
 0x504   : > { %v11217_v36 = vcombine.high %v11213_v2, %v11213_v2  ;;  %v12344_v0 = vrot.slane %v11216_v25, %v25718_v45  ;;  %v12352_v49 = vrot.slane %v11213_v2, %v25718_v45  ;;  %v12356_v24 = vrot.slane %v11215_v41, %v25718_v45 }
 0x505   : > { %v13034_v40 = vsel %vm544_vm1, %v25962_v56, %v12336_v6  ;;  %v13035_v14 = vsel %vm544_vm1, %v25963_v38, %v12340_v21  ;;  %v13037_v4 = vsel %vm544_vm1, %v25964_v7, %v12348_v35  ;;  %v11248_v57 = vrot.slane %v11232_v31, %v18240_v54  ;;  %v25970_v21 = vld [vmem:[#allocation17_spill] sm:$0xff] }
 0x506   : > { %v12360_v39 = vrot.slane %v11217_v36, %v25718_v45  ;;  %v13036_v43 = vsel %vm544_vm1, %v25965_v53, %v12344_v0  ;;  %v13038_v28 = vsel %vm544_vm1, %v25966_v34, %v12352_v49  ;;  %v25967_v12 = vcombine.high %v25964_v7, %v25964_v7  ;;  %v25973_v0 = vld [vmem:[#allocation36_spill] sm:$0xff] }
 0x507   : > { %v15577_v60 = vcombine.low %v13033_v61, %v13034_v40  ;;  %v15578_v52 = vcombine.low %v13035_v14, %v13036_v43  ;;  %v15594_v26 = vcombine.low %v13037_v4, %v13038_v28  ;;  %v11255_v63 = vrot.slane %v11233_v27, %v18240_v54  ;;  %v24002_v28 = vld [vmem:[%s24375_s2] ss:$0 sm:$0xff] }
 0x508   : > { %v13039_v19 = vsel %vm544_vm1, %v25967_v12, %v12356_v24  ;;  %v25968_v58 = vcombine.high %v25966_v34, %v25966_v34  ;;  %v11262_v1 = vrot.slane %v11234_v23, %v18240_v54  ;;  %v11263_v29 = vcombine.high %v11241_v10, %v11241_v10  ;;  %v25974_v24 = vld [vmem:[#allocation39_spill] sm:$0xff] }
 0x509   : > { %v11264_v44 = vcombine.high %v11248_v57, %v11248_v57  ;;  %v15585_v47 = vrot.slane %v15577_v60, %v25727_v55  ;;  %v15592_v33 = vrot.slane %v15578_v52, %v25727_v55  ;;  %v15602_v22 = vrot.slane %v15594_v26, %v25727_v55  ;;  %v25977_v26 = vld [vmem:[#allocation111_spill] sm:$0xff] }
 0x50a   : > { %v13040_v20 = vsel %vm544_vm1, %v25968_v58, %v12360_v39  ;;  %v11265_v3 = vcombine.high %v11255_v63, %v11255_v63  ;;  %v11266_v59 = vcombine.high %v11262_v1, %v11262_v1  ;;  %v12364_v30 = vrot.slane %v11241_v10, %v25718_v45  ;;  %v25969_v10 = vld [vmem:[#allocation37_spill] sm:$0xff] }
 0x50b   : > { %v15595_v5 = vcombine.low %v13039_v19, %v13040_v20  ;;  %v12368_v50 = vrot.slane %v11255_v63, %v25718_v45  ;;  %v15593_v9 = vcombine.low %v15585_v47, %v15592_v33  ;;  %v12372_v62 = vrot.slane %v11263_v29, %v25718_v45  ;;  %v25978_v47 = vld [vmem:[#allocation112_spill] sm:$0xff]  ;;  %v25979_v33 = vld [vmem:[#allocation114_spill] sm:$0xff] }
 0x50c   : > { %v12380_v51 = vrot.slane %v11248_v57, %v25718_v45  ;;  %v12376_v31 = vrot.slane %v11265_v3, %v25718_v45  ;;  %v12384_v27 = vrot.slane %v11262_v1, %v25718_v45  ;;  %v12388_v2 = vrot.slane %v11264_v44, %v25718_v45 }
 0x50d   : > { %v15609_v11 = vrot.slane %v15595_v5, %v25727_v55  ;;  %v12392_v41 = vrot.slane %v11266_v59, %v25718_v45  ;;  %16013 = vst [vmem:[%s19313_s9 + $0x320] sm:$0xff] %v15593_v9  ;;  %v13041_v6 = vsel %vm544_vm1, %v25969_v10, %v12364_v30  ;;  %v13042_v35 = vsel %vm544_vm1, %v25970_v21, %v12368_v50 }
 0x50e   : > { %v25971_v37 = vcombine.high %v25969_v10, %v25969_v10  ;;  %v25972_v23 = vcombine.high %v25970_v21, %v25970_v21  ;;  %v13045_v49 = vsel %vm544_vm1, %v25973_v0, %v12380_v51  ;;  %v13046_v56 = vsel %vm544_vm1, %v25974_v24, %v12384_v27 }
 0x50f   : > { %v15610_v25 = vcombine.low %v15602_v22, %v15609_v11  ;;  %v25975_v40 = vcombine.high %v25973_v0, %v25973_v0  ;;  %v25976_v14 = vcombine.high %v25974_v24, %v25974_v24  ;;  %v15611_v4 = vcombine.low %v13041_v6, %v13042_v35  ;;  %v25983_v24 = vld [vmem:[#allocation86_spill] sm:$0xff] }
 0x510   : > { %v13043_v61 = vsel %vm544_vm1, %v25971_v37, %v12372_v62  ;;  %v13044_v36 = vsel %vm544_vm1, %v25972_v23, %v12376_v31  ;;  %v15628_v39 = vcombine.low %v13045_v49, %v13046_v56  ;;  %v11267_v43 = vcombine.high %v23912_v48, %v23912_v48  ;;  %v25981_v23 = vld [vmem:[#allocation87_spill] sm:$0xff] }
 0x511   : > { %v13047_v38 = vsel %vm544_vm1, %v25975_v40, %v12388_v2  ;;  %16014 = vst [vmem:[%s19313_s9 + $0x328] sm:$0xff] %v15610_v25  ;;  %v13048_v7 = vsel %vm544_vm1, %v25976_v14, %v12392_v41  ;;  %v15612_v57 = vcombine.low %v13043_v61, %v13044_v36  ;;  %v11274_v34 = vrot.slane %v23912_v48, %v18240_v54  ;;  %v25980_v25 = vld [vmem:[#allocation84_spill] sm:$0xff] }
 0x512   : > { %v15629_v53 = vcombine.low %v13047_v38, %v13048_v7  ;;  %v9956_v12 = vadd.f32 %v24002_v28, %v23914_v16  ;;  %v15619_v19 = vrot.slane %v15611_v4, %v25727_v55  ;;  %v15636_v52 = vrot.slane %v15628_v39, %v25727_v55  ;;  %v25985_v4 = vld [vmem:[#allocation85_spill] sm:$0xff] }
 0x513   : > { %v15626_v60 = vrot.slane %v15612_v57, %v25727_v55  ;;  %v24011_v63 = vadd.f32 %v25977_v26, %v23395_v13  ;;  %v11281_v58 = vrot.slane %v11267_v43, %v18240_v54  ;;  %v11282_v20 = vcombine.high %v11274_v34, %v11274_v34 }
 0x514   : > { %v15643_v48 = vrot.slane %v15629_v53, %v25727_v55  ;;  %v11290_v1 = vrot.slane %v11274_v34, %v18240_v54  ;;  %v11316_v29 = vcombine.high %v9956_v12, %v9956_v12  ;;  %v11323_v44 = vrot.slane %v9956_v12, %v18240_v54 }
 0x515   : > { %v15627_v16 = vcombine.low %v15619_v19, %v15626_v60  ;;  %v24019_v5 = vadd.f32 %v25979_v33, %v25978_v47  ;;  %v11283_v3 = vcombine.high %v11281_v58, %v11281_v58  ;;  %v11297_v13 = vrot.slane %v11281_v58, %v18240_v54 }
 0x516   : > { %v15644_v22 = vcombine.low %v15636_v52, %v15643_v48  ;;  %v11304_v59 = vrot.slane %v11282_v20, %v18240_v54  ;;  %v11312_v30 = vcombine.high %v11290_v1, %v11290_v1  ;;  %v12396_v50 = vrot.slane %v11290_v1, %v25718_v45 }
 0x517   : > { %16015 = vst [vmem:[%s19313_s9 + $0x330] sm:$0xff] %v15627_v16  ;;  %v11330_v9 = vrot.slane %v11316_v29, %v18240_v54  ;;  %v11331_v11 = vcombine.high %v11323_v44, %v11323_v44  ;;  %v11311_v62 = vrot.slane %v11283_v3, %v18240_v54  ;;  %v11313_v51 = vcombine.high %v11297_v13, %v11297_v13 }
 0x518   : > { %16016 = vst [vmem:[%s19313_s9 + $0x338] sm:$0xff] %v15644_v22  ;;  %v11314_v31 = vcombine.high %v11304_v59, %v11304_v59  ;;  %v12400_v27 = vrot.slane %v11304_v59, %v25718_v45  ;;  %v12404_v2 = vrot.slane %v11312_v30, %v25718_v45  ;;  %v12412_v41 = vrot.slane %v11297_v13, %v25718_v45 }
 0x519   : > { %v13049_v10 = vsel %vm544_vm1, %v25980_v25, %v12396_v50  ;;  %v11332_v6 = vcombine.high %v11330_v9, %v11330_v9  ;;  %v11315_v21 = vcombine.high %v11311_v62, %v11311_v62  ;;  %v12416_v37 = vrot.slane %v11311_v62, %v25718_v45 }
 0x51a   : > { %v12408_v35 = vrot.slane %v11314_v31, %v25718_v45  ;;  %v12420_v61 = vrot.slane %v11313_v51, %v25718_v45  ;;  %v13050_v36 = vsel %vm544_vm1, %v25981_v23, %v12400_v27  ;;  %v25982_v0 = vcombine.high %v25980_v25, %v25980_v25  ;;  %v25988_v27 = vld [vmem:[#allocation88_spill] sm:$0xff] }
 0x51b   : > { %v13053_v56 = vsel %vm544_vm1, %v25983_v24, %v12412_v41  ;;  %v11339_v40 = vrot.slane %v11323_v44, %v18240_v54  ;;  %v12424_v38 = vrot.slane %v11315_v21, %v25718_v45  ;;  %v25984_v14 = vcombine.high %v25981_v23, %v25981_v23  ;;  %v25989_v41 = vld [vmem:[#allocation92_spill] sm:$0xff]  ;;  %v25993_v23 = vld [vmem:[#allocation41_spill] sm:$0xff] }
 0x51c   : > { %v13051_v49 = vsel %vm544_vm1, %v25982_v0, %v12404_v2  ;;  %v13054_v57 = vsel %vm544_vm1, %v25985_v4, %v12416_v37  ;;  %v25986_v39 = vcombine.high %v25983_v24, %v25983_v24  ;;  %v15645_v43 = vcombine.low %v13049_v10, %v13050_v36  ;;  %v25992_v37 = vld [vmem:[#allocation90_spill] sm:$0xff] }
 0x51d   : > { %v13052_v7 = vsel %vm544_vm1, %v25984_v14, %v12408_v35  ;;  %v15662_v12 = vcombine.low %v13053_v56, %v13054_v57  ;;  %v11346_v19 = vrot.slane %v11330_v9, %v18240_v54  ;;  %v25987_v60 = vcombine.high %v25985_v4, %v25985_v4 }
 0x51e   : > { %v13055_v53 = vsel %vm544_vm1, %v25986_v39, %v12420_v61  ;;  %v15646_v34 = vcombine.low %v13051_v49, %v13052_v7  ;;  %v11353_v26 = vrot.slane %v11331_v11, %v18240_v54  ;;  %v11360_v48 = vrot.slane %v11332_v6, %v18240_v54 }
 0x51f   : > { %v13056_v52 = vsel %vm544_vm1, %v25987_v60, %v12424_v38  ;;  %v11361_v58 = vcombine.high %v11339_v40, %v11339_v40  ;;  %v15653_v20 = vrot.slane %v15645_v43, %v25727_v55  ;;  %v15670_v29 = vrot.slane %v15662_v12, %v25727_v55 }
 0x520   : > { %v15660_v1 = vrot.slane %v15646_v34, %v25727_v55  ;;  %v15663_v16 = vcombine.low %v13055_v53, %v13056_v52  ;;  %v11362_v44 = vcombine.high %v11346_v19, %v11346_v19  ;;  %v11363_v47 = vcombine.high %v11353_v26, %v11353_v26  ;;  %v25997_v52 = vld [vmem:[#allocation21_spill] sm:$0xff] }
 0x521   : > { %v11364_v33 = vcombine.high %v11360_v48, %v11360_v48  ;;  %v12428_v22 = vrot.slane %v11339_v40, %v25718_v45  ;;  %v12432_v59 = vrot.slane %v11353_v26, %v25718_v45  ;;  %v12436_v30 = vrot.slane %v11361_v58, %v25718_v45  ;;  %v25998_v26 = vld [vmem:[#allocation11_spill] sm:$0xff] }
 0x522   : > { %v15661_v3 = vcombine.low %v15653_v20, %v15660_v1  ;;  %v15677_v13 = vrot.slane %v15663_v16, %v25727_v55  ;;  %v12440_v50 = vrot.slane %v11363_v47, %v25718_v45  ;;  %v12444_v9 = vrot.slane %v11346_v19, %v25718_v45  ;;  %v26001_v16 = vld [vmem:[#allocation100_spill] sm:$0xff] }
 0x523   : > { %v12448_v11 = vrot.slane %v11360_v48, %v25718_v45  ;;  %v12452_v62 = vrot.slane %v11362_v44, %v25718_v45  ;;  %v12456_v31 = vrot.slane %v11364_v33, %v25718_v45  ;;  %v13057_v2 = vsel %vm544_vm1, %v25988_v27, %v12428_v22  ;;  %v26002_v44 = vld [vmem:[#allocation47_spill] sm:$0xff]  ;;  %v26003_v22 = vld [vmem:[#allocation101_spill] sm:$0xff] }
 0x524   : > { %v15678_v51 = vcombine.low %v15670_v29, %v15677_v13  ;;  %16021 = vst [vmem:[%s19313_s9 + $0x360] sm:$0xff] %v15661_v3  ;;  %v13058_v25 = vsel %vm544_vm1, %v25989_v41, %v12432_v59  ;;  %v25990_v10 = vcombine.high %v25988_v27, %v25988_v27  ;;  %v25991_v21 = vcombine.high %v25989_v41, %v25989_v41 }
 0x525   : > { %v13061_v61 = vsel %vm544_vm1, %v25992_v37, %v12444_v9  ;;  %v13062_v36 = vsel %vm544_vm1, %v25993_v23, %v12448_v11  ;;  %v25994_v0 = vcombine.high %v25992_v37, %v25992_v37  ;;  %v25995_v24 = vcombine.high %v25993_v23, %v25993_v23 }
 0x526   : > { %v13059_v6 = vsel %vm544_vm1, %v25990_v10, %v12436_v30  ;;  %v13060_v35 = vsel %vm544_vm1, %v25991_v21, %v12440_v50  ;;  %16022 = vst [vmem:[%s19313_s9 + $0x368] sm:$0xff] %v15678_v51  ;;  %v15679_v40 = vcombine.low %v13057_v2, %v13058_v25  ;;  %v15696_v14 = vcombine.low %v13061_v61, %v13062_v36  ;;  %v26004_v36 = vld [vmem:[#allocation89_spill] sm:$0xff] }
 0x527   : > { %v13063_v49 = vsel %vm544_vm1, %v25994_v0, %v12452_v62  ;;  %v13064_v56 = vsel %vm544_vm1, %v25995_v24, %v12456_v31  ;;  %v15680_v38 = vcombine.low %v13059_v6, %v13060_v35  ;;  %v9915_v4 = vadd.f32 %v24019_v5, %v24011_v63  ;;  %v25996_v5 = vld [vmem:[#allocation115_spill] sm:$0xff] }
 0x528   : > { %v15697_v7 = vcombine.low %v13063_v49, %v13064_v56  ;;  %v17103_v57 = vadd.f32 %v23463_v32, %v23456_v8  ;;  %v15687_v39 = vrot.slane %v15679_v40, %v25727_v55  ;;  %v17215_v43 = vadd.f32 %v23465_v18, %v23458_v15  ;;  %v25999_v15 = vld [vmem:[#allocation132_spill] sm:$0xff] }
 0x529   : > { %v15694_v53 = vrot.slane %v15680_v38, %v25727_v55  ;;  %v17106_v34 = vadd.f32 %v23525_v46, %v23519_v17  ;;  %v15704_v12 = vrot.slane %v15696_v14, %v25727_v55  ;;  %v9957_v63 = vadd.f32 %v24002_v28, %v9915_v4  ;;  %v26000_v18 = vld [vmem:[#allocation136_spill] sm:$0xff]  ;;  %v26005_v14 = vld [vmem:[#allocation43_spill] sm:$0xff] }
 0x52a   : > { %v15711_v19 = vrot.slane %v15697_v7, %v25727_v55  ;;  %v17218_v8 = vadd.f32 %v25996_v5, %v23521_v42  ;;  %v9918_v60 = vadd.f32 %v17215_v43, %v17103_v57  ;;  %v17109_v48 = vadd.f32 %v25998_v26, %v25997_v52 }
 0x52b   : > { %v15695_v32 = vcombine.low %v15687_v39, %v15694_v53  ;;  %v17221_v58 = vadd.f32 %v26000_v18, %v25999_v15  ;;  %v11365_v17 = vcombine.high %v9957_v63, %v9957_v63  ;;  %v11372_v46 = vrot.slane %v9957_v63, %v18240_v54  ;;  %v26007_v39 = vld [vmem:[#allocation40_spill] sm:$0xff]  ;;  %v26009_v63 = vld [vmem:[#allocation91_spill] sm:$0xff] }
 0x52c   : > { %v15712_v20 = vcombine.low %v15704_v12, %v15711_v19  ;;  %v9923_v1 = vadd.f32 %v17218_v8, %v17106_v34  ;;  %v9043_v29 = vcombine.high %v26001_v16, %v26001_v16  ;;  %v9091_v47 = vcombine.high %v26002_v44, %v26002_v44 }
 0x52d   : > { %16023 = vst [vmem:[%s19313_s9 + $0x370] sm:$0xff] %v15695_v32  ;;  %v9958_v42 = vadd.f32 %v24002_v28, %v9918_v60  ;;  %v9926_v33 = vadd.f32 %v17221_v58, %v17109_v48  ;;  %v9092_v3 = vcombine.high %v26003_v22, %v26003_v22  ;;  %v11379_v13 = vrot.slane %v11365_v17, %v18240_v54 }
 0x52e   : > { %16024 = vst [vmem:[%s19313_s9 + $0x378] sm:$0xff] %v15712_v20  ;;  %v11380_v59 = vcombine.high %v11372_v46, %v11372_v46  ;;  %v11388_v30 = vrot.slane %v11372_v46, %v18240_v54  ;;  %v24134_v11 = vadd.f32 %v24002_v28, %v9923_v1  ;;  %v26006_v4 = vcombine.high %v26004_v36, %v26004_v36 }
 0x52f   : > { %v11414_v50 = vcombine.high %v9958_v42, %v9958_v42  ;;  %v11421_v9 = vrot.slane %v9958_v42, %v18240_v54  ;;  %v24137_v62 = vadd.f32 %v24002_v28, %v9926_v33  ;;  %v11381_v51 = vcombine.high %v11379_v13, %v11379_v13 }
 0x530   : > { %v11395_v31 = vrot.slane %v11379_v13, %v18240_v54  ;;  %v11402_v27 = vrot.slane %v11380_v59, %v18240_v54  ;;  %v11410_v2 = vcombine.high %v11388_v30, %v11388_v30  ;;  %v12460_v41 = vrot.slane %v11388_v30, %v25718_v45 }
 0x531   : > { %v11428_v25 = vrot.slane %v11414_v50, %v18240_v54  ;;  %v11429_v10 = vcombine.high %v11421_v9, %v11421_v9  ;;  %v11437_v6 = vrot.slane %v11421_v9, %v18240_v54  ;;  %v11409_v21 = vrot.slane %v11381_v51, %v18240_v54 }
 0x532   : > { %v11411_v35 = vcombine.high %v11395_v31, %v11395_v31  ;;  %v11412_v37 = vcombine.high %v11402_v27, %v11402_v27  ;;  %v12464_v28 = vrot.slane %v11402_v27, %v25718_v45  ;;  %v12468_v61 = vrot.slane %v11410_v2, %v25718_v45 }
 0x533   : > { %v12476_v23 = vrot.slane %v11395_v31, %v25718_v45  ;;  %v13065_v0 = vsel %vm544_vm1, %v26004_v36, %v12460_v41  ;;  %v11430_v49 = vcombine.high %v11428_v25, %v11428_v25  ;;  %v11413_v24 = vcombine.high %v11409_v21, %v11409_v21 }
 0x534   : > { %v12472_v56 = vrot.slane %v11412_v37, %v25718_v45  ;;  %v12480_v40 = vrot.slane %v11409_v21, %v25718_v45  ;;  %v12484_v38 = vrot.slane %v11411_v35, %v25718_v45  ;;  %v13066_v7 = vsel %vm544_vm1, %v26005_v14, %v12464_v28  ;;  %v26013_v37 = vld [vmem:[#allocation96_spill] sm:$0xff] }
 0x535   : > { %v13067_v57 = vsel %vm544_vm1, %v26006_v4, %v12468_v61  ;;  %v13069_v53 = vsel %vm544_vm1, %v26007_v39, %v12476_v23  ;;  %v11444_v43 = vrot.slane %v11428_v25, %v18240_v54  ;;  %v12488_v34 = vrot.slane %v11413_v24, %v25718_v45 }
 0x536   : > { %v26008_v12 = vcombine.high %v26005_v14, %v26005_v14  ;;  %v13070_v5 = vsel %vm544_vm1, %v26009_v63, %v12480_v40  ;;  %v26010_v8 = vcombine.high %v26007_v39, %v26007_v39  ;;  %v15713_v60 = vcombine.low %v13065_v0, %v13066_v7 }
 0x537   : > { %v15730_v26 = vcombine.low %v13069_v53, %v13070_v5  ;;  %v11451_v48 = vrot.slane %v11429_v10, %v18240_v54  ;;  %v26011_v15 = vcombine.high %v26009_v63, %v26009_v63  ;;  %v11458_v58 = vrot.slane %v11430_v49, %v18240_v54  ;;  %v26016_v49 = vld [vmem:[#allocation94_spill] sm:$0xff] }
 0x538   : > { %v13068_v19 = vsel %vm544_vm1, %v26008_v12, %v12472_v56  ;;  %v13071_v32 = vsel %vm544_vm1, %v26010_v8, %v12484_v38  ;;  %v11459_v20 = vcombine.high %v11437_v6, %v11437_v6  ;;  %v11460_v17 = vcombine.high %v11444_v43, %v11444_v43  ;;  %v26017_v56 = vld [vmem:[#allocation98_spill] sm:$0xff] }
 0x539   : > { %v15714_v52 = vcombine.low %v13067_v57, %v13068_v19  ;;  %v13072_v18 = vsel %vm544_vm1, %v26011_v15, %v12488_v34  ;;  %v15721_v46 = vrot.slane %v15713_v60, %v25727_v55  ;;  %v15738_v33 = vrot.slane %v15730_v26, %v25727_v55 }
 0x53a   : > { %v15731_v42 = vcombine.low %v13071_v32, %v13072_v18  ;;  %v11461_v13 = vcombine.high %v11451_v48, %v11451_v48  ;;  %v11462_v59 = vcombine.high %v11458_v58, %v11458_v58  ;;  %v12492_v30 = vrot.slane %v11437_v6, %v25718_v45  ;;  %v26012_v6 = vld [vmem:[#allocation93_spill] sm:$0xff] }
 0x53b   : > { %v15728_v1 = vrot.slane %v15714_v52, %v25727_v55  ;;  %v12496_v50 = vrot.slane %v11451_v48, %v25718_v45  ;;  %v12500_v31 = vrot.slane %v11459_v20, %v25718_v45  ;;  %v12508_v27 = vrot.slane %v11444_v43, %v25718_v45 }
 0x53c   : > { %v15745_v51 = vrot.slane %v15731_v42, %v25727_v55  ;;  %v12504_v2 = vrot.slane %v11461_v13, %v25718_v45  ;;  %v12512_v41 = vrot.slane %v11458_v58, %v25718_v45  ;;  %v12516_v25 = vrot.slane %v11460_v17, %v25718_v45 }
 0x53d   : > { %v15729_v9 = vcombine.low %v15721_v46, %v15728_v1  ;;  %v12520_v10 = vrot.slane %v11462_v59, %v25718_v45  ;;  %v13073_v35 = vsel %vm544_vm1, %v26012_v6, %v12492_v30  ;;  %v13074_v28 = vsel %vm544_vm1, %v26013_v37, %v12496_v50 }
 0x53e   : > { %v15746_v21 = vcombine.low %v15738_v33, %v15745_v51  ;;  %v26014_v61 = vcombine.high %v26012_v6, %v26012_v6  ;;  %v26015_v36 = vcombine.high %v26013_v37, %v26013_v37  ;;  %v13077_v24 = vsel %vm544_vm1, %v26016_v49, %v12508_v27  ;;  %v26020_v27 = vld [vmem:[#allocation95_spill] sm:$0xff] }
 0x53f   : > { %16029 = vst [vmem:[%s19313_s9 + $0x3a0] sm:$0xff] %v15729_v9  ;;  %v13078_v40 = vsel %vm544_vm1, %v26017_v56, %v12512_v41  ;;  %v26018_v38 = vcombine.high %v26016_v49, %v26016_v49  ;;  %v26019_v7 = vcombine.high %v26017_v56, %v26017_v56  ;;  %v15747_v57 = vcombine.low %v13073_v35, %v13074_v28  ;;  %v26021_v35 = vld [vmem:[#allocation45_spill] sm:$0xff] }
 0x540   : > { %v13075_v23 = vsel %vm544_vm1, %v26014_v61, %v12500_v31  ;;  %v13076_v0 = vsel %vm544_vm1, %v26015_v36, %v12504_v2  ;;  %16030 = vst [vmem:[%s19313_s9 + $0x3a8] sm:$0xff] %v15746_v21  ;;  %v15764_v53 = vcombine.low %v13077_v24, %v13078_v40  ;;  %v11463_v34 = vcombine.high %v24134_v11, %v24134_v11 }
 0x541   : > { %v13079_v14 = vsel %vm544_vm1, %v26018_v38, %v12516_v25  ;;  %v13080_v4 = vsel %vm544_vm1, %v26019_v7, %v12520_v10  ;;  %v15748_v39 = vcombine.low %v13075_v23, %v13076_v0  ;;  %v11470_v12 = vrot.slane %v24134_v11, %v18240_v54  ;;  %v26023_v23 = vld [vmem:[#allocation99_spill] sm:$0xff] }
 0x542   : > { %v15765_v43 = vcombine.low %v13079_v14, %v13080_v4  ;;  %v11512_v19 = vcombine.high %v24137_v62, %v24137_v62  ;;  %v15755_v63 = vrot.slane %v15747_v57, %v25727_v55  ;;  %v15772_v8 = vrot.slane %v15764_v53, %v25727_v55 }
 0x543   : > { %v15762_v5 = vrot.slane %v15748_v39, %v25727_v55  ;;  %v11519_v32 = vrot.slane %v24137_v62, %v18240_v54  ;;  %v11477_v52 = vrot.slane %v11463_v34, %v18240_v54  ;;  %v11478_v26 = vcombine.high %v11470_v12, %v11470_v12 }
 0x544   : > { %v15779_v60 = vrot.slane %v15765_v43, %v25727_v55  ;;  %v11486_v11 = vrot.slane %v11470_v12, %v18240_v54  ;;  %v11526_v15 = vrot.slane %v11512_v19, %v18240_v54  ;;  %v26022_v28 = vcombine.high %v26020_v27, %v26020_v27 }
 0x545   : > { %v15763_v48 = vcombine.low %v15755_v63, %v15762_v5  ;;  %v11527_v18 = vcombine.high %v11519_v32, %v11519_v32  ;;  %v11535_v58 = vrot.slane %v11519_v32, %v18240_v54  ;;  %v11479_v17 = vcombine.high %v11477_v52, %v11477_v52 }
 0x546   : > { %v15780_v20 = vcombine.low %v15772_v8, %v15779_v60  ;;  %v11493_v46 = vrot.slane %v11477_v52, %v18240_v54  ;;  %v11500_v62 = vrot.slane %v11478_v26, %v18240_v54  ;;  %v11508_v1 = vcombine.high %v11486_v11, %v11486_v11 }
 0x547   : > { %16031 = vst [vmem:[%s19313_s9 + $0x3b0] sm:$0xff] %v15763_v48  ;;  %v12524_v42 = vrot.slane %v11486_v11, %v25718_v45  ;;  %v11528_v33 = vcombine.high %v11526_v15, %v11526_v15  ;;  %v11542_v13 = vrot.slane %v11526_v15, %v18240_v54  ;;  %v11507_v59 = vrot.slane %v11479_v17, %v18240_v54 }
 0x548   : > { %16032 = vst [vmem:[%s19313_s9 + $0x3b8] sm:$0xff] %v15780_v20  ;;  %v11509_v30 = vcombine.high %v11493_v46, %v11493_v46  ;;  %v11510_v50 = vcombine.high %v11500_v62, %v11500_v62  ;;  %v12528_v9 = vrot.slane %v11500_v62, %v25718_v45  ;;  %v12532_v51 = vrot.slane %v11508_v1, %v25718_v45  ;;  %v26028_v1 = vld [vmem:[#allocation44_spill] sm:$0xff] }
 0x549   : > { %v12540_v31 = vrot.slane %v11493_v46, %v25718_v45  ;;  %v13081_v2 = vsel %vm544_vm1, %v26020_v27, %v12524_v42  ;;  %v11549_v41 = vrot.slane %v11527_v18, %v18240_v54  ;;  %v11511_v25 = vcombine.high %v11507_v59, %v11507_v59  ;;  %v26026_v18 = vld [vmem:[#allocation97_spill] sm:$0xff] }
 0x54a   : > { %v12536_v10 = vrot.slane %v11510_v50, %v25718_v45  ;;  %v12544_v21 = vrot.slane %v11507_v59, %v25718_v45  ;;  %v12548_v6 = vrot.slane %v11509_v30, %v25718_v45  ;;  %v13082_v37 = vsel %vm544_vm1, %v26021_v35, %v12528_v9 }
 0x54b   : > { %v13083_v61 = vsel %vm544_vm1, %v26022_v28, %v12532_v51  ;;  %v13085_v36 = vsel %vm544_vm1, %v26023_v23, %v12540_v31  ;;  %v11556_v0 = vrot.slane %v11528_v33, %v18240_v54  ;;  %v12552_v49 = vrot.slane %v11511_v25, %v25718_v45 }
 0x54c   : > { %v26024_v24 = vcombine.high %v26021_v35, %v26021_v35  ;;  %v13086_v40 = vsel %vm544_vm1, %v26001_v16, %v12544_v21  ;;  %v26025_v38 = vcombine.high %v26023_v23, %v26023_v23  ;;  %v15781_v7 = vcombine.low %v13081_v2, %v13082_v37 }
 0x54d   : > { %v15798_v57 = vcombine.low %v13085_v36, %v13086_v40  ;;  %v11557_v39 = vcombine.high %v11535_v58, %v11535_v58  ;;  %v13088_v54 = vsel %vm544_vm1, %v9043_v29, %v12552_v49  ;;  %v11558_v53 = vcombine.high %v11542_v13, %v11542_v13 }
 0x54e   : > { %v13084_v56 = vsel %vm544_vm1, %v26024_v24, %v12536_v10  ;;  %v13087_v14 = vsel %vm544_vm1, %v26025_v38, %v12548_v6  ;;  %v11559_v43 = vcombine.high %v11549_v41, %v11549_v41  ;;  %v11560_v34 = vcombine.high %v11556_v0, %v11556_v0 }
 0x54f   : > { %v15782_v4 = vcombine.low %v13083_v61, %v13084_v56  ;;  %v15789_v12 = vrot.slane %v15781_v7, %v25727_v55  ;;  %v15799_v63 = vcombine.low %v13087_v14, %v13088_v54  ;;  %v15806_v5 = vrot.slane %v15798_v57, %v25727_v55 }
 0x550   : > { %v12556_v8 = vrot.slane %v11535_v58, %v25718_v45  ;;  %v12560_v32 = vrot.slane %v11549_v41, %v25718_v45  ;;  %v12564_v60 = vrot.slane %v11557_v39, %v25718_v45  ;;  %v12568_v16 = vrot.slane %v11559_v43, %v25718_v45 }
 0x551   : > { %v15796_v19 = vrot.slane %v15782_v4, %v25727_v55  ;;  %v15813_v52 = vrot.slane %v15799_v63, %v25727_v55  ;;  %v12572_v26 = vrot.slane %v11542_v13, %v25718_v45  ;;  %v12576_v11 = vrot.slane %v11556_v0, %v25718_v45 }
 0x552   : > { %v12580_v48 = vrot.slane %v11558_v53, %v25718_v45  ;;  %v12584_v15 = vrot.slane %v11560_v34, %v25718_v45  ;;  %v13089_v58 = vsel %vm544_vm1, %v26026_v18, %v12556_v8  ;;  %v13090_v20 = vsel %vm544_vm1, %v26002_v44, %v12560_v32 }
 0x553   : > { %v15797_v29 = vcombine.low %v15789_v12, %v15796_v19  ;;  %v15814_v17 = vcombine.low %v15806_v5, %v15813_v52  ;;  %v26027_v46 = vcombine.high %v26026_v18, %v26026_v18  ;;  %v13092_v45 = vsel %vm544_vm1, %v9091_v47, %v12568_v16 }
 0x554   : > { %v13093_v42 = vsel %vm544_vm1, %v26028_v1, %v12572_v26  ;;  %v13094_v33 = vsel %vm544_vm1, %v26003_v22, %v12576_v11  ;;  %v26029_v13 = vcombine.high %v26028_v1, %v26028_v1  ;;  %v13096_v30 = vsel %vm544_vm1, %v9092_v3, %v12584_v15 }
 0x555   : > { %16037 = vst [vmem:[%s19313_s9 + $0x3e0] sm:$0xff] %v15797_v29  ;;  %v13091_v62 = vsel %vm544_vm1, %v26027_v46, %v12564_v60  ;;  %v15815_v44 = vcombine.low %v13089_v58, %v13090_v20  ;;  %16038 = vst [vmem:[%s19313_s9 + $0x3e8] sm:$0xff] %v15814_v17  ;;  %v15832_v50 = vcombine.low %v13093_v42, %v13094_v33 }
 0x556   : > { %v13095_v59 = vsel %vm544_vm1, %v26029_v13, %v12580_v48  ;;  %v15816_v47 = vcombine.low %v13091_v62, %v13092_v45 }
 0x557   : > { %v15833_v9 = vcombine.low %v13095_v59, %v13096_v30  ;;  %v15823_v51 = vrot.slane %v15815_v44, %v25727_v55  ;;  %v15840_v27 = vrot.slane %v15832_v50, %v25727_v55 }
 0x558   : > { %v15830_v31 = vrot.slane %v15816_v47, %v25727_v55 }
 0x559   : > { %v15847_v22 = vrot.slane %v15833_v9, %v25727_v55 }
 0x55a   : > { %v15831_v3 = vcombine.low %v15823_v51, %v15830_v31 }
 0x55b   : > { %v15848_v2 = vcombine.low %v15840_v27, %v15847_v22 }
 0x55c   : > { %16039 = vst [vmem:[%s19313_s9 + $0x3f0] sm:$0xff] %v15831_v3 }
 0x55d   : > { %16040 = vst [vmem:[%s19313_s9 + $0x3f8] sm:$0xff] %v15848_v2 }
 0x55e   : > { %17556 = shalt.err (!%p17553_p5)
}
 0x55f   : > { %s17557_s9 = scalar_lea.hbm %s24320_s26, 16384  ;;  %s17561_s20 = scalar_lea.hbm %s24376_s3, 32768 }
 0x560   : > { %p17558_p9 = scmp.ne.s32.totalorder %s24320_s26, %s17557_s9  ;;  %p17562_p3 = scmp.lt.u32.totalorder %s24320_s26, %s24376_s3 }
 0x561   : > { %p17563_p7 = scmp.lt.u32.totalorder %s17561_s20, %s17557_s9  ;;  %p17565_p4 = scmp.lt.u32.totalorder %s17557_s9, %s24320_s26 }
 0x562   : > { %p17559_p1 = pnand %p17558_p9, %p17759_p10 }
 0x563   : > { %p17564_p13 = por %p17563_p7, %p17562_p3 }
 0x564   : > { %p17560_p2 = pneg %p17559_p1 }
 0x565   : > { %p17566_p6 = por %p17565_p4, %p17564_p13 }
 0x567   : > { %p17567_p8 = pnand %p17566_p6, %p17560_p2 }
 0x569   : > { %17570 = shalt.err (!%p17567_p8)
}
 0x56a   : > { %s17638_s10 = smov 128   ;;  %s17639_s11 = smov 8  }
 0x56b   : > { %17228 = dma.vmem_to_hbm [thread:$0]  (%p17759_p10), %s24322_s18, 16384, %s24320_s26, %s16042_s15, %s17638_s10, %s17638_s10, %s17639_s11  }
 0x56c PF: > { %s16073_s19 = sand.u32 1, %s17609_s12   ;;  %p26030_p12 = scmp.ne.s32.totalorder %s24905_s23, 0 }
 0x56d   : > { %p26031_p11 = scmp.ge.s32.totalorder %s17629_s17, 2  ;;  %s16074_s25 = scalar_lea.sflag [#allocation4], %s16073_s19 }
 0x56f   : > { %p17239_p0 = pnand %p26031_p11, %p26030_p12 }
 0x571   : > { %17604 = dma.done.wait (!%p17239_p0), %s16074_s25, 16384  }
 0x572   : > { %17606 = vsyncadd (!%p17239_p0), %s16074_s25, 4294950912  ;;  %s20_s17 = sadd.s32 1, %s17629_s17   ;;  %s26032_s12 = smov %s17613_s13 }
 0x573   : > { %p17_p5 = scmp.ge.s32.totalorder %s20_s17, 4   ;;  %s26033_s13 = smov %s17617_s14 }
 0x574   : > { %s26034_s14 = smov %s17768_s5  ;;  %s26035_s15 = smov %s17625_s16 }
 0x575   : > { %s26036_s16 = smov %s26038_s28  ;;  %19 = sbr.rel (!%p17_p5) target bundleno = 7 (0x7), region = 91 }
 0x57c   :  { %16079 = vsyncpa [#allocation3], 1 }
 0x57d   :  { %16081 = vsyncpa [#allocation3 + $0x1], 1 }
 0x57e   :  { %16082 = vsyncpa [#allocation6], 1 }
 0x57f   :  { %16083 = vsyncpa [#allocation4], 1 }
 0x580   :  { %16085 = vsyncpa [#allocation4 + $0x1], 1 }

</bundles_post_ra>
